<compile_context>
chip_gen: v7x
topology: tpu7x:2x2x1
jax: 0.10.0
libtpu: 0.0.40
codegen_flags: <defaults>
</compile_context>

<pallas_src>
import math

import jax
import jax.numpy as jnp
from jax.experimental import pallas as pl
from jax.experimental.pallas import tpu as pltpu


def _round_up(a, m):
    return (a + m - 1) // m * m


def _reorder_ifog(a, H):
    """Permute PyTorch gate blocks [i, f, g, o] (last axis) -> [i, f, o, g]."""
    return jnp.concatenate(
        [a[..., 0:2 * H], a[..., 3 * H:4 * H], a[..., 2 * H:3 * H]], axis=-1)


# ----------------------------------------------------------------------------
# Pallas kernels
# ----------------------------------------------------------------------------
def _fused_lstm2_kernel(x_ref, wih0_ref, wblk_ref, b0_ref, b1_ref, out_ref,
                        gx_sc, xh_sc, c0_sc, c1_sc):
    """One time-chunk of two stacked LSTM layers (PyTorch semantics).

    Grid: (batch_chunks [parallel], time_chunks [arbitrary / sequential]).
    Carries (xh_sc = [h0|h1] bf16, c0_sc/c1_sc f32) persist across time chunks.

    x_ref   : (Tc*Bc, E)  bf16  time-major chunk (batch innermost)
    wih0_ref: (E, 4H)     bf16  layer-0 input weights (transposed, i/f/o/g)
    wblk_ref: (2H, 8H)    bf16  block weight [[Whh0^T, Wih1^T], [0, Whh1^T]]
    b0_ref  : (1, 4H)     f32   fused layer-0 bias (b_ih0 + b_hh0)
    b1_ref  : (1, 4H)     f32   fused layer-1 bias (b_ih1 + b_hh1)
    out_ref : (Tc*Bc, H)  bf16  layer-1 hidden states for this chunk
    """
    Bc, H = c0_sc.shape
    Tc = x_ref.shape[0] // Bc

    @pl.when(pl.program_id(1) == 0)
    def _():
        xh_sc[...] = jnp.zeros_like(xh_sc)
        c0_sc[...] = jnp.zeros_like(c0_sc)
        c1_sc[...] = jnp.zeros_like(c1_sc)

    # Hoisted, time-parallel layer-0 input projection for this chunk: one big
    # MXU matmul over all Tc*Bc rows; bias folded in, stays f32 in VMEM.
    gx_sc[...] = (
        jnp.dot(x_ref[...], wih0_ref[...], preferred_element_type=jnp.float32)
        + b0_ref[...])

    # Hoist the bias broadcast out of the loop (JAX does not CSE broadcasts).
    b1 = jnp.broadcast_to(b1_ref[...], (Bc, 4 * H))

    def l0_update(g0):
        sg = jax.nn.sigmoid(g0[:, 0:3 * H])          # one EUP pass for i, f, o
        gg = jnp.tanh(g0[:, 3 * H:4 * H])
        c = sg[:, H:2 * H] * c0_sc[...] + sg[:, 0:H] * gg
        h = sg[:, 2 * H:3 * H] * jnp.tanh(c)
        c0_sc[...] = c
        xh_sc[:, 0:H] = h.astype(xh_sc.dtype)

    def l1_update(g1, out_row):
        sg = jax.nn.sigmoid(g1[:, 0:3 * H])
        gg = jnp.tanh(g1[:, 3 * H:4 * H])
        c = sg[:, H:2 * H] * c1_sc[...] + sg[:, 0:H] * gg
        h = sg[:, 2 * H:3 * H] * jnp.tanh(c)
        c1_sc[...] = c
        xh_sc[:, H:2 * H] = h.astype(xh_sc.dtype)
        out_ref[pl.ds(out_row, Bc), :] = h.astype(out_ref.dtype)

    # Prologue: layer-0 step 0 of this chunk (h0_prev lives in xh_sc[:, :H]).
    g0 = gx_sc[pl.ds(0, Bc), :] + jnp.dot(
        xh_sc[:, 0:H], wblk_ref[0:H, 0:4 * H],
        preferred_element_type=jnp.float32)
    l0_update(g0)

    # Wavefront: ONE fused (Bc,2H)@(2H,8H) dot per iteration computes layer-0
    # step s AND layer-1 step s-1 (halves serialized MXU issues per step).
    def step(s, carry):
        row = pl.multiple_of(s * Bc, Bc)
        prev_row = pl.multiple_of((s - 1) * Bc, Bc)
        g = jnp.dot(xh_sc[...], wblk_ref[...],
                    preferred_element_type=jnp.float32)
        g1 = g[:, 4 * H:8 * H] + b1
        g0 = g[:, 0:4 * H] + gx_sc[pl.ds(row, Bc), :]
        l1_update(g1, prev_row)
        l0_update(g0)
        return carry

    # Tc is capped (<= 16) by the wrapper, so a full unroll stays small while
    # giving the scheduler visibility to overlap MXU / EUP / VPU.
    jax.lax.fori_loop(1, Tc, step, 0, unroll=True)

    # Epilogue: layer-1 step Tc-1 of this chunk.
    g1 = jnp.dot(xh_sc[...], wblk_ref[:, 4 * H:8 * H],
                 preferred_element_type=jnp.float32) + b1
    l1_update(g1, (Tc - 1) * Bc)


def _fc_logsoftmax_kernel(x_ref, w_ref, b_ref, out_ref):
    """logits = x @ W + b (bf16 operands, f32 acc), then log_softmax over lanes.

    Padded vocab columns carry bias = -1e30 (kept in f32, added AFTER the f32
    accumulation) so they contribute exp(.) == 0 and never win the max.
    """
    logits = (
        jnp.dot(x_ref[...], w_ref[...], preferred_element_type=jnp.float32)
        + b_ref[...])
    m = jnp.max(logits, axis=-1, keepdims=True)
    shifted = logits - m
    lse = jnp.log(jnp.sum(jnp.exp(shifted), axis=-1, keepdims=True))
    out_ref[...] = shifted - lse


# ----------------------------------------------------------------------------
# Wrappers
# ----------------------------------------------------------------------------
def lstm2_stack(x3, wih0, wblk, b0, b1, *, Tc, Bc, H):
    """x3: (nB, Tp*Bc, E) bf16 time-major chunks.  Returns (nB, Tp*Bc, H) bf16."""
    nB, rows, E = x3.shape
    Tp = rows // Bc
    return pl.pallas_call(
        _fused_lstm2_kernel,
        out_shape=jax.ShapeDtypeStruct((nB, rows, H), jnp.bfloat16),
        grid=(nB, Tp // Tc),
        in_specs=[
            pl.BlockSpec((None, Tc * Bc, E), lambda b, t: (b, t, 0)),
            pl.BlockSpec((E, 4 * H), lambda b, t: (0, 0)),
            pl.BlockSpec((2 * H, 8 * H), lambda b, t: (0, 0)),
            pl.BlockSpec((1, 4 * H), lambda b, t: (0, 0)),
            pl.BlockSpec((1, 4 * H), lambda b, t: (0, 0)),
        ],
        out_specs=pl.BlockSpec((None, Tc * Bc, H), lambda b, t: (b, t, 0)),
        scratch_shapes=[
            pltpu.VMEM((Tc * Bc, 4 * H), jnp.float32),   # hoisted layer-0 gates
            pltpu.VMEM((Bc, 2 * H), jnp.bfloat16),       # [h0 | h1] carry
            pltpu.VMEM((Bc, H), jnp.float32),            # c0 carry
            pltpu.VMEM((Bc, H), jnp.float32),            # c1 carry
        ],
        compiler_params=pltpu.CompilerParams(
            dimension_semantics=("parallel", "arbitrary"),
            vmem_limit_bytes=32 * 1024 * 1024),
    )(x3, wih0, wblk, b0, b1)


def fc_logsoftmax(x_bf, w_bf, b_f32, vocab_size):
    """x_bf: (N, H) bf16.  w_bf: (H, Vp) bf16, b_f32: (1, Vp).  Returns (N, V)."""
    N, H = x_bf.shape
    Vp = w_bf.shape[1]

    # Large row tiles hit the HBM roofline; cap by a conservative VMEM budget.
    if N >= 512:
        TN = 512
    elif N >= 128:
        TN = 128
    else:
        TN = _round_up(N, 8)
    while TN > 128 and TN * Vp * 4 * 2 > 16 * 1024 * 1024:
        TN //= 2

    Np = _round_up(N, TN)
    x = x_bf if Np == N else jnp.pad(x_bf, ((0, Np - N), (0, 0)))

    out = pl.pallas_call(
        _fc_logsoftmax_kernel,
        out_shape=jax.ShapeDtypeStruct((Np, Vp), jnp.float32),
        grid=(Np // TN,),
        in_specs=[
            pl.BlockSpec((TN, H), lambda i: (i, 0)),
            pl.BlockSpec((H, Vp), lambda i: (0, 0)),
            pl.BlockSpec((1, Vp), lambda i: (0, 0)),
        ],
        out_specs=pl.BlockSpec((TN, Vp), lambda i: (i, 0)),
        compiler_params=pltpu.CompilerParams(
            dimension_semantics=("parallel",),
            vmem_limit_bytes=32 * 1024 * 1024),
    )(x, w_bf, b_f32)
    return out[:N, :vocab_size]


def prepack_params(params):
    """One-time parameter packing (transposes, gate reorder, casts, padding)."""
    H = params["w_hh0"].shape[1]
    V = params["w_fc"].shape[0]
    ro = lambda a: _reorder_ifog(a, H)

    wih0 = ro(params["w_ih0"].T).astype(jnp.bfloat16)            # (E, 4H)
    whh0 = ro(params["w_hh0"].T)                                  # (H, 4H)
    wih1 = ro(params["w_ih1"].T)                                  # (H, 4H)
    whh1 = ro(params["w_hh1"].T)                                  # (H, 4H)
    top = jnp.concatenate([whh0, wih1], axis=1)                   # (H, 8H)
    bot = jnp.concatenate(
        [jnp.zeros((H, 4 * H), whh1.dtype), whh1], axis=1)        # (H, 8H)
    wblk = jnp.concatenate([top, bot], axis=0).astype(jnp.bfloat16)

    b0 = ro(params["b_ih0"] + params["b_hh0"]).reshape(1, 4 * H).astype(jnp.float32)
    b1 = ro(params["b_ih1"] + params["b_hh1"]).reshape(1, 4 * H).astype(jnp.float32)

    Vp = _round_up(V, 128)
    w_fc = params["w_fc"].T                                       # (H, V)
    b_fc = params["b_fc"]
    if Vp != V:
        w_fc = jnp.pad(w_fc, ((0, 0), (0, Vp - V)))
        b_fc = jnp.pad(b_fc, (0, Vp - V), constant_values=-1e30)  # keep f32!

    return {
        "emb": params["embedding"].astype(jnp.bfloat16),
        "wih0": wih0,
        "wblk": wblk,
        "b0": b0,
        "b1": b1,
        "w_fc": w_fc.astype(jnp.bfloat16),
        "b_fc": b_fc.reshape(1, Vp).astype(jnp.float32),
    }


def my_lstm_forward(tokens, packed, vocab_size):
    """tokens: (B, T) int32.  Returns (B, T, V) log-probabilities."""
    B, T = tokens.shape
    E = packed["wih0"].shape[0]
    H = packed["wblk"].shape[0] // 2
    assert H % 128 == 0, "hidden size must be a multiple of 128 (lane-aligned gates)"

    # Embedding gather directly in time-major bf16 (no f32 materialisation).
    x = jnp.take(packed["emb"], tokens.T, axis=0)                 # (T, B, E)

    # Pad batch to a sublane multiple so gate elementwise math fills vregs.
    Bp = _round_up(max(B, 8), 8)
    if Bp != B:
        x = jnp.pad(x, ((0, 0), (0, Bp - B), (0, 0)))

    # Batch chunks expose both TensorCores on v7x (no-op on v5e/v6e).
    nB = 2 if (Bp >= 16 and Bp % 16 == 0) else 1
    Bc = Bp // nB

    # Time chunks bound per-step VMEM and enable double-buffered pipelining.
    Tc = T if T <= 16 else 16
    Tp = _round_up(T, Tc)
    if Tp != T:
        x = jnp.pad(x, ((0, Tp - T), (0, 0), (0, 0)))

    x = x.reshape(Tp, nB, Bc, E).transpose(1, 0, 2, 3).reshape(nB, Tp * Bc, E)

    h = lstm2_stack(x, packed["wih0"], packed["wblk"], packed["b0"],
                    packed["b1"], Tc=Tc, Bc=Bc, H=H)              # bf16

    h = h.reshape(nB, Tp, Bc, H).transpose(1, 0, 2, 3).reshape(Tp, Bp, H)
    h = h[:T, :B, :].reshape(T * B, H)                            # drop pads

    logp = fc_logsoftmax(h, packed["w_fc"], packed["b_fc"], vocab_size)
    return logp.reshape(T, B, vocab_size).transpose(1, 0, 2)      # (B, T, V)


# ----------------------------------------------------------------------------
# Pure-JAX reference (same bf16-operand / f32-accumulate math)
# ----------------------------------------------------------------------------
def my_lstm_forward_ref(tokens, params):
    B, T = tokens.shape
    H = params["w_hh0"].shape[1]
    x = jnp.take(params["embedding"], tokens, axis=0)   # (B, T, E)
    x = jnp.transpose(x, (1, 0, 2))                     # (T, B, E)

    wih0 = params["w_ih0"].T.astype(jnp.bfloat16)
    whh0 = params["w_hh0"].T.astype(jnp.bfloat16)
    b0 = (params["b_ih0"] + params["b_hh0"]).astype(jnp.float32)
    w1 = jnp.concatenate(
        [params["w_ih1"].T, params["w_hh1"].T], axis=0).astype(jnp.bfloat16)
    b1 = (params["b_ih1"] + params["b_hh1"]).astype(jnp.float32)

    def step(carry, x_t):
        h0, c0, h1, c1 = carry
        g0 = (jnp.dot(x_t.astype(jnp.bfloat16), wih0,
                      preferred_element_type=jnp.float32) + b0
              + jnp.dot(h0.astype(jnp.bfloat16), whh0,
                        preferred_element_type=jnp.float32))
        i0 = jax.nn.sigmoid(g0[:, 0:H]); f0 = jax.nn.sigmoid(g0[:, H:2 * H])
        gg0 = jnp.tanh(g0[:, 2 * H:3 * H]); o0 = jax.nn.sigmoid(g0[:, 3 * H:4 * H])
        c0 = f0 * c0 + i0 * gg0
        h0 = o0 * jnp.tanh(c0)

        xh = jnp.concatenate([h0, h1], axis=1).astype(jnp.bfloat16)
        g1 = jnp.dot(xh, w1, preferred_element_type=jnp.float32) + b1
        i1 = jax.nn.sigmoid(g1[:, 0:H]); f1 = jax.nn.sigmoid(g1[:, H:2 * H])
        gg1 = jnp.tanh(g1[:, 2 * H:3 * H]); o1 = jax.nn.sigmoid(g1[:, 3 * H:4 * H])
        c1 = f1 * c1 + i1 * gg1
        h1 = o1 * jnp.tanh(c1)
        return (h0, c0, h1, c1), h1

    z = jnp.zeros((B, H), jnp.float32)
    _, hs = jax.lax.scan(step, (z, z, z, z), x)          # (T, B, H)
    hs = jnp.transpose(hs, (1, 0, 2))                    # (B, T, H)

    w_fc = params["w_fc"].T.astype(jnp.bfloat16)
    logits = jnp.dot(hs.reshape(B * T, H).astype(jnp.bfloat16), w_fc,
                     preferred_element_type=jnp.float32) + params["b_fc"]
    return jax.nn.log_softmax(logits, axis=-1).reshape(B, T, -1)


# ----------------------------------------------------------------------------
# Parameter init (deterministic, PyTorch-style uniform)
# ----------------------------------------------------------------------------
def init_params(key, vocab_size, embedding_dim, h1):
    ks = jax.random.split(key, 12)
    k = 1.0 / math.sqrt(h1)

    def u(key, shape):
        return jax.random.uniform(key, shape, jnp.float32, minval=-k, maxval=k)

    return {
        "embedding": jax.random.normal(ks[0], (vocab_size, embedding_dim), jnp.float32),
        "w_ih0": u(ks[1], (4 * h1, embedding_dim)),
        "w_hh0": u(ks[2], (4 * h1, h1)),
        "b_ih0": u(ks[3], (4 * h1,)),
        "b_hh0": u(ks[4], (4 * h1,)),
        "w_ih1": u(ks[5], (4 * h1, h1)),
        "w_hh1": u(ks[6], (4 * h1, h1)),
        "b_ih1": u(ks[7], (4 * h1,)),
        "b_hh1": u(ks[8], (4 * h1,)),
        "w_fc": u(ks[9], (vocab_size, h1)),
        "b_fc": u(ks[10], (vocab_size,)),
    }


# ----------------------------------------------------------------------------
if __name__ == "__main__":
    VOCAB = 64
    EMB = 128
    H1 = 128
    B = 2
    T = 8

    key = jax.random.PRNGKey(0)
    pkey, tkey = jax.random.split(key)
    params = init_params(pkey, VOCAB, EMB, H1)
    tokens = jax.random.randint(tkey, (B, T), 0, VOCAB, dtype=jnp.int32)

    packed = prepack_params(params)                       # one-time prepacking

    fwd = jax.jit(my_lstm_forward, static_argnums=(2,))
    out = jax.block_until_ready(fwd(tokens, packed, VOCAB))
    ref = jax.block_until_ready(jax.jit(my_lstm_forward_ref)(tokens, params))

    assert out.shape == (B, T, VOCAB), out.shape
    max_err = float(jnp.max(jnp.abs(out - ref)))
    assert max_err < 2e-3, max_err

    print("KERNEL_OK")
</pallas_src>

<mosaic_0001>
module attributes {stable_mosaic.version = 11 : i64} {
  func.func @_fc_logsoftmax_kernel(%arg0: i32, %arg1: memref<16x128xbf16, #tpu.memory_space<vmem>>, %arg2: memref<128x128xbf16, #tpu.memory_space<vmem>>, %arg3: memref<1x128xf32, #tpu.memory_space<vmem>>, %arg4: memref<16x128xf32, #tpu.memory_space<vmem>>) attributes {dimension_semantics = [#tpu.dimension_semantics<parallel>], iteration_bounds = array<i64: 1>, scalar_prefetch = 0 : i64, scratch_operands = 0 : i64, tpu.core_type = #tpu.core_type<tc>, window_params = [{transform_indices = @transform_0, window_bounds = array<i64: 16, 128>}, {pipeline_mode = #tpu.pipeline_mode<synchronous>, transform_indices = @transform_1, window_bounds = array<i64: 128, 128>}, {pipeline_mode = #tpu.pipeline_mode<synchronous>, transform_indices = @transform_2, window_bounds = array<i64: 1, 128>}, {transform_indices = @transform_3, window_bounds = array<i64: 16, 128>}]} {
    %c0 = arith.constant 0 : index
    %c0_0 = arith.constant 0 : index
    %0 = vector.load %arg1[%c0, %c0_0] : memref<16x128xbf16, #tpu.memory_space<vmem>>, vector<16x128xbf16>
    %c0_1 = arith.constant 0 : index
    %c0_2 = arith.constant 0 : index
    %1 = vector.load %arg2[%c0_1, %c0_2] : memref<128x128xbf16, #tpu.memory_space<vmem>>, vector<128x128xbf16>
    %cst = arith.constant dense<0.000000e+00> : vector<16x128xf32>
    %2 = tpu.matmul %0, %1, %cst {dimension_numbers = #tpu.dot_dimension_numbers<[1], [0], [0], [1], [0, 0, 1, 1], [], []>} : vector<16x128xbf16>, vector<128x128xbf16>, vector<16x128xf32> -> vector<16x128xf32>
    %c0_3 = arith.constant 0 : index
    %c0_4 = arith.constant 0 : index
    %3 = vector.load %arg3[%c0_3, %c0_4] : memref<1x128xf32, #tpu.memory_space<vmem>>, vector<1x128xf32>
    %4 = vector.broadcast %3 : vector<1x128xf32> to vector<16x128xf32>
    %5 = arith.addf %2, %4 : vector<16x128xf32>
    %cst_5 = arith.constant dense<0xFF800000> : vector<16xf32>
    %6 = vector.multi_reduction <maximumf>, %5, %cst_5 [1] : vector<16x128xf32> to vector<16xf32>
    %7 = vector.shape_cast %6 : vector<16xf32> to vector<16x1xf32>
    %8 = vector.broadcast %7 : vector<16x1xf32> to vector<16x128xf32>
    %9 = arith.subf %5, %8 : vector<16x128xf32>
    %10 = math.exp %9 : vector<16x128xf32>
    %cst_6 = arith.constant dense<0.000000e+00> : vector<16xf32>
    %11 = vector.multi_reduction <add>, %10, %cst_6 [1] : vector<16x128xf32> to vector<16xf32>
    %12 = vector.shape_cast %11 : vector<16xf32> to vector<16x1xf32>
    %13 = math.log %12 : vector<16x1xf32>
    %14 = vector.broadcast %13 : vector<16x1xf32> to vector<16x128xf32>
    %15 = arith.subf %9, %14 : vector<16x128xf32>
    %c0_7 = arith.constant 0 : index
    %c0_8 = arith.constant 0 : index
    %16 = vector.load %arg4[%c0_7, %c0_8] : memref<16x128xf32, #tpu.memory_space<vmem>>, vector<16x128xf32>
    tpu.vector_store %arg4[%c0_7, %c0_8], %15 {strides = array<i32>} : memref<16x128xf32, #tpu.memory_space<vmem>>, vector<16x128xf32>,
    return
  }
  func.func @transform_0(%arg0: i32) -> (i32, i32) {
    %c0_i32 = arith.constant 0 : i32
    %c0_i32_0 = arith.constant 0 : i32
    return %arg0, %c0_i32 : i32, i32
  }
  func.func @transform_1(%arg0: i32) -> (i32, i32) {
    %c0_i32 = arith.constant 0 : i32
    %c0_i32_0 = arith.constant 0 : i32
    %c0_i32_1 = arith.constant 0 : i32
    return %c0_i32, %c0_i32_0 : i32, i32
  }
  func.func @transform_2(%arg0: i32) -> (i32, i32) {
    %c0_i32 = arith.constant 0 : i32
    %c0_i32_0 = arith.constant 0 : i32
    %c0_i32_1 = arith.constant 0 : i32
    return %c0_i32, %c0_i32_0 : i32, i32
  }
  func.func @transform_3(%arg0: i32) -> (i32, i32) {
    %c0_i32 = arith.constant 0 : i32
    %c0_i32_0 = arith.constant 0 : i32
    return %arg0, %c0_i32 : i32, i32
  }
}

module attributes {stable_mosaic.version = 11 : i64} {
  func.func @_fused_lstm2_kernel(%arg0: i32, %arg1: i32, %arg2: memref<1x64x128xbf16, #tpu.memory_space<vmem>>, %arg3: memref<128x512xbf16, #tpu.memory_space<vmem>>, %arg4: memref<256x1024xbf16, #tpu.memory_space<vmem>>, %arg5: memref<1x512xf32, #tpu.memory_space<vmem>>, %arg6: memref<1x512xf32, #tpu.memory_space<vmem>>, %arg7: memref<1x64x128xbf16, #tpu.memory_space<vmem>>, %arg8: memref<64x512xf32, #tpu.memory_space<vmem>>, %arg9: memref<8x256xbf16, #tpu.memory_space<vmem>>, %arg10: memref<8x128xf32, #tpu.memory_space<vmem>>, %arg11: memref<8x128xf32, #tpu.memory_space<vmem>>) attributes {dimension_semantics = [#tpu.dimension_semantics<parallel>, #tpu.dimension_semantics<arbitrary>], iteration_bounds = array<i64: 1, 1>, scalar_prefetch = 0 : i64, scratch_operands = 4 : i64, tpu.core_type = #tpu.core_type<tc>, window_params = [{transform_indices = @transform_0, window_bounds = array<i64: 1, 64, 128>}, {pipeline_mode = #tpu.pipeline_mode<synchronous>, transform_indices = @transform_1, window_bounds = array<i64: 128, 512>}, {pipeline_mode = #tpu.pipeline_mode<synchronous>, transform_indices = @transform_2, window_bounds = array<i64: 256, 1024>}, {pipeline_mode = #tpu.pipeline_mode<synchronous>, transform_indices = @transform_3, window_bounds = array<i64: 1, 512>}, {pipeline_mode = #tpu.pipeline_mode<synchronous>, transform_indices = @transform_4, window_bounds = array<i64: 1, 512>}, {transform_indices = @transform_5, window_bounds = array<i64: 1, 64, 128>}]} {
    %c0_i32 = arith.constant 0 : i32
    %0 = arith.cmpi eq, %arg1, %c0_i32 : i32
    %1 = arith.extui %0 : i1 to i32
    %c0_i32_0 = arith.constant 0 : i32
    %2 = arith.cmpi ne, %1, %c0_i32_0 : i32
    scf.if %2 {
      %cst_212 = arith.constant 0.000000e+00 : bf16
      %480 = vector.broadcast %cst_212 : bf16 to vector<8x256xbf16>
      %c0_213 = arith.constant 0 : index
      %c0_214 = arith.constant 0 : index
      %481 = vector.load %arg9[%c0_213, %c0_214] : memref<8x256xbf16, #tpu.memory_space<vmem>>, vector<8x256xbf16>
      tpu.vector_store %arg9[%c0_213, %c0_214], %480 {strides = array<i32>} : memref<8x256xbf16, #tpu.memory_space<vmem>>, vector<8x256xbf16>,
      %cst_215 = arith.constant 0.000000e+00 : f32
      %482 = vector.broadcast %cst_215 : f32 to vector<8x128xf32>
      %c0_216 = arith.constant 0 : index
      %c0_217 = arith.constant 0 : index
      %483 = vector.load %arg10[%c0_216, %c0_217] : memref<8x128xf32, #tpu.memory_space<vmem>>, vector<8x128xf32>
      tpu.vector_store %arg10[%c0_216, %c0_217], %482 {strides = array<i32>} : memref<8x128xf32, #tpu.memory_space<vmem>>, vector<8x128xf32>,
      %cst_218 = arith.constant 0.000000e+00 : f32
      %484 = vector.broadcast %cst_218 : f32 to vector<8x128xf32>
      %c0_219 = arith.constant 0 : index
      %c0_220 = arith.constant 0 : index
      %485 = vector.load %arg11[%c0_219, %c0_220] : memref<8x128xf32, #tpu.memory_space<vmem>>, vector<8x128xf32>
      tpu.vector_store %arg11[%c0_219, %c0_220], %484 {strides = array<i32>} : memref<8x128xf32, #tpu.memory_space<vmem>>, vector<8x128xf32>,
    } else {
    }
    %c0 = arith.constant 0 : index
    %c0_1 = arith.constant 0 : index
    %c0_2 = arith.constant 0 : index
    %3 = vector.load %arg2[%c0, %c0_1, %c0_2] : memref<1x64x128xbf16, #tpu.memory_space<vmem>>, vector<1x64x128xbf16>
    %4 = vector.shape_cast %3 : vector<1x64x128xbf16> to vector<64x128xbf16>
    %c0_3 = arith.constant 0 : index
    %c0_4 = arith.constant 0 : index
    %5 = vector.load %arg3[%c0_3, %c0_4] : memref<128x512xbf16, #tpu.memory_space<vmem>>, vector<128x512xbf16>
    %cst = arith.constant dense<0.000000e+00> : vector<64x512xf32>
    %6 = tpu.matmul %4, %5, %cst {dimension_numbers = #tpu.dot_dimension_numbers<[1], [0], [0], [1], [0, 0, 1, 1], [], []>} : vector<64x128xbf16>, vector<128x512xbf16>, vector<64x512xf32> -> vector<64x512xf32>
    %c0_5 = arith.constant 0 : index
    %c0_6 = arith.constant 0 : index
    %7 = vector.load %arg5[%c0_5, %c0_6] : memref<1x512xf32, #tpu.memory_space<vmem>>, vector<1x512xf32>
    %8 = vector.broadcast %7 : vector<1x512xf32> to vector<64x512xf32>
    %9 = arith.addf %6, %8 : vector<64x512xf32>
    %c0_7 = arith.constant 0 : index
    %c0_8 = arith.constant 0 : index
    %10 = vector.load %arg8[%c0_7, %c0_8] : memref<64x512xf32, #tpu.memory_space<vmem>>, vector<64x512xf32>
    tpu.vector_store %arg8[%c0_7, %c0_8], %9 {strides = array<i32>} : memref<64x512xf32, #tpu.memory_space<vmem>>, vector<64x512xf32>,
    %c0_9 = arith.constant 0 : index
    %c0_10 = arith.constant 0 : index
    %11 = vector.load %arg6[%c0_9, %c0_10] : memref<1x512xf32, #tpu.memory_space<vmem>>, vector<1x512xf32>
    %12 = vector.shape_cast %11 : vector<1x512xf32> to vector<1x512xf32>
    %13 = vector.broadcast %12 : vector<1x512xf32> to vector<8x512xf32>
    %c0_11 = arith.constant 0 : index
    %c0_12 = arith.constant 0 : index
    %14 = vector.load %arg8[%c0_11, %c0_12] : memref<64x512xf32, #tpu.memory_space<vmem>>, vector<8x512xf32>
    %c0_13 = arith.constant 0 : index
    %c0_14 = arith.constant 0 : index
    %15 = vector.load %arg9[%c0_13, %c0_14] : memref<8x256xbf16, #tpu.memory_space<vmem>>, vector<8x128xbf16>
    %c0_15 = arith.constant 0 : index
    %c0_16 = arith.constant 0 : index
    %16 = vector.load %arg4[%c0_15, %c0_16] : memref<256x1024xbf16, #tpu.memory_space<vmem>>, vector<128x512xbf16>
    %cst_17 = arith.constant dense<0.000000e+00> : vector<8x512xf32>
    %17 = tpu.matmul %15, %16, %cst_17 {dimension_numbers = #tpu.dot_dimension_numbers<[1], [0], [0], [1], [0, 0, 1, 1], [], []>} : vector<8x128xbf16>, vector<128x512xbf16>, vector<8x512xf32> -> vector<8x512xf32>
    %18 = arith.addf %14, %17 : vector<8x512xf32>
    %19 = vector.extract_strided_slice %18 {offsets = [0, 0], sizes = [8, 384], strides = [1, 1]} : vector<8x512xf32> to vector<8x384xf32>
    %20 = arith.negf %19 : vector<8x384xf32>
    %21 = math.exp %20 : vector<8x384xf32>
    %cst_18 = arith.constant 1.000000e+00 : f32
    %22 = vector.broadcast %cst_18 : f32 to vector<8x384xf32>
    %23 = arith.addf %22, %21 : vector<8x384xf32>
    %24 = arith.divf %22, %23 : vector<8x384xf32>
    %25 = vector.extract_strided_slice %18 {offsets = [0, 384], sizes = [8, 128], strides = [1, 1]} : vector<8x512xf32> to vector<8x128xf32>
    %26 = math.tanh %25 : vector<8x128xf32>
    %27 = vector.extract_strided_slice %24 {offsets = [0, 128], sizes = [8, 128], strides = [1, 1]} : vector<8x384xf32> to vector<8x128xf32>
    %c0_19 = arith.constant 0 : index
    %c0_20 = arith.constant 0 : index
    %28 = vector.load %arg10[%c0_19, %c0_20] : memref<8x128xf32, #tpu.memory_space<vmem>>, vector<8x128xf32>
    %29 = arith.mulf %27, %28 : vector<8x128xf32>
    %30 = vector.extract_strided_slice %24 {offsets = [0, 0], sizes = [8, 128], strides = [1, 1]} : vector<8x384xf32> to vector<8x128xf32>
    %31 = arith.mulf %30, %26 : vector<8x128xf32>
    %32 = arith.addf %29, %31 : vector<8x128xf32>
    %33 = vector.extract_strided_slice %24 {offsets = [0, 256], sizes = [8, 128], strides = [1, 1]} : vector<8x384xf32> to vector<8x128xf32>
    %34 = math.tanh %32 : vector<8x128xf32>
    %35 = arith.mulf %33, %34 : vector<8x128xf32>
    %c0_21 = arith.constant 0 : index
    %c0_22 = arith.constant 0 : index
    %36 = vector.load %arg10[%c0_21, %c0_22] : memref<8x128xf32, #tpu.memory_space<vmem>>, vector<8x128xf32>
    tpu.vector_store %arg10[%c0_21, %c0_22], %32 {strides = array<i32>} : memref<8x128xf32, #tpu.memory_space<vmem>>, vector<8x128xf32>,
    %37 = arith.truncf %35 : vector<8x128xf32> to vector<8x128xbf16>
    %c0_23 = arith.constant 0 : index
    %c0_24 = arith.constant 0 : index
    %38 = vector.load %arg9[%c0_23, %c0_24] : memref<8x256xbf16, #tpu.memory_space<vmem>>, vector<8x128xbf16>
    tpu.vector_store %arg9[%c0_23, %c0_24], %37 {strides = array<i32>} : memref<8x256xbf16, #tpu.memory_space<vmem>>, vector<8x128xbf16>,
    %c1_i32 = arith.constant 1 : i32
    %c8_i32 = arith.constant 8 : i32
    %39 = arith.muli %c1_i32, %c8_i32 : i32
    %40 = tpu.assume_multiple %39, 8 : i32
    %c1_i32_25 = arith.constant 1 : i32
    %41 = arith.subi %c1_i32, %c1_i32_25 : i32
    %c8_i32_26 = arith.constant 8 : i32
    %42 = arith.muli %41, %c8_i32_26 : i32
    %43 = tpu.assume_multiple %42, 8 : i32
    %c0_27 = arith.constant 0 : index
    %c0_28 = arith.constant 0 : index
    %44 = vector.load %arg9[%c0_27, %c0_28] : memref<8x256xbf16, #tpu.memory_space<vmem>>, vector<8x256xbf16>
    %c0_29 = arith.constant 0 : index
    %c0_30 = arith.constant 0 : index
    %45 = vector.load %arg4[%c0_29, %c0_30] : memref<256x1024xbf16, #tpu.memory_space<vmem>>, vector<256x1024xbf16>
    %cst_31 = arith.constant dense<0.000000e+00> : vector<8x1024xf32>
    %46 = tpu.matmul %44, %45, %cst_31 {dimension_numbers = #tpu.dot_dimension_numbers<[1], [0], [0], [1], [0, 0, 1, 1], [], []>} : vector<8x256xbf16>, vector<256x1024xbf16>, vector<8x1024xf32> -> vector<8x1024xf32>
    %47 = vector.extract_strided_slice %46 {offsets = [0, 512], sizes = [8, 512], strides = [1, 1]} : vector<8x1024xf32> to vector<8x512xf32>
    %48 = arith.addf %47, %13 : vector<8x512xf32>
    %49 = vector.extract_strided_slice %46 {offsets = [0, 0], sizes = [8, 512], strides = [1, 1]} : vector<8x1024xf32> to vector<8x512xf32>
    %50 = arith.index_cast %40 : i32 to index
    %c0_32 = arith.constant 0 : index
    %51 = vector.load %arg8[%50, %c0_32] : memref<64x512xf32, #tpu.memory_space<vmem>>, vector<8x512xf32>
    %52 = arith.addf %49, %51 : vector<8x512xf32>
    %53 = vector.extract_strided_slice %48 {offsets = [0, 0], sizes = [8, 384], strides = [1, 1]} : vector<8x512xf32> to vector<8x384xf32>
    %54 = arith.negf %53 : vector<8x384xf32>
    %55 = math.exp %54 : vector<8x384xf32>
    %cst_33 = arith.constant 1.000000e+00 : f32
    %56 = vector.broadcast %cst_33 : f32 to vector<8x384xf32>
    %57 = arith.addf %56, %55 : vector<8x384xf32>
    %58 = arith.divf %56, %57 : vector<8x384xf32>
    %59 = vector.extract_strided_slice %48 {offsets = [0, 384], sizes = [8, 128], strides = [1, 1]} : vector<8x512xf32> to vector<8x128xf32>
    %60 = math.tanh %59 : vector<8x128xf32>
    %61 = vector.extract_strided_slice %58 {offsets = [0, 128], sizes = [8, 128], strides = [1, 1]} : vector<8x384xf32> to vector<8x128xf32>
    %c0_34 = arith.constant 0 : index
    %c0_35 = arith.constant 0 : index
    %62 = vector.load %arg11[%c0_34, %c0_35] : memref<8x128xf32, #tpu.memory_space<vmem>>, vector<8x128xf32>
    %63 = arith.mulf %61, %62 : vector<8x128xf32>
    %64 = vector.extract_strided_slice %58 {offsets = [0, 0], sizes = [8, 128], strides = [1, 1]} : vector<8x384xf32> to vector<8x128xf32>
    %65 = arith.mulf %64, %60 : vector<8x128xf32>
    %66 = arith.addf %63, %65 : vector<8x128xf32>
    %67 = vector.extract_strided_slice %58 {offsets = [0, 256], sizes = [8, 128], strides = [1, 1]} : vector<8x384xf32> to vector<8x128xf32>
    %68 = math.tanh %66 : vector<8x128xf32>
    %69 = arith.mulf %67, %68 : vector<8x128xf32>
    %c0_36 = arith.constant 0 : index
    %c0_37 = arith.constant 0 : index
    %70 = vector.load %arg11[%c0_36, %c0_37] : memref<8x128xf32, #tpu.memory_space<vmem>>, vector<8x128xf32>
    tpu.vector_store %arg11[%c0_36, %c0_37], %66 {strides = array<i32>} : memref<8x128xf32, #tpu.memory_space<vmem>>, vector<8x128xf32>,
    %71 = arith.truncf %69 : vector<8x128xf32> to vector<8x128xbf16>
    %c0_38 = arith.constant 0 : index
    %c128 = arith.constant 128 : index
    %72 = vector.load %arg9[%c0_38, %c128] : memref<8x256xbf16, #tpu.memory_space<vmem>>, vector<8x128xbf16>
    tpu.vector_store %arg9[%c0_38, %c128], %71 {strides = array<i32>} : memref<8x256xbf16, #tpu.memory_space<vmem>>, vector<8x128xbf16>,
    %73 = arith.truncf %69 : vector<8x128xf32> to vector<8x128xbf16>
    %c0_39 = arith.constant 0 : index
    %74 = arith.index_cast %43 : i32 to index
    %c0_40 = arith.constant 0 : index
    %75 = vector.load %arg7[%c0_39, %74, %c0_40] : memref<1x64x128xbf16, #tpu.memory_space<vmem>>, vector<1x8x128xbf16>
    %76 = vector.shape_cast %75 : vector<1x8x128xbf16> to vector<8x128xbf16>
    %77 = vector.shape_cast %73 : vector<8x128xbf16> to vector<1x8x128xbf16>
    tpu.vector_store %arg7[%c0_39, %74, %c0_40], %77 {strides = array<i32>} : memref<1x64x128xbf16, #tpu.memory_space<vmem>>, vector<1x8x128xbf16>,
    %78 = vector.extract_strided_slice %52 {offsets = [0, 0], sizes = [8, 384], strides = [1, 1]} : vector<8x512xf32> to vector<8x384xf32>
    %79 = arith.negf %78 : vector<8x384xf32>
    %80 = math.exp %79 : vector<8x384xf32>
    %cst_41 = arith.constant 1.000000e+00 : f32
    %81 = vector.broadcast %cst_41 : f32 to vector<8x384xf32>
    %82 = arith.addf %81, %80 : vector<8x384xf32>
    %83 = arith.divf %81, %82 : vector<8x384xf32>
    %84 = vector.extract_strided_slice %52 {offsets = [0, 384], sizes = [8, 128], strides = [1, 1]} : vector<8x512xf32> to vector<8x128xf32>
    %85 = math.tanh %84 : vector<8x128xf32>
    %86 = vector.extract_strided_slice %83 {offsets = [0, 128], sizes = [8, 128], strides = [1, 1]} : vector<8x384xf32> to vector<8x128xf32>
    %c0_42 = arith.constant 0 : index
    %c0_43 = arith.constant 0 : index
    %87 = vector.load %arg10[%c0_42, %c0_43] : memref<8x128xf32, #tpu.memory_space<vmem>>, vector<8x128xf32>
    %88 = arith.mulf %86, %87 : vector<8x128xf32>
    %89 = vector.extract_strided_slice %83 {offsets = [0, 0], sizes = [8, 128], strides = [1, 1]} : vector<8x384xf32> to vector<8x128xf32>
    %90 = arith.mulf %89, %85 : vector<8x128xf32>
    %91 = arith.addf %88, %90 : vector<8x128xf32>
    %92 = vector.extract_strided_slice %83 {offsets = [0, 256], sizes = [8, 128], strides = [1, 1]} : vector<8x384xf32> to vector<8x128xf32>
    %93 = math.tanh %91 : vector<8x128xf32>
    %94 = arith.mulf %92, %93 : vector<8x128xf32>
    %c0_44 = arith.constant 0 : index
    %c0_45 = arith.constant 0 : index
    %95 = vector.load %arg10[%c0_44, %c0_45] : memref<8x128xf32, #tpu.memory_space<vmem>>, vector<8x128xf32>
    tpu.vector_store %arg10[%c0_44, %c0_45], %91 {strides = array<i32>} : memref<8x128xf32, #tpu.memory_space<vmem>>, vector<8x128xf32>,
    %96 = arith.truncf %94 : vector<8x128xf32> to vector<8x128xbf16>
    %c0_46 = arith.constant 0 : index
    %c0_47 = arith.constant 0 : index
    %97 = vector.load %arg9[%c0_46, %c0_47] : memref<8x256xbf16, #tpu.memory_space<vmem>>, vector<8x128xbf16>
    tpu.vector_store %arg9[%c0_46, %c0_47], %96 {strides = array<i32>} : memref<8x256xbf16, #tpu.memory_space<vmem>>, vector<8x128xbf16>,
    %c2_i32 = arith.constant 2 : i32
    %c8_i32_48 = arith.constant 8 : i32
    %98 = arith.muli %c2_i32, %c8_i32_48 : i32
    %99 = tpu.assume_multiple %98, 8 : i32
    %c1_i32_49 = arith.constant 1 : i32
    %100 = arith.subi %c2_i32, %c1_i32_49 : i32
    %c8_i32_50 = arith.constant 8 : i32
    %101 = arith.muli %100, %c8_i32_50 : i32
    %102 = tpu.assume_multiple %101, 8 : i32
    %c0_51 = arith.constant 0 : index
    %c0_52 = arith.constant 0 : index
    %103 = vector.load %arg9[%c0_51, %c0_52] : memref<8x256xbf16, #tpu.memory_space<vmem>>, vector<8x256xbf16>
    %c0_53 = arith.constant 0 : index
    %c0_54 = arith.constant 0 : index
    %104 = vector.load %arg4[%c0_53, %c0_54] : memref<256x1024xbf16, #tpu.memory_space<vmem>>, vector<256x1024xbf16>
    %cst_55 = arith.constant dense<0.000000e+00> : vector<8x1024xf32>
    %105 = tpu.matmul %103, %104, %cst_55 {dimension_numbers = #tpu.dot_dimension_numbers<[1], [0], [0], [1], [0, 0, 1, 1], [], []>} : vector<8x256xbf16>, vector<256x1024xbf16>, vector<8x1024xf32> -> vector<8x1024xf32>
    %106 = vector.extract_strided_slice %105 {offsets = [0, 512], sizes = [8, 512], strides = [1, 1]} : vector<8x1024xf32> to vector<8x512xf32>
    %107 = arith.addf %106, %13 : vector<8x512xf32>
    %108 = vector.extract_strided_slice %105 {offsets = [0, 0], sizes = [8, 512], strides = [1, 1]} : vector<8x1024xf32> to vector<8x512xf32>
    %109 = arith.index_cast %99 : i32 to index
    %c0_56 = arith.constant 0 : index
    %110 = vector.load %arg8[%109, %c0_56] : memref<64x512xf32, #tpu.memory_space<vmem>>, vector<8x512xf32>
    %111 = arith.addf %108, %110 : vector<8x512xf32>
    %112 = vector.extract_strided_slice %107 {offsets = [0, 0], sizes = [8, 384], strides = [1, 1]} : vector<8x512xf32> to vector<8x384xf32>
    %113 = arith.negf %112 : vector<8x384xf32>
    %114 = math.exp %113 : vector<8x384xf32>
    %cst_57 = arith.constant 1.000000e+00 : f32
    %115 = vector.broadcast %cst_57 : f32 to vector<8x384xf32>
    %116 = arith.addf %115, %114 : vector<8x384xf32>
    %117 = arith.divf %115, %116 : vector<8x384xf32>
    %118 = vector.extract_strided_slice %107 {offsets = [0, 384], sizes = [8, 128], strides = [1, 1]} : vector<8x512xf32> to vector<8x128xf32>
    %119 = math.tanh %118 : vector<8x128xf32>
    %120 = vector.extract_strided_slice %117 {offsets = [0, 128], sizes = [8, 128], strides = [1, 1]} : vector<8x384xf32> to vector<8x128xf32>
    %c0_58 = arith.constant 0 : index
    %c0_59 = arith.constant 0 : index
    %121 = vector.load %arg11[%c0_58, %c0_59] : memref<8x128xf32, #tpu.memory_space<vmem>>, vector<8x128xf32>
    %122 = arith.mulf %120, %121 : vector<8x128xf32>
    %123 = vector.extract_strided_slice %117 {offsets = [0, 0], sizes = [8, 128], strides = [1, 1]} : vector<8x384xf32> to vector<8x128xf32>
    %124 = arith.mulf %123, %119 : vector<8x128xf32>
    %125 = arith.addf %122, %124 : vector<8x128xf32>
    %126 = vector.extract_strided_slice %117 {offsets = [0, 256], sizes = [8, 128], strides = [1, 1]} : vector<8x384xf32> to vector<8x128xf32>
    %127 = math.tanh %125 : vector<8x128xf32>
    %128 = arith.mulf %126, %127 : vector<8x128xf32>
    %c0_60 = arith.constant 0 : index
    %c0_61 = arith.constant 0 : index
    %129 = vector.load %arg11[%c0_60, %c0_61] : memref<8x128xf32, #tpu.memory_space<vmem>>, vector<8x128xf32>
    tpu.vector_store %arg11[%c0_60, %c0_61], %125 {strides = array<i32>} : memref<8x128xf32, #tpu.memory_space<vmem>>, vector<8x128xf32>,
    %130 = arith.truncf %128 : vector<8x128xf32> to vector<8x128xbf16>
    %c0_62 = arith.constant 0 : index
    %c128_63 = arith.constant 128 : index
    %131 = vector.load %arg9[%c0_62, %c128_63] : memref<8x256xbf16, #tpu.memory_space<vmem>>, vector<8x128xbf16>
    tpu.vector_store %arg9[%c0_62, %c128_63], %130 {strides = array<i32>} : memref<8x256xbf16, #tpu.memory_space<vmem>>, vector<8x128xbf16>,
    %132 = arith.truncf %128 : vector<8x128xf32> to vector<8x128xbf16>
    %c0_64 = arith.constant 0 : index
    %133 = arith.index_cast %102 : i32 to index
    %c0_65 = arith.constant 0 : index
    %134 = vector.load %arg7[%c0_64, %133, %c0_65] : memref<1x64x128xbf16, #tpu.memory_space<vmem>>, vector<1x8x128xbf16>
    %135 = vector.shape_cast %134 : vector<1x8x128xbf16> to vector<8x128xbf16>
    %136 = vector.shape_cast %132 : vector<8x128xbf16> to vector<1x8x128xbf16>
    tpu.vector_store %arg7[%c0_64, %133, %c0_65], %136 {strides = array<i32>} : memref<1x64x128xbf16, #tpu.memory_space<vmem>>, vector<1x8x128xbf16>,
    %137 = vector.extract_strided_slice %111 {offsets = [0, 0], sizes = [8, 384], strides = [1, 1]} : vector<8x512xf32> to vector<8x384xf32>
    %138 = arith.negf %137 : vector<8x384xf32>
    %139 = math.exp %138 : vector<8x384xf32>
    %cst_66 = arith.constant 1.000000e+00 : f32
    %140 = vector.broadcast %cst_66 : f32 to vector<8x384xf32>
    %141 = arith.addf %140, %139 : vector<8x384xf32>
    %142 = arith.divf %140, %141 : vector<8x384xf32>
    %143 = vector.extract_strided_slice %111 {offsets = [0, 384], sizes = [8, 128], strides = [1, 1]} : vector<8x512xf32> to vector<8x128xf32>
    %144 = math.tanh %143 : vector<8x128xf32>
    %145 = vector.extract_strided_slice %142 {offsets = [0, 128], sizes = [8, 128], strides = [1, 1]} : vector<8x384xf32> to vector<8x128xf32>
    %c0_67 = arith.constant 0 : index
    %c0_68 = arith.constant 0 : index
    %146 = vector.load %arg10[%c0_67, %c0_68] : memref<8x128xf32, #tpu.memory_space<vmem>>, vector<8x128xf32>
    %147 = arith.mulf %145, %146 : vector<8x128xf32>
    %148 = vector.extract_strided_slice %142 {offsets = [0, 0], sizes = [8, 128], strides = [1, 1]} : vector<8x384xf32> to vector<8x128xf32>
    %149 = arith.mulf %148, %144 : vector<8x128xf32>
    %150 = arith.addf %147, %149 : vector<8x128xf32>
    %151 = vector.extract_strided_slice %142 {offsets = [0, 256], sizes = [8, 128], strides = [1, 1]} : vector<8x384xf32> to vector<8x128xf32>
    %152 = math.tanh %150 : vector<8x128xf32>
    %153 = arith.mulf %151, %152 : vector<8x128xf32>
    %c0_69 = arith.constant 0 : index
    %c0_70 = arith.constant 0 : index
    %154 = vector.load %arg10[%c0_69, %c0_70] : memref<8x128xf32, #tpu.memory_space<vmem>>, vector<8x128xf32>
    tpu.vector_store %arg10[%c0_69, %c0_70], %150 {strides = array<i32>} : memref<8x128xf32, #tpu.memory_space<vmem>>, vector<8x128xf32>,
    %155 = arith.truncf %153 : vector<8x128xf32> to vector<8x128xbf16>
    %c0_71 = arith.constant 0 : index
    %c0_72 = arith.constant 0 : index
    %156 = vector.load %arg9[%c0_71, %c0_72] : memref<8x256xbf16, #tpu.memory_space<vmem>>, vector<8x128xbf16>
    tpu.vector_store %arg9[%c0_71, %c0_72], %155 {strides = array<i32>} : memref<8x256xbf16, #tpu.memory_space<vmem>>, vector<8x128xbf16>,
    %c3_i32 = arith.constant 3 : i32
    %c8_i32_73 = arith.constant 8 : i32
    %157 = arith.muli %c3_i32, %c8_i32_73 : i32
    %158 = tpu.assume_multiple %157, 8 : i32
    %c1_i32_74 = arith.constant 1 : i32
    %159 = arith.subi %c3_i32, %c1_i32_74 : i32
    %c8_i32_75 = arith.constant 8 : i32
    %160 = arith.muli %159, %c8_i32_75 : i32
    %161 = tpu.assume_multiple %160, 8 : i32
    %c0_76 = arith.constant 0 : index
    %c0_77 = arith.constant 0 : index
    %162 = vector.load %arg9[%c0_76, %c0_77] : memref<8x256xbf16, #tpu.memory_space<vmem>>, vector<8x256xbf16>
    %c0_78 = arith.constant 0 : index
    %c0_79 = arith.constant 0 : index
    %163 = vector.load %arg4[%c0_78, %c0_79] : memref<256x1024xbf16, #tpu.memory_space<vmem>>, vector<256x1024xbf16>
    %cst_80 = arith.constant dense<0.000000e+00> : vector<8x1024xf32>
    %164 = tpu.matmul %162, %163, %cst_80 {dimension_numbers = #tpu.dot_dimension_numbers<[1], [0], [0], [1], [0, 0, 1, 1], [], []>} : vector<8x256xbf16>, vector<256x1024xbf16>, vector<8x1024xf32> -> vector<8x1024xf32>
    %165 = vector.extract_strided_slice %164 {offsets = [0, 512], sizes = [8, 512], strides = [1, 1]} : vector<8x1024xf32> to vector<8x512xf32>
    %166 = arith.addf %165, %13 : vector<8x512xf32>
    %167 = vector.extract_strided_slice %164 {offsets = [0, 0], sizes = [8, 512], strides = [1, 1]} : vector<8x1024xf32> to vector<8x512xf32>
    %168 = arith.index_cast %158 : i32 to index
    %c0_81 = arith.constant 0 : index
    %169 = vector.load %arg8[%168, %c0_81] : memref<64x512xf32, #tpu.memory_space<vmem>>, vector<8x512xf32>
    %170 = arith.addf %167, %169 : vector<8x512xf32>
    %171 = vector.extract_strided_slice %166 {offsets = [0, 0], sizes = [8, 384], strides = [1, 1]} : vector<8x512xf32> to vector<8x384xf32>
    %172 = arith.negf %171 : vector<8x384xf32>
    %173 = math.exp %172 : vector<8x384xf32>
    %cst_82 = arith.constant 1.000000e+00 : f32
    %174 = vector.broadcast %cst_82 : f32 to vector<8x384xf32>
    %175 = arith.addf %174, %173 : vector<8x384xf32>
    %176 = arith.divf %174, %175 : vector<8x384xf32>
    %177 = vector.extract_strided_slice %166 {offsets = [0, 384], sizes = [8, 128], strides = [1, 1]} : vector<8x512xf32> to vector<8x128xf32>
    %178 = math.tanh %177 : vector<8x128xf32>
    %179 = vector.extract_strided_slice %176 {offsets = [0, 128], sizes = [8, 128], strides = [1, 1]} : vector<8x384xf32> to vector<8x128xf32>
    %c0_83 = arith.constant 0 : index
    %c0_84 = arith.constant 0 : index
    %180 = vector.load %arg11[%c0_83, %c0_84] : memref<8x128xf32, #tpu.memory_space<vmem>>, vector<8x128xf32>
    %181 = arith.mulf %179, %180 : vector<8x128xf32>
    %182 = vector.extract_strided_slice %176 {offsets = [0, 0], sizes = [8, 128], strides = [1, 1]} : vector<8x384xf32> to vector<8x128xf32>
    %183 = arith.mulf %182, %178 : vector<8x128xf32>
    %184 = arith.addf %181, %183 : vector<8x128xf32>
    %185 = vector.extract_strided_slice %176 {offsets = [0, 256], sizes = [8, 128], strides = [1, 1]} : vector<8x384xf32> to vector<8x128xf32>
    %186 = math.tanh %184 : vector<8x128xf32>
    %187 = arith.mulf %185, %186 : vector<8x128xf32>
    %c0_85 = arith.constant 0 : index
    %c0_86 = arith.constant 0 : index
    %188 = vector.load %arg11[%c0_85, %c0_86] : memref<8x128xf32, #tpu.memory_space<vmem>>, vector<8x128xf32>
    tpu.vector_store %arg11[%c0_85, %c0_86], %184 {strides = array<i32>} : memref<8x128xf32, #tpu.memory_space<vmem>>, vector<8x128xf32>,
    %189 = arith.truncf %187 : vector<8x128xf32> to vector<8x128xbf16>
    %c0_87 = arith.constant 0 : index
    %c128_88 = arith.constant 128 : index
    %190 = vector.load %arg9[%c0_87, %c128_88] : memref<8x256xbf16, #tpu.memory_space<vmem>>, vector<8x128xbf16>
    tpu.vector_store %arg9[%c0_87, %c128_88], %189 {strides = array<i32>} : memref<8x256xbf16, #tpu.memory_space<vmem>>, vector<8x128xbf16>,
    %191 = arith.truncf %187 : vector<8x128xf32> to vector<8x128xbf16>
    %c0_89 = arith.constant 0 : index
    %192 = arith.index_cast %161 : i32 to index
    %c0_90 = arith.constant 0 : index
    %193 = vector.load %arg7[%c0_89, %192, %c0_90] : memref<1x64x128xbf16, #tpu.memory_space<vmem>>, vector<1x8x128xbf16>
    %194 = vector.shape_cast %193 : vector<1x8x128xbf16> to vector<8x128xbf16>
    %195 = vector.shape_cast %191 : vector<8x128xbf16> to vector<1x8x128xbf16>
    tpu.vector_store %arg7[%c0_89, %192, %c0_90], %195 {strides = array<i32>} : memref<1x64x128xbf16, #tpu.memory_space<vmem>>, vector<1x8x128xbf16>,
    %196 = vector.extract_strided_slice %170 {offsets = [0, 0], sizes = [8, 384], strides = [1, 1]} : vector<8x512xf32> to vector<8x384xf32>
    %197 = arith.negf %196 : vector<8x384xf32>
    %198 = math.exp %197 : vector<8x384xf32>
    %cst_91 = arith.constant 1.000000e+00 : f32
    %199 = vector.broadcast %cst_91 : f32 to vector<8x384xf32>
    %200 = arith.addf %199, %198 : vector<8x384xf32>
    %201 = arith.divf %199, %200 : vector<8x384xf32>
    %202 = vector.extract_strided_slice %170 {offsets = [0, 384], sizes = [8, 128], strides = [1, 1]} : vector<8x512xf32> to vector<8x128xf32>
    %203 = math.tanh %202 : vector<8x128xf32>
    %204 = vector.extract_strided_slice %201 {offsets = [0, 128], sizes = [8, 128], strides = [1, 1]} : vector<8x384xf32> to vector<8x128xf32>
    %c0_92 = arith.constant 0 : index
    %c0_93 = arith.constant 0 : index
    %205 = vector.load %arg10[%c0_92, %c0_93] : memref<8x128xf32, #tpu.memory_space<vmem>>, vector<8x128xf32>
    %206 = arith.mulf %204, %205 : vector<8x128xf32>
    %207 = vector.extract_strided_slice %201 {offsets = [0, 0], sizes = [8, 128], strides = [1, 1]} : vector<8x384xf32> to vector<8x128xf32>
    %208 = arith.mulf %207, %203 : vector<8x128xf32>
    %209 = arith.addf %206, %208 : vector<8x128xf32>
    %210 = vector.extract_strided_slice %201 {offsets = [0, 256], sizes = [8, 128], strides = [1, 1]} : vector<8x384xf32> to vector<8x128xf32>
    %211 = math.tanh %209 : vector<8x128xf32>
    %212 = arith.mulf %210, %211 : vector<8x128xf32>
    %c0_94 = arith.constant 0 : index
    %c0_95 = arith.constant 0 : index
    %213 = vector.load %arg10[%c0_94, %c0_95] : memref<8x128xf32, #tpu.memory_space<vmem>>, vector<8x128xf32>
    tpu.vector_store %arg10[%c0_94, %c0_95], %209 {strides = array<i32>} : memref<8x128xf32, #tpu.memory_space<vmem>>, vector<8x128xf32>,
    %214 = arith.truncf %212 : vector<8x128xf32> to vector<8x128xbf16>
    %c0_96 = arith.constant 0 : index
    %c0_97 = arith.constant 0 : index
    %215 = vector.load %arg9[%c0_96, %c0_97] : memref<8x256xbf16, #tpu.memory_space<vmem>>, vector<8x128xbf16>
    tpu.vector_store %arg9[%c0_96, %c0_97], %214 {strides = array<i32>} : memref<8x256xbf16, #tpu.memory_space<vmem>>, vector<8x128xbf16>,
    %c4_i32 = arith.constant 4 : i32
    %c8_i32_98 = arith.constant 8 : i32
    %216 = arith.muli %c4_i32, %c8_i32_98 : i32
    %217 = tpu.assume_multiple %216, 8 : i32
    %c1_i32_99 = arith.constant 1 : i32
    %218 = arith.subi %c4_i32, %c1_i32_99 : i32
    %c8_i32_100 = arith.constant 8 : i32
    %219 = arith.muli %218, %c8_i32_100 : i32
    %220 = tpu.assume_multiple %219, 8 : i32
    %c0_101 = arith.constant 0 : index
    %c0_102 = arith.constant 0 : index
    %221 = vector.load %arg9[%c0_101, %c0_102] : memref<8x256xbf16, #tpu.memory_space<vmem>>, vector<8x256xbf16>
    %c0_103 = arith.constant 0 : index
    %c0_104 = arith.constant 0 : index
    %222 = vector.load %arg4[%c0_103, %c0_104] : memref<256x1024xbf16, #tpu.memory_space<vmem>>, vector<256x1024xbf16>
    %cst_105 = arith.constant dense<0.000000e+00> : vector<8x1024xf32>
    %223 = tpu.matmul %221, %222, %cst_105 {dimension_numbers = #tpu.dot_dimension_numbers<[1], [0], [0], [1], [0, 0, 1, 1], [], []>} : vector<8x256xbf16>, vector<256x1024xbf16>, vector<8x1024xf32> -> vector<8x1024xf32>
    %224 = vector.extract_strided_slice %223 {offsets = [0, 512], sizes = [8, 512], strides = [1, 1]} : vector<8x1024xf32> to vector<8x512xf32>
    %225 = arith.addf %224, %13 : vector<8x512xf32>
    %226 = vector.extract_strided_slice %223 {offsets = [0, 0], sizes = [8, 512], strides = [1, 1]} : vector<8x1024xf32> to vector<8x512xf32>
    %227 = arith.index_cast %217 : i32 to index
    %c0_106 = arith.constant 0 : index
    %228 = vector.load %arg8[%227, %c0_106] : memref<64x512xf32, #tpu.memory_space<vmem>>, vector<8x512xf32>
    %229 = arith.addf %226, %228 : vector<8x512xf32>
    %230 = vector.extract_strided_slice %225 {offsets = [0, 0], sizes = [8, 384], strides = [1, 1]} : vector<8x512xf32> to vector<8x384xf32>
    %231 = arith.negf %230 : vector<8x384xf32>
    %232 = math.exp %231 : vector<8x384xf32>
    %cst_107 = arith.constant 1.000000e+00 : f32
    %233 = vector.broadcast %cst_107 : f32 to vector<8x384xf32>
    %234 = arith.addf %233, %232 : vector<8x384xf32>
    %235 = arith.divf %233, %234 : vector<8x384xf32>
    %236 = vector.extract_strided_slice %225 {offsets = [0, 384], sizes = [8, 128], strides = [1, 1]} : vector<8x512xf32> to vector<8x128xf32>
    %237 = math.tanh %236 : vector<8x128xf32>
    %238 = vector.extract_strided_slice %235 {offsets = [0, 128], sizes = [8, 128], strides = [1, 1]} : vector<8x384xf32> to vector<8x128xf32>
    %c0_108 = arith.constant 0 : index
    %c0_109 = arith.constant 0 : index
    %239 = vector.load %arg11[%c0_108, %c0_109] : memref<8x128xf32, #tpu.memory_space<vmem>>, vector<8x128xf32>
    %240 = arith.mulf %238, %239 : vector<8x128xf32>
    %241 = vector.extract_strided_slice %235 {offsets = [0, 0], sizes = [8, 128], strides = [1, 1]} : vector<8x384xf32> to vector<8x128xf32>
    %242 = arith.mulf %241, %237 : vector<8x128xf32>
    %243 = arith.addf %240, %242 : vector<8x128xf32>
    %244 = vector.extract_strided_slice %235 {offsets = [0, 256], sizes = [8, 128], strides = [1, 1]} : vector<8x384xf32> to vector<8x128xf32>
    %245 = math.tanh %243 : vector<8x128xf32>
    %246 = arith.mulf %244, %245 : vector<8x128xf32>
    %c0_110 = arith.constant 0 : index
    %c0_111 = arith.constant 0 : index
    %247 = vector.load %arg11[%c0_110, %c0_111] : memref<8x128xf32, #tpu.memory_space<vmem>>, vector<8x128xf32>
    tpu.vector_store %arg11[%c0_110, %c0_111], %243 {strides = array<i32>} : memref<8x128xf32, #tpu.memory_space<vmem>>, vector<8x128xf32>,
    %248 = arith.truncf %246 : vector<8x128xf32> to vector<8x128xbf16>
    %c0_112 = arith.constant 0 : index
    %c128_113 = arith.constant 128 : index
    %249 = vector.load %arg9[%c0_112, %c128_113] : memref<8x256xbf16, #tpu.memory_space<vmem>>, vector<8x128xbf16>
    tpu.vector_store %arg9[%c0_112, %c128_113], %248 {strides = array<i32>} : memref<8x256xbf16, #tpu.memory_space<vmem>>, vector<8x128xbf16>,
    %250 = arith.truncf %246 : vector<8x128xf32> to vector<8x128xbf16>
    %c0_114 = arith.constant 0 : index
    %251 = arith.index_cast %220 : i32 to index
    %c0_115 = arith.constant 0 : index
    %252 = vector.load %arg7[%c0_114, %251, %c0_115] : memref<1x64x128xbf16, #tpu.memory_space<vmem>>, vector<1x8x128xbf16>
    %253 = vector.shape_cast %252 : vector<1x8x128xbf16> to vector<8x128xbf16>
    %254 = vector.shape_cast %250 : vector<8x128xbf16> to vector<1x8x128xbf16>
    tpu.vector_store %arg7[%c0_114, %251, %c0_115], %254 {strides = array<i32>} : memref<1x64x128xbf16, #tpu.memory_space<vmem>>, vector<1x8x128xbf16>,
    %255 = vector.extract_strided_slice %229 {offsets = [0, 0], sizes = [8, 384], strides = [1, 1]} : vector<8x512xf32> to vector<8x384xf32>
    %256 = arith.negf %255 : vector<8x384xf32>
    %257 = math.exp %256 : vector<8x384xf32>
    %cst_116 = arith.constant 1.000000e+00 : f32
    %258 = vector.broadcast %cst_116 : f32 to vector<8x384xf32>
    %259 = arith.addf %258, %257 : vector<8x384xf32>
    %260 = arith.divf %258, %259 : vector<8x384xf32>
    %261 = vector.extract_strided_slice %229 {offsets = [0, 384], sizes = [8, 128], strides = [1, 1]} : vector<8x512xf32> to vector<8x128xf32>
    %262 = math.tanh %261 : vector<8x128xf32>
    %263 = vector.extract_strided_slice %260 {offsets = [0, 128], sizes = [8, 128], strides = [1, 1]} : vector<8x384xf32> to vector<8x128xf32>
    %c0_117 = arith.constant 0 : index
    %c0_118 = arith.constant 0 : index
    %264 = vector.load %arg10[%c0_117, %c0_118] : memref<8x128xf32, #tpu.memory_space<vmem>>, vector<8x128xf32>
    %265 = arith.mulf %263, %264 : vector<8x128xf32>
    %266 = vector.extract_strided_slice %260 {offsets = [0, 0], sizes = [8, 128], strides = [1, 1]} : vector<8x384xf32> to vector<8x128xf32>
    %267 = arith.mulf %266, %262 : vector<8x128xf32>
    %268 = arith.addf %265, %267 : vector<8x128xf32>
    %269 = vector.extract_strided_slice %260 {offsets = [0, 256], sizes = [8, 128], strides = [1, 1]} : vector<8x384xf32> to vector<8x128xf32>
    %270 = math.tanh %268 : vector<8x128xf32>
    %271 = arith.mulf %269, %270 : vector<8x128xf32>
    %c0_119 = arith.constant 0 : index
    %c0_120 = arith.constant 0 : index
    %272 = vector.load %arg10[%c0_119, %c0_120] : memref<8x128xf32, #tpu.memory_space<vmem>>, vector<8x128xf32>
    tpu.vector_store %arg10[%c0_119, %c0_120], %268 {strides = array<i32>} : memref<8x128xf32, #tpu.memory_space<vmem>>, vector<8x128xf32>,
    %273 = arith.truncf %271 : vector<8x128xf32> to vector<8x128xbf16>
    %c0_121 = arith.constant 0 : index
    %c0_122 = arith.constant 0 : index
    %274 = vector.load %arg9[%c0_121, %c0_122] : memref<8x256xbf16, #tpu.memory_space<vmem>>, vector<8x128xbf16>
    tpu.vector_store %arg9[%c0_121, %c0_122], %273 {strides = array<i32>} : memref<8x256xbf16, #tpu.memory_space<vmem>>, vector<8x128xbf16>,
    %c5_i32 = arith.constant 5 : i32
    %c8_i32_123 = arith.constant 8 : i32
    %275 = arith.muli %c5_i32, %c8_i32_123 : i32
    %276 = tpu.assume_multiple %275, 8 : i32
    %c1_i32_124 = arith.constant 1 : i32
    %277 = arith.subi %c5_i32, %c1_i32_124 : i32
    %c8_i32_125 = arith.constant 8 : i32
    %278 = arith.muli %277, %c8_i32_125 : i32
    %279 = tpu.assume_multiple %278, 8 : i32
    %c0_126 = arith.constant 0 : index
    %c0_127 = arith.constant 0 : index
    %280 = vector.load %arg9[%c0_126, %c0_127] : memref<8x256xbf16, #tpu.memory_space<vmem>>, vector<8x256xbf16>
    %c0_128 = arith.constant 0 : index
    %c0_129 = arith.constant 0 : index
    %281 = vector.load %arg4[%c0_128, %c0_129] : memref<256x1024xbf16, #tpu.memory_space<vmem>>, vector<256x1024xbf16>
    %cst_130 = arith.constant dense<0.000000e+00> : vector<8x1024xf32>
    %282 = tpu.matmul %280, %281, %cst_130 {dimension_numbers = #tpu.dot_dimension_numbers<[1], [0], [0], [1], [0, 0, 1, 1], [], []>} : vector<8x256xbf16>, vector<256x1024xbf16>, vector<8x1024xf32> -> vector<8x1024xf32>
    %283 = vector.extract_strided_slice %282 {offsets = [0, 512], sizes = [8, 512], strides = [1, 1]} : vector<8x1024xf32> to vector<8x512xf32>
    %284 = arith.addf %283, %13 : vector<8x512xf32>
    %285 = vector.extract_strided_slice %282 {offsets = [0, 0], sizes = [8, 512], strides = [1, 1]} : vector<8x1024xf32> to vector<8x512xf32>
    %286 = arith.index_cast %276 : i32 to index
    %c0_131 = arith.constant 0 : index
    %287 = vector.load %arg8[%286, %c0_131] : memref<64x512xf32, #tpu.memory_space<vmem>>, vector<8x512xf32>
    %288 = arith.addf %285, %287 : vector<8x512xf32>
    %289 = vector.extract_strided_slice %284 {offsets = [0, 0], sizes = [8, 384], strides = [1, 1]} : vector<8x512xf32> to vector<8x384xf32>
    %290 = arith.negf %289 : vector<8x384xf32>
    %291 = math.exp %290 : vector<8x384xf32>
    %cst_132 = arith.constant 1.000000e+00 : f32
    %292 = vector.broadcast %cst_132 : f32 to vector<8x384xf32>
    %293 = arith.addf %292, %291 : vector<8x384xf32>
    %294 = arith.divf %292, %293 : vector<8x384xf32>
    %295 = vector.extract_strided_slice %284 {offsets = [0, 384], sizes = [8, 128], strides = [1, 1]} : vector<8x512xf32> to vector<8x128xf32>
    %296 = math.tanh %295 : vector<8x128xf32>
    %297 = vector.extract_strided_slice %294 {offsets = [0, 128], sizes = [8, 128], strides = [1, 1]} : vector<8x384xf32> to vector<8x128xf32>
    %c0_133 = arith.constant 0 : index
    %c0_134 = arith.constant 0 : index
    %298 = vector.load %arg11[%c0_133, %c0_134] : memref<8x128xf32, #tpu.memory_space<vmem>>, vector<8x128xf32>
    %299 = arith.mulf %297, %298 : vector<8x128xf32>
    %300 = vector.extract_strided_slice %294 {offsets = [0, 0], sizes = [8, 128], strides = [1, 1]} : vector<8x384xf32> to vector<8x128xf32>
    %301 = arith.mulf %300, %296 : vector<8x128xf32>
    %302 = arith.addf %299, %301 : vector<8x128xf32>
    %303 = vector.extract_strided_slice %294 {offsets = [0, 256], sizes = [8, 128], strides = [1, 1]} : vector<8x384xf32> to vector<8x128xf32>
    %304 = math.tanh %302 : vector<8x128xf32>
    %305 = arith.mulf %303, %304 : vector<8x128xf32>
    %c0_135 = arith.constant 0 : index
    %c0_136 = arith.constant 0 : index
    %306 = vector.load %arg11[%c0_135, %c0_136] : memref<8x128xf32, #tpu.memory_space<vmem>>, vector<8x128xf32>
    tpu.vector_store %arg11[%c0_135, %c0_136], %302 {strides = array<i32>} : memref<8x128xf32, #tpu.memory_space<vmem>>, vector<8x128xf32>,
    %307 = arith.truncf %305 : vector<8x128xf32> to vector<8x128xbf16>
    %c0_137 = arith.constant 0 : index
    %c128_138 = arith.constant 128 : index
    %308 = vector.load %arg9[%c0_137, %c128_138] : memref<8x256xbf16, #tpu.memory_space<vmem>>, vector<8x128xbf16>
    tpu.vector_store %arg9[%c0_137, %c128_138], %307 {strides = array<i32>} : memref<8x256xbf16, #tpu.memory_space<vmem>>, vector<8x128xbf16>,
    %309 = arith.truncf %305 : vector<8x128xf32> to vector<8x128xbf16>
    %c0_139 = arith.constant 0 : index
    %310 = arith.index_cast %279 : i32 to index
    %c0_140 = arith.constant 0 : index
    %311 = vector.load %arg7[%c0_139, %310, %c0_140] : memref<1x64x128xbf16, #tpu.memory_space<vmem>>, vector<1x8x128xbf16>
    %312 = vector.shape_cast %311 : vector<1x8x128xbf16> to vector<8x128xbf16>
    %313 = vector.shape_cast %309 : vector<8x128xbf16> to vector<1x8x128xbf16>
    tpu.vector_store %arg7[%c0_139, %310, %c0_140], %313 {strides = array<i32>} : memref<1x64x128xbf16, #tpu.memory_space<vmem>>, vector<1x8x128xbf16>,
    %314 = vector.extract_strided_slice %288 {offsets = [0, 0], sizes = [8, 384], strides = [1, 1]} : vector<8x512xf32> to vector<8x384xf32>
    %315 = arith.negf %314 : vector<8x384xf32>
    %316 = math.exp %315 : vector<8x384xf32>
    %cst_141 = arith.constant 1.000000e+00 : f32
    %317 = vector.broadcast %cst_141 : f32 to vector<8x384xf32>
    %318 = arith.addf %317, %316 : vector<8x384xf32>
    %319 = arith.divf %317, %318 : vector<8x384xf32>
    %320 = vector.extract_strided_slice %288 {offsets = [0, 384], sizes = [8, 128], strides = [1, 1]} : vector<8x512xf32> to vector<8x128xf32>
    %321 = math.tanh %320 : vector<8x128xf32>
    %322 = vector.extract_strided_slice %319 {offsets = [0, 128], sizes = [8, 128], strides = [1, 1]} : vector<8x384xf32> to vector<8x128xf32>
    %c0_142 = arith.constant 0 : index
    %c0_143 = arith.constant 0 : index
    %323 = vector.load %arg10[%c0_142, %c0_143] : memref<8x128xf32, #tpu.memory_space<vmem>>, vector<8x128xf32>
    %324 = arith.mulf %322, %323 : vector<8x128xf32>
    %325 = vector.extract_strided_slice %319 {offsets = [0, 0], sizes = [8, 128], strides = [1, 1]} : vector<8x384xf32> to vector<8x128xf32>
    %326 = arith.mulf %325, %321 : vector<8x128xf32>
    %327 = arith.addf %324, %326 : vector<8x128xf32>
    %328 = vector.extract_strided_slice %319 {offsets = [0, 256], sizes = [8, 128], strides = [1, 1]} : vector<8x384xf32> to vector<8x128xf32>
    %329 = math.tanh %327 : vector<8x128xf32>
    %330 = arith.mulf %328, %329 : vector<8x128xf32>
    %c0_144 = arith.constant 0 : index
    %c0_145 = arith.constant 0 : index
    %331 = vector.load %arg10[%c0_144, %c0_145] : memref<8x128xf32, #tpu.memory_space<vmem>>, vector<8x128xf32>
    tpu.vector_store %arg10[%c0_144, %c0_145], %327 {strides = array<i32>} : memref<8x128xf32, #tpu.memory_space<vmem>>, vector<8x128xf32>,
    %332 = arith.truncf %330 : vector<8x128xf32> to vector<8x128xbf16>
    %c0_146 = arith.constant 0 : index
    %c0_147 = arith.constant 0 : index
    %333 = vector.load %arg9[%c0_146, %c0_147] : memref<8x256xbf16, #tpu.memory_space<vmem>>, vector<8x128xbf16>
    tpu.vector_store %arg9[%c0_146, %c0_147], %332 {strides = array<i32>} : memref<8x256xbf16, #tpu.memory_space<vmem>>, vector<8x128xbf16>,
    %c6_i32 = arith.constant 6 : i32
    %c8_i32_148 = arith.constant 8 : i32
    %334 = arith.muli %c6_i32, %c8_i32_148 : i32
    %335 = tpu.assume_multiple %334, 8 : i32
    %c1_i32_149 = arith.constant 1 : i32
    %336 = arith.subi %c6_i32, %c1_i32_149 : i32
    %c8_i32_150 = arith.constant 8 : i32
    %337 = arith.muli %336, %c8_i32_150 : i32
    %338 = tpu.assume_multiple %337, 8 : i32
    %c0_151 = arith.constant 0 : index
    %c0_152 = arith.constant 0 : index
    %339 = vector.load %arg9[%c0_151, %c0_152] : memref<8x256xbf16, #tpu.memory_space<vmem>>, vector<8x256xbf16>
    %c0_153 = arith.constant 0 : index
    %c0_154 = arith.constant 0 : index
    %340 = vector.load %arg4[%c0_153, %c0_154] : memref<256x1024xbf16, #tpu.memory_space<vmem>>, vector<256x1024xbf16>
    %cst_155 = arith.constant dense<0.000000e+00> : vector<8x1024xf32>
    %341 = tpu.matmul %339, %340, %cst_155 {dimension_numbers = #tpu.dot_dimension_numbers<[1], [0], [0], [1], [0, 0, 1, 1], [], []>} : vector<8x256xbf16>, vector<256x1024xbf16>, vector<8x1024xf32> -> vector<8x1024xf32>
    %342 = vector.extract_strided_slice %341 {offsets = [0, 512], sizes = [8, 512], strides = [1, 1]} : vector<8x1024xf32> to vector<8x512xf32>
    %343 = arith.addf %342, %13 : vector<8x512xf32>
    %344 = vector.extract_strided_slice %341 {offsets = [0, 0], sizes = [8, 512], strides = [1, 1]} : vector<8x1024xf32> to vector<8x512xf32>
    %345 = arith.index_cast %335 : i32 to index
    %c0_156 = arith.constant 0 : index
    %346 = vector.load %arg8[%345, %c0_156] : memref<64x512xf32, #tpu.memory_space<vmem>>, vector<8x512xf32>
    %347 = arith.addf %344, %346 : vector<8x512xf32>
    %348 = vector.extract_strided_slice %343 {offsets = [0, 0], sizes = [8, 384], strides = [1, 1]} : vector<8x512xf32> to vector<8x384xf32>
    %349 = arith.negf %348 : vector<8x384xf32>
    %350 = math.exp %349 : vector<8x384xf32>
    %cst_157 = arith.constant 1.000000e+00 : f32
    %351 = vector.broadcast %cst_157 : f32 to vector<8x384xf32>
    %352 = arith.addf %351, %350 : vector<8x384xf32>
    %353 = arith.divf %351, %352 : vector<8x384xf32>
    %354 = vector.extract_strided_slice %343 {offsets = [0, 384], sizes = [8, 128], strides = [1, 1]} : vector<8x512xf32> to vector<8x128xf32>
    %355 = math.tanh %354 : vector<8x128xf32>
    %356 = vector.extract_strided_slice %353 {offsets = [0, 128], sizes = [8, 128], strides = [1, 1]} : vector<8x384xf32> to vector<8x128xf32>
    %c0_158 = arith.constant 0 : index
    %c0_159 = arith.constant 0 : index
    %357 = vector.load %arg11[%c0_158, %c0_159] : memref<8x128xf32, #tpu.memory_space<vmem>>, vector<8x128xf32>
    %358 = arith.mulf %356, %357 : vector<8x128xf32>
    %359 = vector.extract_strided_slice %353 {offsets = [0, 0], sizes = [8, 128], strides = [1, 1]} : vector<8x384xf32> to vector<8x128xf32>
    %360 = arith.mulf %359, %355 : vector<8x128xf32>
    %361 = arith.addf %358, %360 : vector<8x128xf32>
    %362 = vector.extract_strided_slice %353 {offsets = [0, 256], sizes = [8, 128], strides = [1, 1]} : vector<8x384xf32> to vector<8x128xf32>
    %363 = math.tanh %361 : vector<8x128xf32>
    %364 = arith.mulf %362, %363 : vector<8x128xf32>
    %c0_160 = arith.constant 0 : index
    %c0_161 = arith.constant 0 : index
    %365 = vector.load %arg11[%c0_160, %c0_161] : memref<8x128xf32, #tpu.memory_space<vmem>>, vector<8x128xf32>
    tpu.vector_store %arg11[%c0_160, %c0_161], %361 {strides = array<i32>} : memref<8x128xf32, #tpu.memory_space<vmem>>, vector<8x128xf32>,
    %366 = arith.truncf %364 : vector<8x128xf32> to vector<8x128xbf16>
    %c0_162 = arith.constant 0 : index
    %c128_163 = arith.constant 128 : index
    %367 = vector.load %arg9[%c0_162, %c128_163] : memref<8x256xbf16, #tpu.memory_space<vmem>>, vector<8x128xbf16>
    tpu.vector_store %arg9[%c0_162, %c128_163], %366 {strides = array<i32>} : memref<8x256xbf16, #tpu.memory_space<vmem>>, vector<8x128xbf16>,
    %368 = arith.truncf %364 : vector<8x128xf32> to vector<8x128xbf16>
    %c0_164 = arith.constant 0 : index
    %369 = arith.index_cast %338 : i32 to index
    %c0_165 = arith.constant 0 : index
    %370 = vector.load %arg7[%c0_164, %369, %c0_165] : memref<1x64x128xbf16, #tpu.memory_space<vmem>>, vector<1x8x128xbf16>
    %371 = vector.shape_cast %370 : vector<1x8x128xbf16> to vector<8x128xbf16>
    %372 = vector.shape_cast %368 : vector<8x128xbf16> to vector<1x8x128xbf16>
    tpu.vector_store %arg7[%c0_164, %369, %c0_165], %372 {strides = array<i32>} : memref<1x64x128xbf16, #tpu.memory_space<vmem>>, vector<1x8x128xbf16>,
    %373 = vector.extract_strided_slice %347 {offsets = [0, 0], sizes = [8, 384], strides = [1, 1]} : vector<8x512xf32> to vector<8x384xf32>
    %374 = arith.negf %373 : vector<8x384xf32>
    %375 = math.exp %374 : vector<8x384xf32>
    %cst_166 = arith.constant 1.000000e+00 : f32
    %376 = vector.broadcast %cst_166 : f32 to vector<8x384xf32>
    %377 = arith.addf %376, %375 : vector<8x384xf32>
    %378 = arith.divf %376, %377 : vector<8x384xf32>
    %379 = vector.extract_strided_slice %347 {offsets = [0, 384], sizes = [8, 128], strides = [1, 1]} : vector<8x512xf32> to vector<8x128xf32>
    %380 = math.tanh %379 : vector<8x128xf32>
    %381 = vector.extract_strided_slice %378 {offsets = [0, 128], sizes = [8, 128], strides = [1, 1]} : vector<8x384xf32> to vector<8x128xf32>
    %c0_167 = arith.constant 0 : index
    %c0_168 = arith.constant 0 : index
    %382 = vector.load %arg10[%c0_167, %c0_168] : memref<8x128xf32, #tpu.memory_space<vmem>>, vector<8x128xf32>
    %383 = arith.mulf %381, %382 : vector<8x128xf32>
    %384 = vector.extract_strided_slice %378 {offsets = [0, 0], sizes = [8, 128], strides = [1, 1]} : vector<8x384xf32> to vector<8x128xf32>
    %385 = arith.mulf %384, %380 : vector<8x128xf32>
    %386 = arith.addf %383, %385 : vector<8x128xf32>
    %387 = vector.extract_strided_slice %378 {offsets = [0, 256], sizes = [8, 128], strides = [1, 1]} : vector<8x384xf32> to vector<8x128xf32>
    %388 = math.tanh %386 : vector<8x128xf32>
    %389 = arith.mulf %387, %388 : vector<8x128xf32>
    %c0_169 = arith.constant 0 : index
    %c0_170 = arith.constant 0 : index
    %390 = vector.load %arg10[%c0_169, %c0_170] : memref<8x128xf32, #tpu.memory_space<vmem>>, vector<8x128xf32>
    tpu.vector_store %arg10[%c0_169, %c0_170], %386 {strides = array<i32>} : memref<8x128xf32, #tpu.memory_space<vmem>>, vector<8x128xf32>,
    %391 = arith.truncf %389 : vector<8x128xf32> to vector<8x128xbf16>
    %c0_171 = arith.constant 0 : index
    %c0_172 = arith.constant 0 : index
    %392 = vector.load %arg9[%c0_171, %c0_172] : memref<8x256xbf16, #tpu.memory_space<vmem>>, vector<8x128xbf16>
    tpu.vector_store %arg9[%c0_171, %c0_172], %391 {strides = array<i32>} : memref<8x256xbf16, #tpu.memory_space<vmem>>, vector<8x128xbf16>,
    %c7_i32 = arith.constant 7 : i32
    %c8_i32_173 = arith.constant 8 : i32
    %393 = arith.muli %c7_i32, %c8_i32_173 : i32
    %394 = tpu.assume_multiple %393, 8 : i32
    %c1_i32_174 = arith.constant 1 : i32
    %395 = arith.subi %c7_i32, %c1_i32_174 : i32
    %c8_i32_175 = arith.constant 8 : i32
    %396 = arith.muli %395, %c8_i32_175 : i32
    %397 = tpu.assume_multiple %396, 8 : i32
    %c0_176 = arith.constant 0 : index
    %c0_177 = arith.constant 0 : index
    %398 = vector.load %arg9[%c0_176, %c0_177] : memref<8x256xbf16, #tpu.memory_space<vmem>>, vector<8x256xbf16>
    %c0_178 = arith.constant 0 : index
    %c0_179 = arith.constant 0 : index
    %399 = vector.load %arg4[%c0_178, %c0_179] : memref<256x1024xbf16, #tpu.memory_space<vmem>>, vector<256x1024xbf16>
    %cst_180 = arith.constant dense<0.000000e+00> : vector<8x1024xf32>
    %400 = tpu.matmul %398, %399, %cst_180 {dimension_numbers = #tpu.dot_dimension_numbers<[1], [0], [0], [1], [0, 0, 1, 1], [], []>} : vector<8x256xbf16>, vector<256x1024xbf16>, vector<8x1024xf32> -> vector<8x1024xf32>
    %401 = vector.extract_strided_slice %400 {offsets = [0, 512], sizes = [8, 512], strides = [1, 1]} : vector<8x1024xf32> to vector<8x512xf32>
    %402 = arith.addf %401, %13 : vector<8x512xf32>
    %403 = vector.extract_strided_slice %400 {offsets = [0, 0], sizes = [8, 512], strides = [1, 1]} : vector<8x1024xf32> to vector<8x512xf32>
    %404 = arith.index_cast %394 : i32 to index
    %c0_181 = arith.constant 0 : index
    %405 = vector.load %arg8[%404, %c0_181] : memref<64x512xf32, #tpu.memory_space<vmem>>, vector<8x512xf32>
    %406 = arith.addf %403, %405 : vector<8x512xf32>
    %407 = vector.extract_strided_slice %402 {offsets = [0, 0], sizes = [8, 384], strides = [1, 1]} : vector<8x512xf32> to vector<8x384xf32>
    %408 = arith.negf %407 : vector<8x384xf32>
    %409 = math.exp %408 : vector<8x384xf32>
    %cst_182 = arith.constant 1.000000e+00 : f32
    %410 = vector.broadcast %cst_182 : f32 to vector<8x384xf32>
    %411 = arith.addf %410, %409 : vector<8x384xf32>
    %412 = arith.divf %410, %411 : vector<8x384xf32>
    %413 = vector.extract_strided_slice %402 {offsets = [0, 384], sizes = [8, 128], strides = [1, 1]} : vector<8x512xf32> to vector<8x128xf32>
    %414 = math.tanh %413 : vector<8x128xf32>
    %415 = vector.extract_strided_slice %412 {offsets = [0, 128], sizes = [8, 128], strides = [1, 1]} : vector<8x384xf32> to vector<8x128xf32>
    %c0_183 = arith.constant 0 : index
    %c0_184 = arith.constant 0 : index
    %416 = vector.load %arg11[%c0_183, %c0_184] : memref<8x128xf32, #tpu.memory_space<vmem>>, vector<8x128xf32>
    %417 = arith.mulf %415, %416 : vector<8x128xf32>
    %418 = vector.extract_strided_slice %412 {offsets = [0, 0], sizes = [8, 128], strides = [1, 1]} : vector<8x384xf32> to vector<8x128xf32>
    %419 = arith.mulf %418, %414 : vector<8x128xf32>
    %420 = arith.addf %417, %419 : vector<8x128xf32>
    %421 = vector.extract_strided_slice %412 {offsets = [0, 256], sizes = [8, 128], strides = [1, 1]} : vector<8x384xf32> to vector<8x128xf32>
    %422 = math.tanh %420 : vector<8x128xf32>
    %423 = arith.mulf %421, %422 : vector<8x128xf32>
    %c0_185 = arith.constant 0 : index
    %c0_186 = arith.constant 0 : index
    %424 = vector.load %arg11[%c0_185, %c0_186] : memref<8x128xf32, #tpu.memory_space<vmem>>, vector<8x128xf32>
    tpu.vector_store %arg11[%c0_185, %c0_186], %420 {strides = array<i32>} : memref<8x128xf32, #tpu.memory_space<vmem>>, vector<8x128xf32>,
    %425 = arith.truncf %423 : vector<8x128xf32> to vector<8x128xbf16>
    %c0_187 = arith.constant 0 : index
    %c128_188 = arith.constant 128 : index
    %426 = vector.load %arg9[%c0_187, %c128_188] : memref<8x256xbf16, #tpu.memory_space<vmem>>, vector<8x128xbf16>
    tpu.vector_store %arg9[%c0_187, %c128_188], %425 {strides = array<i32>} : memref<8x256xbf16, #tpu.memory_space<vmem>>, vector<8x128xbf16>,
    %427 = arith.truncf %423 : vector<8x128xf32> to vector<8x128xbf16>
    %c0_189 = arith.constant 0 : index
    %428 = arith.index_cast %397 : i32 to index
    %c0_190 = arith.constant 0 : index
    %429 = vector.load %arg7[%c0_189, %428, %c0_190] : memref<1x64x128xbf16, #tpu.memory_space<vmem>>, vector<1x8x128xbf16>
    %430 = vector.shape_cast %429 : vector<1x8x128xbf16> to vector<8x128xbf16>
    %431 = vector.shape_cast %427 : vector<8x128xbf16> to vector<1x8x128xbf16>
    tpu.vector_store %arg7[%c0_189, %428, %c0_190], %431 {strides = array<i32>} : memref<1x64x128xbf16, #tpu.memory_space<vmem>>, vector<1x8x128xbf16>,
    %432 = vector.extract_strided_slice %406 {offsets = [0, 0], sizes = [8, 384], strides = [1, 1]} : vector<8x512xf32> to vector<8x384xf32>
    %433 = arith.negf %432 : vector<8x384xf32>
    %434 = math.exp %433 : vector<8x384xf32>
    %cst_191 = arith.constant 1.000000e+00 : f32
    %435 = vector.broadcast %cst_191 : f32 to vector<8x384xf32>
    %436 = arith.addf %435, %434 : vector<8x384xf32>
    %437 = arith.divf %435, %436 : vector<8x384xf32>
    %438 = vector.extract_strided_slice %406 {offsets = [0, 384], sizes = [8, 128], strides = [1, 1]} : vector<8x512xf32> to vector<8x128xf32>
    %439 = math.tanh %438 : vector<8x128xf32>
    %440 = vector.extract_strided_slice %437 {offsets = [0, 128], sizes = [8, 128], strides = [1, 1]} : vector<8x384xf32> to vector<8x128xf32>
    %c0_192 = arith.constant 0 : index
    %c0_193 = arith.constant 0 : index
    %441 = vector.load %arg10[%c0_192, %c0_193] : memref<8x128xf32, #tpu.memory_space<vmem>>, vector<8x128xf32>
    %442 = arith.mulf %440, %441 : vector<8x128xf32>
    %443 = vector.extract_strided_slice %437 {offsets = [0, 0], sizes = [8, 128], strides = [1, 1]} : vector<8x384xf32> to vector<8x128xf32>
    %444 = arith.mulf %443, %439 : vector<8x128xf32>
    %445 = arith.addf %442, %444 : vector<8x128xf32>
    %446 = vector.extract_strided_slice %437 {offsets = [0, 256], sizes = [8, 128], strides = [1, 1]} : vector<8x384xf32> to vector<8x128xf32>
    %447 = math.tanh %445 : vector<8x128xf32>
    %448 = arith.mulf %446, %447 : vector<8x128xf32>
    %c0_194 = arith.constant 0 : index
    %c0_195 = arith.constant 0 : index
    %449 = vector.load %arg10[%c0_194, %c0_195] : memref<8x128xf32, #tpu.memory_space<vmem>>, vector<8x128xf32>
    tpu.vector_store %arg10[%c0_194, %c0_195], %445 {strides = array<i32>} : memref<8x128xf32, #tpu.memory_space<vmem>>, vector<8x128xf32>,
    %450 = arith.truncf %448 : vector<8x128xf32> to vector<8x128xbf16>
    %c0_196 = arith.constant 0 : index
    %c0_197 = arith.constant 0 : index
    %451 = vector.load %arg9[%c0_196, %c0_197] : memref<8x256xbf16, #tpu.memory_space<vmem>>, vector<8x128xbf16>
    tpu.vector_store %arg9[%c0_196, %c0_197], %450 {strides = array<i32>} : memref<8x256xbf16, #tpu.memory_space<vmem>>, vector<8x128xbf16>,
    %c7_i32_198 = arith.constant 7 : i32
    %c0_199 = arith.constant 0 : index
    %c0_200 = arith.constant 0 : index
    %452 = vector.load %arg9[%c0_199, %c0_200] : memref<8x256xbf16, #tpu.memory_space<vmem>>, vector<8x256xbf16>
    %c0_201 = arith.constant 0 : index
    %c512 = arith.constant 512 : index
    %453 = vector.load %arg4[%c0_201, %c512] : memref<256x1024xbf16, #tpu.memory_space<vmem>>, vector<256x512xbf16>
    %cst_202 = arith.constant dense<0.000000e+00> : vector<8x512xf32>
    %454 = tpu.matmul %452, %453, %cst_202 {dimension_numbers = #tpu.dot_dimension_numbers<[1], [0], [0], [1], [0, 0, 1, 1], [], []>} : vector<8x256xbf16>, vector<256x512xbf16>, vector<8x512xf32> -> vector<8x512xf32>
    %455 = arith.addf %454, %13 : vector<8x512xf32>
    %456 = vector.extract_strided_slice %455 {offsets = [0, 0], sizes = [8, 384], strides = [1, 1]} : vector<8x512xf32> to vector<8x384xf32>
    %457 = arith.negf %456 : vector<8x384xf32>
    %458 = math.exp %457 : vector<8x384xf32>
    %cst_203 = arith.constant 1.000000e+00 : f32
    %459 = vector.broadcast %cst_203 : f32 to vector<8x384xf32>
    %460 = arith.addf %459, %458 : vector<8x384xf32>
    %461 = arith.divf %459, %460 : vector<8x384xf32>
    %462 = vector.extract_strided_slice %455 {offsets = [0, 384], sizes = [8, 128], strides = [1, 1]} : vector<8x512xf32> to vector<8x128xf32>
    %463 = math.tanh %462 : vector<8x128xf32>
    %464 = vector.extract_strided_slice %461 {offsets = [0, 128], sizes = [8, 128], strides = [1, 1]} : vector<8x384xf32> to vector<8x128xf32>
    %c0_204 = arith.constant 0 : index
    %c0_205 = arith.constant 0 : index
    %465 = vector.load %arg11[%c0_204, %c0_205] : memref<8x128xf32, #tpu.memory_space<vmem>>, vector<8x128xf32>
    %466 = arith.mulf %464, %465 : vector<8x128xf32>
    %467 = vector.extract_strided_slice %461 {offsets = [0, 0], sizes = [8, 128], strides = [1, 1]} : vector<8x384xf32> to vector<8x128xf32>
    %468 = arith.mulf %467, %463 : vector<8x128xf32>
    %469 = arith.addf %466, %468 : vector<8x128xf32>
    %470 = vector.extract_strided_slice %461 {offsets = [0, 256], sizes = [8, 128], strides = [1, 1]} : vector<8x384xf32> to vector<8x128xf32>
    %471 = math.tanh %469 : vector<8x128xf32>
    %472 = arith.mulf %470, %471 : vector<8x128xf32>
    %c0_206 = arith.constant 0 : index
    %c0_207 = arith.constant 0 : index
    %473 = vector.load %arg11[%c0_206, %c0_207] : memref<8x128xf32, #tpu.memory_space<vmem>>, vector<8x128xf32>
    tpu.vector_store %arg11[%c0_206, %c0_207], %469 {strides = array<i32>} : memref<8x128xf32, #tpu.memory_space<vmem>>, vector<8x128xf32>,
    %474 = arith.truncf %472 : vector<8x128xf32> to vector<8x128xbf16>
    %c0_208 = arith.constant 0 : index
    %c128_209 = arith.constant 128 : index
    %475 = vector.load %arg9[%c0_208, %c128_209] : memref<8x256xbf16, #tpu.memory_space<vmem>>, vector<8x128xbf16>
    tpu.vector_store %arg9[%c0_208, %c128_209], %474 {strides = array<i32>} : memref<8x256xbf16, #tpu.memory_space<vmem>>, vector<8x128xbf16>,
    %476 = arith.truncf %472 : vector<8x128xf32> to vector<8x128xbf16>
    %c0_210 = arith.constant 0 : index
    %c56 = arith.constant 56 : index
    %c0_211 = arith.constant 0 : index
    %477 = vector.load %arg7[%c0_210, %c56, %c0_211] : memref<1x64x128xbf16, #tpu.memory_space<vmem>>, vector<1x8x128xbf16>
    %478 = vector.shape_cast %477 : vector<1x8x128xbf16> to vector<8x128xbf16>
    %479 = vector.shape_cast %476 : vector<8x128xbf16> to vector<1x8x128xbf16>
    tpu.vector_store %arg7[%c0_210, %c56, %c0_211], %479 {strides = array<i32>} : memref<1x64x128xbf16, #tpu.memory_space<vmem>>, vector<1x8x128xbf16>,
    return
  }
  func.func @transform_0(%arg0: i32, %arg1: i32) -> (i32, i32, i32) {
    %c0_i32 = arith.constant 0 : i32
    %c0_i32_0 = arith.constant 0 : i32
    return %arg0, %arg1, %c0_i32 : i32, i32, i32
  }
  func.func @transform_1(%arg0: i32, %arg1: i32) -> (i32, i32) {
    %c0_i32 = arith.constant 0 : i32
    %c0_i32_0 = arith.constant 0 : i32
    %c0_i32_1 = arith.constant 0 : i32
    return %c0_i32, %c0_i32_0 : i32, i32
  }
  func.func @transform_2(%arg0: i32, %arg1: i32) -> (i32, i32) {
    %c0_i32 = arith.constant 0 : i32
    %c0_i32_0 = arith.constant 0 : i32
    %c0_i32_1 = arith.constant 0 : i32
    return %c0_i32, %c0_i32_0 : i32, i32
  }
  func.func @transform_3(%arg0: i32, %arg1: i32) -> (i32, i32) {
    %c0_i32 = arith.constant 0 : i32
    %c0_i32_0 = arith.constant 0 : i32
    %c0_i32_1 = arith.constant 0 : i32
    return %c0_i32, %c0_i32_0 : i32, i32
  }
  func.func @transform_4(%arg0: i32, %arg1: i32) -> (i32, i32) {
    %c0_i32 = arith.constant 0 : i32
    %c0_i32_0 = arith.constant 0 : i32
    %c0_i32_1 = arith.constant 0 : i32
    return %c0_i32, %c0_i32_0 : i32, i32
  }
  func.func @transform_5(%arg0: i32, %arg1: i32) -> (i32, i32, i32) {
    %c0_i32 = arith.constant 0 : i32
    %c0_i32_0 = arith.constant 0 : i32
    return %arg0, %arg1, %c0_i32 : i32, i32, i32
  }
}

</mosaic_0001>

<bundles_post_ra>
// kernel: my_lstm_forward.3
= control target key start
LH: loop header
LB: loop body
LE: loop exit
PB: predicated region body
PF: predicated region fallthrough
CT: control target
= control target key end

     0   :  { %v219_v0 = vmov 0.0   ;;  %vm220_vm0 = vmmov 0   ;;  %s277_s1 = inlined_call_operand.vmem [shape: bf16[128,128], index: 1, kind: input, shape index: {}]   ;;  %s278_s0 = inlined_call_operand.vmem [shape: bf16[16,128], index: 0, kind: input, shape index: {}]   ;;  %s279_s2 = inlined_call_operand.vmem [shape: f32[1,128], index: 2, kind: input, shape index: {}]   ;;  %s280_s3 = inlined_call_operand.vmem [shape: f32[16,128], index: 3, kind: output, shape index: {}]  }
   0x1   :  { %180 = vmatprep.subr.bf16.mxu0 %v219_v0  ;;  %v202_v1 = vld [vmem:[%s277_s1] sm:$0xff]   ;;  %196 = vmatprep.mubr.msk.bf16.mxu0 %vm220_vm0, %v219_v0  ;;  %v203_v2 = vld [vmem:[%s277_s1 + $0x8] sm:$0xff]   ;;  %v204_v3 = vld [vmem:[%s277_s1 + $0x10] sm:$0xff]  }
   0x2   :  { %181 = vmatpush3.bf16.msra.mxu0 %v202_v1  ;;  %v205_v4 = vld [vmem:[%s277_s1 + $0x18] sm:$0xff]   ;;  %v206_v5 = vld [vmem:[%s277_s1 + $0x20] sm:$0xff]   ;;  %v207_v6 = vld [vmem:[%s277_s1 + $0x28] sm:$0xff]  }
   0x3   :  { %182 = vmatprep.subr.bf16.mxu0 %v219_v0  ;;  %v208_v7 = vld [vmem:[%s277_s1 + $0x30] sm:$0xff]   ;;  %v209_v8 = vld [vmem:[%s277_s1 + $0x38] sm:$0xff]   ;;  %v210_v9 = vld [vmem:[%s278_s0] sm:$0xff]  }
   0x4   :  { %v161_v10 = vld [vmem:[%s279_s2] ss:$0 sm:$0xff] }
   0x6   :  { %183 = vmatpush3.bf16.msra.mxu0 %v203_v2 }
   0x7   :  { %184 = vmatprep.subr.bf16.mxu0 %v219_v0 }
   0xa   :  { %185 = vmatpush3.bf16.msra.mxu0 %v204_v3 }
   0xb   :  { %186 = vmatprep.subr.bf16.mxu0 %v219_v0 }
   0xe   :  { %187 = vmatpush3.bf16.msra.mxu0 %v205_v4 }
   0xf   :  { %188 = vmatprep.subr.bf16.mxu0 %v219_v0 }
  0x12   :  { %189 = vmatpush3.bf16.msra.mxu0 %v206_v5 }
  0x13   :  { %190 = vmatprep.subr.bf16.mxu0 %v219_v0 }
  0x16   :  { %191 = vmatpush3.bf16.msra.mxu0 %v207_v6 }
  0x17   :  { %192 = vmatprep.subr.bf16.mxu0 %v219_v0 }
  0x1a   :  { %193 = vmatpush3.bf16.msra.mxu0 %v208_v7 }
  0x1b   :  { %194 = vmatprep.subr.bf16.mxu0 %v219_v0 }
  0x1e   :  { %195 = vmatpush3.bf16.msra.mxu0 %v209_v8 }
  0x21   :  { %197 = vmatmul.mubr.bf16.vlgmr.msra.gmra.mrb[0].mxu0 %v210_v9 }
  0xf4   :  { %v128_v11 = vpop.f32.mrb[0].mxu0 }
  0xf5   :  { %v129_v12 = vadd.f32 %v161_v10, %v128_v11  ;;  %v198_v13 = vpop.f32.mrb[1].mxu0 }
  0xf6   :  { %v131_v14 = vpop.f32.mrb[2].mxu0 }
  0xf7   :  { %135 = vmax.xlane.f32.xlu0 %v129_v12  ;;  %v199_v15 = vpop.f32.mrb[3].mxu0  ;;  %v132_v16 = vadd.f32 %v161_v10, %v131_v14 }
  0xfb   :  { %137 = vmax.xlane.f32.xlu0 %v132_v16 }
 0x184   :  { %v136_v17 = vpop.xlane.xlu0 %135 }
 0x185   :  { %v139_v18 = vsub.f32 %v129_v12, %v136_v17 }
 0x187   :  { %v141_v19 = vmul.f32 1.442695, %v139_v18 }
 0x188   :  { %v138_v20 = vpop.xlane.xlu0 %137 }
 0x189   :  { %v140_v21 = vsub.f32 %v132_v16, %v138_v20  ;;  %211 = vpow2.f32 %v141_v19 }
 0x18b   :  { %v143_v22 = vmul.f32 1.442695, %v140_v21 }
 0x18d   :  { %213 = vpow2.f32 %v143_v22 }
 0x193   :  { %v212_v23 = vpop.eup %211 }
 0x194   :  { %145 = vadd.xlane.f32.xlu1 %v212_v23 }
 0x197   :  { %v214_v24 = vpop.eup %213 }
 0x198   :  { %147 = vadd.xlane.f32.xlu1 %v214_v24 }
 0x221   :  { %v146_v25 = vpop.xlane.xlu1 %145 }
 0x222   :  { %215 = vlog2.f32 %v146_v25 }
 0x225   :  { %v148_v26 = vpop.xlane.xlu1 %147 }
 0x226   :  { %217 = vlog2.f32 %v148_v26 }
 0x22c   :  { %v216_v27 = vpop.eup %215 }
 0x22d   :  { %v150_v28 = vmul.f32 0.6931472, %v216_v27 }
 0x22f   :  { %v153_v29 = vsub.f32 %v139_v18, %v150_v28 }
 0x230   :  { %v218_v30 = vpop.eup %217 }
 0x231   :  { %155 = vst [vmem:[%s280_s3] sm:$0xff] %v153_v29  ;;  %v152_v31 = vmul.f32 0.6931472, %v218_v30 }
 0x233   :  { %v154_v32 = vsub.f32 %v140_v21, %v152_v31 }
 0x235   :  { %156 = vst [vmem:[%s280_s3 + $0x8] sm:$0xff] %v154_v32 }

// kernel: my_lstm_forward.2
= control target key start
LH: loop header
LB: loop body
LE: loop exit
PB: predicated region body
PF: predicated region fallthrough
CT: control target
= control target key end

     0   :  { %10 = vsyncpa [#allocation7], 0  ;;  %s12156_s0 = inlined_call_operand.vmem [shape: bf16[1,64,128], index: 0, kind: input, shape index: {}]   ;;  %s12157_s1 = inlined_call_operand.hbm [shape: bf16[128,512], index: 1, kind: input, shape index: {}]   ;;  %s12158_s2 = inlined_call_operand.hbm [shape: bf16[256,1024], index: 2, kind: input, shape index: {}]   ;;  %s12159_s3 = inlined_call_operand.vmem [shape: f32[1,512], index: 3, kind: input, shape index: {}]   ;;  %s12160_s4 = inlined_call_operand.vmem [shape: f32[1,512], index: 4, kind: input, shape index: {}]   ;;  %s12161_s5 = inlined_call_operand.vmem [shape: bf16[1,64,128], index: 5, kind: output, shape index: {}]  }
   0x1   :  { %11 = vsyncpa [#allocation9], 0  ;;  %s9896_s18 = smov [#allocation6]   ;;  %s9848_s22 = scalar_lea.hbm %s12157_s1, 4096 }
   0x2   :  { %s19_s19 = sshll.u32 %s9896_s18, 4  ;;  %p9849_p0 = scmp.ne.s32.totalorder %s12157_s1, %s9848_s22  ;;  %s20_s19 = int_to_ptr.vmem [resolvable:$true] %s19_s19 }
   0x3   :  { %p9852_p1 = scmp.lt.u32.totalorder %s9848_s22, %s12157_s1 }
   0x5   :  { %p9854_p2 = pnand %p9852_p1, %p9849_p0 }
   0x7   :  { %9857 = shalt.err (!%p9854_p2)
}
   0x8   :  { %s9858_s27 = scalar_lea.vmem %s20_s19, 4096  ;;  %p9863_p4 = scmp.lt.s32.totalorder %s20_s19, %s20_s19 }
   0x9   :  { %p9859_p3 = scmp.ne.s32.totalorder %s20_s19, %s9858_s27  ;;  %p9864_p5 = scmp.lt.s32.totalorder %s9858_s27, %s9858_s27 }
   0xb   :  { %p9865_p6 = por %p9864_p5, %p9863_p4 }
   0xd   :  { %p9866_p7 = pnand %p9865_p6, %p9859_p3 }
   0xf   :  { %9869 = shalt.err (!%p9866_p7)
}
  0x10   :  { %s9897_s28 = smov 256   ;;  %s9898_s29 = smov 16  }
  0x11   :  { %25 = dma.hbm_to_vmem [thread:$0]  %s12157_s1, 4096, %s20_s19, [#allocation7], %s9897_s28, %s9897_s28, %s9898_s29  }
  0x12   :  { %s9899_s7 = smov [#allocation8]   ;;  %s9870_s11 = scalar_lea.hbm %s12158_s2, 16384 }
  0x13   :  { %s31_s8 = sshll.u32 %s9899_s7, 4  ;;  %p9871_p8 = scmp.ne.s32.totalorder %s12158_s2, %s9870_s11  ;;  %s32_s8 = int_to_ptr.vmem [resolvable:$true] %s31_s8 }
  0x14   :  { %p9874_p9 = scmp.lt.u32.totalorder %s9870_s11, %s12158_s2 }
  0x16   :  { %p9876_p10 = pnand %p9874_p9, %p9871_p8 }
  0x18   :  { %9879 = shalt.err (!%p9876_p10)
}
  0x19   :  { %s9880_s16 = scalar_lea.vmem %s32_s8, 16384  ;;  %p9885_p12 = scmp.lt.s32.totalorder %s32_s8, %s32_s8 }
  0x1a   :  { %p9881_p11 = scmp.ne.s32.totalorder %s32_s8, %s9880_s16  ;;  %p9886_p13 = scmp.lt.s32.totalorder %s9880_s16, %s9880_s16 }
  0x1c   :  { %p9887_p0 = por %p9886_p13, %p9885_p12 }
  0x1e   :  { %p9888_p1 = pnand %p9887_p0, %p9881_p11 }
  0x20   :  { %9891 = shalt.err (!%p9888_p1)
}
  0x21   :  { %s9900_s1 = smov 512   ;;  %s9901_s17 = smov 32  }
  0x22   :  { %37 = dma.hbm_to_vmem [thread:$0]  %s12158_s2, 16384, %s32_s8, [#allocation9], %s9900_s1, %s9900_s1, %s9901_s17  }
  0x23   :  { %9892 = dma.done.wait [#allocation7], 4096  }
  0x24   :  { %9893 = vsyncadd [#allocation7], 4294963200 }
  0x25   :  { %9894 = dma.done.wait [#allocation9], 16384  }
  0x26   :  { %9895 = vsyncadd [#allocation9], 4294950912  ;;  %v9902_v0 = vmov 0   ;;  %v9524_v1 = vld [vmem:[#allocation6 + $0x4] ss:$16 sps:$4 sm:$0xff]   ;;  %v508_v33 = vld [vmem:[#allocation8 + $0x8] sm:$0xff] }
  0x27   :  { %334 = vmatprep.mubr.bf16.mxu0 %v9902_v0  ;;  %53 = vst [vmem:[#allocation3] sm:$0xff] %v9902_v0  ;;  %407 = vmatprep.mubr.bf16.mxu1 %v9902_v0  ;;  %v9526_v2 = vld [vmem:[#allocation6 + $0xc] ss:$16 sps:$4 sm:$0xff]   ;;  %v9528_v3 = vld [vmem:[#allocation6] ss:$16 sps:$4 sm:$0xff]  }
  0x28   :  { %302 = vmatprep.subr.bf16.mxu0 %v9524_v1  ;;  %v9529_v4 = vld [vmem:[#allocation6 + $0x8] ss:$16 sps:$4 sm:$0xff]   ;;  %375 = vmatprep.subr.bf16.mxu1 %v9526_v2  ;;  %v9530_v5 = vld [vmem:[#allocation6 + $0x24] ss:$16 sps:$4 sm:$0xff]   ;;  %v9532_v6 = vld [vmem:[#allocation6 + $0x2c] ss:$16 sps:$4 sm:$0xff]  }
  0x29   :  { %303 = vmatpush1.bf16.msra.mxu0 %v9528_v3  ;;  %376 = vmatpush1.bf16.msra.mxu1 %v9529_v4  ;;  %v9534_v7 = vld [vmem:[#allocation6 + $0x20] ss:$16 sps:$4 sm:$0xff]   ;;  %v9535_v8 = vld [vmem:[#allocation6 + $0x28] ss:$16 sps:$4 sm:$0xff]   ;;  %v9536_v9 = vld [vmem:[#allocation6 + $0x44] ss:$16 sps:$4 sm:$0xff]  }
  0x2a   :  { %304 = vmatprep.subr.bf16.mxu0 %v9530_v5  ;;  %377 = vmatprep.subr.bf16.mxu1 %v9532_v6  ;;  %v9538_v10 = vld [vmem:[#allocation6 + $0x4c] ss:$16 sps:$4 sm:$0xff]   ;;  %v9540_v11 = vld [vmem:[#allocation6 + $0x40] ss:$16 sps:$4 sm:$0xff]   ;;  %v9541_v12 = vld [vmem:[#allocation6 + $0x48] ss:$16 sps:$4 sm:$0xff]  }
  0x2b   :  { %v9542_v13 = vld [vmem:[#allocation6 + $0x64] ss:$16 sps:$4 sm:$0xff]   ;;  %v9544_v14 = vld [vmem:[#allocation6 + $0x6c] ss:$16 sps:$4 sm:$0xff]   ;;  %v9546_v15 = vld [vmem:[#allocation6 + $0x60] ss:$16 sps:$4 sm:$0xff]  }
  0x2c   :  { %v9547_v16 = vld [vmem:[#allocation6 + $0x68] ss:$16 sps:$4 sm:$0xff]   ;;  %v9548_v17 = vld [vmem:[#allocation6 + $0x84] ss:$16 sps:$4 sm:$0xff]   ;;  %v9550_v18 = vld [vmem:[#allocation6 + $0x8c] ss:$16 sps:$4 sm:$0xff]  }
  0x2d   :  { %305 = vmatpush1.bf16.msra.mxu0 %v9534_v7  ;;  %378 = vmatpush1.bf16.msra.mxu1 %v9535_v8  ;;  %v9552_v19 = vld [vmem:[#allocation6 + $0x80] ss:$16 sps:$4 sm:$0xff]   ;;  %v9553_v20 = vld [vmem:[#allocation6 + $0x88] ss:$16 sps:$4 sm:$0xff]   ;;  %v9554_v21 = vld [vmem:[#allocation6 + $0xa4] ss:$16 sps:$4 sm:$0xff]  }
  0x2e   :  { %306 = vmatprep.subr.bf16.mxu0 %v9536_v9  ;;  %379 = vmatprep.subr.bf16.mxu1 %v9538_v10  ;;  %v9556_v22 = vld [vmem:[#allocation6 + $0xac] ss:$16 sps:$4 sm:$0xff]   ;;  %v9558_v23 = vld [vmem:[#allocation6 + $0xa0] ss:$16 sps:$4 sm:$0xff]   ;;  %v9559_v24 = vld [vmem:[#allocation6 + $0xa8] ss:$16 sps:$4 sm:$0xff]  }
  0x2f   :  { %v9560_v25 = vld [vmem:[#allocation6 + $0xc4] ss:$16 sps:$4 sm:$0xff]   ;;  %v9562_v26 = vld [vmem:[#allocation6 + $0xcc] ss:$16 sps:$4 sm:$0xff]   ;;  %v9564_v27 = vld [vmem:[#allocation6 + $0xc0] ss:$16 sps:$4 sm:$0xff]  }
  0x30   :  { %v9565_v28 = vld [vmem:[#allocation6 + $0xc8] ss:$16 sps:$4 sm:$0xff]   ;;  %v9566_v29 = vld [vmem:[#allocation6 + $0xe4] ss:$16 sps:$4 sm:$0xff]   ;;  %v9568_v30 = vld [vmem:[#allocation6 + $0xec] ss:$16 sps:$4 sm:$0xff]  }
  0x31   :  { %307 = vmatpush1.bf16.msra.mxu0 %v9540_v11  ;;  %380 = vmatpush1.bf16.msra.mxu1 %v9541_v12  ;;  %v507_v31 = vld [vmem:[#allocation8] sm:$0xff]  ;;  %v510_v34 = vld [vmem:[#allocation8 + $0x28] sm:$0xff]  ;;  %v9572_v43 = vld [vmem:[%s12156_s0] sm:$0xff]  }
  0x32   :  { %308 = vmatprep.subr.bf16.mxu0 %v9542_v13  ;;  %381 = vmatprep.subr.bf16.mxu1 %v9544_v14  ;;  %v509_v32 = vld [vmem:[#allocation8 + $0x20] sm:$0xff]  ;;  %v9571_v36 = vld [vmem:[#allocation6 + $0xe8] ss:$16 sps:$4 sm:$0xff]   ;;  %v9962_v38 = vcombine.high %v508_v33, %v510_v34  ;;  %v9969_v45 = vcombine.low %v508_v33, %v510_v34 }
  0x33   :  { %v9570_v35 = vld [vmem:[#allocation6 + $0xe0] ss:$16 sps:$4 sm:$0xff]   ;;  %v9960_v37 = vcombine.high %v507_v31, %v509_v32  ;;  %v512_v41 = vld [vmem:[#allocation8 + $0x48] sm:$0xff]  ;;  %v9967_v44 = vcombine.low %v507_v31, %v509_v32 }
  0x34   :  { %v511_v39 = vld [vmem:[#allocation8 + $0x40] sm:$0xff]  ;;  %v514_v42 = vld [vmem:[#allocation8 + $0x68] sm:$0xff]  ;;  %v9575_v31 = vld [vmem:[%s12156_s0 + $0x18] sm:$0xff]  }
  0x35   :  { %309 = vmatpush1.bf16.msra.mxu0 %v9546_v15  ;;  %382 = vmatpush1.bf16.msra.mxu1 %v9547_v16  ;;  %v513_v40 = vld [vmem:[#allocation8 + $0x60] sm:$0xff]  ;;  %v9975_v47 = vcombine.high %v512_v41, %v514_v42  ;;  %v516_v50 = vld [vmem:[#allocation8 + $0x88] sm:$0xff]  ;;  %v9981_v53 = vcombine.low %v512_v41, %v514_v42 }
  0x36   :  { %310 = vmatprep.subr.bf16.mxu0 %v9548_v17  ;;  %383 = vmatprep.subr.bf16.mxu1 %v9550_v18  ;;  %v9973_v46 = vcombine.high %v511_v39, %v513_v40  ;;  %v515_v48 = vld [vmem:[#allocation8 + $0x80] sm:$0xff]  ;;  %v518_v51 = vld [vmem:[#allocation8 + $0xa8] sm:$0xff]  ;;  %v9979_v52 = vcombine.low %v511_v39, %v513_v40  ;;  %v506_v40 = vld [vmem:[#allocation3] sm:$0xf] }
  0x37   :  { %v517_v49 = vld [vmem:[#allocation8 + $0xa0] sm:$0xff]  ;;  %v9987_v55 = vcombine.high %v516_v50, %v518_v51  ;;  %v520_v58 = vld [vmem:[#allocation8 + $0xc8] sm:$0xff]  ;;  %v9998_v62 = vcombine.low %v516_v50, %v518_v51 }
  0x38   :  { %v9985_v54 = vcombine.high %v515_v48, %v517_v49  ;;  %v519_v56 = vld [vmem:[#allocation8 + $0xc0] sm:$0xff]  ;;  %v522_v59 = vld [vmem:[#allocation8 + $0xe8] sm:$0xff]  ;;  %v9996_v61 = vcombine.low %v515_v48, %v517_v49 }
  0x39   :  { %311 = vmatpush1.bf16.msra.mxu0 %v9552_v19  ;;  %384 = vmatpush1.bf16.msra.mxu1 %v9553_v20  ;;  %v521_v57 = vld [vmem:[#allocation8 + $0xe0] sm:$0xff]  ;;  %v10004_v1 = vcombine.high %v520_v58, %v522_v59  ;;  %v524_v4 = vld [vmem:[#allocation8 + $0x108] sm:$0xff]  ;;  %v10010_v7 = vcombine.low %v520_v58, %v522_v59 }
  0x3a   :  { %312 = vmatprep.subr.bf16.mxu0 %v9554_v21  ;;  %385 = vmatprep.subr.bf16.mxu1 %v9556_v22  ;;  %v9573_v60 = vld [vmem:[%s12156_s0 + $0x8] sm:$0xff]   ;;  %v10002_v63 = vcombine.high %v519_v56, %v521_v57  ;;  %v526_v5 = vld [vmem:[#allocation8 + $0x128] sm:$0xff]  ;;  %v10008_v6 = vcombine.low %v519_v56, %v521_v57 }
  0x3b   :  { %v523_v2 = vld [vmem:[#allocation8 + $0x100] sm:$0xff]  ;;  %v10016_v9 = vcombine.high %v524_v4, %v526_v5  ;;  %v528_v12 = vld [vmem:[#allocation8 + $0x148] sm:$0xff]  ;;  %v10027_v16 = vcombine.low %v524_v4, %v526_v5 }
  0x3c   :  { %v525_v3 = vld [vmem:[#allocation8 + $0x120] sm:$0xff]  ;;  %v530_v13 = vld [vmem:[#allocation8 + $0x168] sm:$0xff] }
  0x3d   :  { %313 = vmatpush1.bf16.msra.mxu0 %v9558_v23  ;;  %386 = vmatpush1.bf16.msra.mxu1 %v9559_v24  ;;  %v10014_v8 = vcombine.high %v523_v2, %v525_v3  ;;  %v527_v10 = vld [vmem:[#allocation8 + $0x140] sm:$0xff]  ;;  %v9574_v14 = vld [vmem:[%s12156_s0 + $0x10] sm:$0xff]   ;;  %v10025_v15 = vcombine.low %v523_v2, %v525_v3  ;;  %v10033_v18 = vcombine.high %v528_v12, %v530_v13 }
  0x3e   :  { %314 = vmatprep.subr.bf16.mxu0 %v9560_v25  ;;  %387 = vmatprep.subr.bf16.mxu1 %v9562_v26  ;;  %v529_v11 = vld [vmem:[#allocation8 + $0x160] sm:$0xff]  ;;  %v532_v21 = vld [vmem:[#allocation8 + $0x188] sm:$0xff]  ;;  %v8477_v24 = vcombine.low %v528_v12, %v530_v13 }
  0x3f   :  { %v10031_v17 = vcombine.high %v527_v10, %v529_v11  ;;  %v531_v19 = vld [vmem:[#allocation8 + $0x180] sm:$0xff]  ;;  %v534_v22 = vld [vmem:[#allocation8 + $0x1a8] sm:$0xff]  ;;  %v8475_v23 = vcombine.low %v527_v10, %v529_v11 }
  0x40   :  { %v533_v20 = vld [vmem:[#allocation8 + $0x1a0] sm:$0xff]  ;;  %v8482_v26 = vcombine.high %v532_v21, %v534_v22  ;;  %v8481_v33 = vcombine.low %v532_v21, %v534_v22  ;;  %v883_v42 = vld [vmem:[#allocation8 + $0x228] sm:$0xff] }
  0x41   :  { %315 = vmatpush1.bf16.msra.mxu0 %v9564_v27  ;;  %388 = vmatpush1.bf16.msra.mxu1 %v9565_v28  ;;  %v8480_v25 = vcombine.high %v531_v19, %v533_v20  ;;  %v535_v27 = vld [vmem:[#allocation8 + $0x1c0] sm:$0xff]  ;;  %v8479_v32 = vcombine.low %v531_v19, %v533_v20  ;;  %v887_v48 = vld [vmem:[#allocation8 + $0x248] sm:$0xff] }
  0x42   :  { %316 = vmatprep.subr.bf16.mxu0 %v9566_v29  ;;  %389 = vmatprep.subr.bf16.mxu1 %v9568_v30  ;;  %v537_v28 = vld [vmem:[#allocation8 + $0x1e0] sm:$0xff]  ;;  %v536_v29 = vld [vmem:[#allocation8 + $0x1c8] sm:$0xff] }
  0x43   :  { %v538_v30 = vld [vmem:[#allocation8 + $0x1e8] sm:$0xff]  ;;  %v8484_v34 = vcombine.high %v535_v27, %v537_v28 }
  0x44   :  { %v8485_v39 = vcombine.low %v536_v29, %v538_v30  ;;  %v891_v50 = vld [vmem:[#allocation8 + $0x268] sm:$0xff] }
  0x45   :  { %317 = vmatpush1.bf16.msra.mxu0 %v9570_v35  ;;  %390 = vmatpush1.bf16.msra.mxu1 %v9571_v36  ;;  %v8486_v35 = vcombine.high %v536_v29, %v538_v30  ;;  %v8483_v36 = vcombine.low %v535_v27, %v537_v28  ;;  %v895_v56 = vld [vmem:[#allocation8 + $0x288] sm:$0xff] }
  0x46   :  { %699 = vmatprep.subr.bf16.mxu0 %v9960_v37  ;;  %740 = vmatprep.subr.bf16.mxu1 %v9962_v38  ;;  %v899_v58 = vld [vmem:[#allocation8 + $0x2a8] sm:$0xff] }
  0x47   :  { %v907_v3 = vld [vmem:[#allocation8 + $0x2e8] sm:$0xff] }
  0x48   :  { %335 = vmatmul.mubr.bf16.vlgmr.msra.gmra.mrb[0].mxu0 %v9572_v43  ;;  %408 = vmatmul.mubr.bf16.vlgmr.msra.gmra.mrb[0].mxu1 %v9572_v43  ;;  %v915_v11 = vld [vmem:[#allocation8 + $0x328] sm:$0xff] }
  0x49   :  { %700 = vmatpush1.bf16.msra.mxu0 %v9967_v44  ;;  %741 = vmatpush1.bf16.msra.mxu1 %v9969_v45  ;;  %v923_v19 = vld [vmem:[#allocation8 + $0x368] sm:$0xff] }
  0x4a   :  { %701 = vmatprep.subr.bf16.mxu0 %v9973_v46  ;;  %742 = vmatprep.subr.bf16.mxu1 %v9975_v47  ;;  %v931_v27 = vld [vmem:[#allocation8 + $0x3a8] sm:$0xff] }
  0x4b   :  { %344 = vmatprep.mubr.bf16.mxu0 %v9902_v0  ;;  %417 = vmatprep.mubr.bf16.mxu1 %v9902_v0 }
  0x4d   :  { %702 = vmatpush1.bf16.msra.mxu0 %v9979_v52  ;;  %743 = vmatpush1.bf16.msra.mxu1 %v9981_v53 }
  0x4e   :  { %703 = vmatprep.subr.bf16.mxu0 %v9985_v54  ;;  %744 = vmatprep.subr.bf16.mxu1 %v9987_v55 }
  0x50   :  { %345 = vmatmul.mubr.bf16.gmra.mrb[4].mxu0 %v9573_v60  ;;  %418 = vmatmul.mubr.bf16.gmra.mrb[4].mxu1 %v9573_v60  ;;  %v10096_v60 = vcombine.low %v895_v56, %v899_v58 }
  0x51   :  { %704 = vmatpush1.bf16.msra.mxu0 %v9996_v61  ;;  %745 = vmatpush1.bf16.msra.mxu1 %v9998_v62 }
  0x52   :  { %705 = vmatprep.subr.bf16.mxu0 %v10002_v63  ;;  %746 = vmatprep.subr.bf16.mxu1 %v10004_v1 }
  0x53   :  { %354 = vmatprep.mubr.bf16.mxu0 %v9902_v0  ;;  %427 = vmatprep.mubr.bf16.mxu1 %v9902_v0 }
  0x55   :  { %706 = vmatpush1.bf16.msra.mxu0 %v10008_v6  ;;  %747 = vmatpush1.bf16.msra.mxu1 %v10010_v7 }
  0x56   :  { %707 = vmatprep.subr.bf16.mxu0 %v10014_v8  ;;  %748 = vmatprep.subr.bf16.mxu1 %v10016_v9 }
  0x58   :  { %355 = vmatmul.mubr.bf16.gmra.mrb[8].mxu0 %v9574_v14  ;;  %428 = vmatmul.mubr.bf16.gmra.mrb[8].mxu1 %v9574_v14 }
  0x59   :  { %708 = vmatpush1.bf16.msra.mxu0 %v10025_v15  ;;  %749 = vmatpush1.bf16.msra.mxu1 %v10027_v16 }
  0x5a   :  { %709 = vmatprep.subr.bf16.mxu0 %v10031_v17  ;;  %750 = vmatprep.subr.bf16.mxu1 %v10033_v18 }
  0x5b   :  { %364 = vmatprep.mubr.bf16.mxu0 %v9902_v0  ;;  %437 = vmatprep.mubr.bf16.mxu1 %v9902_v0 }
  0x5d   :  { %710 = vmatpush1.bf16.msra.mxu0 %v8475_v23  ;;  %751 = vmatpush1.bf16.msra.mxu1 %v8477_v24 }
  0x5e   :  { %711 = vmatprep.subr.bf16.mxu0 %v8480_v25  ;;  %752 = vmatprep.subr.bf16.mxu1 %v8482_v26 }
  0x60   :  { %365 = vmatmul.mubr.bf16.gmra.mrb[12].mxu0 %v9575_v31  ;;  %438 = vmatmul.mubr.bf16.gmra.mrb[12].mxu1 %v9575_v31  ;;  %v934_v31 = vld [vmem:[#allocation8 + $0x3c0] sm:$0xff] }
  0x61   :  { %712 = vmatpush1.bf16.msra.mxu0 %v8479_v32  ;;  %753 = vmatpush1.bf16.msra.mxu1 %v8481_v33 }
  0x62   :  { %713 = vmatprep.subr.bf16.mxu0 %v8484_v34  ;;  %754 = vmatprep.subr.bf16.mxu1 %v8486_v35 }
  0x63   :  { %731 = vmatprep.mubr.bf16.mxu0 %v9902_v0  ;;  %772 = vmatprep.mubr.bf16.mxu1 %v9902_v0  ;;  %v878_v0 = vld [vmem:[#allocation8 + $0x200] sm:$0xff] }
  0x65   :  { %714 = vmatpush1.bf16.msra.mxu0 %v8483_v36  ;;  %755 = vmatpush1.bf16.msra.mxu1 %v8485_v39 }
  0x66   :  { %1589 = vmatprep.subr.bf16.mxu0 %v9960_v37  ;;  %1630 = vmatprep.subr.bf16.mxu1 %v9962_v38  ;;  %v882_v37 = vld [vmem:[#allocation8 + $0x220] sm:$0xff]  ;;  %v879_v38 = vld [vmem:[#allocation8 + $0x208] sm:$0xff] }
  0x67   :  { %v10068_v41 = vcombine.high %v878_v0, %v882_v37  ;;  %v10070_v43 = vcombine.low %v878_v0, %v882_v37  ;;  %v816_v0 = vld [vmem:[#allocation8 + $0x10] sm:$0xff] }
  0x68   :  { %732 = vmatmul.mubr.bf16.vlgmr.msra.gmra.mrb[16].mxu0 %v506_v40  ;;  %773 = vmatmul.mubr.bf16.vlgmr.msra.gmra.mrb[16].mxu1 %v506_v40  ;;  %v820_v37 = vld [vmem:[#allocation8 + $0x30] sm:$0xff] }
  0x69   :  { %1590 = vmatpush1.bf16.msra.mxu0 %v9967_v44  ;;  %1631 = vmatpush1.bf16.msra.mxu1 %v9969_v45  ;;  %v10072_v44 = vcombine.low %v879_v38, %v883_v42  ;;  %v10074_v45 = vcombine.high %v879_v38, %v883_v42  ;;  %v817_v38 = vld [vmem:[#allocation8 + $0x18] sm:$0xff]  ;;  %v10164_v42 = vcombine.high %v816_v0, %v820_v37 }
  0x6a   :  { %1591 = vmatprep.subr.bf16.mxu0 %v9973_v46  ;;  %1632 = vmatprep.subr.bf16.mxu1 %v9975_v47  ;;  %v886_v46 = vld [vmem:[#allocation8 + $0x240] sm:$0xff] }
  0x6b   :  { %v890_v47 = vld [vmem:[#allocation8 + $0x260] sm:$0xff] }
  0x6c   :  { %v10080_v49 = vcombine.high %v886_v46, %v890_v47  ;;  %v10082_v51 = vcombine.low %v886_v46, %v890_v47  ;;  %v821_v46 = vld [vmem:[#allocation8 + $0x38] sm:$0xff]  ;;  %v10166_v47 = vcombine.low %v816_v0, %v820_v37 }
  0x6d   :  { %1592 = vmatpush1.bf16.msra.mxu0 %v9979_v52  ;;  %1633 = vmatpush1.bf16.msra.mxu1 %v9981_v53  ;;  %v10084_v52 = vcombine.low %v887_v48, %v891_v50  ;;  %v10086_v53 = vcombine.high %v887_v48, %v891_v50  ;;  %v10168_v48 = vcombine.low %v817_v38, %v821_v46 }
  0x6e   :  { %1593 = vmatprep.subr.bf16.mxu0 %v9985_v54  ;;  %1634 = vmatprep.subr.bf16.mxu1 %v9987_v55  ;;  %v894_v54 = vld [vmem:[#allocation8 + $0x280] sm:$0xff]  ;;  %v10170_v50 = vcombine.high %v817_v38, %v821_v46 }
  0x6f   :  { %v898_v55 = vld [vmem:[#allocation8 + $0x2a0] sm:$0xff] }
  0x70   :  { %v10092_v57 = vcombine.high %v894_v54, %v898_v55  ;;  %v10094_v59 = vcombine.low %v894_v54, %v898_v55  ;;  %v98_v54 = vlaneseq }
  0x71   :  { %1594 = vmatpush1.bf16.msra.mxu0 %v9996_v61  ;;  %1635 = vmatpush1.bf16.msra.mxu1 %v9998_v62  ;;  %v10098_v61 = vcombine.high %v895_v56, %v899_v58  ;;  %v902_v62 = vld [vmem:[#allocation8 + $0x2c0] sm:$0xff] }
  0x72   :  { %1595 = vmatprep.subr.bf16.mxu0 %v10002_v63  ;;  %1636 = vmatprep.subr.bf16.mxu1 %v10004_v1  ;;  %v906_v63 = vld [vmem:[#allocation8 + $0x2e0] sm:$0xff]  ;;  %v903_v1 = vld [vmem:[#allocation8 + $0x2c8] sm:$0xff]  ;;  %v10174_v55 = vshrl.u32 %v98_v54, 7 }
  0x73   :  { %v10104_v2 = vcombine.high %v902_v62, %v906_v63  ;;  %v10106_v4 = vcombine.low %v902_v62, %v906_v63  ;;  %v10108_v5 = vcombine.low %v903_v1, %v907_v3  ;;  %v96_v63 = vld [vmem:[%s12159_s3] sm:$0xf] }
  0x74   :  { %12410 = vst [vmem:[#allocation12_spill] sm:$0xff] %v10174_v55  ;;  %v12163_v56 = vsub.s32 2, %v10174_v55  ;;  %v12162_v58 = vsub.s32 3, %v10174_v55  ;;  %v12165_v62 = vsub.s32 0, %v10174_v55 }
  0x75   :  { %1596 = vmatpush1.bf16.msra.mxu0 %v10008_v6  ;;  %1637 = vmatpush1.bf16.msra.mxu1 %v10010_v7  ;;  %v10110_v6 = vcombine.high %v903_v1, %v907_v3  ;;  %v910_v7 = vld [vmem:[#allocation8 + $0x300] sm:$0xff]  ;;  %v12164_v1 = vsub.s32 1, %v10174_v55 }
  0x76   :  { %1597 = vmatprep.subr.bf16.mxu0 %v10014_v8  ;;  %1638 = vmatprep.subr.bf16.mxu1 %v10016_v9  ;;  %v914_v8 = vld [vmem:[#allocation8 + $0x320] sm:$0xff]  ;;  %v911_v9 = vld [vmem:[#allocation8 + $0x308] sm:$0xff]  ;;  %v10185_v3 = vrot.slane %v96_v63, %v12163_v56 }
  0x77   :  { %v10116_v10 = vcombine.high %v910_v7, %v914_v8  ;;  %v10118_v12 = vcombine.low %v910_v7, %v914_v8  ;;  %v10120_v13 = vcombine.low %v911_v9, %v915_v11  ;;  %v10122_v14 = vcombine.high %v911_v9, %v915_v11 }
  0x78   :  { %v10193_v9 = vrot.slane %v96_v63, %v12162_v58  ;;  %v101_v11 = vrot.slane %v96_v63, %v12165_v62 }
  0x79   :  { %1598 = vmatpush1.bf16.msra.mxu0 %v10025_v15  ;;  %1639 = vmatpush1.bf16.msra.mxu1 %v10027_v16  ;;  %v918_v15 = vld [vmem:[#allocation8 + $0x340] sm:$0xff] }
  0x7a   :  { %1599 = vmatprep.subr.bf16.mxu0 %v10031_v17  ;;  %1640 = vmatprep.subr.bf16.mxu1 %v10033_v18  ;;  %v922_v16 = vld [vmem:[#allocation8 + $0x360] sm:$0xff]  ;;  %v919_v17 = vld [vmem:[#allocation8 + $0x348] sm:$0xff] }
  0x7b   :  { %v10128_v18 = vcombine.high %v918_v15, %v922_v16  ;;  %v10130_v20 = vcombine.low %v918_v15, %v922_v16  ;;  %v10132_v21 = vcombine.low %v919_v17, %v923_v19  ;;  %v10134_v22 = vcombine.high %v919_v17, %v923_v19 }
  0x7c   :  { %v105_v17 = vrot.slane %v96_v63, %v12164_v1 }
  0x7d   :  { %1600 = vmatpush1.bf16.msra.mxu0 %v8475_v23  ;;  %1641 = vmatpush1.bf16.msra.mxu1 %v8477_v24  ;;  %v926_v23 = vld [vmem:[#allocation8 + $0x380] sm:$0xff] }
  0x7e   :  { %1601 = vmatprep.subr.bf16.mxu0 %v8480_v25  ;;  %1642 = vmatprep.subr.bf16.mxu1 %v8482_v26  ;;  %v930_v24 = vld [vmem:[#allocation8 + $0x3a0] sm:$0xff]  ;;  %v927_v25 = vld [vmem:[#allocation8 + $0x388] sm:$0xff] }
  0x7f   :  { %v10140_v26 = vcombine.high %v926_v23, %v930_v24  ;;  %v10142_v28 = vcombine.low %v926_v23, %v930_v24  ;;  %v10144_v29 = vcombine.low %v927_v25, %v931_v27  ;;  %v10146_v30 = vcombine.high %v927_v25, %v931_v27 }
  0x81   :  { %1602 = vmatpush1.bf16.msra.mxu0 %v8479_v32  ;;  %1643 = vmatpush1.bf16.msra.mxu1 %v8481_v33  ;;  %v938_v32 = vld [vmem:[#allocation8 + $0x3e0] sm:$0xff]  ;;  %v935_v33 = vld [vmem:[#allocation8 + $0x3c8] sm:$0xff] }
  0x82   :  { %1603 = vmatprep.subr.bf16.mxu0 %v8484_v34  ;;  %1644 = vmatprep.subr.bf16.mxu1 %v8486_v35  ;;  %v10152_v34 = vcombine.high %v934_v31, %v938_v32  ;;  %v939_v35 = vld [vmem:[#allocation8 + $0x3e8] sm:$0xff] }
  0x83   :  { %v10158_v40 = vcombine.high %v935_v33, %v939_v35 }
  0x85   :  { %1604 = vmatpush1.bf16.msra.mxu0 %v8483_v36  ;;  %1645 = vmatpush1.bf16.msra.mxu1 %v8485_v39  ;;  %v10154_v36 = vcombine.low %v934_v31, %v938_v32  ;;  %v10156_v39 = vcombine.low %v935_v33, %v939_v35 }
  0x86   :  { %1605 = vmatprep.subr.bf16.mxu0 %v10068_v41  ;;  %1646 = vmatprep.subr.bf16.mxu1 %v10074_v45 }
  0x89   :  { %1606 = vmatpush1.bf16.msra.mxu0 %v10070_v43  ;;  %1647 = vmatpush1.bf16.msra.mxu1 %v10072_v44 }
  0x8a   :  { %1607 = vmatprep.subr.bf16.mxu0 %v10080_v49  ;;  %1648 = vmatprep.subr.bf16.mxu1 %v10086_v53 }
  0x8d   :  { %1608 = vmatpush1.bf16.msra.mxu0 %v10082_v51  ;;  %1649 = vmatpush1.bf16.msra.mxu1 %v10084_v52 }
  0x8e   :  { %1609 = vmatprep.subr.bf16.mxu0 %v10092_v57  ;;  %1650 = vmatprep.subr.bf16.mxu1 %v10098_v61 }
  0x91   :  { %1610 = vmatpush1.bf16.msra.mxu0 %v10094_v59  ;;  %1651 = vmatpush1.bf16.msra.mxu1 %v10096_v60 }
  0x92   :  { %1611 = vmatprep.subr.bf16.mxu0 %v10104_v2  ;;  %1652 = vmatprep.subr.bf16.mxu1 %v10110_v6 }
  0x95   :  { %1612 = vmatpush1.bf16.msra.mxu0 %v10106_v4  ;;  %1653 = vmatpush1.bf16.msra.mxu1 %v10108_v5 }
  0x96   :  { %1613 = vmatprep.subr.bf16.mxu0 %v10116_v10  ;;  %1654 = vmatprep.subr.bf16.mxu1 %v10122_v14 }
  0x99   :  { %1614 = vmatpush1.bf16.msra.mxu0 %v10118_v12  ;;  %1655 = vmatpush1.bf16.msra.mxu1 %v10120_v13 }
  0x9a   :  { %1615 = vmatprep.subr.bf16.mxu0 %v10128_v18  ;;  %1656 = vmatprep.subr.bf16.mxu1 %v10134_v22 }
  0x9d   :  { %1616 = vmatpush1.bf16.msra.mxu0 %v10130_v20  ;;  %1657 = vmatpush1.bf16.msra.mxu1 %v10132_v21 }
  0x9e   :  { %1617 = vmatprep.subr.bf16.mxu0 %v10140_v26  ;;  %1658 = vmatprep.subr.bf16.mxu1 %v10146_v30 }
  0xa1   :  { %1618 = vmatpush1.bf16.msra.mxu0 %v10142_v28  ;;  %1659 = vmatpush1.bf16.msra.mxu1 %v10144_v29 }
  0xa2   :  { %1619 = vmatprep.subr.bf16.mxu0 %v10152_v34  ;;  %1660 = vmatprep.subr.bf16.mxu1 %v10158_v40 }
  0xa5   :  { %1620 = vmatpush1.bf16.msra.mxu0 %v10154_v36  ;;  %1661 = vmatpush1.bf16.msra.mxu1 %v10156_v39 }
  0xa6   :  { %1671 = vmatprep.subr.bf16.mxu0 %v10164_v42  ;;  %1712 = vmatprep.subr.bf16.mxu1 %v10170_v50 }
 0x11b   :  { %v10187_v7 = vpop.f32.mrb[0].mxu0  ;;  %v10189_v8 = vpop.f32.mrb[0].mxu1 }
 0x11c   :  { %v338_v15 = vpop.f32.mrb[1].mxu0  ;;  %v411_v16 = vpop.f32.mrb[1].mxu1 }
 0x11d   :  { %v340_v19 = vpop.f32.mrb[2].mxu0  ;;  %v413_v23 = vpop.f32.mrb[2].mxu1 }
 0x11e   :  { %v10199_v24 = vadd.f32 %v340_v19, %v101_v11  ;;  %v342_v25 = vpop.f32.mrb[3].mxu0  ;;  %v10202_v27 = vadd.f32 %v413_v23, %v10185_v3  ;;  %v415_v31 = vpop.f32.mrb[3].mxu1 }
 0x11f   :  { %v10204_v32 = vadd.f32 %v342_v25, %v105_v17  ;;  %v10207_v33 = vadd.f32 %v415_v31, %v10193_v9 }
 0x121   :  { %12411 = vst [vmem:[#allocation13_spill] sm:$0xff] %v10207_v33 }
 0x123   :  { %v346_v35 = vpop.f32.mrb[4].mxu0  ;;  %v419_v0 = vpop.f32.mrb[4].mxu1 }
 0x124   :  { %v10209_v37 = vadd.f32 %v346_v35, %v101_v11  ;;  %v348_v38 = vpop.f32.mrb[5].mxu0  ;;  %v10212_v46 = vadd.f32 %v419_v0, %v10185_v3  ;;  %v421_v54 = vpop.f32.mrb[5].mxu1 }
 0x125   :  { %v10214_v63 = vadd.f32 %v348_v38, %v105_v17  ;;  %v350_v19 = vpop.f32.mrb[6].mxu0  ;;  %v10217_v23 = vadd.f32 %v421_v54, %v10193_v9  ;;  %v423_v25 = vpop.f32.mrb[6].mxu1 }
 0x126   :  { %12412 = vst [vmem:[#allocation14_spill] sm:$0xff] %v10209_v37  ;;  %12413 = vst [vmem:[#allocation15_spill] sm:$0xff] %v10212_v46  ;;  %v10219_v58 = vadd.f32 %v350_v19, %v101_v11  ;;  %v352_v31 = vpop.f32.mrb[7].mxu0  ;;  %v10222_v56 = vadd.f32 %v423_v25, %v10185_v3  ;;  %v425_v35 = vpop.f32.mrb[7].mxu1 }
 0x127   :  { %12414 = vst [vmem:[#allocation16_spill] sm:$0xff] %v10214_v63  ;;  %12415 = vst [vmem:[#allocation17_spill] sm:$0xff] %v10217_v23  ;;  %v10224_v1 = vadd.f32 %v352_v31, %v105_v17  ;;  %v10227_v0 = vadd.f32 %v425_v35, %v10193_v9 }
 0x128   :  { %12416 = vst [vmem:[#allocation18_spill] sm:$0xff] %v10219_v58  ;;  %12417 = vst [vmem:[#allocation19_spill] sm:$0xff] %v10222_v56 }
 0x129   :  { %12418 = vst [vmem:[#allocation20_spill] sm:$0xff] %v10224_v1  ;;  %12419 = vst [vmem:[#allocation21_spill] sm:$0xff] %v10227_v0 }
 0x12b   :  { %v356_v62 = vpop.f32.mrb[8].mxu0  ;;  %v429_v38 = vpop.f32.mrb[8].mxu1 }
 0x12c   :  { %v10229_v63 = vadd.f32 %v356_v62, %v101_v11  ;;  %v358_v46 = vpop.f32.mrb[9].mxu0  ;;  %v10232_v54 = vadd.f32 %v429_v38, %v10185_v3  ;;  %v431_v19 = vpop.f32.mrb[9].mxu1 }
 0x12d   :  { %v10234_v58 = vadd.f32 %v358_v46, %v105_v17  ;;  %v360_v23 = vpop.f32.mrb[10].mxu0  ;;  %v10237_v25 = vadd.f32 %v431_v19, %v10193_v9  ;;  %v433_v31 = vpop.f32.mrb[10].mxu1 }
 0x12e   :  { %12420 = vst [vmem:[#allocation22_spill] sm:$0xff] %v10229_v63  ;;  %12421 = vst [vmem:[#allocation23_spill] sm:$0xff] %v10232_v54  ;;  %v10239_v1 = vadd.f32 %v360_v23, %v101_v11  ;;  %v362_v35 = vpop.f32.mrb[11].mxu0  ;;  %v10242_v0 = vadd.f32 %v433_v31, %v10185_v3  ;;  %v435_v62 = vpop.f32.mrb[11].mxu1 }
 0x12f   :  { %12422 = vst [vmem:[#allocation24_spill] sm:$0xff] %v10234_v58  ;;  %12423 = vst [vmem:[#allocation25_spill] sm:$0xff] %v10237_v25  ;;  %v10244_v63 = vadd.f32 %v362_v35, %v105_v17  ;;  %v10247_v38 = vadd.f32 %v435_v62, %v10193_v9 }
 0x130   :  { %12424 = vst [vmem:[#allocation26_spill] sm:$0xff] %v10239_v1  ;;  %12425 = vst [vmem:[#allocation27_spill] sm:$0xff] %v10242_v0 }
 0x131   :  { %12426 = vst [vmem:[#allocation28_spill] sm:$0xff] %v10244_v63  ;;  %12427 = vst [vmem:[#allocation29_spill] sm:$0xff] %v10247_v38 }
 0x133   :  { %v366_v54 = vpop.f32.mrb[12].mxu0  ;;  %v439_v46 = vpop.f32.mrb[12].mxu1 }
 0x134   :  { %v10249_v58 = vadd.f32 %v366_v54, %v101_v11  ;;  %v368_v56 = vpop.f32.mrb[13].mxu0  ;;  %v10252_v19 = vadd.f32 %v439_v46, %v10185_v3  ;;  %v441_v23 = vpop.f32.mrb[13].mxu1 }
 0x135   :  { %v10254_v1 = vadd.f32 %v368_v56, %v105_v17  ;;  %v370_v25 = vpop.f32.mrb[14].mxu0  ;;  %v10257_v31 = vadd.f32 %v441_v23, %v10193_v9  ;;  %v443_v35 = vpop.f32.mrb[14].mxu1  ;;  %v337_v56 = vadd.f32 %v10187_v7, %v101_v11  ;;  %v339_v23 = vadd.f32 %v338_v15, %v105_v17 }
 0x136   :  { %12428 = vst [vmem:[#allocation30_spill] sm:$0xff] %v10249_v58  ;;  %12429 = vst [vmem:[#allocation31_spill] sm:$0xff] %v10252_v19  ;;  %v10259_v63 = vadd.f32 %v370_v25, %v101_v11  ;;  %v372_v62 = vpop.f32.mrb[15].mxu0  ;;  %v10262_v38 = vadd.f32 %v443_v35, %v10185_v3  ;;  %v445_v54 = vpop.f32.mrb[15].mxu1 }
 0x137   :  { %12430 = vst [vmem:[#allocation32_spill] sm:$0xff] %v10254_v1  ;;  %12431 = vst [vmem:[#allocation33_spill] sm:$0xff] %v10257_v31  ;;  %v10264_v58 = vadd.f32 %v372_v62, %v105_v17  ;;  %v10267_v46 = vadd.f32 %v445_v54, %v10193_v9  ;;  %v410_v1 = vadd.f32 %v10189_v8, %v10185_v3 }
 0x138   :  { %12432 = vst [vmem:[#allocation34_spill] sm:$0xff] %v10259_v63  ;;  %12433 = vst [vmem:[#allocation35_spill] sm:$0xff] %v10262_v38  ;;  %v412_v31 = vadd.f32 %v411_v16, %v10193_v9 }
 0x139   :  { %12434 = vst [vmem:[#allocation36_spill] sm:$0xff] %v10264_v58  ;;  %12435 = vst [vmem:[#allocation37_spill] sm:$0xff] %v10267_v46 }
 0x13b   :  { %v733_v25 = vpop.f32.mrb[16].mxu0  ;;  %v774_v63 = vpop.f32.mrb[16].mxu1 }
 0x13c   :  { %v781_v19 = vadd.f32 %v733_v25, %v337_v56  ;;  %v783_v0 = vadd.f32 %v774_v63, %v410_v1  ;;  %v735_v35 = vpop.f32.mrb[17].mxu0  ;;  %v776_v38 = vpop.f32.mrb[17].mxu1  ;;  %v828_v56 = vld [vmem:[#allocation8 + $0x70] sm:$0xff]  ;;  %v825_v25 = vld [vmem:[#allocation8 + $0x58] sm:$0xff] }
 0x13d   :  { %v782_v37 = vadd.f32 %v735_v35, %v339_v23  ;;  %v784_v62 = vadd.f32 %v776_v38, %v412_v31  ;;  %v737_v58 = vpop.f32.mrb[18].mxu0  ;;  %v778_v55 = vpop.f32.mrb[18].mxu1  ;;  %v829_v35 = vld [vmem:[#allocation8 + $0x78] sm:$0xff] }
 0x13e   :  { %v8487_v54 = vmul.f32 -1.442695, %v781_v19  ;;  %v738_v46 = vpop.f32.mrb[19].mxu0  ;;  %v779_v33 = vpop.f32.mrb[19].mxu1  ;;  %v8489_v3 = vmul.f32 -1.442695, %v783_v0 }
 0x13f   :  { %v8488_v7 = vmul.f32 -1.442695, %v782_v37  ;;  %v824_v46 = vld [vmem:[#allocation8 + $0x50] sm:$0xff] }
 0x140   :  { %9592 = vpow2.f32 %v8487_v54 }
 0x141   :  { %9594 = vpow2.f32 %v8488_v7  ;;  %v832_v7 = vld [vmem:[#allocation8 + $0x90] sm:$0xff] }
 0x142   :  { %9596 = vtanh.f32 %v784_v62 }
 0x143   :  { %9598 = vpow2.f32 %v8489_v3  ;;  %v10278_v3 = vcombine.high %v824_v46, %v828_v56 }
 0x14a   :  { %v9593_v8 = vpop.eup %9592 }
 0x14b   :  { %v794_v11 = vadd.f32 1.0, %v9593_v8  ;;  %v9595_v9 = vpop.eup %9594  ;;  %v10280_v8 = vcombine.high %v825_v25, %v829_v35 }
 0x14c   :  { %v795_v1 = vadd.f32 1.0, %v9595_v9  ;;  %v9597_v15 = vpop.eup %9596  ;;  %v833_v9 = vld [vmem:[#allocation8 + $0x98] sm:$0xff] }
 0x14d   :  { %9600 = vrcp.f32 %v794_v11  ;;  %v9599_v16 = vpop.eup %9598  ;;  %v836_v11 = vld [vmem:[#allocation8 + $0xb0] sm:$0xff] }
 0x14e   :  { %9602 = vrcp.f32 %v795_v1  ;;  %v796_v63 = vadd.f32 1.0, %v9599_v16  ;;  %v837_v1 = vld [vmem:[#allocation8 + $0xb8] sm:$0xff]  ;;  %v10288_v16 = vcombine.low %v825_v25, %v829_v35 }
 0x14f   :  { %v849_v25 = vld [vmem:[#allocation8 + $0x118] sm:$0xff] }
 0x150   :  { %9604 = vrcp.f32 %v796_v63  ;;  %12436 = vst [vmem:[#allocation38_spill] sm:$0xff] %v10288_v16  ;;  %v844_v63 = vld [vmem:[#allocation8 + $0xf0] sm:$0xff]  ;;  %v853_v35 = vld [vmem:[#allocation8 + $0x138] sm:$0xff] }
 0x157   :  { %v9601_v17 = vpop.eup %9600 }
 0x158   :  { %v806_v58 = vmul.f32 %v9601_v17, %v9597_v15  ;;  %v9603_v55 = vpop.eup %9602  ;;  %v10286_v15 = vcombine.low %v824_v46, %v828_v56  ;;  %v10290_v17 = vcombine.high %v832_v7, %v836_v11  ;;  %v848_v56 = vld [vmem:[#allocation8 + $0x110] sm:$0xff] }
 0x159   :  { %v805_v38 = vmul.f32 0.0, %v9603_v55  ;;  %v840_v55 = vld [vmem:[#allocation8 + $0xd0] sm:$0xff] }
 0x15a   :  { %v9605_v37 = vpop.eup %9604  ;;  %12437 = vst [vmem:[#allocation39_spill] sm:$0xff] %v10290_v17 }
 0x15b   :  { %v10273_v33 = vadd.f32 %v806_v58, %v805_v38  ;;  %v10292_v58 = vcombine.high %v833_v9, %v837_v1  ;;  %v841_v38 = vld [vmem:[#allocation8 + $0xd8] sm:$0xff] }
 0x15d   :  { %9606 = vtanh.f32 %v10273_v33  ;;  %12438 = vst [vmem:[#allocation40_spill] sm:$0xff] %v10292_v58 }
 0x167   :  { %v9607_v0 = vpop.eup %9606 }
 0x168   :  { %v809_v19 = vmul.f32 %v9607_v0, %v9605_v37  ;;  %v845_v37 = vld [vmem:[#allocation8 + $0xf8] sm:$0xff]  ;;  %v10298_v0 = vcombine.low %v832_v7, %v836_v11 }
 0x169   :  { %v10306_v46 = vcombine.high %v841_v38, %v845_v37  ;;  %v10312_v7 = vcombine.low %v841_v38, %v845_v37 }
 0x16a   :  { %v811_v31 = vpack.c.bf16 %v809_v19, %v809_v19  ;;  %12439 = vst [vmem:[#allocation41_spill] sm:$0xff] %v10298_v0  ;;  %v10300_v19 = vcombine.low %v833_v9, %v837_v1  ;;  %v10318_v9 = vcombine.high %v849_v25, %v853_v35  ;;  %v856_v1 = vld [vmem:[#allocation8 + $0x150] sm:$0xff] }
 0x16b   :  { %12442 = vst [vmem:[#allocation44_spill] sm:$0xff] %v10306_v46  ;;  %12444 = vst [vmem:[#allocation46_spill] sm:$0xff] %v10312_v7 }
 0x16c   :  { %812 = vst [vmem:[#allocation3] sm:$0xf] %v811_v31  ;;  %12440 = vst [vmem:[#allocation42_spill] sm:$0xff] %v10300_v19  ;;  %v10304_v31 = vcombine.high %v840_v55, %v844_v63 }
 0x16d   :  { %12446 = vst [vmem:[#allocation48_spill] sm:$0xff] %v10318_v9 }
 0x16e   :  { %12441 = vst [vmem:[#allocation43_spill] sm:$0xff] %v10304_v31 }
 0x173   :  { %v813_v23 = vld [vmem:[#allocation3] sm:$0xff] }
 0x174   :  { %v8491_v62 = vcombine.high %v813_v23, %v813_v23  ;;  %v10276_v54 = vcombine.low %v813_v23, %v813_v23  ;;  %v852_v23 = vld [vmem:[#allocation8 + $0x130] sm:$0xff] }
 0x175   :  { %v10316_v11 = vcombine.high %v848_v56, %v852_v23 }
 0x176   :  { %1621 = vmatprep.mubr.bf16.mxu0 %v8491_v62  ;;  %1662 = vmatprep.mubr.bf16.mxu1 %v8491_v62 }
 0x177   :  { %1622 = vmatmul.mubr.bf16.vlgmr.msra.gmra.mrb[20].mxu0 %v10276_v54  ;;  %1663 = vmatmul.mubr.bf16.vlgmr.msra.gmra.mrb[20].mxu1 %v10276_v54  ;;  %12445 = vst [vmem:[#allocation47_spill] sm:$0xff] %v10316_v11 }
 0x178   :  { %1672 = vmatpush1.bf16.msra.mxu0 %v10166_v47  ;;  %1713 = vmatpush1.bf16.msra.mxu1 %v10168_v48 }
 0x179   :  { %1703 = vmatprep.mubr.bf16.mxu0 %v8491_v62  ;;  %1744 = vmatprep.mubr.bf16.mxu1 %v8491_v62  ;;  %v10310_v62 = vcombine.low %v840_v55, %v844_v63  ;;  %v10322_v55 = vcombine.low %v848_v56, %v852_v23  ;;  %v10324_v63 = vcombine.low %v849_v25, %v853_v35 }
 0x17a   :  { %1673 = vmatprep.subr.bf16.mxu0 %v10278_v3  ;;  %1714 = vmatprep.subr.bf16.mxu1 %v10280_v8 }
 0x17b   :  { %12443 = vst [vmem:[#allocation45_spill] sm:$0xff] %v10310_v62  ;;  %12447 = vst [vmem:[#allocation49_spill] sm:$0xff] %v10322_v55 }
 0x17c   :  { %1674 = vmatpush1.bf16.msra.mxu0 %v10286_v15  ;;  %1715 = vmatpush1.bf16.msra.mxu1 %v10288_v16  ;;  %v861_v16 = vld [vmem:[#allocation8 + $0x178] sm:$0xff]  ;;  %12448 = vst [vmem:[#allocation50_spill] sm:$0xff] %v10324_v63 }
 0x17d   :  { %1675 = vmatprep.subr.bf16.mxu0 %v10290_v17  ;;  %1716 = vmatprep.subr.bf16.mxu1 %v10292_v58  ;;  %v860_v58 = vld [vmem:[#allocation8 + $0x170] sm:$0xff]  ;;  %v857_v17 = vld [vmem:[#allocation8 + $0x158] sm:$0xff] }
 0x17e   :  { %v10328_v38 = vcombine.high %v856_v1, %v860_v58  ;;  %v10330_v37 = vcombine.high %v857_v17, %v861_v16  ;;  %v10334_v56 = vcombine.low %v856_v1, %v860_v58  ;;  %v10336_v23 = vcombine.low %v857_v17, %v861_v16 }
 0x180   :  { %1676 = vmatpush1.bf16.msra.mxu0 %v10298_v0  ;;  %1717 = vmatpush1.bf16.msra.mxu1 %v10300_v19  ;;  %12449 = vst [vmem:[#allocation51_spill] sm:$0xff] %v10328_v38  ;;  %12450 = vst [vmem:[#allocation52_spill] sm:$0xff] %v10330_v37  ;;  %v865_v19 = vld [vmem:[#allocation8 + $0x198] sm:$0xff] }
 0x181   :  { %1677 = vmatprep.subr.bf16.mxu0 %v10304_v31  ;;  %1718 = vmatprep.subr.bf16.mxu1 %v10306_v46  ;;  %v864_v46 = vld [vmem:[#allocation8 + $0x190] sm:$0xff]  ;;  %v869_v0 = vld [vmem:[#allocation8 + $0x1b8] sm:$0xff]  ;;  %12451 = vst [vmem:[#allocation53_spill] sm:$0xff] %v10334_v56  ;;  %12452 = vst [vmem:[#allocation54_spill] sm:$0xff] %v10336_v23 }
 0x182   :  { %v868_v31 = vld [vmem:[#allocation8 + $0x1b0] sm:$0xff]  ;;  %v10342_v35 = vcombine.high %v865_v19, %v869_v0  ;;  %v10348_v16 = vcombine.low %v865_v19, %v869_v0 }
 0x183   :  { %v10340_v25 = vcombine.high %v864_v46, %v868_v31  ;;  %v10346_v58 = vcombine.low %v864_v46, %v868_v31 }
 0x184   :  { %1678 = vmatpush1.bf16.msra.mxu0 %v10310_v62  ;;  %1719 = vmatpush1.bf16.msra.mxu1 %v10312_v7  ;;  %12454 = vst [vmem:[#allocation56_spill] sm:$0xff] %v10342_v35  ;;  %v873_v7 = vld [vmem:[#allocation8 + $0x1d8] sm:$0xff]  ;;  %12456 = vst [vmem:[#allocation58_spill] sm:$0xff] %v10348_v16 }
 0x185   :  { %1679 = vmatprep.subr.bf16.mxu0 %v10316_v11  ;;  %1720 = vmatprep.subr.bf16.mxu1 %v10318_v9  ;;  %12453 = vst [vmem:[#allocation55_spill] sm:$0xff] %v10340_v25  ;;  %v872_v9 = vld [vmem:[#allocation8 + $0x1d0] sm:$0xff]  ;;  %v877_v62 = vld [vmem:[#allocation8 + $0x1f8] sm:$0xff]  ;;  %12455 = vst [vmem:[#allocation57_spill] sm:$0xff] %v10346_v58 }
 0x186   :  { %v876_v11 = vld [vmem:[#allocation8 + $0x1f0] sm:$0xff]  ;;  %v10354_v1 = vcombine.high %v873_v7, %v877_v62  ;;  %v10360_v0 = vcombine.low %v873_v7, %v877_v62 }
 0x187   :  { %v10352_v17 = vcombine.high %v872_v9, %v876_v11  ;;  %v10358_v31 = vcombine.low %v872_v9, %v876_v11 }
 0x188   :  { %1680 = vmatpush1.bf16.msra.mxu0 %v10322_v55  ;;  %1721 = vmatpush1.bf16.msra.mxu1 %v10324_v63  ;;  %12458 = vst [vmem:[#allocation60_spill] sm:$0xff] %v10354_v1  ;;  %v881_v63 = vld [vmem:[#allocation8 + $0x218] sm:$0xff]  ;;  %12460 = vst [vmem:[#allocation62_spill] sm:$0xff] %v10360_v0 }
 0x189   :  { %1681 = vmatprep.subr.bf16.mxu0 %v10328_v38  ;;  %1722 = vmatprep.subr.bf16.mxu1 %v10330_v37  ;;  %12457 = vst [vmem:[#allocation59_spill] sm:$0xff] %v10352_v17  ;;  %v880_v37 = vld [vmem:[#allocation8 + $0x210] sm:$0xff]  ;;  %v885_v55 = vld [vmem:[#allocation8 + $0x238] sm:$0xff]  ;;  %12459 = vst [vmem:[#allocation61_spill] sm:$0xff] %v10358_v31 }
 0x18a   :  { %v884_v38 = vld [vmem:[#allocation8 + $0x230] sm:$0xff]  ;;  %v10366_v46 = vcombine.high %v881_v63, %v885_v55  ;;  %v10372_v62 = vcombine.low %v881_v63, %v885_v55 }
 0x18b   :  { %v10364_v19 = vcombine.high %v880_v37, %v884_v38  ;;  %v10370_v11 = vcombine.low %v880_v37, %v884_v38 }
 0x18c   :  { %1682 = vmatpush1.bf16.msra.mxu0 %v10334_v56  ;;  %1723 = vmatpush1.bf16.msra.mxu1 %v10336_v23  ;;  %12462 = vst [vmem:[#allocation64_spill] sm:$0xff] %v10366_v46  ;;  %v889_v23 = vld [vmem:[#allocation8 + $0x258] sm:$0xff]  ;;  %12464 = vst [vmem:[#allocation66_spill] sm:$0xff] %v10372_v62 }
 0x18d   :  { %1683 = vmatprep.subr.bf16.mxu0 %v10340_v25  ;;  %1724 = vmatprep.subr.bf16.mxu1 %v10342_v35  ;;  %12461 = vst [vmem:[#allocation63_spill] sm:$0xff] %v10364_v19  ;;  %v888_v35 = vld [vmem:[#allocation8 + $0x250] sm:$0xff]  ;;  %v893_v56 = vld [vmem:[#allocation8 + $0x278] sm:$0xff]  ;;  %12463 = vst [vmem:[#allocation65_spill] sm:$0xff] %v10370_v11 }
 0x18e   :  { %v892_v25 = vld [vmem:[#allocation8 + $0x270] sm:$0xff]  ;;  %v10378_v9 = vcombine.high %v889_v23, %v893_v56  ;;  %v10384_v55 = vcombine.low %v889_v23, %v893_v56 }
 0x18f   :  { %v10376_v7 = vcombine.high %v888_v35, %v892_v25  ;;  %v10382_v38 = vcombine.low %v888_v35, %v892_v25 }
 0x190   :  { %1684 = vmatpush1.bf16.msra.mxu0 %v10346_v58  ;;  %1725 = vmatpush1.bf16.msra.mxu1 %v10348_v16  ;;  %12466 = vst [vmem:[#allocation68_spill] sm:$0xff] %v10378_v9  ;;  %v897_v16 = vld [vmem:[#allocation8 + $0x298] sm:$0xff]  ;;  %12468 = vst [vmem:[#allocation70_spill] sm:$0xff] %v10384_v55 }
 0x191   :  { %1685 = vmatprep.subr.bf16.mxu0 %v10352_v17  ;;  %1726 = vmatprep.subr.bf16.mxu1 %v10354_v1  ;;  %12465 = vst [vmem:[#allocation67_spill] sm:$0xff] %v10376_v7  ;;  %v896_v1 = vld [vmem:[#allocation8 + $0x290] sm:$0xff]  ;;  %v901_v58 = vld [vmem:[#allocation8 + $0x2b8] sm:$0xff]  ;;  %12467 = vst [vmem:[#allocation69_spill] sm:$0xff] %v10382_v38 }
 0x192   :  { %v900_v17 = vld [vmem:[#allocation8 + $0x2b0] sm:$0xff]  ;;  %v10390_v37 = vcombine.high %v897_v16, %v901_v58  ;;  %v10396_v56 = vcombine.low %v897_v16, %v901_v58 }
 0x193   :  { %v10388_v63 = vcombine.high %v896_v1, %v900_v17  ;;  %v10394_v25 = vcombine.low %v896_v1, %v900_v17 }
 0x194   :  { %1686 = vmatpush1.bf16.msra.mxu0 %v10358_v31  ;;  %1727 = vmatpush1.bf16.msra.mxu1 %v10360_v0  ;;  %12470 = vst [vmem:[#allocation72_spill] sm:$0xff] %v10390_v37  ;;  %v905_v0 = vld [vmem:[#allocation8 + $0x2d8] sm:$0xff]  ;;  %12472 = vst [vmem:[#allocation74_spill] sm:$0xff] %v10396_v56 }
 0x195   :  { %1687 = vmatprep.subr.bf16.mxu0 %v10364_v19  ;;  %1728 = vmatprep.subr.bf16.mxu1 %v10366_v46  ;;  %12469 = vst [vmem:[#allocation71_spill] sm:$0xff] %v10388_v63  ;;  %v904_v46 = vld [vmem:[#allocation8 + $0x2d0] sm:$0xff]  ;;  %v909_v31 = vld [vmem:[#allocation8 + $0x2f8] sm:$0xff]  ;;  %12471 = vst [vmem:[#allocation73_spill] sm:$0xff] %v10394_v25 }
 0x196   :  { %v908_v19 = vld [vmem:[#allocation8 + $0x2f0] sm:$0xff]  ;;  %v10402_v35 = vcombine.high %v905_v0, %v909_v31  ;;  %v10408_v58 = vcombine.low %v905_v0, %v909_v31 }
 0x197   :  { %v10400_v23 = vcombine.high %v904_v46, %v908_v19  ;;  %v10406_v17 = vcombine.low %v904_v46, %v908_v19 }
 0x198   :  { %1688 = vmatpush1.bf16.msra.mxu0 %v10370_v11  ;;  %1729 = vmatpush1.bf16.msra.mxu1 %v10372_v62  ;;  %12474 = vst [vmem:[#allocation76_spill] sm:$0xff] %v10402_v35  ;;  %v913_v62 = vld [vmem:[#allocation8 + $0x318] sm:$0xff]  ;;  %12476 = vst [vmem:[#allocation78_spill] sm:$0xff] %v10408_v58 }
 0x199   :  { %1689 = vmatprep.subr.bf16.mxu0 %v10376_v7  ;;  %1730 = vmatprep.subr.bf16.mxu1 %v10378_v9  ;;  %12473 = vst [vmem:[#allocation75_spill] sm:$0xff] %v10400_v23  ;;  %v912_v9 = vld [vmem:[#allocation8 + $0x310] sm:$0xff]  ;;  %v917_v11 = vld [vmem:[#allocation8 + $0x338] sm:$0xff]  ;;  %12475 = vst [vmem:[#allocation77_spill] sm:$0xff] %v10406_v17 }
 0x19a   :  { %v916_v7 = vld [vmem:[#allocation8 + $0x330] sm:$0xff]  ;;  %v10414_v1 = vcombine.high %v913_v62, %v917_v11  ;;  %v10420_v31 = vcombine.low %v913_v62, %v917_v11 }
 0x19b   :  { %v10412_v16 = vcombine.high %v912_v9, %v916_v7  ;;  %v10418_v19 = vcombine.low %v912_v9, %v916_v7 }
 0x19c   :  { %1690 = vmatpush1.bf16.msra.mxu0 %v10382_v38  ;;  %1731 = vmatpush1.bf16.msra.mxu1 %v10384_v55  ;;  %12478 = vst [vmem:[#allocation80_spill] sm:$0xff] %v10414_v1  ;;  %v921_v55 = vld [vmem:[#allocation8 + $0x358] sm:$0xff] }
 0x19d   :  { %1691 = vmatprep.subr.bf16.mxu0 %v10388_v63  ;;  %1732 = vmatprep.subr.bf16.mxu1 %v10390_v37  ;;  %12477 = vst [vmem:[#allocation79_spill] sm:$0xff] %v10412_v16  ;;  %v920_v37 = vld [vmem:[#allocation8 + $0x350] sm:$0xff]  ;;  %v925_v38 = vld [vmem:[#allocation8 + $0x378] sm:$0xff] }
 0x19e   :  { %v924_v63 = vld [vmem:[#allocation8 + $0x370] sm:$0xff]  ;;  %v10426_v46 = vcombine.high %v921_v55, %v925_v38  ;;  %v10432_v11 = vcombine.low %v921_v55, %v925_v38 }
 0x19f   :  { %v10424_v0 = vcombine.high %v920_v37, %v924_v63  ;;  %v10430_v7 = vcombine.low %v920_v37, %v924_v63 }
 0x1a0   :  { %1692 = vmatpush1.bf16.msra.mxu0 %v10394_v25  ;;  %1733 = vmatpush1.bf16.msra.mxu1 %v10396_v56  ;;  %12479 = vst [vmem:[#allocation81_spill] sm:$0xff] %v10426_v46  ;;  %v929_v56 = vld [vmem:[#allocation8 + $0x398] sm:$0xff] }
 0x1a1   :  { %1693 = vmatprep.subr.bf16.mxu0 %v10400_v23  ;;  %1734 = vmatprep.subr.bf16.mxu1 %v10402_v35  ;;  %v928_v35 = vld [vmem:[#allocation8 + $0x390] sm:$0xff]  ;;  %v933_v25 = vld [vmem:[#allocation8 + $0x3b8] sm:$0xff]  ;;  %12480 = vst [vmem:[#allocation82_spill] sm:$0xff] %v10430_v7 }
 0x1a2   :  { %v932_v23 = vld [vmem:[#allocation8 + $0x3b0] sm:$0xff]  ;;  %v10438_v9 = vcombine.high %v929_v56, %v933_v25  ;;  %v10444_v38 = vcombine.low %v929_v56, %v933_v25  ;;  %v1826_v25 = vld [vmem:[#allocation8] sm:$0xff] }
 0x1a3   :  { %v10436_v62 = vcombine.high %v928_v35, %v932_v23  ;;  %v10442_v63 = vcombine.low %v928_v35, %v932_v23  ;;  %v1830_v56 = vld [vmem:[#allocation8 + $0x20] sm:$0xff]  ;;  %v1827_v23 = vld [vmem:[#allocation8 + $0x8] sm:$0xff] }
 0x1a4   :  { %1694 = vmatpush1.bf16.msra.mxu0 %v10406_v17  ;;  %1735 = vmatpush1.bf16.msra.mxu1 %v10408_v58  ;;  %v937_v58 = vld [vmem:[#allocation8 + $0x3d8] sm:$0xff]  ;;  %12481 = vst [vmem:[#allocation83_spill] sm:$0xff] %v10444_v38  ;;  %v10464_v35 = vcombine.low %v1826_v25, %v1830_v56 }
 0x1a5   :  { %1695 = vmatprep.subr.bf16.mxu0 %v10412_v16  ;;  %1736 = vmatprep.subr.bf16.mxu1 %v10414_v1  ;;  %v936_v1 = vld [vmem:[#allocation8 + $0x3d0] sm:$0xff]  ;;  %v941_v17 = vld [vmem:[#allocation8 + $0x3f8] sm:$0xff] }
 0x1a6   :  { %v940_v16 = vld [vmem:[#allocation8 + $0x3f0] sm:$0xff]  ;;  %v10450_v37 = vcombine.high %v937_v58, %v941_v17  ;;  %12486 = vst [vmem:[#allocation88_spill] sm:$0xff] %v10464_v35 }
 0x1a7   :  { %v10448_v55 = vcombine.high %v936_v1, %v940_v16 }
 0x1a8   :  { %1696 = vmatpush1.bf16.msra.mxu0 %v10418_v19  ;;  %1737 = vmatpush1.bf16.msra.mxu1 %v10420_v31  ;;  %12483 = vst [vmem:[#allocation85_spill] sm:$0xff] %v10450_v37 }
 0x1a9   :  { %1697 = vmatprep.subr.bf16.mxu0 %v10424_v0  ;;  %1738 = vmatprep.subr.bf16.mxu1 %v10426_v46  ;;  %12482 = vst [vmem:[#allocation84_spill] sm:$0xff] %v10448_v55  ;;  %v10454_v46 = vcombine.low %v936_v1, %v940_v16  ;;  %v10466_v16 = vcombine.high %v1826_v25, %v1830_v56  ;;  %v1838_v1 = vld [vmem:[#allocation8 + $0x60] sm:$0xff] }
 0x1ab   :  { %12484 = vst [vmem:[#allocation86_spill] sm:$0xff] %v10454_v46  ;;  %12487 = vst [vmem:[#allocation89_spill] sm:$0xff] %v10466_v16 }
 0x1ac   :  { %1698 = vmatpush1.bf16.msra.mxu0 %v10430_v7  ;;  %1739 = vmatpush1.bf16.msra.mxu1 %v10432_v11  ;;  %v10456_v7 = vcombine.low %v937_v58, %v941_v17  ;;  %v1831_v17 = vld [vmem:[#allocation8 + $0x28] sm:$0xff]  ;;  %v1834_v58 = vld [vmem:[#allocation8 + $0x40] sm:$0xff] }
 0x1ad   :  { %1699 = vmatprep.subr.bf16.mxu0 %v10436_v62  ;;  %1740 = vmatprep.subr.bf16.mxu1 %v10438_v9  ;;  %v10479_v25 = vcombine.low %v1834_v58, %v1838_v1 }
 0x1ae   :  { %12485 = vst [vmem:[#allocation87_spill] sm:$0xff] %v10456_v7 }
 0x1af   :  { %12491 = vst [vmem:[#allocation93_spill] sm:$0xff] %v10479_v25 }
 0x1b0   :  { %1700 = vmatpush1.bf16.msra.mxu0 %v10442_v63  ;;  %1741 = vmatpush1.bf16.msra.mxu1 %v10444_v38  ;;  %v1839_v38 = vld [vmem:[#allocation8 + $0x68] sm:$0xff] }
 0x1b1   :  { %1701 = vmatprep.subr.bf16.mxu0 %v10448_v55  ;;  %1742 = vmatprep.subr.bf16.mxu1 %v10450_v37  ;;  %v10468_v55 = vcombine.low %v1827_v23, %v1831_v17  ;;  %v10470_v37 = vcombine.high %v1827_v23, %v1831_v17  ;;  %v1842_v23 = vld [vmem:[#allocation8 + $0x80] sm:$0xff] }
 0x1b2   :  { %v1846_v17 = vld [vmem:[#allocation8 + $0xa0] sm:$0xff] }
 0x1b3   :  { %12488 = vst [vmem:[#allocation90_spill] sm:$0xff] %v10468_v55  ;;  %12489 = vst [vmem:[#allocation91_spill] sm:$0xff] %v10470_v37 }
 0x1b4   :  { %1702 = vmatpush1.bf16.msra.mxu0 %v10454_v46  ;;  %1743 = vmatpush1.bf16.msra.mxu1 %v10456_v7  ;;  %v10472_v46 = vcombine.high %v1834_v58, %v1838_v1  ;;  %v1835_v7 = vld [vmem:[#allocation8 + $0x48] sm:$0xff]  ;;  %v10490_v58 = vcombine.low %v1842_v23, %v1846_v17 }
 0x1b5   :  { %2601 = vmatprep.subr.bf16.mxu0 %v10466_v16  ;;  %2642 = vmatprep.subr.bf16.mxu1 %v10470_v37  ;;  %v10483_v56 = vcombine.low %v1835_v7, %v1839_v38  ;;  %v1843_v16 = vld [vmem:[#allocation8 + $0x88] sm:$0xff]  ;;  %v10488_v37 = vcombine.high %v1842_v23, %v1846_v17 }
 0x1b6   :  { %12494 = vst [vmem:[#allocation96_spill] sm:$0xff] %v10490_v58 }
 0x1b7   :  { %1704 = vmatmul.mubr.bf16.vlgmr.msra.gmra.mrb[24].mxu0 %v10276_v54  ;;  %1745 = vmatmul.mubr.bf16.vlgmr.msra.gmra.mrb[24].mxu1 %v10276_v54  ;;  %v10475_v54 = vcombine.high %v1835_v7, %v1839_v38  ;;  %12492 = vst [vmem:[#allocation94_spill] sm:$0xff] %v10483_v56  ;;  %12493 = vst [vmem:[#allocation95_spill] sm:$0xff] %v10488_v37  ;;  %v1850_v7 = vld [vmem:[#allocation8 + $0xc0] sm:$0xff] }
 0x1b8   :  { %2602 = vmatpush1.bf16.msra.mxu0 %v10464_v35  ;;  %2643 = vmatpush1.bf16.msra.mxu1 %v10468_v55  ;;  %v1847_v35 = vld [vmem:[#allocation8 + $0xa8] sm:$0xff]  ;;  %v1854_v38 = vld [vmem:[#allocation8 + $0xe0] sm:$0xff] }
 0x1b9   :  { %12490 = vst [vmem:[#allocation92_spill] sm:$0xff] %v10475_v54  ;;  %2603 = vmatprep.subr.bf16.mxu0 %v10472_v46  ;;  %2644 = vmatprep.subr.bf16.mxu1 %v10475_v54  ;;  %v10492_v1 = vcombine.low %v1843_v16, %v1847_v35  ;;  %v10494_v55 = vcombine.high %v1843_v16, %v1847_v35  ;;  %v1855_v54 = vld [vmem:[#allocation8 + $0xe8] sm:$0xff]  ;;  %v1858_v16 = vld [vmem:[#allocation8 + $0x100] sm:$0xff] }
 0x1ba   :  { %v10502_v23 = vcombine.low %v1850_v7, %v1854_v38 }
 0x1bb   :  { %12495 = vst [vmem:[#allocation97_spill] sm:$0xff] %v10492_v1  ;;  %12496 = vst [vmem:[#allocation98_spill] sm:$0xff] %v10494_v55 }
 0x1bc   :  { %2604 = vmatpush1.bf16.msra.mxu0 %v10479_v25  ;;  %2645 = vmatpush1.bf16.msra.mxu1 %v10483_v56  ;;  %v1851_v56 = vld [vmem:[#allocation8 + $0xc8] sm:$0xff]  ;;  %v10500_v25 = vcombine.high %v1850_v7, %v1854_v38  ;;  %12498 = vst [vmem:[#allocation100_spill] sm:$0xff] %v10502_v23 }
 0x1bd   :  { %2605 = vmatprep.subr.bf16.mxu0 %v10488_v37  ;;  %2646 = vmatprep.subr.bf16.mxu1 %v10494_v55  ;;  %v10504_v17 = vcombine.low %v1851_v56, %v1855_v54  ;;  %v10506_v35 = vcombine.high %v1851_v56, %v1855_v54  ;;  %v1859_v55 = vld [vmem:[#allocation8 + $0x108] sm:$0xff]  ;;  %v1866_v56 = vld [vmem:[#allocation8 + $0x140] sm:$0xff] }
 0x1be   :  { %12497 = vst [vmem:[#allocation99_spill] sm:$0xff] %v10500_v25  ;;  %v1863_v37 = vld [vmem:[#allocation8 + $0x128] sm:$0xff] }
 0x1bf   :  { %12499 = vst [vmem:[#allocation101_spill] sm:$0xff] %v10504_v17  ;;  %12500 = vst [vmem:[#allocation102_spill] sm:$0xff] %v10506_v35  ;;  %v10516_v38 = vcombine.low %v1859_v55, %v1863_v37  ;;  %v10518_v54 = vcombine.high %v1859_v55, %v1863_v37  ;;  %v1874_v37 = vld [vmem:[#allocation8 + $0x180] sm:$0xff] }
 0x1c0   :  { %2606 = vmatpush1.bf16.msra.mxu0 %v10490_v58  ;;  %2647 = vmatpush1.bf16.msra.mxu1 %v10492_v1  ;;  %v1862_v58 = vld [vmem:[#allocation8 + $0x120] sm:$0xff] }
 0x1c1   :  { %2607 = vmatprep.subr.bf16.mxu0 %v10500_v25  ;;  %2648 = vmatprep.subr.bf16.mxu1 %v10506_v35  ;;  %v10512_v1 = vcombine.high %v1858_v16, %v1862_v58  ;;  %v10514_v7 = vcombine.low %v1858_v16, %v1862_v58  ;;  %12503 = vst [vmem:[#allocation105_spill] sm:$0xff] %v10516_v38  ;;  %12504 = vst [vmem:[#allocation106_spill] sm:$0xff] %v10518_v54  ;;  %v1867_v35 = vld [vmem:[#allocation8 + $0x148] sm:$0xff] }
 0x1c2   :  { %v1871_v25 = vld [vmem:[#allocation8 + $0x168] sm:$0xff] }
 0x1c3   :  { %12501 = vst [vmem:[#allocation103_spill] sm:$0xff] %v10512_v1  ;;  %12502 = vst [vmem:[#allocation104_spill] sm:$0xff] %v10514_v7  ;;  %v10528_v16 = vcombine.low %v1867_v35, %v1871_v25  ;;  %v10530_v55 = vcombine.high %v1867_v35, %v1871_v25  ;;  %v1882_v35 = vld [vmem:[#allocation8 + $0x1c0] sm:$0xff] }
 0x1c4   :  { %2608 = vmatpush1.bf16.msra.mxu0 %v10502_v23  ;;  %2649 = vmatpush1.bf16.msra.mxu1 %v10504_v17  ;;  %v1870_v23 = vld [vmem:[#allocation8 + $0x160] sm:$0xff] }
 0x1c5   :  { %2609 = vmatprep.subr.bf16.mxu0 %v10512_v1  ;;  %2650 = vmatprep.subr.bf16.mxu1 %v10518_v54  ;;  %v10524_v17 = vcombine.high %v1866_v56, %v1870_v23  ;;  %v10526_v58 = vcombine.low %v1866_v56, %v1870_v23  ;;  %12507 = vst [vmem:[#allocation109_spill] sm:$0xff] %v10528_v16  ;;  %12508 = vst [vmem:[#allocation110_spill] sm:$0xff] %v10530_v55  ;;  %v1875_v54 = vld [vmem:[#allocation8 + $0x188] sm:$0xff] }
 0x1c6   :  { %v1879_v1 = vld [vmem:[#allocation8 + $0x1a8] sm:$0xff] }
 0x1c7   :  { %12505 = vst [vmem:[#allocation107_spill] sm:$0xff] %v10524_v17  ;;  %12506 = vst [vmem:[#allocation108_spill] sm:$0xff] %v10526_v58  ;;  %v10540_v56 = vcombine.low %v1875_v54, %v1879_v1  ;;  %v10542_v25 = vcombine.high %v1875_v54, %v1879_v1 }
 0x1c8   :  { %2610 = vmatpush1.bf16.msra.mxu0 %v10514_v7  ;;  %2651 = vmatpush1.bf16.msra.mxu1 %v10516_v38  ;;  %v1878_v7 = vld [vmem:[#allocation8 + $0x1a0] sm:$0xff] }
 0x1c9   :  { %2611 = vmatprep.subr.bf16.mxu0 %v10524_v17  ;;  %2652 = vmatprep.subr.bf16.mxu1 %v10530_v55  ;;  %v10536_v38 = vcombine.high %v1874_v37, %v1878_v7  ;;  %v10538_v23 = vcombine.low %v1874_v37, %v1878_v7  ;;  %v1883_v55 = vld [vmem:[#allocation8 + $0x1c8] sm:$0xff] }
 0x1ca   :  { %v1887_v17 = vld [vmem:[#allocation8 + $0x1e8] sm:$0xff] }
 0x1cb   :  { %v10552_v37 = vcombine.low %v1883_v55, %v1887_v17  ;;  %v10554_v1 = vcombine.high %v1883_v55, %v1887_v17 }
 0x1cc   :  { %2612 = vmatpush1.bf16.msra.mxu0 %v10526_v58  ;;  %2653 = vmatpush1.bf16.msra.mxu1 %v10528_v16  ;;  %v1886_v58 = vld [vmem:[#allocation8 + $0x1e0] sm:$0xff] }
 0x1cd   :  { %2613 = vmatprep.subr.bf16.mxu0 %v10536_v38  ;;  %2654 = vmatprep.subr.bf16.mxu1 %v10542_v25  ;;  %v10548_v16 = vcombine.high %v1882_v35, %v1886_v58  ;;  %v10550_v7 = vcombine.low %v1882_v35, %v1886_v58 }
 0x1d0   :  { %2614 = vmatpush1.bf16.msra.mxu0 %v10538_v23  ;;  %2655 = vmatpush1.bf16.msra.mxu1 %v10540_v56 }
 0x1d1   :  { %2615 = vmatprep.subr.bf16.mxu0 %v10548_v16  ;;  %2656 = vmatprep.subr.bf16.mxu1 %v10554_v1 }
 0x1d4   :  { %2616 = vmatpush1.bf16.msra.mxu0 %v10550_v7  ;;  %2657 = vmatpush1.bf16.msra.mxu1 %v10552_v37 }
 0x1d5   :  { %2617 = vmatprep.subr.bf16.mxu0 %v10068_v41  ;;  %2658 = vmatprep.subr.bf16.mxu1 %v10074_v45 }
 0x1d8   :  { %2618 = vmatpush1.bf16.msra.mxu0 %v10070_v43  ;;  %2659 = vmatpush1.bf16.msra.mxu1 %v10072_v44 }
 0x1d9   :  { %2619 = vmatprep.subr.bf16.mxu0 %v10080_v49  ;;  %2660 = vmatprep.subr.bf16.mxu1 %v10086_v53  ;;  %v12509_v53 = vld [vmem:[#allocation13_spill] sm:$0xff] }
 0x1dc   :  { %2620 = vmatpush1.bf16.msra.mxu0 %v10082_v51  ;;  %2661 = vmatpush1.bf16.msra.mxu1 %v10084_v52 }
 0x1dd   :  { %2621 = vmatprep.subr.bf16.mxu0 %v10092_v57  ;;  %2662 = vmatprep.subr.bf16.mxu1 %v10098_v61 }
 0x1e0   :  { %2622 = vmatpush1.bf16.msra.mxu0 %v10094_v59  ;;  %2663 = vmatpush1.bf16.msra.mxu1 %v10096_v60 }
 0x1e1   :  { %2623 = vmatprep.subr.bf16.mxu0 %v10104_v2  ;;  %2664 = vmatprep.subr.bf16.mxu1 %v10110_v6 }
 0x1e4   :  { %2624 = vmatpush1.bf16.msra.mxu0 %v10106_v4  ;;  %2665 = vmatpush1.bf16.msra.mxu1 %v10108_v5 }
 0x1e5   :  { %2625 = vmatprep.subr.bf16.mxu0 %v10116_v10  ;;  %2666 = vmatprep.subr.bf16.mxu1 %v10122_v14 }
 0x1e8   :  { %2626 = vmatpush1.bf16.msra.mxu0 %v10118_v12  ;;  %2667 = vmatpush1.bf16.msra.mxu1 %v10120_v13 }
 0x1e9   :  { %2627 = vmatprep.subr.bf16.mxu0 %v10128_v18  ;;  %2668 = vmatprep.subr.bf16.mxu1 %v10134_v22 }
 0x1ec   :  { %2628 = vmatpush1.bf16.msra.mxu0 %v10130_v20  ;;  %2669 = vmatpush1.bf16.msra.mxu1 %v10132_v21 }
 0x1ed   :  { %2629 = vmatprep.subr.bf16.mxu0 %v10140_v26  ;;  %2670 = vmatprep.subr.bf16.mxu1 %v10146_v30 }
 0x1f0   :  { %2630 = vmatpush1.bf16.msra.mxu0 %v10142_v28  ;;  %2671 = vmatpush1.bf16.msra.mxu1 %v10144_v29 }
 0x1f1   :  { %2631 = vmatprep.subr.bf16.mxu0 %v10152_v34  ;;  %2672 = vmatprep.subr.bf16.mxu1 %v10158_v40 }
 0x1f4   :  { %2632 = vmatpush1.bf16.msra.mxu0 %v10154_v36  ;;  %2673 = vmatpush1.bf16.msra.mxu1 %v10156_v39 }
 0x1f5   :  { %2683 = vmatprep.subr.bf16.mxu0 %v10164_v42  ;;  %2724 = vmatprep.subr.bf16.mxu1 %v10170_v50  ;;  %v480_v42 = vld [vmem:[%s12160_s4] sm:$0xf]  ;;  %v12510_v50 = vld [vmem:[#allocation12_spill] sm:$0xff] }
 0x24a   :  { %v1623_v41 = vpop.f32.mrb[20].mxu0  ;;  %v1664_v43 = vpop.f32.mrb[20].mxu1 }
 0x24b   :  { %v1764_v44 = vadd.f32 %v1623_v41, %v10199_v24  ;;  %v1766_v45 = vadd.f32 %v1664_v43, %v10202_v27  ;;  %v1625_v49 = vpop.f32.mrb[21].mxu0  ;;  %v1666_v51 = vpop.f32.mrb[21].mxu1  ;;  %v12511_v24 = vsub.s32 0, %v12510_v50 }
 0x24c   :  { %v1765_v52 = vadd.f32 %v1625_v49, %v10204_v32  ;;  %v1767_v57 = vadd.f32 %v1666_v51, %v12509_v53  ;;  %v1627_v59 = vpop.f32.mrb[22].mxu0  ;;  %v1668_v60 = vpop.f32.mrb[22].mxu1  ;;  %v12513_v32 = vsub.s32 1, %v12510_v50  ;;  %v12515_v53 = vsub.s32 2, %v12510_v50 }
 0x24d   :  { %v8623_v61 = vmul.f32 -1.442695, %v1764_v44  ;;  %v1628_v2 = vpop.f32.mrb[23].mxu0  ;;  %v1669_v4 = vpop.f32.mrb[23].mxu1  ;;  %v8625_v6 = vmul.f32 -1.442695, %v1766_v45  ;;  %v10607_v27 = vrot.slane %v480_v42, %v12511_v24 }
 0x24e   :  { %v8624_v5 = vmul.f32 -1.442695, %v1765_v52  ;;  %v12517_v59 = vsub.s32 3, %v12510_v50  ;;  %v12519_v24 = vld [vmem:[#allocation38_spill] sm:$0xff] }
 0x24f   :  { %9608 = vpow2.f32 %v8623_v61  ;;  %12512 = vst [vmem:[#allocation13_spill] sm:$0xff] %v10607_v27 }
 0x250   :  { %9610 = vpow2.f32 %v8624_v5  ;;  %v10621_v60 = vrot.slane %v480_v42, %v12517_v59  ;;  %v12539_v59 = vld [vmem:[#allocation58_spill] sm:$0xff] }
 0x251   :  { %9612 = vtanh.f32 %v1767_v57  ;;  %v10617_v57 = vrot.slane %v480_v42, %v12515_v53  ;;  %v12538_v53 = vld [vmem:[#allocation57_spill] sm:$0xff] }
 0x252   :  { %9614 = vpow2.f32 %v8625_v6  ;;  %12518 = vst [vmem:[#allocation112_spill] sm:$0xff] %v10621_v60 }
 0x253   :  { %12516 = vst [vmem:[#allocation111_spill] sm:$0xff] %v10617_v57 }
 0x259   :  { %v9609_v10 = vpop.eup %9608 }
 0x25a   :  { %v1806_v12 = vadd.f32 1.0, %v9609_v10  ;;  %v9611_v13 = vpop.eup %9610 }
 0x25b   :  { %v1807_v14 = vadd.f32 1.0, %v9611_v13  ;;  %v9613_v18 = vpop.eup %9612 }
 0x25c   :  { %9616 = vrcp.f32 %v1806_v12  ;;  %v9615_v20 = vpop.eup %9614 }
 0x25d   :  { %9618 = vrcp.f32 %v1807_v14  ;;  %v1808_v28 = vadd.f32 1.0, %v9615_v20 }
 0x25f   :  { %9620 = vrcp.f32 %v1808_v28 }
 0x266   :  { %v9617_v21 = vpop.eup %9616 }
 0x267   :  { %v1818_v22 = vmul.f32 %v9617_v21, %v9613_v18  ;;  %v9619_v26 = vpop.eup %9618 }
 0x268   :  { %v1817_v29 = vmul.f32 %v9619_v26, %v10273_v33  ;;  %v10611_v33 = vrot.slane %v480_v42, %v12513_v32  ;;  %v12520_v32 = vld [vmem:[#allocation39_spill] sm:$0xff] }
 0x269   :  { %v9621_v34 = vpop.eup %9620 }
 0x26a   :  { %v10599_v30 = vadd.f32 %v1818_v22, %v1817_v29  ;;  %12514 = vst [vmem:[#allocation12_spill] sm:$0xff] %v10611_v33 }
 0x26c   :  { %9622 = vtanh.f32 %v10599_v30 }
 0x276   :  { %v9623_v36 = vpop.eup %9622 }
 0x277   :  { %v1821_v39 = vmul.f32 %v9623_v36, %v9621_v34 }
 0x279   :  { %v1823_v40 = vpack.c.bf16 %v1821_v39, %v1821_v39 }
 0x27b   :  { %1824 = vst [vmem:[#allocation3] sm:$0xf] %v1823_v40 }
 0x28a   :  { %v1705_v17 = vpop.f32.mrb[24].mxu0  ;;  %v1746_v54 = vpop.f32.mrb[24].mxu1 }
 0x28b   :  { %v1753_v58 = vadd.f32 %v1705_v17, %v10607_v27  ;;  %v1707_v55 = vpop.f32.mrb[25].mxu0  ;;  %v1748_v35 = vpop.f32.mrb[25].mxu1  ;;  %v1755_v61 = vadd.f32 %v1746_v54, %v10617_v57  ;;  %v12521_v17 = vld [vmem:[#allocation40_spill] sm:$0xff]  ;;  %v12522_v54 = vld [vmem:[#allocation41_spill] sm:$0xff] }
 0x28c   :  { %v1754_v41 = vadd.f32 %v1707_v55, %v10611_v33  ;;  %v1709_v43 = vpop.f32.mrb[26].mxu0  ;;  %v1750_v44 = vpop.f32.mrb[26].mxu1  ;;  %v1756_v2 = vadd.f32 %v1748_v35, %v10621_v60  ;;  %v12526_v55 = vld [vmem:[#allocation45_spill] sm:$0xff] }
 0x28d   :  { %v8620_v45 = vmul.f32 -1.442695, %v1753_v58  ;;  %v1710_v49 = vpop.f32.mrb[27].mxu0  ;;  %v1751_v51 = vpop.f32.mrb[27].mxu1  ;;  %v8622_v4 = vmul.f32 -1.442695, %v1755_v61 }
 0x28e   :  { %v8621_v52 = vmul.f32 -1.442695, %v1754_v41  ;;  %v12523_v58 = vld [vmem:[#allocation42_spill] sm:$0xff]  ;;  %v12530_v35 = vld [vmem:[#allocation49_spill] sm:$0xff]  ;;  %v12532_v43 = vld [vmem:[#allocation51_spill] sm:$0xff] }
 0x28f   :  { %9624 = vpow2.f32 %v8620_v45  ;;  %v12531_v41 = vld [vmem:[#allocation50_spill] sm:$0xff]  ;;  %v12533_v44 = vld [vmem:[#allocation52_spill] sm:$0xff]  ;;  %v12534_v45 = vld [vmem:[#allocation53_spill] sm:$0xff] }
 0x290   :  { %9626 = vpow2.f32 %v8621_v52  ;;  %v12535_v49 = vld [vmem:[#allocation54_spill] sm:$0xff]  ;;  %v12536_v51 = vld [vmem:[#allocation55_spill] sm:$0xff]  ;;  %v12537_v52 = vld [vmem:[#allocation56_spill] sm:$0xff] }
 0x291   :  { %9628 = vtanh.f32 %v1756_v2  ;;  %v12540_v61 = vld [vmem:[#allocation59_spill] sm:$0xff]  ;;  %v12541_v2 = vld [vmem:[#allocation60_spill] sm:$0xff] }
 0x292   :  { %9630 = vpow2.f32 %v8622_v4  ;;  %v12542_v4 = vld [vmem:[#allocation61_spill] sm:$0xff] }
 0x299   :  { %v9625_v5 = vpop.eup %9624 }
 0x29a   :  { %v1777_v6 = vadd.f32 1.0, %v9625_v5  ;;  %v9627_v10 = vpop.eup %9626  ;;  %v12543_v5 = vld [vmem:[#allocation62_spill] sm:$0xff] }
 0x29b   :  { %v1778_v12 = vadd.f32 1.0, %v9627_v10  ;;  %v9629_v13 = vpop.eup %9628  ;;  %v12545_v10 = vld [vmem:[#allocation64_spill] sm:$0xff] }
 0x29c   :  { %9632 = vrcp.f32 %v1777_v6  ;;  %v9631_v14 = vpop.eup %9630  ;;  %v12544_v6 = vld [vmem:[#allocation63_spill] sm:$0xff] }
 0x29d   :  { %9634 = vrcp.f32 %v1778_v12  ;;  %v1779_v22 = vadd.f32 1.0, %v9631_v14  ;;  %v12546_v12 = vld [vmem:[#allocation65_spill] sm:$0xff]  ;;  %v12548_v14 = vld [vmem:[#allocation67_spill] sm:$0xff] }
 0x29f   :  { %9636 = vrcp.f32 %v1779_v22  ;;  %v12552_v22 = vld [vmem:[#allocation71_spill] sm:$0xff] }
 0x2a6   :  { %v9633_v18 = vpop.eup %9632 }
 0x2a7   :  { %v1789_v20 = vmul.f32 %v9633_v18, %v9629_v13  ;;  %v9635_v21 = vpop.eup %9634  ;;  %v12547_v13 = vld [vmem:[#allocation66_spill] sm:$0xff]  ;;  %v12549_v18 = vld [vmem:[#allocation68_spill] sm:$0xff] }
 0x2a8   :  { %v1788_v26 = vmul.f32 0.0, %v9635_v21  ;;  %v12551_v21 = vld [vmem:[#allocation70_spill] sm:$0xff] }
 0x2a9   :  { %v9637_v29 = vpop.eup %9636 }
 0x2aa   :  { %v10625_v28 = vadd.f32 %v1789_v20, %v1788_v26  ;;  %v12550_v20 = vld [vmem:[#allocation69_spill] sm:$0xff]  ;;  %v12553_v26 = vld [vmem:[#allocation72_spill] sm:$0xff] }
 0x2ac   :  { %9638 = vtanh.f32 %v10625_v28 }
 0x2b6   :  { %v9639_v34 = vpop.eup %9638 }
 0x2b7   :  { %v1792_v36 = vmul.f32 %v9639_v34, %v9637_v29  ;;  %v12554_v29 = vld [vmem:[#allocation73_spill] sm:$0xff]  ;;  %v12555_v34 = vld [vmem:[#allocation74_spill] sm:$0xff] }
 0x2b9   :  { %v1794_v39 = vpack.c.bf16 %v1792_v36, %v1792_v36  ;;  %v12556_v36 = vld [vmem:[#allocation75_spill] sm:$0xff] }
 0x2bb   :  { %1795 = vst [vmem:[#allocation3 + $0x4] sm:$0xf] %v1794_v39  ;;  %1796 = vst [vmem:[%s12161_s5] sm:$0xf] %v1794_v39  ;;  %v12557_v39 = vld [vmem:[#allocation76_spill] sm:$0xff] }
 0x2c2   :  { %v1825_v40 = vld [vmem:[#allocation3] sm:$0xff] }
 0x2c3   :  { %v8627_v42 = vcombine.high %v1825_v40, %v1825_v40  ;;  %v10631_v50 = vcombine.low %v1825_v40, %v1825_v40  ;;  %v12558_v40 = vld [vmem:[#allocation77_spill] sm:$0xff] }
 0x2c5   :  { %2633 = vmatprep.mubr.bf16.mxu0 %v8627_v42  ;;  %2674 = vmatprep.mubr.bf16.mxu1 %v8627_v42 }
 0x2c6   :  { %2634 = vmatmul.mubr.bf16.vlgmr.msra.gmra.mrb[28].mxu0 %v10631_v50  ;;  %2675 = vmatmul.mubr.bf16.vlgmr.msra.gmra.mrb[28].mxu1 %v10631_v50 }
 0x2c7   :  { %2684 = vmatpush1.bf16.msra.mxu0 %v10166_v47  ;;  %2725 = vmatpush1.bf16.msra.mxu1 %v10168_v48  ;;  %v12524_v47 = vld [vmem:[#allocation43_spill] sm:$0xff]  ;;  %v12525_v48 = vld [vmem:[#allocation44_spill] sm:$0xff] }
 0x2c8   :  { %2715 = vmatprep.mubr.bf16.mxu0 %v8627_v42  ;;  %2756 = vmatprep.mubr.bf16.mxu1 %v8627_v42  ;;  %v12559_v42 = vld [vmem:[#allocation78_spill] sm:$0xff] }
 0x2c9   :  { %2685 = vmatprep.subr.bf16.mxu0 %v10278_v3  ;;  %2726 = vmatprep.subr.bf16.mxu1 %v10280_v8  ;;  %v12527_v3 = vld [vmem:[#allocation46_spill] sm:$0xff]  ;;  %v12528_v8 = vld [vmem:[#allocation47_spill] sm:$0xff] }
 0x2cb   :  { %2686 = vmatpush1.bf16.msra.mxu0 %v10286_v15  ;;  %2727 = vmatpush1.bf16.msra.mxu1 %v12519_v24  ;;  %v12529_v15 = vld [vmem:[#allocation48_spill] sm:$0xff]  ;;  %v12560_v24 = vld [vmem:[#allocation79_spill] sm:$0xff] }
 0x2cc   :  { %2687 = vmatprep.subr.bf16.mxu0 %v12520_v32  ;;  %2728 = vmatprep.subr.bf16.mxu1 %v12521_v17  ;;  %v12561_v32 = vld [vmem:[#allocation80_spill] sm:$0xff]  ;;  %v12562_v17 = vld [vmem:[#allocation81_spill] sm:$0xff] }
 0x2cf   :  { %2688 = vmatpush1.bf16.msra.mxu0 %v12522_v54  ;;  %2729 = vmatpush1.bf16.msra.mxu1 %v12523_v58  ;;  %v12563_v54 = vld [vmem:[#allocation82_spill] sm:$0xff]  ;;  %v12564_v58 = vld [vmem:[#allocation83_spill] sm:$0xff] }
 0x2d0   :  { %2689 = vmatprep.subr.bf16.mxu0 %v12524_v47  ;;  %2730 = vmatprep.subr.bf16.mxu1 %v12525_v48  ;;  %v12565_v47 = vld [vmem:[#allocation84_spill] sm:$0xff]  ;;  %v12569_v48 = vld [vmem:[#allocation89_spill] sm:$0xff] }
 0x2d3   :  { %2690 = vmatpush1.bf16.msra.mxu0 %v12526_v55  ;;  %2731 = vmatpush1.bf16.msra.mxu1 %v12527_v3  ;;  %v12570_v55 = vld [vmem:[#allocation91_spill] sm:$0xff]  ;;  %v12575_v3 = vld [vmem:[#allocation94_spill] sm:$0xff] }
 0x2d4   :  { %2691 = vmatprep.subr.bf16.mxu0 %v12528_v8  ;;  %2732 = vmatprep.subr.bf16.mxu1 %v12529_v15  ;;  %v12576_v8 = vld [vmem:[#allocation95_spill] sm:$0xff]  ;;  %v12577_v15 = vld [vmem:[#allocation98_spill] sm:$0xff] }
 0x2d7   :  { %2692 = vmatpush1.bf16.msra.mxu0 %v12530_v35  ;;  %2733 = vmatpush1.bf16.msra.mxu1 %v12531_v41  ;;  %v12578_v35 = vld [vmem:[#allocation96_spill] sm:$0xff]  ;;  %v12579_v41 = vld [vmem:[#allocation97_spill] sm:$0xff] }
 0x2d8   :  { %2693 = vmatprep.subr.bf16.mxu0 %v12532_v43  ;;  %2734 = vmatprep.subr.bf16.mxu1 %v12533_v44  ;;  %v12581_v43 = vld [vmem:[#allocation102_spill] sm:$0xff]  ;;  %v12582_v44 = vld [vmem:[#allocation100_spill] sm:$0xff] }
 0x2db   :  { %2694 = vmatpush1.bf16.msra.mxu0 %v12534_v45  ;;  %2735 = vmatpush1.bf16.msra.mxu1 %v12535_v49  ;;  %v12584_v45 = vld [vmem:[#allocation103_spill] sm:$0xff]  ;;  %v12585_v49 = vld [vmem:[#allocation106_spill] sm:$0xff] }
 0x2dc   :  { %2695 = vmatprep.subr.bf16.mxu0 %v12536_v51  ;;  %2736 = vmatprep.subr.bf16.mxu1 %v12537_v52  ;;  %v12586_v51 = vld [vmem:[#allocation104_spill] sm:$0xff]  ;;  %v12587_v52 = vld [vmem:[#allocation105_spill] sm:$0xff] }
 0x2df   :  { %2696 = vmatpush1.bf16.msra.mxu0 %v12538_v53  ;;  %2737 = vmatpush1.bf16.msra.mxu1 %v12539_v59  ;;  %v12588_v53 = vld [vmem:[#allocation107_spill] sm:$0xff]  ;;  %v12589_v59 = vld [vmem:[#allocation110_spill] sm:$0xff] }
 0x2e0   :  { %2697 = vmatprep.subr.bf16.mxu0 %v12540_v61  ;;  %2738 = vmatprep.subr.bf16.mxu1 %v12541_v2  ;;  %v12590_v61 = vld [vmem:[#allocation108_spill] sm:$0xff]  ;;  %v12591_v2 = vld [vmem:[#allocation109_spill] sm:$0xff] }
 0x2e3   :  { %2698 = vmatpush1.bf16.msra.mxu0 %v12542_v4  ;;  %2739 = vmatpush1.bf16.msra.mxu1 %v12543_v5  ;;  %v2903_v4 = vld [vmem:[#allocation8 + $0x200] sm:$0xff] }
 0x2e4   :  { %2699 = vmatprep.subr.bf16.mxu0 %v12544_v6  ;;  %2740 = vmatprep.subr.bf16.mxu1 %v12545_v10  ;;  %v2907_v5 = vld [vmem:[#allocation8 + $0x220] sm:$0xff]  ;;  %v2904_v6 = vld [vmem:[#allocation8 + $0x208] sm:$0xff] }
 0x2e5   :  { %v10731_v10 = vcombine.high %v2903_v4, %v2907_v5 }
 0x2e7   :  { %2700 = vmatpush1.bf16.msra.mxu0 %v12546_v12  ;;  %2741 = vmatpush1.bf16.msra.mxu1 %v12547_v13  ;;  %v10733_v12 = vcombine.low %v2903_v4, %v2907_v5  ;;  %v2960_v5 = vld [vmem:[#allocation8 + $0x3c8] sm:$0xff] }
 0x2e8   :  { %2701 = vmatprep.subr.bf16.mxu0 %v12548_v14  ;;  %2742 = vmatprep.subr.bf16.mxu1 %v12549_v18 }
 0x2eb   :  { %2702 = vmatpush1.bf16.msra.mxu0 %v12550_v20  ;;  %2743 = vmatpush1.bf16.msra.mxu1 %v12551_v21  ;;  %v2919_v20 = vld [vmem:[#allocation8 + $0x280] sm:$0xff] }
 0x2ec   :  { %2703 = vmatprep.subr.bf16.mxu0 %v12552_v22  ;;  %2744 = vmatprep.subr.bf16.mxu1 %v12553_v26  ;;  %v2923_v21 = vld [vmem:[#allocation8 + $0x2a0] sm:$0xff]  ;;  %v2920_v22 = vld [vmem:[#allocation8 + $0x288] sm:$0xff] }
 0x2ed   :  { %v10755_v26 = vcombine.high %v2919_v20, %v2923_v21 }
 0x2ef   :  { %2704 = vmatpush1.bf16.msra.mxu0 %v12554_v29  ;;  %2745 = vmatpush1.bf16.msra.mxu1 %v12555_v34  ;;  %v2924_v29 = vld [vmem:[#allocation8 + $0x2a8] sm:$0xff]  ;;  %v10757_v34 = vcombine.low %v2919_v20, %v2923_v21  ;;  %v2842_v20 = vld [vmem:[#allocation8 + $0x18] sm:$0xff] }
 0x2f0   :  { %2705 = vmatprep.subr.bf16.mxu0 %v12556_v36  ;;  %2746 = vmatprep.subr.bf16.mxu1 %v12557_v39  ;;  %v10759_v36 = vcombine.low %v2920_v22, %v2924_v29  ;;  %v10761_v39 = vcombine.high %v2920_v22, %v2924_v29  ;;  %v2846_v22 = vld [vmem:[#allocation8 + $0x38] sm:$0xff] }
 0x2f3   :  { %2706 = vmatpush1.bf16.msra.mxu0 %v12558_v40  ;;  %2747 = vmatpush1.bf16.msra.mxu1 %v12559_v42  ;;  %v2927_v40 = vld [vmem:[#allocation8 + $0x2c0] sm:$0xff] }
 0x2f4   :  { %2707 = vmatprep.subr.bf16.mxu0 %v12560_v24  ;;  %2748 = vmatprep.subr.bf16.mxu1 %v12561_v32  ;;  %v2931_v42 = vld [vmem:[#allocation8 + $0x2e0] sm:$0xff]  ;;  %v2928_v24 = vld [vmem:[#allocation8 + $0x2c8] sm:$0xff] }
 0x2f5   :  { %v10767_v32 = vcombine.high %v2927_v40, %v2931_v42 }
 0x2f7   :  { %2708 = vmatpush1.bf16.msra.mxu0 %v10418_v19  ;;  %2749 = vmatpush1.bf16.msra.mxu1 %v10420_v31  ;;  %v12566_v19 = vld [vmem:[#allocation85_spill] sm:$0xff]  ;;  %v12567_v31 = vld [vmem:[#allocation86_spill] sm:$0xff] }
 0x2f8   :  { %2709 = vmatprep.subr.bf16.mxu0 %v10424_v0  ;;  %2750 = vmatprep.subr.bf16.mxu1 %v12562_v17  ;;  %v12568_v0 = vld [vmem:[#allocation87_spill] sm:$0xff]  ;;  %v2932_v17 = vld [vmem:[#allocation8 + $0x2e8] sm:$0xff] }
 0x2fb   :  { %2710 = vmatpush1.bf16.msra.mxu0 %v12563_v54  ;;  %2751 = vmatpush1.bf16.msra.mxu1 %v10432_v11  ;;  %v12571_v11 = vld [vmem:[#allocation88_spill] sm:$0xff]  ;;  %v10769_v54 = vcombine.low %v2927_v40, %v2931_v42  ;;  %v10831_v40 = vcombine.low %v2842_v20, %v2846_v22  ;;  %v10833_v42 = vcombine.high %v2842_v20, %v2846_v22 }
 0x2fc   :  { %2711 = vmatprep.subr.bf16.mxu0 %v10436_v62  ;;  %2752 = vmatprep.subr.bf16.mxu1 %v10438_v9  ;;  %v12572_v62 = vld [vmem:[#allocation90_spill] sm:$0xff]  ;;  %v12573_v9 = vld [vmem:[#allocation92_spill] sm:$0xff] }
 0x2ff   :  { %2712 = vmatpush1.bf16.msra.mxu0 %v10442_v63  ;;  %2753 = vmatpush1.bf16.msra.mxu1 %v12564_v58  ;;  %v12574_v63 = vld [vmem:[#allocation93_spill] sm:$0xff]  ;;  %v10771_v58 = vcombine.low %v2928_v24, %v2932_v17 }
 0x300   :  { %2713 = vmatprep.subr.bf16.mxu0 %v12565_v47  ;;  %2754 = vmatprep.subr.bf16.mxu1 %v12566_v19  ;;  %v10773_v47 = vcombine.high %v2928_v24, %v2932_v17  ;;  %v2935_v19 = vld [vmem:[#allocation8 + $0x300] sm:$0xff] }
 0x303   :  { %2714 = vmatpush1.bf16.msra.mxu0 %v12567_v31  ;;  %2755 = vmatpush1.bf16.msra.mxu1 %v12568_v0  ;;  %v2939_v31 = vld [vmem:[#allocation8 + $0x320] sm:$0xff]  ;;  %v2936_v0 = vld [vmem:[#allocation8 + $0x308] sm:$0xff] }
 0x304   :  { %3614 = vmatprep.subr.bf16.mxu0 %v12569_v48  ;;  %3655 = vmatprep.subr.bf16.mxu1 %v12570_v55  ;;  %v10779_v48 = vcombine.high %v2935_v19, %v2939_v31  ;;  %v2940_v55 = vld [vmem:[#allocation8 + $0x328] sm:$0xff] }
 0x306   :  { %2716 = vmatmul.mubr.bf16.vlgmr.msra.gmra.mrb[32].mxu0 %v10631_v50  ;;  %2757 = vmatmul.mubr.bf16.vlgmr.msra.gmra.mrb[32].mxu1 %v10631_v50  ;;  %v12580_v50 = vld [vmem:[#allocation99_spill] sm:$0xff] }
 0x307   :  { %3615 = vmatpush1.bf16.msra.mxu0 %v12571_v11  ;;  %3656 = vmatpush1.bf16.msra.mxu1 %v12572_v62  ;;  %v10781_v11 = vcombine.low %v2935_v19, %v2939_v31  ;;  %v10783_v62 = vcombine.low %v2936_v0, %v2940_v55  ;;  %v12592_v19 = vld [vmem:[#allocation14_spill] sm:$0xff] }
 0x308   :  { %3616 = vmatprep.subr.bf16.mxu0 %v10472_v46  ;;  %3657 = vmatprep.subr.bf16.mxu1 %v12573_v9  ;;  %v12583_v46 = vld [vmem:[#allocation101_spill] sm:$0xff]  ;;  %v10785_v9 = vcombine.high %v2936_v0, %v2940_v55  ;;  %v12593_v0 = vld [vmem:[#allocation15_spill] sm:$0xff] }
 0x30b   :  { %3617 = vmatpush1.bf16.msra.mxu0 %v12574_v63  ;;  %3658 = vmatpush1.bf16.msra.mxu1 %v12575_v3  ;;  %v2943_v63 = vld [vmem:[#allocation8 + $0x340] sm:$0xff] }
 0x30c   :  { %3618 = vmatprep.subr.bf16.mxu0 %v12576_v8  ;;  %3659 = vmatprep.subr.bf16.mxu1 %v12577_v15  ;;  %v2947_v3 = vld [vmem:[#allocation8 + $0x360] sm:$0xff]  ;;  %v2944_v8 = vld [vmem:[#allocation8 + $0x348] sm:$0xff] }
 0x30d   :  { %v10791_v15 = vcombine.high %v2943_v63, %v2947_v3 }
 0x30f   :  { %3619 = vmatpush1.bf16.msra.mxu0 %v12578_v35  ;;  %3660 = vmatpush1.bf16.msra.mxu1 %v12579_v41  ;;  %v2948_v35 = vld [vmem:[#allocation8 + $0x368] sm:$0xff]  ;;  %v10793_v41 = vcombine.low %v2943_v63, %v2947_v3 }
 0x310   :  { %3620 = vmatprep.subr.bf16.mxu0 %v12580_v50  ;;  %3661 = vmatprep.subr.bf16.mxu1 %v12581_v43  ;;  %v10795_v50 = vcombine.low %v2944_v8, %v2948_v35  ;;  %v10797_v43 = vcombine.high %v2944_v8, %v2948_v35  ;;  %v12594_v8 = vld [vmem:[#allocation16_spill] sm:$0xff] }
 0x313   :  { %3621 = vmatpush1.bf16.msra.mxu0 %v12582_v44  ;;  %3662 = vmatpush1.bf16.msra.mxu1 %v12583_v46  ;;  %v2951_v44 = vld [vmem:[#allocation8 + $0x380] sm:$0xff] }
 0x314   :  { %3622 = vmatprep.subr.bf16.mxu0 %v12584_v45  ;;  %3663 = vmatprep.subr.bf16.mxu1 %v12585_v49  ;;  %v2955_v46 = vld [vmem:[#allocation8 + $0x3a0] sm:$0xff]  ;;  %v2952_v45 = vld [vmem:[#allocation8 + $0x388] sm:$0xff] }
 0x315   :  { %v10803_v49 = vcombine.low %v2951_v44, %v2955_v46 }
 0x317   :  { %3623 = vmatpush1.bf16.msra.mxu0 %v12586_v51  ;;  %3664 = vmatpush1.bf16.msra.mxu1 %v12587_v52  ;;  %v10805_v51 = vcombine.high %v2951_v44, %v2955_v46  ;;  %v2956_v52 = vld [vmem:[#allocation8 + $0x3a8] sm:$0xff] }
 0x318   :  { %3624 = vmatprep.subr.bf16.mxu0 %v12588_v53  ;;  %3665 = vmatprep.subr.bf16.mxu1 %v12589_v59  ;;  %v2959_v53 = vld [vmem:[#allocation8 + $0x3c0] sm:$0xff]  ;;  %v12595_v44 = vld [vmem:[#allocation17_spill] sm:$0xff] }
 0x319   :  { %v2963_v59 = vld [vmem:[#allocation8 + $0x3e0] sm:$0xff] }
 0x31a   :  { %v10811_v4 = vcombine.high %v2959_v53, %v2963_v59 }
 0x31b   :  { %3625 = vmatpush1.bf16.msra.mxu0 %v12590_v61  ;;  %3666 = vmatpush1.bf16.msra.mxu1 %v12591_v2  ;;  %v10807_v61 = vcombine.low %v2952_v45, %v2956_v52  ;;  %v10809_v2 = vcombine.high %v2952_v45, %v2956_v52 }
 0x31c   :  { %3626 = vmatprep.subr.bf16.mxu0 %v10536_v38  ;;  %3667 = vmatprep.subr.bf16.mxu1 %v10542_v25  ;;  %v2908_v38 = vld [vmem:[#allocation8 + $0x228] sm:$0xff] }
 0x31d   :  { %v10735_v25 = vcombine.low %v2904_v6, %v2908_v38 }
 0x31f   :  { %3627 = vmatpush1.bf16.msra.mxu0 %v10538_v23  ;;  %3668 = vmatpush1.bf16.msra.mxu1 %v10540_v56  ;;  %v10737_v23 = vcombine.high %v2904_v6, %v2908_v38  ;;  %v2915_v56 = vld [vmem:[#allocation8 + $0x260] sm:$0xff]  ;;  %v2964_v6 = vld [vmem:[#allocation8 + $0x3e8] sm:$0xff] }
 0x320   :  { %3628 = vmatprep.subr.bf16.mxu0 %v10548_v16  ;;  %3669 = vmatprep.subr.bf16.mxu1 %v10554_v1  ;;  %v2911_v16 = vld [vmem:[#allocation8 + $0x240] sm:$0xff]  ;;  %v2916_v1 = vld [vmem:[#allocation8 + $0x268] sm:$0xff]  ;;  %v10814_v38 = vcombine.high %v2960_v5, %v2964_v6 }
 0x321   :  { %v10745_v13 = vcombine.low %v2911_v16, %v2915_v56 }
 0x323   :  { %3629 = vmatpush1.bf16.msra.mxu0 %v10550_v7  ;;  %3670 = vmatpush1.bf16.msra.mxu1 %v10552_v37  ;;  %v2912_v7 = vld [vmem:[#allocation8 + $0x248] sm:$0xff]  ;;  %v10743_v37 = vcombine.high %v2911_v16, %v2915_v56  ;;  %v10818_v16 = vcombine.low %v2959_v53, %v2963_v59  ;;  %v10822_v56 = vcombine.low %v2960_v5, %v2964_v6 }
 0x324   :  { %3630 = vmatprep.subr.bf16.mxu0 %v10731_v10  ;;  %3671 = vmatprep.subr.bf16.mxu1 %v10737_v23  ;;  %v10747_v14 = vcombine.low %v2912_v7, %v2916_v1  ;;  %v10749_v18 = vcombine.high %v2912_v7, %v2916_v1  ;;  %v2841_v7 = vld [vmem:[#allocation8 + $0x10] sm:$0xff] }
 0x325   :  { %v2845_v1 = vld [vmem:[#allocation8 + $0x30] sm:$0xff] }
 0x326   :  { %v10827_v21 = vcombine.high %v2841_v7, %v2845_v1  ;;  %v10829_v29 = vcombine.low %v2841_v7, %v2845_v1 }
 0x327   :  { %3631 = vmatpush1.bf16.msra.mxu0 %v10733_v12  ;;  %3672 = vmatpush1.bf16.msra.mxu1 %v10735_v25 }
 0x328   :  { %3632 = vmatprep.subr.bf16.mxu0 %v10743_v37  ;;  %3673 = vmatprep.subr.bf16.mxu1 %v10749_v18 }
 0x32b   :  { %3633 = vmatpush1.bf16.msra.mxu0 %v10745_v13  ;;  %3674 = vmatpush1.bf16.msra.mxu1 %v10747_v14 }
 0x32c   :  { %3634 = vmatprep.subr.bf16.mxu0 %v10755_v26  ;;  %3675 = vmatprep.subr.bf16.mxu1 %v10761_v39 }
 0x32f   :  { %3635 = vmatpush1.bf16.msra.mxu0 %v10757_v34  ;;  %3676 = vmatpush1.bf16.msra.mxu1 %v10759_v36 }
 0x330   :  { %3636 = vmatprep.subr.bf16.mxu0 %v10767_v32  ;;  %3677 = vmatprep.subr.bf16.mxu1 %v10773_v47 }
 0x333   :  { %3637 = vmatpush1.bf16.msra.mxu0 %v10769_v54  ;;  %3678 = vmatpush1.bf16.msra.mxu1 %v10771_v58 }
 0x334   :  { %3638 = vmatprep.subr.bf16.mxu0 %v10779_v48  ;;  %3679 = vmatprep.subr.bf16.mxu1 %v10785_v9 }
 0x337   :  { %3639 = vmatpush1.bf16.msra.mxu0 %v10781_v11  ;;  %3680 = vmatpush1.bf16.msra.mxu1 %v10783_v62 }
 0x338   :  { %3640 = vmatprep.subr.bf16.mxu0 %v10791_v15  ;;  %3681 = vmatprep.subr.bf16.mxu1 %v10797_v43 }
 0x33b   :  { %3641 = vmatpush1.bf16.msra.mxu0 %v10793_v41  ;;  %3682 = vmatpush1.bf16.msra.mxu1 %v10795_v50 }
 0x33c   :  { %3642 = vmatprep.subr.bf16.mxu0 %v10805_v51  ;;  %3683 = vmatprep.subr.bf16.mxu1 %v10809_v2 }
 0x33f   :  { %3643 = vmatpush1.bf16.msra.mxu0 %v10803_v49  ;;  %3684 = vmatpush1.bf16.msra.mxu1 %v10807_v61 }
 0x340   :  { %3644 = vmatprep.subr.bf16.mxu0 %v10811_v4  ;;  %3685 = vmatprep.subr.bf16.mxu1 %v10814_v38 }
 0x343   :  { %3645 = vmatpush1.bf16.msra.mxu0 %v10818_v16  ;;  %3686 = vmatpush1.bf16.msra.mxu1 %v10822_v56 }
 0x344   :  { %3696 = vmatprep.subr.bf16.mxu0 %v10827_v21  ;;  %3737 = vmatprep.subr.bf16.mxu1 %v10833_v42 }
 0x399   :  { %v2635_v24 = vpop.f32.mrb[28].mxu0  ;;  %v2676_v17 = vpop.f32.mrb[28].mxu1 }
 0x39a   :  { %v2776_v31 = vadd.f32 %v2635_v24, %v12592_v19  ;;  %v2778_v55 = vadd.f32 %v2676_v17, %v12593_v0  ;;  %v2637_v63 = vpop.f32.mrb[29].mxu0  ;;  %v2678_v3 = vpop.f32.mrb[29].mxu1 }
 0x39b   :  { %v2777_v35 = vadd.f32 %v2637_v63, %v12594_v8  ;;  %v2779_v46 = vadd.f32 %v2678_v3, %v12595_v44  ;;  %v2639_v45 = vpop.f32.mrb[30].mxu0  ;;  %v2680_v52 = vpop.f32.mrb[30].mxu1 }
 0x39c   :  { %v8760_v53 = vmul.f32 -1.442695, %v2776_v31  ;;  %v2640_v59 = vpop.f32.mrb[31].mxu0  ;;  %v2681_v5 = vpop.f32.mrb[31].mxu1  ;;  %v8762_v7 = vmul.f32 -1.442695, %v2778_v55 }
 0x39d   :  { %v8761_v6 = vmul.f32 -1.442695, %v2777_v35 }
 0x39e   :  { %9640 = vpow2.f32 %v8760_v53 }
 0x39f   :  { %9642 = vpow2.f32 %v8761_v6 }
 0x3a0   :  { %9644 = vtanh.f32 %v2779_v46 }
 0x3a1   :  { %9646 = vpow2.f32 %v8762_v7 }
 0x3a8   :  { %v9641_v1 = vpop.eup %9640 }
 0x3a9   :  { %v2819_v20 = vadd.f32 1.0, %v9641_v1  ;;  %v9643_v22 = vpop.eup %9642 }
 0x3aa   :  { %v2820_v24 = vadd.f32 1.0, %v9643_v22  ;;  %v9645_v17 = vpop.eup %9644 }
 0x3ab   :  { %9648 = vrcp.f32 %v2819_v20  ;;  %v9647_v19 = vpop.eup %9646 }
 0x3ac   :  { %9650 = vrcp.f32 %v2820_v24  ;;  %v2821_v31 = vadd.f32 1.0, %v9647_v19 }
 0x3ae   :  { %9652 = vrcp.f32 %v2821_v31 }
 0x3b5   :  { %v9649_v0 = vpop.eup %9648 }
 0x3b6   :  { %v2831_v63 = vmul.f32 %v9649_v0, %v9645_v17  ;;  %v9651_v3 = vpop.eup %9650 }
 0x3b7   :  { %v2830_v8 = vmul.f32 %v9651_v3, %v10599_v30 }
 0x3b8   :  { %v9653_v55 = vpop.eup %9652 }
 0x3b9   :  { %v10842_v35 = vadd.f32 %v2831_v63, %v2830_v8 }
 0x3bb   :  { %9654 = vtanh.f32 %v10842_v35 }
 0x3c5   :  { %v9655_v44 = vpop.eup %9654 }
 0x3c6   :  { %v2834_v46 = vmul.f32 %v9655_v44, %v9653_v55 }
 0x3c8   :  { %v2836_v45 = vpack.c.bf16 %v2834_v46, %v2834_v46 }
 0x3ca   :  { %2837 = vst [vmem:[#allocation3] sm:$0xf] %v2836_v45 }
 0x3d9   :  { %v2717_v52 = vpop.f32.mrb[32].mxu0  ;;  %v2758_v53 = vpop.f32.mrb[32].mxu1 }
 0x3da   :  { %v2765_v59 = vadd.f32 %v2717_v52, %v10607_v27  ;;  %v2719_v5 = vpop.f32.mrb[33].mxu0  ;;  %v2760_v6 = vpop.f32.mrb[33].mxu1  ;;  %v2767_v19 = vadd.f32 %v2758_v53, %v10617_v57 }
 0x3db   :  { %v2766_v7 = vadd.f32 %v2719_v5, %v10611_v33  ;;  %v2721_v1 = vpop.f32.mrb[34].mxu0  ;;  %v2762_v30 = vpop.f32.mrb[34].mxu1  ;;  %v2768_v0 = vadd.f32 %v2760_v6, %v10621_v60 }
 0x3dc   :  { %v8756_v20 = vmul.f32 -1.442695, %v2765_v59  ;;  %v2722_v22 = vpop.f32.mrb[35].mxu0  ;;  %v2763_v24 = vpop.f32.mrb[35].mxu1  ;;  %v8758_v63 = vmul.f32 -1.442695, %v2767_v19 }
 0x3dd   :  { %v8757_v17 = vmul.f32 -1.442695, %v2766_v7  ;;  %v2849_v22 = vld [vmem:[#allocation8 + $0x50] sm:$0xff]  ;;  %v2850_v19 = vld [vmem:[#allocation8 + $0x58] sm:$0xff] }
 0x3de   :  { %9656 = vpow2.f32 %v8756_v20  ;;  %v2853_v24 = vld [vmem:[#allocation8 + $0x70] sm:$0xff] }
 0x3df   :  { %9658 = vpow2.f32 %v8757_v17 }
 0x3e0   :  { %9660 = vtanh.f32 %v2768_v0  ;;  %v2854_v0 = vld [vmem:[#allocation8 + $0x78] sm:$0xff] }
 0x3e1   :  { %9662 = vpow2.f32 %v8758_v63 }
 0x3e8   :  { %v9657_v3 = vpop.eup %9656 }
 0x3e9   :  { %v2789_v31 = vadd.f32 1.0, %v9657_v3  ;;  %v9659_v8 = vpop.eup %9658  ;;  %v2857_v3 = vld [vmem:[#allocation8 + $0x90] sm:$0xff] }
 0x3ea   :  { %v2790_v55 = vadd.f32 1.0, %v9659_v8  ;;  %v9661_v44 = vpop.eup %9660  ;;  %v10860_v8 = vcombine.high %v2850_v19, %v2854_v0 }
 0x3eb   :  { %9664 = vrcp.f32 %v2789_v31  ;;  %v9663_v46 = vpop.eup %9662  ;;  %v10858_v31 = vcombine.high %v2849_v22, %v2853_v24 }
 0x3ec   :  { %9666 = vrcp.f32 %v2790_v55  ;;  %v2791_v5 = vadd.f32 1.0, %v9663_v46  ;;  %12596 = vst [vmem:[#allocation38_spill] sm:$0xff] %v10860_v8  ;;  %v2861_v55 = vld [vmem:[#allocation8 + $0xb0] sm:$0xff]  ;;  %v2862_v46 = vld [vmem:[#allocation8 + $0xb8] sm:$0xff] }
 0x3ee   :  { %9668 = vrcp.f32 %v2791_v5 }
 0x3f5   :  { %v9665_v45 = vpop.eup %9664 }
 0x3f6   :  { %v2801_v52 = vmul.f32 %v9665_v45, %v9661_v44  ;;  %v9667_v59 = vpop.eup %9666  ;;  %v2858_v44 = vld [vmem:[#allocation8 + $0x98] sm:$0xff]  ;;  %v10866_v45 = vcombine.low %v2849_v22, %v2853_v24 }
 0x3f7   :  { %v2800_v7 = vmul.f32 %v9667_v59, %v10625_v28  ;;  %v10870_v59 = vcombine.high %v2857_v3, %v2861_v55  ;;  %v10872_v5 = vcombine.high %v2858_v44, %v2862_v46  ;;  %v10880_v22 = vcombine.low %v2858_v44, %v2862_v46 }
 0x3f8   :  { %v9669_v6 = vpop.eup %9668  ;;  %12597 = vst [vmem:[#allocation39_spill] sm:$0xff] %v10866_v45 }
 0x3f9   :  { %v10850_v53 = vadd.f32 %v2801_v52, %v2800_v7  ;;  %v10868_v52 = vcombine.low %v2850_v19, %v2854_v0  ;;  %12599 = vst [vmem:[#allocation41_spill] sm:$0xff] %v10870_v59  ;;  %12600 = vst [vmem:[#allocation42_spill] sm:$0xff] %v10872_v5  ;;  %v2865_v7 = vld [vmem:[#allocation8 + $0xd0] sm:$0xff] }
 0x3fa   :  { %12602 = vst [vmem:[#allocation44_spill] sm:$0xff] %v10880_v22  ;;  %v2873_v19 = vld [vmem:[#allocation8 + $0x110] sm:$0xff] }
 0x3fb   :  { %9670 = vtanh.f32 %v10850_v53  ;;  %12598 = vst [vmem:[#allocation40_spill] sm:$0xff] %v10868_v52  ;;  %v2877_v0 = vld [vmem:[#allocation8 + $0x130] sm:$0xff] }
 0x3fc   :  { %v10896_v44 = vcombine.high %v2873_v19, %v2877_v0 }
 0x3fe   :  { %12607 = vst [vmem:[#allocation49_spill] sm:$0xff] %v10896_v44 }
 0x405   :  { %v9671_v1 = vpop.eup %9670 }
 0x406   :  { %v2804_v30 = vmul.f32 %v9671_v1, %v9669_v6  ;;  %v2869_v6 = vld [vmem:[#allocation8 + $0xf0] sm:$0xff]  ;;  %v2866_v1 = vld [vmem:[#allocation8 + $0xd8] sm:$0xff] }
 0x407   :  { %v10884_v24 = vcombine.high %v2865_v7, %v2869_v6 }
 0x408   :  { %v2806_v20 = vpack.c.bf16 %v2804_v30, %v2804_v30  ;;  %v2870_v30 = vld [vmem:[#allocation8 + $0xf8] sm:$0xff] }
 0x409   :  { %12603 = vst [vmem:[#allocation45_spill] sm:$0xff] %v10884_v24 }
 0x40a   :  { %2807 = vst [vmem:[#allocation3 + $0x4] sm:$0xf] %v2806_v20  ;;  %8759 = vst [vmem:[%s12161_s5 + $0x4] sm:$0xf] %v2806_v20  ;;  %v10878_v20 = vcombine.low %v2857_v3, %v2861_v55  ;;  %v10890_v3 = vcombine.low %v2865_v7, %v2869_v6  ;;  %v10892_v55 = vcombine.low %v2866_v1, %v2870_v30 }
 0x40b   :  { %v10902_v7 = vcombine.low %v2873_v19, %v2877_v0 }
 0x40c   :  { %12601 = vst [vmem:[#allocation43_spill] sm:$0xff] %v10878_v20  ;;  %12605 = vst [vmem:[#allocation47_spill] sm:$0xff] %v10890_v3 }
 0x40d   :  { %12606 = vst [vmem:[#allocation48_spill] sm:$0xff] %v10892_v55  ;;  %12609 = vst [vmem:[#allocation51_spill] sm:$0xff] %v10902_v7 }
 0x411   :  { %v2838_v17 = vld [vmem:[#allocation3] sm:$0xff] }
 0x412   :  { %v8764_v28 = vcombine.high %v2838_v17, %v2838_v17  ;;  %v10856_v63 = vcombine.low %v2838_v17, %v2838_v17  ;;  %v10886_v17 = vcombine.high %v2866_v1, %v2870_v30 }
 0x414   :  { %3646 = vmatprep.mubr.bf16.mxu0 %v8764_v28  ;;  %3687 = vmatprep.mubr.bf16.mxu1 %v8764_v28  ;;  %12604 = vst [vmem:[#allocation46_spill] sm:$0xff] %v10886_v17 }
 0x415   :  { %3647 = vmatmul.mubr.bf16.vlgmr.msra.gmra.mrb[36].mxu0 %v10856_v63  ;;  %3688 = vmatmul.mubr.bf16.vlgmr.msra.gmra.mrb[36].mxu1 %v10856_v63 }
 0x416   :  { %3697 = vmatpush1.bf16.msra.mxu0 %v10829_v29  ;;  %3738 = vmatpush1.bf16.msra.mxu1 %v10831_v40 }
 0x417   :  { %3728 = vmatprep.mubr.bf16.mxu0 %v8764_v28  ;;  %3769 = vmatprep.mubr.bf16.mxu1 %v8764_v28  ;;  %v2874_v28 = vld [vmem:[#allocation8 + $0x118] sm:$0xff] }
 0x418   :  { %3698 = vmatprep.subr.bf16.mxu0 %v10858_v31  ;;  %3739 = vmatprep.subr.bf16.mxu1 %v10860_v8  ;;  %v2878_v8 = vld [vmem:[#allocation8 + $0x138] sm:$0xff] }
 0x419   :  { %v10898_v46 = vcombine.high %v2874_v28, %v2878_v8  ;;  %v10904_v6 = vcombine.low %v2874_v28, %v2878_v8 }
 0x41a   :  { %3699 = vmatpush1.bf16.msra.mxu0 %v10866_v45  ;;  %3740 = vmatpush1.bf16.msra.mxu1 %v10868_v52  ;;  %v2882_v52 = vld [vmem:[#allocation8 + $0x158] sm:$0xff] }
 0x41b   :  { %3700 = vmatprep.subr.bf16.mxu0 %v10870_v59  ;;  %3741 = vmatprep.subr.bf16.mxu1 %v10872_v5  ;;  %12608 = vst [vmem:[#allocation50_spill] sm:$0xff] %v10898_v46  ;;  %v2881_v5 = vld [vmem:[#allocation8 + $0x150] sm:$0xff]  ;;  %v2886_v45 = vld [vmem:[#allocation8 + $0x178] sm:$0xff]  ;;  %12610 = vst [vmem:[#allocation52_spill] sm:$0xff] %v10904_v6 }
 0x41c   :  { %v2885_v59 = vld [vmem:[#allocation8 + $0x170] sm:$0xff]  ;;  %v10910_v30 = vcombine.high %v2882_v52, %v2886_v45  ;;  %v10916_v8 = vcombine.low %v2882_v52, %v2886_v45 }
 0x41d   :  { %v10908_v1 = vcombine.high %v2881_v5, %v2885_v59  ;;  %v10914_v19 = vcombine.low %v2881_v5, %v2885_v59 }
 0x41e   :  { %3701 = vmatpush1.bf16.msra.mxu0 %v10878_v20  ;;  %3742 = vmatpush1.bf16.msra.mxu1 %v10880_v22  ;;  %12612 = vst [vmem:[#allocation54_spill] sm:$0xff] %v10910_v30  ;;  %v2890_v22 = vld [vmem:[#allocation8 + $0x198] sm:$0xff]  ;;  %12614 = vst [vmem:[#allocation56_spill] sm:$0xff] %v10916_v8 }
 0x41f   :  { %3702 = vmatprep.subr.bf16.mxu0 %v10884_v24  ;;  %3743 = vmatprep.subr.bf16.mxu1 %v10886_v17  ;;  %12611 = vst [vmem:[#allocation53_spill] sm:$0xff] %v10908_v1  ;;  %v2889_v17 = vld [vmem:[#allocation8 + $0x190] sm:$0xff]  ;;  %v2894_v20 = vld [vmem:[#allocation8 + $0x1b8] sm:$0xff]  ;;  %12613 = vst [vmem:[#allocation55_spill] sm:$0xff] %v10914_v19 }
 0x420   :  { %v2893_v24 = vld [vmem:[#allocation8 + $0x1b0] sm:$0xff]  ;;  %v10922_v28 = vcombine.high %v2890_v22, %v2894_v20  ;;  %v10928_v45 = vcombine.low %v2890_v22, %v2894_v20 }
 0x421   :  { %v10920_v0 = vcombine.high %v2889_v17, %v2893_v24  ;;  %v10926_v59 = vcombine.low %v2889_v17, %v2893_v24 }
 0x422   :  { %3703 = vmatpush1.bf16.msra.mxu0 %v10890_v3  ;;  %3744 = vmatpush1.bf16.msra.mxu1 %v10892_v55  ;;  %12616 = vst [vmem:[#allocation58_spill] sm:$0xff] %v10922_v28  ;;  %v2898_v55 = vld [vmem:[#allocation8 + $0x1d8] sm:$0xff]  ;;  %12618 = vst [vmem:[#allocation60_spill] sm:$0xff] %v10928_v45 }
 0x423   :  { %3704 = vmatprep.subr.bf16.mxu0 %v10896_v44  ;;  %3745 = vmatprep.subr.bf16.mxu1 %v10898_v46  ;;  %12615 = vst [vmem:[#allocation57_spill] sm:$0xff] %v10920_v0  ;;  %v2897_v46 = vld [vmem:[#allocation8 + $0x1d0] sm:$0xff]  ;;  %v2902_v3 = vld [vmem:[#allocation8 + $0x1f8] sm:$0xff]  ;;  %12617 = vst [vmem:[#allocation59_spill] sm:$0xff] %v10926_v59 }
 0x424   :  { %v2901_v44 = vld [vmem:[#allocation8 + $0x1f0] sm:$0xff]  ;;  %v10934_v5 = vcombine.high %v2898_v55, %v2902_v3  ;;  %v10940_v20 = vcombine.low %v2898_v55, %v2902_v3 }
 0x425   :  { %v10932_v52 = vcombine.high %v2897_v46, %v2901_v44  ;;  %v10938_v24 = vcombine.low %v2897_v46, %v2901_v44 }
 0x426   :  { %3705 = vmatpush1.bf16.msra.mxu0 %v10902_v7  ;;  %3746 = vmatpush1.bf16.msra.mxu1 %v10904_v6  ;;  %12620 = vst [vmem:[#allocation62_spill] sm:$0xff] %v10934_v5  ;;  %v2906_v6 = vld [vmem:[#allocation8 + $0x218] sm:$0xff]  ;;  %12622 = vst [vmem:[#allocation64_spill] sm:$0xff] %v10940_v20 }
 0x427   :  { %3706 = vmatprep.subr.bf16.mxu0 %v10908_v1  ;;  %3747 = vmatprep.subr.bf16.mxu1 %v10910_v30  ;;  %12619 = vst [vmem:[#allocation61_spill] sm:$0xff] %v10932_v52  ;;  %v2905_v30 = vld [vmem:[#allocation8 + $0x210] sm:$0xff]  ;;  %v2910_v7 = vld [vmem:[#allocation8 + $0x238] sm:$0xff]  ;;  %12621 = vst [vmem:[#allocation63_spill] sm:$0xff] %v10938_v24 }
 0x428   :  { %v2909_v1 = vld [vmem:[#allocation8 + $0x230] sm:$0xff]  ;;  %v10946_v17 = vcombine.high %v2906_v6, %v2910_v7  ;;  %v10952_v3 = vcombine.low %v2906_v6, %v2910_v7 }
 0x429   :  { %v10944_v22 = vcombine.high %v2905_v30, %v2909_v1  ;;  %v10950_v44 = vcombine.low %v2905_v30, %v2909_v1 }
 0x42a   :  { %3707 = vmatpush1.bf16.msra.mxu0 %v10914_v19  ;;  %3748 = vmatpush1.bf16.msra.mxu1 %v10916_v8  ;;  %12624 = vst [vmem:[#allocation66_spill] sm:$0xff] %v10946_v17  ;;  %v2914_v8 = vld [vmem:[#allocation8 + $0x258] sm:$0xff]  ;;  %12626 = vst [vmem:[#allocation68_spill] sm:$0xff] %v10952_v3 }
 0x42b   :  { %3708 = vmatprep.subr.bf16.mxu0 %v10920_v0  ;;  %3749 = vmatprep.subr.bf16.mxu1 %v10922_v28  ;;  %12623 = vst [vmem:[#allocation65_spill] sm:$0xff] %v10944_v22  ;;  %v2913_v28 = vld [vmem:[#allocation8 + $0x250] sm:$0xff]  ;;  %v2918_v19 = vld [vmem:[#allocation8 + $0x278] sm:$0xff]  ;;  %12625 = vst [vmem:[#allocation67_spill] sm:$0xff] %v10950_v44 }
 0x42c   :  { %v2917_v0 = vld [vmem:[#allocation8 + $0x270] sm:$0xff]  ;;  %v10958_v46 = vcombine.high %v2914_v8, %v2918_v19  ;;  %v10964_v7 = vcombine.low %v2914_v8, %v2918_v19 }
 0x42d   :  { %v10956_v55 = vcombine.high %v2913_v28, %v2917_v0  ;;  %v10962_v1 = vcombine.low %v2913_v28, %v2917_v0 }
 0x42e   :  { %3709 = vmatpush1.bf16.msra.mxu0 %v10926_v59  ;;  %3750 = vmatpush1.bf16.msra.mxu1 %v10928_v45  ;;  %12628 = vst [vmem:[#allocation70_spill] sm:$0xff] %v10958_v46  ;;  %v2922_v45 = vld [vmem:[#allocation8 + $0x298] sm:$0xff]  ;;  %12630 = vst [vmem:[#allocation72_spill] sm:$0xff] %v10964_v7 }
 0x42f   :  { %3710 = vmatprep.subr.bf16.mxu0 %v10932_v52  ;;  %3751 = vmatprep.subr.bf16.mxu1 %v10934_v5  ;;  %12627 = vst [vmem:[#allocation69_spill] sm:$0xff] %v10956_v55  ;;  %v2921_v5 = vld [vmem:[#allocation8 + $0x290] sm:$0xff]  ;;  %v2926_v59 = vld [vmem:[#allocation8 + $0x2b8] sm:$0xff]  ;;  %12629 = vst [vmem:[#allocation71_spill] sm:$0xff] %v10962_v1 }
 0x430   :  { %v2925_v52 = vld [vmem:[#allocation8 + $0x2b0] sm:$0xff]  ;;  %v10970_v30 = vcombine.high %v2922_v45, %v2926_v59  ;;  %v10976_v19 = vcombine.low %v2922_v45, %v2926_v59 }
 0x431   :  { %v10968_v6 = vcombine.high %v2921_v5, %v2925_v52  ;;  %v10974_v0 = vcombine.low %v2921_v5, %v2925_v52 }
 0x432   :  { %3711 = vmatpush1.bf16.msra.mxu0 %v10938_v24  ;;  %3752 = vmatpush1.bf16.msra.mxu1 %v10940_v20  ;;  %12632 = vst [vmem:[#allocation74_spill] sm:$0xff] %v10970_v30  ;;  %v2930_v20 = vld [vmem:[#allocation8 + $0x2d8] sm:$0xff]  ;;  %12634 = vst [vmem:[#allocation76_spill] sm:$0xff] %v10976_v19 }
 0x433   :  { %3712 = vmatprep.subr.bf16.mxu0 %v10944_v22  ;;  %3753 = vmatprep.subr.bf16.mxu1 %v10946_v17  ;;  %12631 = vst [vmem:[#allocation73_spill] sm:$0xff] %v10968_v6  ;;  %v2929_v17 = vld [vmem:[#allocation8 + $0x2d0] sm:$0xff]  ;;  %v2934_v24 = vld [vmem:[#allocation8 + $0x2f8] sm:$0xff]  ;;  %12633 = vst [vmem:[#allocation75_spill] sm:$0xff] %v10974_v0 }
 0x434   :  { %v2933_v22 = vld [vmem:[#allocation8 + $0x2f0] sm:$0xff]  ;;  %v10982_v28 = vcombine.high %v2930_v20, %v2934_v24  ;;  %v10988_v59 = vcombine.low %v2930_v20, %v2934_v24 }
 0x435   :  { %v10980_v8 = vcombine.high %v2929_v17, %v2933_v22  ;;  %v10986_v52 = vcombine.low %v2929_v17, %v2933_v22 }
 0x436   :  { %3713 = vmatpush1.bf16.msra.mxu0 %v10950_v44  ;;  %3754 = vmatpush1.bf16.msra.mxu1 %v10952_v3  ;;  %12636 = vst [vmem:[#allocation78_spill] sm:$0xff] %v10982_v28  ;;  %v2938_v3 = vld [vmem:[#allocation8 + $0x318] sm:$0xff]  ;;  %12638 = vst [vmem:[#allocation80_spill] sm:$0xff] %v10988_v59 }
 0x437   :  { %3714 = vmatprep.subr.bf16.mxu0 %v10956_v55  ;;  %3755 = vmatprep.subr.bf16.mxu1 %v10958_v46  ;;  %12635 = vst [vmem:[#allocation77_spill] sm:$0xff] %v10980_v8  ;;  %v2937_v46 = vld [vmem:[#allocation8 + $0x310] sm:$0xff]  ;;  %v2942_v44 = vld [vmem:[#allocation8 + $0x338] sm:$0xff]  ;;  %12637 = vst [vmem:[#allocation79_spill] sm:$0xff] %v10986_v52 }
 0x438   :  { %v2941_v55 = vld [vmem:[#allocation8 + $0x330] sm:$0xff]  ;;  %v10994_v5 = vcombine.high %v2938_v3, %v2942_v44  ;;  %v11000_v24 = vcombine.low %v2938_v3, %v2942_v44 }
 0x439   :  { %v10992_v45 = vcombine.high %v2937_v46, %v2941_v55  ;;  %v10998_v22 = vcombine.low %v2937_v46, %v2941_v55 }
 0x43a   :  { %3715 = vmatpush1.bf16.msra.mxu0 %v10962_v1  ;;  %3756 = vmatpush1.bf16.msra.mxu1 %v10964_v7  ;;  %12640 = vst [vmem:[#allocation82_spill] sm:$0xff] %v10994_v5  ;;  %v2946_v7 = vld [vmem:[#allocation8 + $0x358] sm:$0xff] }
 0x43b   :  { %3716 = vmatprep.subr.bf16.mxu0 %v10968_v6  ;;  %3757 = vmatprep.subr.bf16.mxu1 %v10970_v30  ;;  %12639 = vst [vmem:[#allocation81_spill] sm:$0xff] %v10992_v45  ;;  %v2945_v30 = vld [vmem:[#allocation8 + $0x350] sm:$0xff]  ;;  %v2950_v1 = vld [vmem:[#allocation8 + $0x378] sm:$0xff] }
 0x43c   :  { %v2949_v6 = vld [vmem:[#allocation8 + $0x370] sm:$0xff]  ;;  %v11006_v17 = vcombine.high %v2946_v7, %v2950_v1  ;;  %v11012_v44 = vcombine.low %v2946_v7, %v2950_v1 }
 0x43d   :  { %v11004_v20 = vcombine.high %v2945_v30, %v2949_v6  ;;  %v11010_v55 = vcombine.low %v2945_v30, %v2949_v6 }
 0x43e   :  { %3717 = vmatpush1.bf16.msra.mxu0 %v10974_v0  ;;  %3758 = vmatpush1.bf16.msra.mxu1 %v10976_v19  ;;  %12641 = vst [vmem:[#allocation83_spill] sm:$0xff] %v11006_v17  ;;  %v2954_v19 = vld [vmem:[#allocation8 + $0x398] sm:$0xff] }
 0x43f   :  { %3718 = vmatprep.subr.bf16.mxu0 %v10980_v8  ;;  %3759 = vmatprep.subr.bf16.mxu1 %v10982_v28  ;;  %v2953_v28 = vld [vmem:[#allocation8 + $0x390] sm:$0xff]  ;;  %v2958_v0 = vld [vmem:[#allocation8 + $0x3b8] sm:$0xff]  ;;  %12642 = vst [vmem:[#allocation84_spill] sm:$0xff] %v11010_v55 }
 0x440   :  { %v2957_v8 = vld [vmem:[#allocation8 + $0x3b0] sm:$0xff]  ;;  %v11018_v46 = vcombine.high %v2954_v19, %v2958_v0  ;;  %v11024_v1 = vcombine.low %v2954_v19, %v2958_v0  ;;  %v3852_v0 = vld [vmem:[#allocation8] sm:$0xff] }
 0x441   :  { %v11016_v3 = vcombine.high %v2953_v28, %v2957_v8  ;;  %v11022_v6 = vcombine.low %v2953_v28, %v2957_v8  ;;  %v3856_v19 = vld [vmem:[#allocation8 + $0x20] sm:$0xff]  ;;  %v3853_v8 = vld [vmem:[#allocation8 + $0x8] sm:$0xff] }
 0x442   :  { %3719 = vmatpush1.bf16.msra.mxu0 %v10986_v52  ;;  %3760 = vmatpush1.bf16.msra.mxu1 %v10988_v59  ;;  %v2962_v59 = vld [vmem:[#allocation8 + $0x3d8] sm:$0xff]  ;;  %12643 = vst [vmem:[#allocation85_spill] sm:$0xff] %v11024_v1  ;;  %v11044_v28 = vcombine.low %v3852_v0, %v3856_v19 }
 0x443   :  { %3720 = vmatprep.subr.bf16.mxu0 %v10992_v45  ;;  %3761 = vmatprep.subr.bf16.mxu1 %v10994_v5  ;;  %v2961_v5 = vld [vmem:[#allocation8 + $0x3d0] sm:$0xff]  ;;  %v2966_v52 = vld [vmem:[#allocation8 + $0x3f8] sm:$0xff] }
 0x444   :  { %v2965_v45 = vld [vmem:[#allocation8 + $0x3f0] sm:$0xff]  ;;  %v11030_v30 = vcombine.high %v2962_v59, %v2966_v52  ;;  %12648 = vst [vmem:[#allocation88_spill] sm:$0xff] %v11044_v28 }
 0x445   :  { %v11028_v7 = vcombine.high %v2961_v5, %v2965_v45 }
 0x446   :  { %3721 = vmatpush1.bf16.msra.mxu0 %v10998_v22  ;;  %3762 = vmatpush1.bf16.msra.mxu1 %v11000_v24  ;;  %12645 = vst [vmem:[#allocation87_spill] sm:$0xff] %v11030_v30 }
 0x447   :  { %3722 = vmatprep.subr.bf16.mxu0 %v11004_v20  ;;  %3763 = vmatprep.subr.bf16.mxu1 %v11006_v17  ;;  %12644 = vst [vmem:[#allocation86_spill] sm:$0xff] %v11028_v7  ;;  %v11034_v17 = vcombine.low %v2961_v5, %v2965_v45  ;;  %v11046_v45 = vcombine.high %v3852_v0, %v3856_v19  ;;  %v3864_v5 = vld [vmem:[#allocation8 + $0x60] sm:$0xff] }
 0x449   :  { %12646 = vst [vmem:[#allocation89_spill] sm:$0xff] %v11034_v17  ;;  %12649 = vst [vmem:[#allocation90_spill] sm:$0xff] %v11046_v45 }
 0x44a   :  { %3723 = vmatpush1.bf16.msra.mxu0 %v11010_v55  ;;  %3764 = vmatpush1.bf16.msra.mxu1 %v11012_v44  ;;  %v11036_v55 = vcombine.low %v2962_v59, %v2966_v52  ;;  %v3857_v52 = vld [vmem:[#allocation8 + $0x28] sm:$0xff]  ;;  %v3860_v59 = vld [vmem:[#allocation8 + $0x40] sm:$0xff] }
 0x44b   :  { %3724 = vmatprep.subr.bf16.mxu0 %v11016_v3  ;;  %3765 = vmatprep.subr.bf16.mxu1 %v11018_v46  ;;  %v11059_v0 = vcombine.low %v3860_v59, %v3864_v5 }
 0x44c   :  { %12647 = vst [vmem:[#allocation91_spill] sm:$0xff] %v11036_v55 }
 0x44d   :  { %12653 = vst [vmem:[#allocation95_spill] sm:$0xff] %v11059_v0 }
 0x44e   :  { %3725 = vmatpush1.bf16.msra.mxu0 %v11022_v6  ;;  %3766 = vmatpush1.bf16.msra.mxu1 %v11024_v1  ;;  %v3865_v1 = vld [vmem:[#allocation8 + $0x68] sm:$0xff] }
 0x44f   :  { %3726 = vmatprep.subr.bf16.mxu0 %v11028_v7  ;;  %3767 = vmatprep.subr.bf16.mxu1 %v11030_v30  ;;  %v11048_v7 = vcombine.low %v3853_v8, %v3857_v52  ;;  %v11050_v30 = vcombine.high %v3853_v8, %v3857_v52  ;;  %v3868_v8 = vld [vmem:[#allocation8 + $0x80] sm:$0xff] }
 0x450   :  { %v3872_v52 = vld [vmem:[#allocation8 + $0xa0] sm:$0xff] }
 0x451   :  { %12650 = vst [vmem:[#allocation92_spill] sm:$0xff] %v11048_v7  ;;  %12651 = vst [vmem:[#allocation93_spill] sm:$0xff] %v11050_v30 }
 0x452   :  { %3727 = vmatpush1.bf16.msra.mxu0 %v11034_v17  ;;  %3768 = vmatpush1.bf16.msra.mxu1 %v11036_v55  ;;  %v11052_v17 = vcombine.high %v3860_v59, %v3864_v5  ;;  %v3861_v55 = vld [vmem:[#allocation8 + $0x48] sm:$0xff]  ;;  %v11070_v59 = vcombine.low %v3868_v8, %v3872_v52 }
 0x453   :  { %4627 = vmatprep.subr.bf16.mxu0 %v11046_v45  ;;  %4668 = vmatprep.subr.bf16.mxu1 %v11050_v30  ;;  %v11063_v19 = vcombine.low %v3861_v55, %v3865_v1  ;;  %v3869_v45 = vld [vmem:[#allocation8 + $0x88] sm:$0xff]  ;;  %v11068_v30 = vcombine.high %v3868_v8, %v3872_v52 }
 0x454   :  { %12656 = vst [vmem:[#allocation97_spill] sm:$0xff] %v11070_v59 }
 0x455   :  { %3729 = vmatmul.mubr.bf16.vlgmr.msra.gmra.mrb[40].mxu0 %v10856_v63  ;;  %3770 = vmatmul.mubr.bf16.vlgmr.msra.gmra.mrb[40].mxu1 %v10856_v63  ;;  %v11055_v63 = vcombine.high %v3861_v55, %v3865_v1  ;;  %12654 = vst [vmem:[#allocation98_spill] sm:$0xff] %v11063_v19  ;;  %12655 = vst [vmem:[#allocation96_spill] sm:$0xff] %v11068_v30  ;;  %v3876_v55 = vld [vmem:[#allocation8 + $0xc0] sm:$0xff] }
 0x456   :  { %4628 = vmatpush1.bf16.msra.mxu0 %v11044_v28  ;;  %4669 = vmatpush1.bf16.msra.mxu1 %v11048_v7  ;;  %v3873_v28 = vld [vmem:[#allocation8 + $0xa8] sm:$0xff]  ;;  %v3880_v1 = vld [vmem:[#allocation8 + $0xe0] sm:$0xff] }
 0x457   :  { %12652 = vst [vmem:[#allocation94_spill] sm:$0xff] %v11055_v63  ;;  %4629 = vmatprep.subr.bf16.mxu0 %v11052_v17  ;;  %4670 = vmatprep.subr.bf16.mxu1 %v11055_v63  ;;  %v11072_v5 = vcombine.low %v3869_v45, %v3873_v28  ;;  %v11074_v7 = vcombine.high %v3869_v45, %v3873_v28  ;;  %v3881_v63 = vld [vmem:[#allocation8 + $0xe8] sm:$0xff]  ;;  %v3884_v45 = vld [vmem:[#allocation8 + $0x100] sm:$0xff] }
 0x458   :  { %v11082_v8 = vcombine.low %v3876_v55, %v3880_v1 }
 0x459   :  { %12657 = vst [vmem:[#allocation99_spill] sm:$0xff] %v11072_v5  ;;  %12658 = vst [vmem:[#allocation102_spill] sm:$0xff] %v11074_v7 }
 0x45a   :  { %4630 = vmatpush1.bf16.msra.mxu0 %v11059_v0  ;;  %4671 = vmatpush1.bf16.msra.mxu1 %v11063_v19  ;;  %v3877_v19 = vld [vmem:[#allocation8 + $0xc8] sm:$0xff]  ;;  %v11080_v0 = vcombine.high %v3876_v55, %v3880_v1  ;;  %12660 = vst [vmem:[#allocation101_spill] sm:$0xff] %v11082_v8 }
 0x45b   :  { %4631 = vmatprep.subr.bf16.mxu0 %v11068_v30  ;;  %4672 = vmatprep.subr.bf16.mxu1 %v11074_v7  ;;  %v11084_v52 = vcombine.low %v3877_v19, %v3881_v63  ;;  %v11086_v28 = vcombine.high %v3877_v19, %v3881_v63  ;;  %v3885_v7 = vld [vmem:[#allocation8 + $0x108] sm:$0xff]  ;;  %v3892_v19 = vld [vmem:[#allocation8 + $0x140] sm:$0xff] }
 0x45c   :  { %12659 = vst [vmem:[#allocation100_spill] sm:$0xff] %v11080_v0  ;;  %v3889_v30 = vld [vmem:[#allocation8 + $0x128] sm:$0xff] }
 0x45d   :  { %12661 = vst [vmem:[#allocation103_spill] sm:$0xff] %v11084_v52  ;;  %12662 = vst [vmem:[#allocation106_spill] sm:$0xff] %v11086_v28  ;;  %v11096_v1 = vcombine.low %v3885_v7, %v3889_v30  ;;  %v11098_v63 = vcombine.high %v3885_v7, %v3889_v30  ;;  %v3900_v30 = vld [vmem:[#allocation8 + $0x180] sm:$0xff] }
 0x45e   :  { %4632 = vmatpush1.bf16.msra.mxu0 %v11070_v59  ;;  %4673 = vmatpush1.bf16.msra.mxu1 %v11072_v5  ;;  %v3888_v59 = vld [vmem:[#allocation8 + $0x120] sm:$0xff] }
 0x45f   :  { %4633 = vmatprep.subr.bf16.mxu0 %v11080_v0  ;;  %4674 = vmatprep.subr.bf16.mxu1 %v11086_v28  ;;  %v11092_v5 = vcombine.high %v3884_v45, %v3888_v59  ;;  %v11094_v55 = vcombine.low %v3884_v45, %v3888_v59  ;;  %12665 = vst [vmem:[#allocation107_spill] sm:$0xff] %v11096_v1  ;;  %12666 = vst [vmem:[#allocation110_spill] sm:$0xff] %v11098_v63  ;;  %v3893_v28 = vld [vmem:[#allocation8 + $0x148] sm:$0xff] }
 0x460   :  { %v3897_v0 = vld [vmem:[#allocation8 + $0x168] sm:$0xff] }
 0x461   :  { %12663 = vst [vmem:[#allocation104_spill] sm:$0xff] %v11092_v5  ;;  %12664 = vst [vmem:[#allocation105_spill] sm:$0xff] %v11094_v55  ;;  %v11108_v45 = vcombine.low %v3893_v28, %v3897_v0  ;;  %v11110_v7 = vcombine.high %v3893_v28, %v3897_v0  ;;  %v3908_v28 = vld [vmem:[#allocation8 + $0x1c0] sm:$0xff] }
 0x462   :  { %4634 = vmatpush1.bf16.msra.mxu0 %v11082_v8  ;;  %4675 = vmatpush1.bf16.msra.mxu1 %v11084_v52  ;;  %v3896_v8 = vld [vmem:[#allocation8 + $0x160] sm:$0xff] }
 0x463   :  { %4635 = vmatprep.subr.bf16.mxu0 %v11092_v5  ;;  %4676 = vmatprep.subr.bf16.mxu1 %v11098_v63  ;;  %v11104_v52 = vcombine.high %v3892_v19, %v3896_v8  ;;  %v11106_v59 = vcombine.low %v3892_v19, %v3896_v8  ;;  %12669 = vst [vmem:[#allocation14_spill] sm:$0xff] %v11108_v45  ;;  %12670 = vst [vmem:[#allocation15_spill] sm:$0xff] %v11110_v7  ;;  %v3901_v63 = vld [vmem:[#allocation8 + $0x188] sm:$0xff] }
 0x464   :  { %v3905_v5 = vld [vmem:[#allocation8 + $0x1a8] sm:$0xff] }
 0x465   :  { %12667 = vst [vmem:[#allocation108_spill] sm:$0xff] %v11104_v52  ;;  %12668 = vst [vmem:[#allocation109_spill] sm:$0xff] %v11106_v59  ;;  %v11120_v19 = vcombine.low %v3901_v63, %v3905_v5  ;;  %v11122_v0 = vcombine.high %v3901_v63, %v3905_v5 }
 0x466   :  { %4636 = vmatpush1.bf16.msra.mxu0 %v11094_v55  ;;  %4677 = vmatpush1.bf16.msra.mxu1 %v11096_v1  ;;  %v3904_v55 = vld [vmem:[#allocation8 + $0x1a0] sm:$0xff] }
 0x467   :  { %4637 = vmatprep.subr.bf16.mxu0 %v11104_v52  ;;  %4678 = vmatprep.subr.bf16.mxu1 %v11110_v7  ;;  %v11116_v1 = vcombine.high %v3900_v30, %v3904_v55  ;;  %v11118_v8 = vcombine.low %v3900_v30, %v3904_v55  ;;  %v3909_v7 = vld [vmem:[#allocation8 + $0x1c8] sm:$0xff] }
 0x468   :  { %v3913_v52 = vld [vmem:[#allocation8 + $0x1e8] sm:$0xff] }
 0x469   :  { %v11132_v30 = vcombine.low %v3909_v7, %v3913_v52  ;;  %v11134_v5 = vcombine.high %v3909_v7, %v3913_v52 }
 0x46a   :  { %4638 = vmatpush1.bf16.msra.mxu0 %v11106_v59  ;;  %4679 = vmatpush1.bf16.msra.mxu1 %v11108_v45  ;;  %v3912_v59 = vld [vmem:[#allocation8 + $0x1e0] sm:$0xff] }
 0x46b   :  { %4639 = vmatprep.subr.bf16.mxu0 %v11116_v1  ;;  %4680 = vmatprep.subr.bf16.mxu1 %v11122_v0  ;;  %v11128_v45 = vcombine.high %v3908_v28, %v3912_v59  ;;  %v11130_v55 = vcombine.low %v3908_v28, %v3912_v59 }
 0x46e   :  { %4640 = vmatpush1.bf16.msra.mxu0 %v11118_v8  ;;  %4681 = vmatpush1.bf16.msra.mxu1 %v11120_v19 }
 0x46f   :  { %4641 = vmatprep.subr.bf16.mxu0 %v11128_v45  ;;  %4682 = vmatprep.subr.bf16.mxu1 %v11134_v5 }
 0x472   :  { %4642 = vmatpush1.bf16.msra.mxu0 %v11130_v55  ;;  %4683 = vmatpush1.bf16.msra.mxu1 %v11132_v30 }
 0x473   :  { %4643 = vmatprep.subr.bf16.mxu0 %v10731_v10  ;;  %4684 = vmatprep.subr.bf16.mxu1 %v10737_v23 }
 0x476   :  { %4644 = vmatpush1.bf16.msra.mxu0 %v10733_v12  ;;  %4685 = vmatpush1.bf16.msra.mxu1 %v10735_v25  ;;  %v12671_v25 = vld [vmem:[#allocation18_spill] sm:$0xff] }
 0x477   :  { %4645 = vmatprep.subr.bf16.mxu0 %v10743_v37  ;;  %4686 = vmatprep.subr.bf16.mxu1 %v10749_v18  ;;  %v12672_v37 = vld [vmem:[#allocation19_spill] sm:$0xff] }
 0x47a   :  { %4646 = vmatpush1.bf16.msra.mxu0 %v10745_v13  ;;  %4687 = vmatpush1.bf16.msra.mxu1 %v10747_v14 }
 0x47b   :  { %4647 = vmatprep.subr.bf16.mxu0 %v10755_v26  ;;  %4688 = vmatprep.subr.bf16.mxu1 %v10761_v39  ;;  %v12673_v26 = vld [vmem:[#allocation20_spill] sm:$0xff] }
 0x47e   :  { %4648 = vmatpush1.bf16.msra.mxu0 %v10757_v34  ;;  %4689 = vmatpush1.bf16.msra.mxu1 %v10759_v36  ;;  %v12674_v36 = vld [vmem:[#allocation21_spill] sm:$0xff] }
 0x47f   :  { %4649 = vmatprep.subr.bf16.mxu0 %v10767_v32  ;;  %4690 = vmatprep.subr.bf16.mxu1 %v10773_v47 }
 0x482   :  { %4650 = vmatpush1.bf16.msra.mxu0 %v10769_v54  ;;  %4691 = vmatpush1.bf16.msra.mxu1 %v10771_v58 }
 0x483   :  { %4651 = vmatprep.subr.bf16.mxu0 %v10779_v48  ;;  %4692 = vmatprep.subr.bf16.mxu1 %v10785_v9 }
 0x486   :  { %4652 = vmatpush1.bf16.msra.mxu0 %v10781_v11  ;;  %4693 = vmatpush1.bf16.msra.mxu1 %v10783_v62 }
 0x487   :  { %4653 = vmatprep.subr.bf16.mxu0 %v10791_v15  ;;  %4694 = vmatprep.subr.bf16.mxu1 %v10797_v43 }
 0x48a   :  { %4654 = vmatpush1.bf16.msra.mxu0 %v10793_v41  ;;  %4695 = vmatpush1.bf16.msra.mxu1 %v10795_v50 }
 0x48b   :  { %4655 = vmatprep.subr.bf16.mxu0 %v10805_v51  ;;  %4696 = vmatprep.subr.bf16.mxu1 %v10809_v2 }
 0x48e   :  { %4656 = vmatpush1.bf16.msra.mxu0 %v10803_v49  ;;  %4697 = vmatpush1.bf16.msra.mxu1 %v10807_v61 }
 0x48f   :  { %4657 = vmatprep.subr.bf16.mxu0 %v10811_v4  ;;  %4698 = vmatprep.subr.bf16.mxu1 %v10814_v38 }
 0x492   :  { %4658 = vmatpush1.bf16.msra.mxu0 %v10818_v16  ;;  %4699 = vmatpush1.bf16.msra.mxu1 %v10822_v56 }
 0x493   :  { %4709 = vmatprep.subr.bf16.mxu0 %v10827_v21  ;;  %4750 = vmatprep.subr.bf16.mxu1 %v10833_v42 }
 0x4e8   :  { %v3648_v10 = vpop.f32.mrb[36].mxu0  ;;  %v3689_v12 = vpop.f32.mrb[36].mxu1 }
 0x4e9   :  { %v3789_v23 = vadd.f32 %v3648_v10, %v12671_v25  ;;  %v3791_v13 = vadd.f32 %v3689_v12, %v12672_v37  ;;  %v3650_v14 = vpop.f32.mrb[37].mxu0  ;;  %v3691_v18 = vpop.f32.mrb[37].mxu1 }
 0x4ea   :  { %v3790_v34 = vadd.f32 %v3650_v14, %v12673_v26  ;;  %v3792_v39 = vadd.f32 %v3691_v18, %v12674_v36  ;;  %v3652_v32 = vpop.f32.mrb[38].mxu0  ;;  %v3693_v54 = vpop.f32.mrb[38].mxu1 }
 0x4eb   :  { %v8897_v58 = vmul.f32 -1.442695, %v3789_v23  ;;  %v3653_v47 = vpop.f32.mrb[39].mxu0  ;;  %v3694_v48 = vpop.f32.mrb[39].mxu1  ;;  %v8899_v62 = vmul.f32 -1.442695, %v3791_v13 }
 0x4ec   :  { %v8898_v11 = vmul.f32 -1.442695, %v3790_v34 }
 0x4ed   :  { %9672 = vpow2.f32 %v8897_v58 }
 0x4ee   :  { %9674 = vpow2.f32 %v8898_v11 }
 0x4ef   :  { %9676 = vtanh.f32 %v3792_v39 }
 0x4f0   :  { %9678 = vpow2.f32 %v8899_v62 }
 0x4f7   :  { %v9673_v9 = vpop.eup %9672 }
 0x4f8   :  { %v3832_v15 = vadd.f32 1.0, %v9673_v9  ;;  %v9675_v41 = vpop.eup %9674 }
 0x4f9   :  { %v3833_v50 = vadd.f32 1.0, %v9675_v41  ;;  %v9677_v43 = vpop.eup %9676 }
 0x4fa   :  { %9680 = vrcp.f32 %v3832_v15  ;;  %v9679_v49 = vpop.eup %9678 }
 0x4fb   :  { %9682 = vrcp.f32 %v3833_v50  ;;  %v3834_v4 = vadd.f32 1.0, %v9679_v49 }
 0x4fd   :  { %9684 = vrcp.f32 %v3834_v4 }
 0x504   :  { %v9681_v51 = vpop.eup %9680 }
 0x505   :  { %v3844_v61 = vmul.f32 %v9681_v51, %v9677_v43  ;;  %v9683_v2 = vpop.eup %9682 }
 0x506   :  { %v3843_v38 = vmul.f32 %v9683_v2, %v10842_v35 }
 0x507   :  { %v9685_v56 = vpop.eup %9684 }
 0x508   :  { %v11179_v16 = vadd.f32 %v3844_v61, %v3843_v38  ;;  %v12676_v38 = vld [vmem:[#allocation39_spill] sm:$0xff] }
 0x50a   :  { %9686 = vtanh.f32 %v11179_v16 }
 0x514   :  { %v9687_v21 = vpop.eup %9686 }
 0x515   :  { %v3847_v42 = vmul.f32 %v9687_v21, %v9685_v56  ;;  %v12677_v56 = vld [vmem:[#allocation40_spill] sm:$0xff]  ;;  %v12678_v21 = vld [vmem:[#allocation41_spill] sm:$0xff] }
 0x517   :  { %v3849_v52 = vpack.c.bf16 %v3847_v42, %v3847_v42  ;;  %v12679_v42 = vld [vmem:[#allocation42_spill] sm:$0xff] }
 0x519   :  { %3850 = vst [vmem:[#allocation3] sm:$0xf] %v3849_v52  ;;  %v12680_v52 = vld [vmem:[#allocation43_spill] sm:$0xff] }
 0x528   :  { %v3730_v63 = vpop.f32.mrb[40].mxu0  ;;  %v3771_v59 = vpop.f32.mrb[40].mxu1 }
 0x529   :  { %v3778_v7 = vadd.f32 %v3730_v63, %v10607_v27  ;;  %v3732_v28 = vpop.f32.mrb[41].mxu0  ;;  %v3773_v10 = vpop.f32.mrb[41].mxu1  ;;  %v3780_v18 = vadd.f32 %v3771_v59, %v10617_v57  ;;  %v12681_v63 = vld [vmem:[#allocation44_spill] sm:$0xff]  ;;  %v12684_v59 = vld [vmem:[#allocation47_spill] sm:$0xff] }
 0x52a   :  { %v3779_v12 = vadd.f32 %v3732_v28, %v10611_v33  ;;  %v3734_v25 = vpop.f32.mrb[42].mxu0  ;;  %v3775_v35 = vpop.f32.mrb[42].mxu1  ;;  %v3781_v26 = vadd.f32 %v3773_v10, %v10621_v60  ;;  %v12687_v28 = vld [vmem:[#allocation50_spill] sm:$0xff]  ;;  %v12688_v10 = vld [vmem:[#allocation51_spill] sm:$0xff] }
 0x52b   :  { %v8893_v23 = vmul.f32 -1.442695, %v3778_v7  ;;  %v3735_v37 = vpop.f32.mrb[43].mxu0  ;;  %v3776_v13 = vpop.f32.mrb[43].mxu1  ;;  %v8895_v34 = vmul.f32 -1.442695, %v3780_v18 }
 0x52c   :  { %v8894_v14 = vmul.f32 -1.442695, %v3779_v12  ;;  %v12686_v7 = vld [vmem:[#allocation49_spill] sm:$0xff]  ;;  %v12689_v12 = vld [vmem:[#allocation52_spill] sm:$0xff]  ;;  %v12691_v35 = vld [vmem:[#allocation54_spill] sm:$0xff] }
 0x52d   :  { %9688 = vpow2.f32 %v8893_v23  ;;  %v12690_v25 = vld [vmem:[#allocation53_spill] sm:$0xff]  ;;  %v12692_v23 = vld [vmem:[#allocation55_spill] sm:$0xff]  ;;  %v12693_v37 = vld [vmem:[#allocation56_spill] sm:$0xff] }
 0x52e   :  { %9690 = vpow2.f32 %v8894_v14  ;;  %v12694_v13 = vld [vmem:[#allocation57_spill] sm:$0xff]  ;;  %v12695_v14 = vld [vmem:[#allocation58_spill] sm:$0xff]  ;;  %v12696_v18 = vld [vmem:[#allocation59_spill] sm:$0xff] }
 0x52f   :  { %9692 = vtanh.f32 %v3781_v26  ;;  %v12697_v26 = vld [vmem:[#allocation60_spill] sm:$0xff] }
 0x530   :  { %9694 = vpow2.f32 %v8895_v34  ;;  %v12698_v34 = vld [vmem:[#allocation61_spill] sm:$0xff] }
 0x537   :  { %v9689_v36 = vpop.eup %9688 }
 0x538   :  { %v3802_v39 = vadd.f32 1.0, %v9689_v36  ;;  %v9691_v32 = vpop.eup %9690  ;;  %v12699_v36 = vld [vmem:[#allocation62_spill] sm:$0xff] }
 0x539   :  { %v3803_v54 = vadd.f32 1.0, %v9691_v32  ;;  %v9693_v58 = vpop.eup %9692  ;;  %v12701_v32 = vld [vmem:[#allocation64_spill] sm:$0xff] }
 0x53a   :  { %9696 = vrcp.f32 %v3802_v39  ;;  %v9695_v47 = vpop.eup %9694  ;;  %v12700_v39 = vld [vmem:[#allocation63_spill] sm:$0xff] }
 0x53b   :  { %9698 = vrcp.f32 %v3803_v54  ;;  %v3804_v9 = vadd.f32 1.0, %v9695_v47  ;;  %v12702_v54 = vld [vmem:[#allocation65_spill] sm:$0xff]  ;;  %v12704_v47 = vld [vmem:[#allocation67_spill] sm:$0xff] }
 0x53d   :  { %9700 = vrcp.f32 %v3804_v9  ;;  %v12708_v9 = vld [vmem:[#allocation71_spill] sm:$0xff] }
 0x544   :  { %v9697_v48 = vpop.eup %9696 }
 0x545   :  { %v3814_v11 = vmul.f32 %v9697_v48, %v9693_v58  ;;  %v9699_v62 = vpop.eup %9698  ;;  %v12703_v58 = vld [vmem:[#allocation66_spill] sm:$0xff]  ;;  %v12705_v48 = vld [vmem:[#allocation68_spill] sm:$0xff] }
 0x546   :  { %v3813_v15 = vmul.f32 %v9699_v62, %v10850_v53  ;;  %v12675_v53 = vld [vmem:[#allocation38_spill] sm:$0xff] }
 0x547   :  { %v9701_v50 = vpop.eup %9700  ;;  %v12707_v62 = vld [vmem:[#allocation70_spill] sm:$0xff] }
 0x548   :  { %v11187_v41 = vadd.f32 %v3814_v11, %v3813_v15  ;;  %v12706_v11 = vld [vmem:[#allocation69_spill] sm:$0xff]  ;;  %v12709_v15 = vld [vmem:[#allocation72_spill] sm:$0xff] }
 0x54a   :  { %9702 = vtanh.f32 %v11187_v41 }
 0x554   :  { %v9703_v43 = vpop.eup %9702 }
 0x555   :  { %v3817_v49 = vmul.f32 %v9703_v43, %v9701_v50  ;;  %v12710_v50 = vld [vmem:[#allocation73_spill] sm:$0xff]  ;;  %v12711_v43 = vld [vmem:[#allocation74_spill] sm:$0xff] }
 0x557   :  { %v3819_v51 = vpack.c.bf16 %v3817_v49, %v3817_v49  ;;  %v12712_v49 = vld [vmem:[#allocation75_spill] sm:$0xff] }
 0x559   :  { %3820 = vst [vmem:[#allocation3 + $0x4] sm:$0xf] %v3819_v51  ;;  %8896 = vst [vmem:[%s12161_s5 + $0x8] sm:$0xf] %v3819_v51  ;;  %v12713_v51 = vld [vmem:[#allocation76_spill] sm:$0xff] }
 0x560   :  { %v3851_v61 = vld [vmem:[#allocation3] sm:$0xff] }
 0x561   :  { %v8901_v2 = vcombine.high %v3851_v61, %v3851_v61  ;;  %v11193_v4 = vcombine.low %v3851_v61, %v3851_v61  ;;  %v12714_v61 = vld [vmem:[#allocation77_spill] sm:$0xff] }
 0x563   :  { %4659 = vmatprep.mubr.bf16.mxu0 %v8901_v2  ;;  %4700 = vmatprep.mubr.bf16.mxu1 %v8901_v2 }
 0x564   :  { %4660 = vmatmul.mubr.bf16.vlgmr.msra.gmra.mrb[44].mxu0 %v11193_v4  ;;  %4701 = vmatmul.mubr.bf16.vlgmr.msra.gmra.mrb[44].mxu1 %v11193_v4 }
 0x565   :  { %4710 = vmatpush1.bf16.msra.mxu0 %v10829_v29  ;;  %4751 = vmatpush1.bf16.msra.mxu1 %v10831_v40  ;;  %v12682_v29 = vld [vmem:[#allocation45_spill] sm:$0xff]  ;;  %v12683_v40 = vld [vmem:[#allocation46_spill] sm:$0xff] }
 0x566   :  { %4741 = vmatprep.mubr.bf16.mxu0 %v8901_v2  ;;  %4782 = vmatprep.mubr.bf16.mxu1 %v8901_v2  ;;  %v12715_v2 = vld [vmem:[#allocation78_spill] sm:$0xff] }
 0x567   :  { %4711 = vmatprep.subr.bf16.mxu0 %v10858_v31  ;;  %4752 = vmatprep.subr.bf16.mxu1 %v12675_v53  ;;  %v12685_v31 = vld [vmem:[#allocation48_spill] sm:$0xff]  ;;  %v12716_v53 = vld [vmem:[#allocation79_spill] sm:$0xff] }
 0x569   :  { %4712 = vmatpush1.bf16.msra.mxu0 %v12676_v38  ;;  %4753 = vmatpush1.bf16.msra.mxu1 %v12677_v56  ;;  %v12717_v38 = vld [vmem:[#allocation80_spill] sm:$0xff]  ;;  %v12718_v56 = vld [vmem:[#allocation81_spill] sm:$0xff] }
 0x56a   :  { %4713 = vmatprep.subr.bf16.mxu0 %v12678_v21  ;;  %4754 = vmatprep.subr.bf16.mxu1 %v12679_v42  ;;  %v12719_v21 = vld [vmem:[#allocation82_spill] sm:$0xff]  ;;  %v12720_v42 = vld [vmem:[#allocation83_spill] sm:$0xff] }
 0x56d   :  { %4714 = vmatpush1.bf16.msra.mxu0 %v12680_v52  ;;  %4755 = vmatpush1.bf16.msra.mxu1 %v12681_v63  ;;  %v12721_v52 = vld [vmem:[#allocation84_spill] sm:$0xff]  ;;  %v12722_v63 = vld [vmem:[#allocation85_spill] sm:$0xff] }
 0x56e   :  { %4715 = vmatprep.subr.bf16.mxu0 %v12682_v29  ;;  %4756 = vmatprep.subr.bf16.mxu1 %v12683_v40  ;;  %v12723_v29 = vld [vmem:[#allocation86_spill] sm:$0xff] }
 0x56f   :  { %v12727_v40 = vld [vmem:[#allocation90_spill] sm:$0xff] }
 0x571   :  { %4716 = vmatpush1.bf16.msra.mxu0 %v12684_v59  ;;  %4757 = vmatpush1.bf16.msra.mxu1 %v12685_v31  ;;  %v12728_v59 = vld [vmem:[#allocation93_spill] sm:$0xff]  ;;  %v12733_v31 = vld [vmem:[#allocation98_spill] sm:$0xff] }
 0x572   :  { %4717 = vmatprep.subr.bf16.mxu0 %v12686_v7  ;;  %4758 = vmatprep.subr.bf16.mxu1 %v12687_v28  ;;  %v12734_v7 = vld [vmem:[#allocation96_spill] sm:$0xff]  ;;  %v12735_v28 = vld [vmem:[#allocation102_spill] sm:$0xff] }
 0x575   :  { %4718 = vmatpush1.bf16.msra.mxu0 %v12688_v10  ;;  %4759 = vmatpush1.bf16.msra.mxu1 %v12689_v12  ;;  %v12736_v10 = vld [vmem:[#allocation97_spill] sm:$0xff]  ;;  %v12737_v12 = vld [vmem:[#allocation99_spill] sm:$0xff] }
 0x576   :  { %4719 = vmatprep.subr.bf16.mxu0 %v12690_v25  ;;  %4760 = vmatprep.subr.bf16.mxu1 %v12691_v35  ;;  %v12739_v25 = vld [vmem:[#allocation106_spill] sm:$0xff]  ;;  %v12740_v35 = vld [vmem:[#allocation101_spill] sm:$0xff] }
 0x579   :  { %4720 = vmatpush1.bf16.msra.mxu0 %v12692_v23  ;;  %4761 = vmatpush1.bf16.msra.mxu1 %v12693_v37  ;;  %v12742_v23 = vld [vmem:[#allocation104_spill] sm:$0xff]  ;;  %v12743_v37 = vld [vmem:[#allocation110_spill] sm:$0xff] }
 0x57a   :  { %4721 = vmatprep.subr.bf16.mxu0 %v12694_v13  ;;  %4762 = vmatprep.subr.bf16.mxu1 %v12695_v14  ;;  %v12744_v13 = vld [vmem:[#allocation105_spill] sm:$0xff]  ;;  %v12745_v14 = vld [vmem:[#allocation107_spill] sm:$0xff] }
 0x57d   :  { %4722 = vmatpush1.bf16.msra.mxu0 %v12696_v18  ;;  %4763 = vmatpush1.bf16.msra.mxu1 %v12697_v26  ;;  %v12746_v18 = vld [vmem:[#allocation108_spill] sm:$0xff]  ;;  %v12747_v26 = vld [vmem:[#allocation15_spill] sm:$0xff] }
 0x57e   :  { %4723 = vmatprep.subr.bf16.mxu0 %v12698_v34  ;;  %4764 = vmatprep.subr.bf16.mxu1 %v12699_v36  ;;  %v12748_v34 = vld [vmem:[#allocation109_spill] sm:$0xff]  ;;  %v12749_v36 = vld [vmem:[#allocation14_spill] sm:$0xff] }
 0x581   :  { %4724 = vmatpush1.bf16.msra.mxu0 %v12700_v39  ;;  %4765 = vmatpush1.bf16.msra.mxu1 %v12701_v32  ;;  %v4929_v39 = vld [vmem:[#allocation8 + $0x200] sm:$0xff] }
 0x582   :  { %4725 = vmatprep.subr.bf16.mxu0 %v12702_v54  ;;  %4766 = vmatprep.subr.bf16.mxu1 %v12703_v58  ;;  %v4933_v32 = vld [vmem:[#allocation8 + $0x220] sm:$0xff]  ;;  %v4930_v54 = vld [vmem:[#allocation8 + $0x208] sm:$0xff] }
 0x583   :  { %v11293_v58 = vcombine.high %v4929_v39, %v4933_v32 }
 0x585   :  { %4726 = vmatpush1.bf16.msra.mxu0 %v12704_v47  ;;  %4767 = vmatpush1.bf16.msra.mxu1 %v12705_v48  ;;  %v11295_v47 = vcombine.low %v4929_v39, %v4933_v32  ;;  %v4986_v32 = vld [vmem:[#allocation8 + $0x3c8] sm:$0xff] }
 0x586   :  { %4727 = vmatprep.subr.bf16.mxu0 %v12706_v11  ;;  %4768 = vmatprep.subr.bf16.mxu1 %v12707_v62 }
 0x589   :  { %4728 = vmatpush1.bf16.msra.mxu0 %v12708_v9  ;;  %4769 = vmatpush1.bf16.msra.mxu1 %v12709_v15  ;;  %v4945_v9 = vld [vmem:[#allocation8 + $0x280] sm:$0xff] }
 0x58a   :  { %4729 = vmatprep.subr.bf16.mxu0 %v12710_v50  ;;  %4770 = vmatprep.subr.bf16.mxu1 %v12711_v43  ;;  %v4949_v15 = vld [vmem:[#allocation8 + $0x2a0] sm:$0xff]  ;;  %v4946_v50 = vld [vmem:[#allocation8 + $0x288] sm:$0xff] }
 0x58b   :  { %v11317_v43 = vcombine.high %v4945_v9, %v4949_v15 }
 0x58d   :  { %4730 = vmatpush1.bf16.msra.mxu0 %v12712_v49  ;;  %4771 = vmatpush1.bf16.msra.mxu1 %v12713_v51  ;;  %v4950_v49 = vld [vmem:[#allocation8 + $0x2a8] sm:$0xff]  ;;  %v11319_v51 = vcombine.low %v4945_v9, %v4949_v15  ;;  %v4868_v9 = vld [vmem:[#allocation8 + $0x18] sm:$0xff] }
 0x58e   :  { %4731 = vmatprep.subr.bf16.mxu0 %v12714_v61  ;;  %4772 = vmatprep.subr.bf16.mxu1 %v12715_v2  ;;  %v11321_v61 = vcombine.low %v4946_v50, %v4950_v49  ;;  %v11323_v2 = vcombine.high %v4946_v50, %v4950_v49  ;;  %v4872_v50 = vld [vmem:[#allocation8 + $0x38] sm:$0xff] }
 0x591   :  { %4732 = vmatpush1.bf16.msra.mxu0 %v12716_v53  ;;  %4773 = vmatpush1.bf16.msra.mxu1 %v12717_v38  ;;  %v4953_v53 = vld [vmem:[#allocation8 + $0x2c0] sm:$0xff] }
 0x592   :  { %4733 = vmatprep.subr.bf16.mxu0 %v12718_v56  ;;  %4774 = vmatprep.subr.bf16.mxu1 %v12719_v21  ;;  %v4957_v38 = vld [vmem:[#allocation8 + $0x2e0] sm:$0xff]  ;;  %v4954_v56 = vld [vmem:[#allocation8 + $0x2c8] sm:$0xff] }
 0x593   :  { %v11329_v21 = vcombine.high %v4953_v53, %v4957_v38 }
 0x595   :  { %4734 = vmatpush1.bf16.msra.mxu0 %v10998_v22  ;;  %4775 = vmatpush1.bf16.msra.mxu1 %v11000_v24  ;;  %v12724_v22 = vld [vmem:[#allocation87_spill] sm:$0xff]  ;;  %v12725_v24 = vld [vmem:[#allocation89_spill] sm:$0xff] }
 0x596   :  { %4735 = vmatprep.subr.bf16.mxu0 %v11004_v20  ;;  %4776 = vmatprep.subr.bf16.mxu1 %v12720_v42  ;;  %v12726_v20 = vld [vmem:[#allocation91_spill] sm:$0xff]  ;;  %v4958_v42 = vld [vmem:[#allocation8 + $0x2e8] sm:$0xff] }
 0x599   :  { %4736 = vmatpush1.bf16.msra.mxu0 %v12721_v52  ;;  %4777 = vmatpush1.bf16.msra.mxu1 %v11012_v44  ;;  %v12729_v44 = vld [vmem:[#allocation88_spill] sm:$0xff]  ;;  %v11331_v52 = vcombine.low %v4953_v53, %v4957_v38  ;;  %v11393_v53 = vcombine.low %v4868_v9, %v4872_v50  ;;  %v11395_v38 = vcombine.high %v4868_v9, %v4872_v50 }
 0x59a   :  { %4737 = vmatprep.subr.bf16.mxu0 %v11016_v3  ;;  %4778 = vmatprep.subr.bf16.mxu1 %v11018_v46  ;;  %v12730_v3 = vld [vmem:[#allocation92_spill] sm:$0xff]  ;;  %v12731_v46 = vld [vmem:[#allocation94_spill] sm:$0xff] }
 0x59d   :  { %4738 = vmatpush1.bf16.msra.mxu0 %v11022_v6  ;;  %4779 = vmatpush1.bf16.msra.mxu1 %v12722_v63  ;;  %v12732_v6 = vld [vmem:[#allocation95_spill] sm:$0xff]  ;;  %v11333_v63 = vcombine.low %v4954_v56, %v4958_v42 }
 0x59e   :  { %4739 = vmatprep.subr.bf16.mxu0 %v12723_v29  ;;  %4780 = vmatprep.subr.bf16.mxu1 %v12724_v22  ;;  %v11335_v29 = vcombine.high %v4954_v56, %v4958_v42  ;;  %v4961_v22 = vld [vmem:[#allocation8 + $0x300] sm:$0xff] }
 0x5a1   :  { %4740 = vmatpush1.bf16.msra.mxu0 %v12725_v24  ;;  %4781 = vmatpush1.bf16.msra.mxu1 %v12726_v20  ;;  %v4965_v24 = vld [vmem:[#allocation8 + $0x320] sm:$0xff]  ;;  %v4962_v20 = vld [vmem:[#allocation8 + $0x308] sm:$0xff] }
 0x5a2   :  { %5640 = vmatprep.subr.bf16.mxu0 %v12727_v40  ;;  %5681 = vmatprep.subr.bf16.mxu1 %v12728_v59  ;;  %v11341_v40 = vcombine.high %v4961_v22, %v4965_v24  ;;  %v4966_v59 = vld [vmem:[#allocation8 + $0x328] sm:$0xff] }
 0x5a4   :  { %4742 = vmatmul.mubr.bf16.vlgmr.msra.gmra.mrb[48].mxu0 %v11193_v4  ;;  %4783 = vmatmul.mubr.bf16.vlgmr.msra.gmra.mrb[48].mxu1 %v11193_v4  ;;  %v12738_v4 = vld [vmem:[#allocation100_spill] sm:$0xff] }
 0x5a5   :  { %5641 = vmatpush1.bf16.msra.mxu0 %v12729_v44  ;;  %5682 = vmatpush1.bf16.msra.mxu1 %v12730_v3  ;;  %v11343_v44 = vcombine.low %v4961_v22, %v4965_v24  ;;  %v11345_v3 = vcombine.low %v4962_v20, %v4966_v59  ;;  %v12750_v22 = vld [vmem:[#allocation22_spill] sm:$0xff] }
 0x5a6   :  { %5642 = vmatprep.subr.bf16.mxu0 %v11052_v17  ;;  %5683 = vmatprep.subr.bf16.mxu1 %v12731_v46  ;;  %v12741_v17 = vld [vmem:[#allocation103_spill] sm:$0xff]  ;;  %v11347_v46 = vcombine.high %v4962_v20, %v4966_v59 }
 0x5a7   :  { %v12751_v20 = vld [vmem:[#allocation23_spill] sm:$0xff] }
 0x5a9   :  { %5643 = vmatpush1.bf16.msra.mxu0 %v12732_v6  ;;  %5684 = vmatpush1.bf16.msra.mxu1 %v12733_v31  ;;  %v4969_v6 = vld [vmem:[#allocation8 + $0x340] sm:$0xff] }
 0x5aa   :  { %5644 = vmatprep.subr.bf16.mxu0 %v12734_v7  ;;  %5685 = vmatprep.subr.bf16.mxu1 %v12735_v28  ;;  %v4973_v31 = vld [vmem:[#allocation8 + $0x360] sm:$0xff]  ;;  %v4970_v7 = vld [vmem:[#allocation8 + $0x348] sm:$0xff] }
 0x5ab   :  { %v11353_v28 = vcombine.high %v4969_v6, %v4973_v31 }
 0x5ad   :  { %5645 = vmatpush1.bf16.msra.mxu0 %v12736_v10  ;;  %5686 = vmatpush1.bf16.msra.mxu1 %v12737_v12  ;;  %v4974_v10 = vld [vmem:[#allocation8 + $0x368] sm:$0xff]  ;;  %v11355_v12 = vcombine.low %v4969_v6, %v4973_v31 }
 0x5ae   :  { %5646 = vmatprep.subr.bf16.mxu0 %v12738_v4  ;;  %5687 = vmatprep.subr.bf16.mxu1 %v12739_v25  ;;  %v11357_v4 = vcombine.low %v4970_v7, %v4974_v10  ;;  %v11359_v25 = vcombine.high %v4970_v7, %v4974_v10  ;;  %v12752_v7 = vld [vmem:[#allocation24_spill] sm:$0xff] }
 0x5b1   :  { %5647 = vmatpush1.bf16.msra.mxu0 %v12740_v35  ;;  %5688 = vmatpush1.bf16.msra.mxu1 %v12741_v17  ;;  %v4977_v35 = vld [vmem:[#allocation8 + $0x380] sm:$0xff] }
 0x5b2   :  { %5648 = vmatprep.subr.bf16.mxu0 %v12742_v23  ;;  %5689 = vmatprep.subr.bf16.mxu1 %v12743_v37  ;;  %v4981_v17 = vld [vmem:[#allocation8 + $0x3a0] sm:$0xff]  ;;  %v4978_v23 = vld [vmem:[#allocation8 + $0x388] sm:$0xff] }
 0x5b3   :  { %v11365_v37 = vcombine.low %v4977_v35, %v4981_v17 }
 0x5b5   :  { %5649 = vmatpush1.bf16.msra.mxu0 %v12744_v13  ;;  %5690 = vmatpush1.bf16.msra.mxu1 %v12745_v14  ;;  %v11367_v13 = vcombine.high %v4977_v35, %v4981_v17  ;;  %v4982_v14 = vld [vmem:[#allocation8 + $0x3a8] sm:$0xff] }
 0x5b6   :  { %5650 = vmatprep.subr.bf16.mxu0 %v12746_v18  ;;  %5691 = vmatprep.subr.bf16.mxu1 %v12747_v26  ;;  %v4985_v18 = vld [vmem:[#allocation8 + $0x3c0] sm:$0xff]  ;;  %v12753_v35 = vld [vmem:[#allocation25_spill] sm:$0xff] }
 0x5b7   :  { %v4989_v26 = vld [vmem:[#allocation8 + $0x3e0] sm:$0xff] }
 0x5b8   :  { %v11373_v39 = vcombine.high %v4985_v18, %v4989_v26 }
 0x5b9   :  { %5651 = vmatpush1.bf16.msra.mxu0 %v12748_v34  ;;  %5692 = vmatpush1.bf16.msra.mxu1 %v12749_v36  ;;  %v11369_v34 = vcombine.low %v4978_v23, %v4982_v14  ;;  %v11371_v36 = vcombine.high %v4978_v23, %v4982_v14 }
 0x5ba   :  { %5652 = vmatprep.subr.bf16.mxu0 %v11116_v1  ;;  %5693 = vmatprep.subr.bf16.mxu1 %v11122_v0  ;;  %v4934_v1 = vld [vmem:[#allocation8 + $0x228] sm:$0xff] }
 0x5bb   :  { %v11297_v0 = vcombine.low %v4930_v54, %v4934_v1 }
 0x5bd   :  { %5653 = vmatpush1.bf16.msra.mxu0 %v11118_v8  ;;  %5694 = vmatpush1.bf16.msra.mxu1 %v11120_v19  ;;  %v11299_v8 = vcombine.high %v4930_v54, %v4934_v1  ;;  %v4941_v19 = vld [vmem:[#allocation8 + $0x260] sm:$0xff]  ;;  %v4990_v54 = vld [vmem:[#allocation8 + $0x3e8] sm:$0xff] }
 0x5be   :  { %5654 = vmatprep.subr.bf16.mxu0 %v11128_v45  ;;  %5695 = vmatprep.subr.bf16.mxu1 %v11134_v5  ;;  %v4937_v45 = vld [vmem:[#allocation8 + $0x240] sm:$0xff]  ;;  %v4942_v5 = vld [vmem:[#allocation8 + $0x268] sm:$0xff]  ;;  %v11376_v1 = vcombine.high %v4986_v32, %v4990_v54 }
 0x5bf   :  { %v11307_v48 = vcombine.low %v4937_v45, %v4941_v19 }
 0x5c1   :  { %5655 = vmatpush1.bf16.msra.mxu0 %v11130_v55  ;;  %5696 = vmatpush1.bf16.msra.mxu1 %v11132_v30  ;;  %v4938_v55 = vld [vmem:[#allocation8 + $0x248] sm:$0xff]  ;;  %v11305_v30 = vcombine.high %v4937_v45, %v4941_v19  ;;  %v11380_v45 = vcombine.low %v4985_v18, %v4989_v26  ;;  %v11384_v19 = vcombine.low %v4986_v32, %v4990_v54 }
 0x5c2   :  { %5656 = vmatprep.subr.bf16.mxu0 %v11293_v58  ;;  %5697 = vmatprep.subr.bf16.mxu1 %v11299_v8  ;;  %v11309_v11 = vcombine.low %v4938_v55, %v4942_v5  ;;  %v11311_v62 = vcombine.high %v4938_v55, %v4942_v5  ;;  %v4867_v55 = vld [vmem:[#allocation8 + $0x10] sm:$0xff] }
 0x5c3   :  { %v4871_v5 = vld [vmem:[#allocation8 + $0x30] sm:$0xff] }
 0x5c4   :  { %v11389_v15 = vcombine.high %v4867_v55, %v4871_v5  ;;  %v11391_v49 = vcombine.low %v4867_v55, %v4871_v5 }
 0x5c5   :  { %5657 = vmatpush1.bf16.msra.mxu0 %v11295_v47  ;;  %5698 = vmatpush1.bf16.msra.mxu1 %v11297_v0 }
 0x5c6   :  { %5658 = vmatprep.subr.bf16.mxu0 %v11305_v30  ;;  %5699 = vmatprep.subr.bf16.mxu1 %v11311_v62 }
 0x5c9   :  { %5659 = vmatpush1.bf16.msra.mxu0 %v11307_v48  ;;  %5700 = vmatpush1.bf16.msra.mxu1 %v11309_v11 }
 0x5ca   :  { %5660 = vmatprep.subr.bf16.mxu0 %v11317_v43  ;;  %5701 = vmatprep.subr.bf16.mxu1 %v11323_v2 }
 0x5cd   :  { %5661 = vmatpush1.bf16.msra.mxu0 %v11319_v51  ;;  %5702 = vmatpush1.bf16.msra.mxu1 %v11321_v61 }
 0x5ce   :  { %5662 = vmatprep.subr.bf16.mxu0 %v11329_v21  ;;  %5703 = vmatprep.subr.bf16.mxu1 %v11335_v29 }
 0x5d1   :  { %5663 = vmatpush1.bf16.msra.mxu0 %v11331_v52  ;;  %5704 = vmatpush1.bf16.msra.mxu1 %v11333_v63 }
 0x5d2   :  { %5664 = vmatprep.subr.bf16.mxu0 %v11341_v40  ;;  %5705 = vmatprep.subr.bf16.mxu1 %v11347_v46 }
 0x5d5   :  { %5665 = vmatpush1.bf16.msra.mxu0 %v11343_v44  ;;  %5706 = vmatpush1.bf16.msra.mxu1 %v11345_v3 }
 0x5d6   :  { %5666 = vmatprep.subr.bf16.mxu0 %v11353_v28  ;;  %5707 = vmatprep.subr.bf16.mxu1 %v11359_v25 }
 0x5d9   :  { %5667 = vmatpush1.bf16.msra.mxu0 %v11355_v12  ;;  %5708 = vmatpush1.bf16.msra.mxu1 %v11357_v4 }
 0x5da   :  { %5668 = vmatprep.subr.bf16.mxu0 %v11367_v13  ;;  %5709 = vmatprep.subr.bf16.mxu1 %v11371_v36 }
 0x5dd   :  { %5669 = vmatpush1.bf16.msra.mxu0 %v11365_v37  ;;  %5710 = vmatpush1.bf16.msra.mxu1 %v11369_v34 }
 0x5de   :  { %5670 = vmatprep.subr.bf16.mxu0 %v11373_v39  ;;  %5711 = vmatprep.subr.bf16.mxu1 %v11376_v1 }
 0x5e1   :  { %5671 = vmatpush1.bf16.msra.mxu0 %v11380_v45  ;;  %5712 = vmatpush1.bf16.msra.mxu1 %v11384_v19 }
 0x5e2   :  { %5722 = vmatprep.subr.bf16.mxu0 %v11389_v15  ;;  %5763 = vmatprep.subr.bf16.mxu1 %v11395_v38 }
 0x637   :  { %v4661_v56 = vpop.f32.mrb[44].mxu0  ;;  %v4702_v42 = vpop.f32.mrb[44].mxu1 }
 0x638   :  { %v4802_v24 = vadd.f32 %v4661_v56, %v12750_v22  ;;  %v4804_v59 = vadd.f32 %v4702_v42, %v12751_v20  ;;  %v4663_v6 = vpop.f32.mrb[45].mxu0  ;;  %v4704_v31 = vpop.f32.mrb[45].mxu1 }
 0x639   :  { %v4803_v10 = vadd.f32 %v4663_v6, %v12752_v7  ;;  %v4805_v17 = vadd.f32 %v4704_v31, %v12753_v35  ;;  %v4665_v23 = vpop.f32.mrb[46].mxu0  ;;  %v4706_v14 = vpop.f32.mrb[46].mxu1 }
 0x63a   :  { %v9034_v18 = vmul.f32 -1.442695, %v4802_v24  ;;  %v4666_v26 = vpop.f32.mrb[47].mxu0  ;;  %v4707_v32 = vpop.f32.mrb[47].mxu1  ;;  %v9036_v55 = vmul.f32 -1.442695, %v4804_v59 }
 0x63b   :  { %v9035_v54 = vmul.f32 -1.442695, %v4803_v10 }
 0x63c   :  { %9704 = vpow2.f32 %v9034_v18 }
 0x63d   :  { %9706 = vpow2.f32 %v9035_v54 }
 0x63e   :  { %9708 = vtanh.f32 %v4805_v17 }
 0x63f   :  { %9710 = vpow2.f32 %v9036_v55 }
 0x646   :  { %v9705_v5 = vpop.eup %9704 }
 0x647   :  { %v4845_v9 = vadd.f32 1.0, %v9705_v5  ;;  %v9707_v50 = vpop.eup %9706 }
 0x648   :  { %v4846_v56 = vadd.f32 1.0, %v9707_v50  ;;  %v9709_v42 = vpop.eup %9708 }
 0x649   :  { %9712 = vrcp.f32 %v4845_v9  ;;  %v9711_v22 = vpop.eup %9710 }
 0x64a   :  { %9714 = vrcp.f32 %v4846_v56  ;;  %v4847_v24 = vadd.f32 1.0, %v9711_v22 }
 0x64c   :  { %9716 = vrcp.f32 %v4847_v24 }
 0x653   :  { %v9713_v20 = vpop.eup %9712 }
 0x654   :  { %v4857_v6 = vmul.f32 %v9713_v20, %v9709_v42  ;;  %v9715_v31 = vpop.eup %9714 }
 0x655   :  { %v4856_v7 = vmul.f32 %v9715_v31, %v11179_v16 }
 0x656   :  { %v9717_v59 = vpop.eup %9716 }
 0x657   :  { %v11404_v10 = vadd.f32 %v4857_v6, %v4856_v7 }
 0x659   :  { %9718 = vtanh.f32 %v11404_v10 }
 0x663   :  { %v9719_v35 = vpop.eup %9718 }
 0x664   :  { %v4860_v17 = vmul.f32 %v9719_v35, %v9717_v59 }
 0x666   :  { %v4862_v23 = vpack.c.bf16 %v4860_v17, %v4860_v17 }
 0x668   :  { %4863 = vst [vmem:[#allocation3] sm:$0xf] %v4862_v23 }
 0x677   :  { %v4743_v14 = vpop.f32.mrb[48].mxu0  ;;  %v4784_v18 = vpop.f32.mrb[48].mxu1 }
 0x678   :  { %v4791_v26 = vadd.f32 %v4743_v14, %v10607_v27  ;;  %v4745_v32 = vpop.f32.mrb[49].mxu0  ;;  %v4786_v54 = vpop.f32.mrb[49].mxu1  ;;  %v4793_v22 = vadd.f32 %v4784_v18, %v10617_v57 }
 0x679   :  { %v4792_v55 = vadd.f32 %v4745_v32, %v10611_v33  ;;  %v4747_v5 = vpop.f32.mrb[50].mxu0  ;;  %v4788_v16 = vpop.f32.mrb[50].mxu1  ;;  %v4794_v20 = vadd.f32 %v4786_v54, %v10621_v60 }
 0x67a   :  { %v9030_v9 = vmul.f32 -1.442695, %v4791_v26  ;;  %v4748_v50 = vpop.f32.mrb[51].mxu0  ;;  %v4789_v56 = vpop.f32.mrb[51].mxu1  ;;  %v9032_v6 = vmul.f32 -1.442695, %v4793_v22 }
 0x67b   :  { %v9031_v42 = vmul.f32 -1.442695, %v4792_v55  ;;  %v4875_v50 = vld [vmem:[#allocation8 + $0x50] sm:$0xff]  ;;  %v4876_v22 = vld [vmem:[#allocation8 + $0x58] sm:$0xff] }
 0x67c   :  { %9720 = vpow2.f32 %v9030_v9  ;;  %v4879_v56 = vld [vmem:[#allocation8 + $0x70] sm:$0xff] }
 0x67d   :  { %9722 = vpow2.f32 %v9031_v42 }
 0x67e   :  { %9724 = vtanh.f32 %v4794_v20  ;;  %v4880_v20 = vld [vmem:[#allocation8 + $0x78] sm:$0xff] }
 0x67f   :  { %9726 = vpow2.f32 %v9032_v6 }
 0x686   :  { %v9721_v31 = vpop.eup %9720 }
 0x687   :  { %v4815_v24 = vadd.f32 1.0, %v9721_v31  ;;  %v9723_v7 = vpop.eup %9722  ;;  %v4883_v31 = vld [vmem:[#allocation8 + $0x90] sm:$0xff] }
 0x688   :  { %v4816_v59 = vadd.f32 1.0, %v9723_v7  ;;  %v9725_v35 = vpop.eup %9724  ;;  %v11422_v7 = vcombine.high %v4876_v22, %v4880_v20 }
 0x689   :  { %9728 = vrcp.f32 %v4815_v24  ;;  %v9727_v17 = vpop.eup %9726  ;;  %v11420_v24 = vcombine.high %v4875_v50, %v4879_v56 }
 0x68a   :  { %9730 = vrcp.f32 %v4816_v59  ;;  %v4817_v32 = vadd.f32 1.0, %v9727_v17  ;;  %12754 = vst [vmem:[#allocation16_spill] sm:$0xff] %v11422_v7  ;;  %v4887_v59 = vld [vmem:[#allocation8 + $0xb0] sm:$0xff]  ;;  %v4888_v17 = vld [vmem:[#allocation8 + $0xb8] sm:$0xff] }
 0x68c   :  { %9732 = vrcp.f32 %v4817_v32 }
 0x693   :  { %v9729_v23 = vpop.eup %9728 }
 0x694   :  { %v4827_v14 = vmul.f32 %v9729_v23, %v9725_v35  ;;  %v9731_v26 = vpop.eup %9730  ;;  %v4884_v35 = vld [vmem:[#allocation8 + $0x98] sm:$0xff]  ;;  %v11428_v23 = vcombine.low %v4875_v50, %v4879_v56 }
 0x695   :  { %v4826_v55 = vmul.f32 %v9731_v26, %v11187_v41  ;;  %v11432_v26 = vcombine.high %v4883_v31, %v4887_v59  ;;  %v11434_v32 = vcombine.high %v4884_v35, %v4888_v17  ;;  %v11442_v50 = vcombine.low %v4884_v35, %v4888_v17 }
 0x696   :  { %v9733_v54 = vpop.eup %9732  ;;  %12755 = vst [vmem:[#allocation17_spill] sm:$0xff] %v11428_v23 }
 0x697   :  { %v11412_v18 = vadd.f32 %v4827_v14, %v4826_v55  ;;  %v11430_v14 = vcombine.low %v4876_v22, %v4880_v20  ;;  %12757 = vst [vmem:[#allocation19_spill] sm:$0xff] %v11432_v26  ;;  %12758 = vst [vmem:[#allocation20_spill] sm:$0xff] %v11434_v32  ;;  %v4891_v55 = vld [vmem:[#allocation8 + $0xd0] sm:$0xff] }
 0x698   :  { %12760 = vst [vmem:[#allocation38_spill] sm:$0xff] %v11442_v50  ;;  %v4899_v22 = vld [vmem:[#allocation8 + $0x110] sm:$0xff] }
 0x699   :  { %9734 = vtanh.f32 %v11412_v18  ;;  %12756 = vst [vmem:[#allocation18_spill] sm:$0xff] %v11430_v14  ;;  %v4903_v20 = vld [vmem:[#allocation8 + $0x130] sm:$0xff] }
 0x69a   :  { %v11458_v35 = vcombine.high %v4899_v22, %v4903_v20 }
 0x69c   :  { %12765 = vst [vmem:[#allocation43_spill] sm:$0xff] %v11458_v35 }
 0x6a3   :  { %v9735_v5 = vpop.eup %9734 }
 0x6a4   :  { %v4830_v16 = vmul.f32 %v9735_v5, %v9733_v54  ;;  %v4895_v54 = vld [vmem:[#allocation8 + $0xf0] sm:$0xff]  ;;  %v4892_v5 = vld [vmem:[#allocation8 + $0xd8] sm:$0xff] }
 0x6a5   :  { %v11446_v56 = vcombine.high %v4891_v55, %v4895_v54 }
 0x6a6   :  { %v4832_v9 = vpack.c.bf16 %v4830_v16, %v4830_v16  ;;  %v4896_v16 = vld [vmem:[#allocation8 + $0xf8] sm:$0xff] }
 0x6a7   :  { %12761 = vst [vmem:[#allocation39_spill] sm:$0xff] %v11446_v56 }
 0x6a8   :  { %4833 = vst [vmem:[#allocation3 + $0x4] sm:$0xf] %v4832_v9  ;;  %9033 = vst [vmem:[%s12161_s5 + $0xc] sm:$0xf] %v4832_v9  ;;  %v11440_v9 = vcombine.low %v4883_v31, %v4887_v59  ;;  %v11452_v31 = vcombine.low %v4891_v55, %v4895_v54  ;;  %v11454_v59 = vcombine.low %v4892_v5, %v4896_v16 }
 0x6a9   :  { %v11464_v55 = vcombine.low %v4899_v22, %v4903_v20 }
 0x6aa   :  { %12759 = vst [vmem:[#allocation21_spill] sm:$0xff] %v11440_v9  ;;  %12763 = vst [vmem:[#allocation41_spill] sm:$0xff] %v11452_v31 }
 0x6ab   :  { %12764 = vst [vmem:[#allocation42_spill] sm:$0xff] %v11454_v59  ;;  %12767 = vst [vmem:[#allocation45_spill] sm:$0xff] %v11464_v55 }
 0x6af   :  { %v4864_v42 = vld [vmem:[#allocation3] sm:$0xff] }
 0x6b0   :  { %v9038_v41 = vcombine.high %v4864_v42, %v4864_v42  ;;  %v11418_v6 = vcombine.low %v4864_v42, %v4864_v42  ;;  %v11448_v42 = vcombine.high %v4892_v5, %v4896_v16 }
 0x6b2   :  { %5672 = vmatprep.mubr.bf16.mxu0 %v9038_v41  ;;  %5713 = vmatprep.mubr.bf16.mxu1 %v9038_v41  ;;  %12762 = vst [vmem:[#allocation40_spill] sm:$0xff] %v11448_v42 }
 0x6b3   :  { %5673 = vmatmul.mubr.bf16.vlgmr.msra.gmra.mrb[52].mxu0 %v11418_v6  ;;  %5714 = vmatmul.mubr.bf16.vlgmr.msra.gmra.mrb[52].mxu1 %v11418_v6 }
 0x6b4   :  { %5723 = vmatpush1.bf16.msra.mxu0 %v11391_v49  ;;  %5764 = vmatpush1.bf16.msra.mxu1 %v11393_v53 }
 0x6b5   :  { %5754 = vmatprep.mubr.bf16.mxu0 %v9038_v41  ;;  %5795 = vmatprep.mubr.bf16.mxu1 %v9038_v41  ;;  %v4900_v41 = vld [vmem:[#allocation8 + $0x118] sm:$0xff] }
 0x6b6   :  { %5724 = vmatprep.subr.bf16.mxu0 %v11420_v24  ;;  %5765 = vmatprep.subr.bf16.mxu1 %v11422_v7  ;;  %v4904_v7 = vld [vmem:[#allocation8 + $0x138] sm:$0xff] }
 0x6b7   :  { %v11460_v17 = vcombine.high %v4900_v41, %v4904_v7  ;;  %v11466_v54 = vcombine.low %v4900_v41, %v4904_v7 }
 0x6b8   :  { %5725 = vmatpush1.bf16.msra.mxu0 %v11428_v23  ;;  %5766 = vmatpush1.bf16.msra.mxu1 %v11430_v14  ;;  %v4908_v14 = vld [vmem:[#allocation8 + $0x158] sm:$0xff] }
 0x6b9   :  { %5726 = vmatprep.subr.bf16.mxu0 %v11432_v26  ;;  %5767 = vmatprep.subr.bf16.mxu1 %v11434_v32  ;;  %12766 = vst [vmem:[#allocation44_spill] sm:$0xff] %v11460_v17  ;;  %v4907_v32 = vld [vmem:[#allocation8 + $0x150] sm:$0xff]  ;;  %v4912_v23 = vld [vmem:[#allocation8 + $0x178] sm:$0xff]  ;;  %12768 = vst [vmem:[#allocation46_spill] sm:$0xff] %v11466_v54 }
 0x6ba   :  { %v4911_v26 = vld [vmem:[#allocation8 + $0x170] sm:$0xff]  ;;  %v11472_v16 = vcombine.high %v4908_v14, %v4912_v23  ;;  %v11478_v7 = vcombine.low %v4908_v14, %v4912_v23 }
 0x6bb   :  { %v11470_v5 = vcombine.high %v4907_v32, %v4911_v26  ;;  %v11476_v22 = vcombine.low %v4907_v32, %v4911_v26 }
 0x6bc   :  { %5727 = vmatpush1.bf16.msra.mxu0 %v11440_v9  ;;  %5768 = vmatpush1.bf16.msra.mxu1 %v11442_v50  ;;  %12770 = vst [vmem:[#allocation48_spill] sm:$0xff] %v11472_v16  ;;  %v4916_v50 = vld [vmem:[#allocation8 + $0x198] sm:$0xff]  ;;  %12772 = vst [vmem:[#allocation50_spill] sm:$0xff] %v11478_v7 }
 0x6bd   :  { %5728 = vmatprep.subr.bf16.mxu0 %v11446_v56  ;;  %5769 = vmatprep.subr.bf16.mxu1 %v11448_v42  ;;  %12769 = vst [vmem:[#allocation47_spill] sm:$0xff] %v11470_v5  ;;  %v4915_v42 = vld [vmem:[#allocation8 + $0x190] sm:$0xff]  ;;  %v4920_v9 = vld [vmem:[#allocation8 + $0x1b8] sm:$0xff]  ;;  %12771 = vst [vmem:[#allocation49_spill] sm:$0xff] %v11476_v22 }
 0x6be   :  { %v4919_v56 = vld [vmem:[#allocation8 + $0x1b0] sm:$0xff]  ;;  %v11484_v41 = vcombine.high %v4916_v50, %v4920_v9  ;;  %v11490_v23 = vcombine.low %v4916_v50, %v4920_v9 }
 0x6bf   :  { %v11482_v20 = vcombine.high %v4915_v42, %v4919_v56  ;;  %v11488_v26 = vcombine.low %v4915_v42, %v4919_v56 }
 0x6c0   :  { %5729 = vmatpush1.bf16.msra.mxu0 %v11452_v31  ;;  %5770 = vmatpush1.bf16.msra.mxu1 %v11454_v59  ;;  %12774 = vst [vmem:[#allocation52_spill] sm:$0xff] %v11484_v41  ;;  %v4924_v59 = vld [vmem:[#allocation8 + $0x1d8] sm:$0xff]  ;;  %12776 = vst [vmem:[#allocation54_spill] sm:$0xff] %v11490_v23 }
 0x6c1   :  { %5730 = vmatprep.subr.bf16.mxu0 %v11458_v35  ;;  %5771 = vmatprep.subr.bf16.mxu1 %v11460_v17  ;;  %12773 = vst [vmem:[#allocation51_spill] sm:$0xff] %v11482_v20  ;;  %v4923_v17 = vld [vmem:[#allocation8 + $0x1d0] sm:$0xff]  ;;  %v4928_v31 = vld [vmem:[#allocation8 + $0x1f8] sm:$0xff]  ;;  %12775 = vst [vmem:[#allocation53_spill] sm:$0xff] %v11488_v26 }
 0x6c2   :  { %v4927_v35 = vld [vmem:[#allocation8 + $0x1f0] sm:$0xff]  ;;  %v11496_v32 = vcombine.high %v4924_v59, %v4928_v31  ;;  %v11502_v9 = vcombine.low %v4924_v59, %v4928_v31 }
 0x6c3   :  { %v11494_v14 = vcombine.high %v4923_v17, %v4927_v35  ;;  %v11500_v56 = vcombine.low %v4923_v17, %v4927_v35 }
 0x6c4   :  { %5731 = vmatpush1.bf16.msra.mxu0 %v11464_v55  ;;  %5772 = vmatpush1.bf16.msra.mxu1 %v11466_v54  ;;  %12778 = vst [vmem:[#allocation56_spill] sm:$0xff] %v11496_v32  ;;  %v4932_v54 = vld [vmem:[#allocation8 + $0x218] sm:$0xff]  ;;  %12780 = vst [vmem:[#allocation58_spill] sm:$0xff] %v11502_v9 }
 0x6c5   :  { %5732 = vmatprep.subr.bf16.mxu0 %v11470_v5  ;;  %5773 = vmatprep.subr.bf16.mxu1 %v11472_v16  ;;  %12777 = vst [vmem:[#allocation55_spill] sm:$0xff] %v11494_v14  ;;  %v4931_v16 = vld [vmem:[#allocation8 + $0x210] sm:$0xff]  ;;  %v4936_v55 = vld [vmem:[#allocation8 + $0x238] sm:$0xff]  ;;  %12779 = vst [vmem:[#allocation57_spill] sm:$0xff] %v11500_v56 }
 0x6c6   :  { %v4935_v5 = vld [vmem:[#allocation8 + $0x230] sm:$0xff]  ;;  %v11508_v42 = vcombine.high %v4932_v54, %v4936_v55  ;;  %v11514_v31 = vcombine.low %v4932_v54, %v4936_v55 }
 0x6c7   :  { %v11506_v50 = vcombine.high %v4931_v16, %v4935_v5  ;;  %v11512_v35 = vcombine.low %v4931_v16, %v4935_v5 }
 0x6c8   :  { %5733 = vmatpush1.bf16.msra.mxu0 %v11476_v22  ;;  %5774 = vmatpush1.bf16.msra.mxu1 %v11478_v7  ;;  %12782 = vst [vmem:[#allocation60_spill] sm:$0xff] %v11508_v42  ;;  %v4940_v7 = vld [vmem:[#allocation8 + $0x258] sm:$0xff]  ;;  %12784 = vst [vmem:[#allocation62_spill] sm:$0xff] %v11514_v31 }
 0x6c9   :  { %5734 = vmatprep.subr.bf16.mxu0 %v11482_v20  ;;  %5775 = vmatprep.subr.bf16.mxu1 %v11484_v41  ;;  %12781 = vst [vmem:[#allocation59_spill] sm:$0xff] %v11506_v50  ;;  %v4939_v41 = vld [vmem:[#allocation8 + $0x250] sm:$0xff]  ;;  %v4944_v22 = vld [vmem:[#allocation8 + $0x278] sm:$0xff]  ;;  %12783 = vst [vmem:[#allocation61_spill] sm:$0xff] %v11512_v35 }
 0x6ca   :  { %v4943_v20 = vld [vmem:[#allocation8 + $0x270] sm:$0xff]  ;;  %v11520_v17 = vcombine.high %v4940_v7, %v4944_v22  ;;  %v11526_v55 = vcombine.low %v4940_v7, %v4944_v22 }
 0x6cb   :  { %v11518_v59 = vcombine.high %v4939_v41, %v4943_v20  ;;  %v11524_v5 = vcombine.low %v4939_v41, %v4943_v20 }
 0x6cc   :  { %5735 = vmatpush1.bf16.msra.mxu0 %v11488_v26  ;;  %5776 = vmatpush1.bf16.msra.mxu1 %v11490_v23  ;;  %12786 = vst [vmem:[#allocation64_spill] sm:$0xff] %v11520_v17  ;;  %v4948_v23 = vld [vmem:[#allocation8 + $0x298] sm:$0xff]  ;;  %12788 = vst [vmem:[#allocation66_spill] sm:$0xff] %v11526_v55 }
 0x6cd   :  { %5736 = vmatprep.subr.bf16.mxu0 %v11494_v14  ;;  %5777 = vmatprep.subr.bf16.mxu1 %v11496_v32  ;;  %12785 = vst [vmem:[#allocation63_spill] sm:$0xff] %v11518_v59  ;;  %v4947_v32 = vld [vmem:[#allocation8 + $0x290] sm:$0xff]  ;;  %v4952_v26 = vld [vmem:[#allocation8 + $0x2b8] sm:$0xff]  ;;  %12787 = vst [vmem:[#allocation65_spill] sm:$0xff] %v11524_v5 }
 0x6ce   :  { %v4951_v14 = vld [vmem:[#allocation8 + $0x2b0] sm:$0xff]  ;;  %v11532_v16 = vcombine.high %v4948_v23, %v4952_v26  ;;  %v11538_v22 = vcombine.low %v4948_v23, %v4952_v26 }
 0x6cf   :  { %v11530_v54 = vcombine.high %v4947_v32, %v4951_v14  ;;  %v11536_v20 = vcombine.low %v4947_v32, %v4951_v14 }
 0x6d0   :  { %5737 = vmatpush1.bf16.msra.mxu0 %v11500_v56  ;;  %5778 = vmatpush1.bf16.msra.mxu1 %v11502_v9  ;;  %12790 = vst [vmem:[#allocation68_spill] sm:$0xff] %v11532_v16  ;;  %v4956_v9 = vld [vmem:[#allocation8 + $0x2d8] sm:$0xff]  ;;  %12792 = vst [vmem:[#allocation70_spill] sm:$0xff] %v11538_v22 }
 0x6d1   :  { %5738 = vmatprep.subr.bf16.mxu0 %v11506_v50  ;;  %5779 = vmatprep.subr.bf16.mxu1 %v11508_v42  ;;  %12789 = vst [vmem:[#allocation67_spill] sm:$0xff] %v11530_v54  ;;  %v4955_v42 = vld [vmem:[#allocation8 + $0x2d0] sm:$0xff]  ;;  %v4960_v56 = vld [vmem:[#allocation8 + $0x2f8] sm:$0xff]  ;;  %12791 = vst [vmem:[#allocation69_spill] sm:$0xff] %v11536_v20 }
 0x6d2   :  { %v4959_v50 = vld [vmem:[#allocation8 + $0x2f0] sm:$0xff]  ;;  %v11544_v41 = vcombine.high %v4956_v9, %v4960_v56  ;;  %v11550_v26 = vcombine.low %v4956_v9, %v4960_v56 }
 0x6d3   :  { %v11542_v7 = vcombine.high %v4955_v42, %v4959_v50  ;;  %v11548_v14 = vcombine.low %v4955_v42, %v4959_v50 }
 0x6d4   :  { %5739 = vmatpush1.bf16.msra.mxu0 %v11512_v35  ;;  %5780 = vmatpush1.bf16.msra.mxu1 %v11514_v31  ;;  %12794 = vst [vmem:[#allocation72_spill] sm:$0xff] %v11544_v41  ;;  %v4964_v31 = vld [vmem:[#allocation8 + $0x318] sm:$0xff]  ;;  %12796 = vst [vmem:[#allocation74_spill] sm:$0xff] %v11550_v26 }
 0x6d5   :  { %5740 = vmatprep.subr.bf16.mxu0 %v11518_v59  ;;  %5781 = vmatprep.subr.bf16.mxu1 %v11520_v17  ;;  %12793 = vst [vmem:[#allocation71_spill] sm:$0xff] %v11542_v7  ;;  %v4963_v17 = vld [vmem:[#allocation8 + $0x310] sm:$0xff]  ;;  %v4968_v35 = vld [vmem:[#allocation8 + $0x338] sm:$0xff]  ;;  %12795 = vst [vmem:[#allocation73_spill] sm:$0xff] %v11548_v14 }
 0x6d6   :  { %v4967_v59 = vld [vmem:[#allocation8 + $0x330] sm:$0xff]  ;;  %v11556_v32 = vcombine.high %v4964_v31, %v4968_v35  ;;  %v11562_v56 = vcombine.low %v4964_v31, %v4968_v35 }
 0x6d7   :  { %v11554_v23 = vcombine.high %v4963_v17, %v4967_v59  ;;  %v11560_v50 = vcombine.low %v4963_v17, %v4967_v59 }
 0x6d8   :  { %5741 = vmatpush1.bf16.msra.mxu0 %v11524_v5  ;;  %5782 = vmatpush1.bf16.msra.mxu1 %v11526_v55  ;;  %12798 = vst [vmem:[#allocation76_spill] sm:$0xff] %v11556_v32  ;;  %v4972_v55 = vld [vmem:[#allocation8 + $0x358] sm:$0xff] }
 0x6d9   :  { %5742 = vmatprep.subr.bf16.mxu0 %v11530_v54  ;;  %5783 = vmatprep.subr.bf16.mxu1 %v11532_v16  ;;  %12797 = vst [vmem:[#allocation75_spill] sm:$0xff] %v11554_v23  ;;  %v4971_v16 = vld [vmem:[#allocation8 + $0x350] sm:$0xff]  ;;  %v4976_v5 = vld [vmem:[#allocation8 + $0x378] sm:$0xff] }
 0x6da   :  { %v4975_v54 = vld [vmem:[#allocation8 + $0x370] sm:$0xff]  ;;  %v11568_v42 = vcombine.high %v4972_v55, %v4976_v5  ;;  %v11574_v35 = vcombine.low %v4972_v55, %v4976_v5 }
 0x6db   :  { %v11566_v9 = vcombine.high %v4971_v16, %v4975_v54  ;;  %v11572_v59 = vcombine.low %v4971_v16, %v4975_v54 }
 0x6dc   :  { %5743 = vmatpush1.bf16.msra.mxu0 %v11536_v20  ;;  %5784 = vmatpush1.bf16.msra.mxu1 %v11538_v22  ;;  %12799 = vst [vmem:[#allocation77_spill] sm:$0xff] %v11568_v42  ;;  %v4980_v22 = vld [vmem:[#allocation8 + $0x398] sm:$0xff] }
 0x6dd   :  { %5744 = vmatprep.subr.bf16.mxu0 %v11542_v7  ;;  %5785 = vmatprep.subr.bf16.mxu1 %v11544_v41  ;;  %v4979_v41 = vld [vmem:[#allocation8 + $0x390] sm:$0xff]  ;;  %v4984_v20 = vld [vmem:[#allocation8 + $0x3b8] sm:$0xff]  ;;  %12800 = vst [vmem:[#allocation78_spill] sm:$0xff] %v11572_v59 }
 0x6de   :  { %v4983_v7 = vld [vmem:[#allocation8 + $0x3b0] sm:$0xff]  ;;  %v11580_v17 = vcombine.high %v4980_v22, %v4984_v20  ;;  %v11586_v5 = vcombine.low %v4980_v22, %v4984_v20  ;;  %v5878_v20 = vld [vmem:[#allocation8] sm:$0xff] }
 0x6df   :  { %v11578_v31 = vcombine.high %v4979_v41, %v4983_v7  ;;  %v11584_v54 = vcombine.low %v4979_v41, %v4983_v7  ;;  %v5882_v22 = vld [vmem:[#allocation8 + $0x20] sm:$0xff]  ;;  %v5879_v7 = vld [vmem:[#allocation8 + $0x8] sm:$0xff] }
 0x6e0   :  { %5745 = vmatpush1.bf16.msra.mxu0 %v11548_v14  ;;  %5786 = vmatpush1.bf16.msra.mxu1 %v11550_v26  ;;  %v4988_v26 = vld [vmem:[#allocation8 + $0x3d8] sm:$0xff]  ;;  %12801 = vst [vmem:[#allocation79_spill] sm:$0xff] %v11586_v5  ;;  %v11606_v41 = vcombine.low %v5878_v20, %v5882_v22 }
 0x6e1   :  { %5746 = vmatprep.subr.bf16.mxu0 %v11554_v23  ;;  %5787 = vmatprep.subr.bf16.mxu1 %v11556_v32  ;;  %v4987_v32 = vld [vmem:[#allocation8 + $0x3d0] sm:$0xff]  ;;  %v4992_v14 = vld [vmem:[#allocation8 + $0x3f8] sm:$0xff] }
 0x6e2   :  { %v4991_v23 = vld [vmem:[#allocation8 + $0x3f0] sm:$0xff]  ;;  %v11592_v16 = vcombine.high %v4988_v26, %v4992_v14  ;;  %12806 = vst [vmem:[#allocation84_spill] sm:$0xff] %v11606_v41 }
 0x6e3   :  { %v11590_v55 = vcombine.high %v4987_v32, %v4991_v23 }
 0x6e4   :  { %5747 = vmatpush1.bf16.msra.mxu0 %v11560_v50  ;;  %5788 = vmatpush1.bf16.msra.mxu1 %v11562_v56  ;;  %12803 = vst [vmem:[#allocation81_spill] sm:$0xff] %v11592_v16 }
 0x6e5   :  { %5748 = vmatprep.subr.bf16.mxu0 %v11566_v9  ;;  %5789 = vmatprep.subr.bf16.mxu1 %v11568_v42  ;;  %12802 = vst [vmem:[#allocation80_spill] sm:$0xff] %v11590_v55  ;;  %v11596_v42 = vcombine.low %v4987_v32, %v4991_v23  ;;  %v11608_v23 = vcombine.high %v5878_v20, %v5882_v22  ;;  %v5890_v32 = vld [vmem:[#allocation8 + $0x60] sm:$0xff] }
 0x6e7   :  { %12804 = vst [vmem:[#allocation82_spill] sm:$0xff] %v11596_v42  ;;  %12807 = vst [vmem:[#allocation85_spill] sm:$0xff] %v11608_v23 }
 0x6e8   :  { %5749 = vmatpush1.bf16.msra.mxu0 %v11572_v59  ;;  %5790 = vmatpush1.bf16.msra.mxu1 %v11574_v35  ;;  %v11598_v59 = vcombine.low %v4988_v26, %v4992_v14  ;;  %v5883_v14 = vld [vmem:[#allocation8 + $0x28] sm:$0xff]  ;;  %v5886_v26 = vld [vmem:[#allocation8 + $0x40] sm:$0xff] }
 0x6e9   :  { %5750 = vmatprep.subr.bf16.mxu0 %v11578_v31  ;;  %5791 = vmatprep.subr.bf16.mxu1 %v11580_v17  ;;  %v11621_v20 = vcombine.low %v5886_v26, %v5890_v32 }
 0x6ea   :  { %12805 = vst [vmem:[#allocation83_spill] sm:$0xff] %v11598_v59 }
 0x6eb   :  { %12811 = vst [vmem:[#allocation91_spill] sm:$0xff] %v11621_v20 }
 0x6ec   :  { %5751 = vmatpush1.bf16.msra.mxu0 %v11584_v54  ;;  %5792 = vmatpush1.bf16.msra.mxu1 %v11586_v5  ;;  %v5891_v5 = vld [vmem:[#allocation8 + $0x68] sm:$0xff] }
 0x6ed   :  { %5752 = vmatprep.subr.bf16.mxu0 %v11590_v55  ;;  %5793 = vmatprep.subr.bf16.mxu1 %v11592_v16  ;;  %v11610_v55 = vcombine.low %v5879_v7, %v5883_v14  ;;  %v11612_v16 = vcombine.high %v5879_v7, %v5883_v14  ;;  %v5894_v7 = vld [vmem:[#allocation8 + $0x80] sm:$0xff] }
 0x6ee   :  { %v5898_v14 = vld [vmem:[#allocation8 + $0xa0] sm:$0xff] }
 0x6ef   :  { %12808 = vst [vmem:[#allocation86_spill] sm:$0xff] %v11610_v55  ;;  %12809 = vst [vmem:[#allocation87_spill] sm:$0xff] %v11612_v16 }
 0x6f0   :  { %5753 = vmatpush1.bf16.msra.mxu0 %v11596_v42  ;;  %5794 = vmatpush1.bf16.msra.mxu1 %v11598_v59  ;;  %v11614_v42 = vcombine.high %v5886_v26, %v5890_v32  ;;  %v5887_v59 = vld [vmem:[#allocation8 + $0x48] sm:$0xff]  ;;  %v11632_v26 = vcombine.low %v5894_v7, %v5898_v14 }
 0x6f1   :  { %6653 = vmatprep.subr.bf16.mxu0 %v11608_v23  ;;  %6694 = vmatprep.subr.bf16.mxu1 %v11612_v16  ;;  %v11625_v22 = vcombine.low %v5887_v59, %v5891_v5  ;;  %v5895_v23 = vld [vmem:[#allocation8 + $0x88] sm:$0xff]  ;;  %v11630_v16 = vcombine.high %v5894_v7, %v5898_v14 }
 0x6f2   :  { %12814 = vst [vmem:[#allocation88_spill] sm:$0xff] %v11632_v26 }
 0x6f3   :  { %5755 = vmatmul.mubr.bf16.vlgmr.msra.gmra.mrb[56].mxu0 %v11418_v6  ;;  %5796 = vmatmul.mubr.bf16.vlgmr.msra.gmra.mrb[56].mxu1 %v11418_v6  ;;  %v11617_v6 = vcombine.high %v5887_v59, %v5891_v5  ;;  %12812 = vst [vmem:[#allocation90_spill] sm:$0xff] %v11625_v22  ;;  %12813 = vst [vmem:[#allocation93_spill] sm:$0xff] %v11630_v16  ;;  %v5902_v59 = vld [vmem:[#allocation8 + $0xc0] sm:$0xff] }
 0x6f4   :  { %6654 = vmatpush1.bf16.msra.mxu0 %v11606_v41  ;;  %6695 = vmatpush1.bf16.msra.mxu1 %v11610_v55  ;;  %v5899_v41 = vld [vmem:[#allocation8 + $0xa8] sm:$0xff]  ;;  %v5906_v5 = vld [vmem:[#allocation8 + $0xe0] sm:$0xff] }
 0x6f5   :  { %12810 = vst [vmem:[#allocation89_spill] sm:$0xff] %v11617_v6  ;;  %6655 = vmatprep.subr.bf16.mxu0 %v11614_v42  ;;  %6696 = vmatprep.subr.bf16.mxu1 %v11617_v6  ;;  %v11634_v32 = vcombine.low %v5895_v23, %v5899_v41  ;;  %v11636_v55 = vcombine.high %v5895_v23, %v5899_v41  ;;  %v5907_v6 = vld [vmem:[#allocation8 + $0xe8] sm:$0xff]  ;;  %v5910_v23 = vld [vmem:[#allocation8 + $0x100] sm:$0xff] }
 0x6f6   :  { %v11644_v7 = vcombine.low %v5902_v59, %v5906_v5 }
 0x6f7   :  { %12815 = vst [vmem:[#allocation92_spill] sm:$0xff] %v11634_v32  ;;  %12816 = vst [vmem:[#allocation94_spill] sm:$0xff] %v11636_v55 }
 0x6f8   :  { %6656 = vmatpush1.bf16.msra.mxu0 %v11621_v20  ;;  %6697 = vmatpush1.bf16.msra.mxu1 %v11625_v22  ;;  %v5903_v22 = vld [vmem:[#allocation8 + $0xc8] sm:$0xff]  ;;  %v11642_v20 = vcombine.high %v5902_v59, %v5906_v5  ;;  %12818 = vst [vmem:[#allocation98_spill] sm:$0xff] %v11644_v7 }
 0x6f9   :  { %6657 = vmatprep.subr.bf16.mxu0 %v11630_v16  ;;  %6698 = vmatprep.subr.bf16.mxu1 %v11636_v55  ;;  %v11646_v14 = vcombine.low %v5903_v22, %v5907_v6  ;;  %v11648_v41 = vcombine.high %v5903_v22, %v5907_v6  ;;  %v5911_v55 = vld [vmem:[#allocation8 + $0x108] sm:$0xff]  ;;  %v5918_v22 = vld [vmem:[#allocation8 + $0x140] sm:$0xff] }
 0x6fa   :  { %12817 = vst [vmem:[#allocation95_spill] sm:$0xff] %v11642_v20  ;;  %v5915_v16 = vld [vmem:[#allocation8 + $0x128] sm:$0xff] }
 0x6fb   :  { %12819 = vst [vmem:[#allocation96_spill] sm:$0xff] %v11646_v14  ;;  %12820 = vst [vmem:[#allocation102_spill] sm:$0xff] %v11648_v41  ;;  %v11658_v5 = vcombine.low %v5911_v55, %v5915_v16  ;;  %v11660_v6 = vcombine.high %v5911_v55, %v5915_v16  ;;  %v5926_v16 = vld [vmem:[#allocation8 + $0x180] sm:$0xff] }
 0x6fc   :  { %6658 = vmatpush1.bf16.msra.mxu0 %v11632_v26  ;;  %6699 = vmatpush1.bf16.msra.mxu1 %v11634_v32  ;;  %v5914_v26 = vld [vmem:[#allocation8 + $0x120] sm:$0xff] }
 0x6fd   :  { %6659 = vmatprep.subr.bf16.mxu0 %v11642_v20  ;;  %6700 = vmatprep.subr.bf16.mxu1 %v11648_v41  ;;  %v11654_v32 = vcombine.high %v5910_v23, %v5914_v26  ;;  %v11656_v59 = vcombine.low %v5910_v23, %v5914_v26  ;;  %12823 = vst [vmem:[#allocation100_spill] sm:$0xff] %v11658_v5  ;;  %12824 = vst [vmem:[#allocation106_spill] sm:$0xff] %v11660_v6  ;;  %v5919_v41 = vld [vmem:[#allocation8 + $0x148] sm:$0xff] }
 0x6fe   :  { %v5923_v20 = vld [vmem:[#allocation8 + $0x168] sm:$0xff] }
 0x6ff   :  { %12821 = vst [vmem:[#allocation97_spill] sm:$0xff] %v11654_v32  ;;  %12822 = vst [vmem:[#allocation99_spill] sm:$0xff] %v11656_v59  ;;  %v11670_v23 = vcombine.low %v5919_v41, %v5923_v20  ;;  %v11672_v55 = vcombine.high %v5919_v41, %v5923_v20  ;;  %v5934_v41 = vld [vmem:[#allocation8 + $0x1c0] sm:$0xff] }
 0x700   :  { %6660 = vmatpush1.bf16.msra.mxu0 %v11644_v7  ;;  %6701 = vmatpush1.bf16.msra.mxu1 %v11646_v14  ;;  %v5922_v7 = vld [vmem:[#allocation8 + $0x160] sm:$0xff] }
 0x701   :  { %6661 = vmatprep.subr.bf16.mxu0 %v11654_v32  ;;  %6702 = vmatprep.subr.bf16.mxu1 %v11660_v6  ;;  %v11666_v14 = vcombine.high %v5918_v22, %v5922_v7  ;;  %v11668_v26 = vcombine.low %v5918_v22, %v5922_v7  ;;  %12827 = vst [vmem:[#allocation104_spill] sm:$0xff] %v11670_v23  ;;  %12828 = vst [vmem:[#allocation110_spill] sm:$0xff] %v11672_v55  ;;  %v5927_v6 = vld [vmem:[#allocation8 + $0x188] sm:$0xff] }
 0x702   :  { %v5931_v32 = vld [vmem:[#allocation8 + $0x1a8] sm:$0xff] }
 0x703   :  { %12825 = vst [vmem:[#allocation101_spill] sm:$0xff] %v11666_v14  ;;  %12826 = vst [vmem:[#allocation103_spill] sm:$0xff] %v11668_v26  ;;  %v11682_v22 = vcombine.low %v5927_v6, %v5931_v32  ;;  %v11684_v20 = vcombine.high %v5927_v6, %v5931_v32 }
 0x704   :  { %6662 = vmatpush1.bf16.msra.mxu0 %v11656_v59  ;;  %6703 = vmatpush1.bf16.msra.mxu1 %v11658_v5  ;;  %v5930_v59 = vld [vmem:[#allocation8 + $0x1a0] sm:$0xff] }
 0x705   :  { %6663 = vmatprep.subr.bf16.mxu0 %v11666_v14  ;;  %6704 = vmatprep.subr.bf16.mxu1 %v11672_v55  ;;  %v11678_v5 = vcombine.high %v5926_v16, %v5930_v59  ;;  %v11680_v7 = vcombine.low %v5926_v16, %v5930_v59  ;;  %v5935_v55 = vld [vmem:[#allocation8 + $0x1c8] sm:$0xff] }
 0x706   :  { %v5939_v14 = vld [vmem:[#allocation8 + $0x1e8] sm:$0xff] }
 0x707   :  { %v11694_v16 = vcombine.low %v5935_v55, %v5939_v14  ;;  %v11696_v32 = vcombine.high %v5935_v55, %v5939_v14 }
 0x708   :  { %6664 = vmatpush1.bf16.msra.mxu0 %v11668_v26  ;;  %6705 = vmatpush1.bf16.msra.mxu1 %v11670_v23  ;;  %v5938_v26 = vld [vmem:[#allocation8 + $0x1e0] sm:$0xff] }
 0x709   :  { %6665 = vmatprep.subr.bf16.mxu0 %v11678_v5  ;;  %6706 = vmatprep.subr.bf16.mxu1 %v11684_v20  ;;  %v11690_v23 = vcombine.high %v5934_v41, %v5938_v26  ;;  %v11692_v59 = vcombine.low %v5934_v41, %v5938_v26 }
 0x70c   :  { %6666 = vmatpush1.bf16.msra.mxu0 %v11680_v7  ;;  %6707 = vmatpush1.bf16.msra.mxu1 %v11682_v22 }
 0x70d   :  { %6667 = vmatprep.subr.bf16.mxu0 %v11690_v23  ;;  %6708 = vmatprep.subr.bf16.mxu1 %v11696_v32 }
 0x710   :  { %6668 = vmatpush1.bf16.msra.mxu0 %v11692_v59  ;;  %6709 = vmatpush1.bf16.msra.mxu1 %v11694_v16 }
 0x711   :  { %6669 = vmatprep.subr.bf16.mxu0 %v11293_v58  ;;  %6710 = vmatprep.subr.bf16.mxu1 %v11299_v8 }
 0x714   :  { %6670 = vmatpush1.bf16.msra.mxu0 %v11295_v47  ;;  %6711 = vmatpush1.bf16.msra.mxu1 %v11297_v0  ;;  %v12829_v0 = vld [vmem:[#allocation26_spill] sm:$0xff] }
 0x715   :  { %6671 = vmatprep.subr.bf16.mxu0 %v11305_v30  ;;  %6712 = vmatprep.subr.bf16.mxu1 %v11311_v62  ;;  %v12830_v30 = vld [vmem:[#allocation27_spill] sm:$0xff] }
 0x718   :  { %6672 = vmatpush1.bf16.msra.mxu0 %v11307_v48  ;;  %6713 = vmatpush1.bf16.msra.mxu1 %v11309_v11 }
 0x719   :  { %6673 = vmatprep.subr.bf16.mxu0 %v11317_v43  ;;  %6714 = vmatprep.subr.bf16.mxu1 %v11323_v2  ;;  %v12831_v43 = vld [vmem:[#allocation28_spill] sm:$0xff] }
 0x71c   :  { %6674 = vmatpush1.bf16.msra.mxu0 %v11319_v51  ;;  %6715 = vmatpush1.bf16.msra.mxu1 %v11321_v61  ;;  %v12832_v61 = vld [vmem:[#allocation29_spill] sm:$0xff] }
 0x71d   :  { %6675 = vmatprep.subr.bf16.mxu0 %v11329_v21  ;;  %6716 = vmatprep.subr.bf16.mxu1 %v11335_v29 }
 0x720   :  { %6676 = vmatpush1.bf16.msra.mxu0 %v11331_v52  ;;  %6717 = vmatpush1.bf16.msra.mxu1 %v11333_v63 }
 0x721   :  { %6677 = vmatprep.subr.bf16.mxu0 %v11341_v40  ;;  %6718 = vmatprep.subr.bf16.mxu1 %v11347_v46 }
 0x724   :  { %6678 = vmatpush1.bf16.msra.mxu0 %v11343_v44  ;;  %6719 = vmatpush1.bf16.msra.mxu1 %v11345_v3 }
 0x725   :  { %6679 = vmatprep.subr.bf16.mxu0 %v11353_v28  ;;  %6720 = vmatprep.subr.bf16.mxu1 %v11359_v25 }
 0x728   :  { %6680 = vmatpush1.bf16.msra.mxu0 %v11355_v12  ;;  %6721 = vmatpush1.bf16.msra.mxu1 %v11357_v4 }
 0x729   :  { %6681 = vmatprep.subr.bf16.mxu0 %v11367_v13  ;;  %6722 = vmatprep.subr.bf16.mxu1 %v11371_v36 }
 0x72c   :  { %6682 = vmatpush1.bf16.msra.mxu0 %v11365_v37  ;;  %6723 = vmatpush1.bf16.msra.mxu1 %v11369_v34 }
 0x72d   :  { %6683 = vmatprep.subr.bf16.mxu0 %v11373_v39  ;;  %6724 = vmatprep.subr.bf16.mxu1 %v11376_v1 }
 0x730   :  { %6684 = vmatpush1.bf16.msra.mxu0 %v11380_v45  ;;  %6725 = vmatpush1.bf16.msra.mxu1 %v11384_v19 }
 0x731   :  { %6735 = vmatprep.subr.bf16.mxu0 %v11389_v15  ;;  %6776 = vmatprep.subr.bf16.mxu1 %v11395_v38 }
 0x786   :  { %v5674_v58 = vpop.f32.mrb[52].mxu0  ;;  %v5715_v47 = vpop.f32.mrb[52].mxu1 }
 0x787   :  { %v5815_v8 = vadd.f32 %v5674_v58, %v12829_v0  ;;  %v5817_v48 = vadd.f32 %v5715_v47, %v12830_v30  ;;  %v5676_v11 = vpop.f32.mrb[53].mxu0  ;;  %v5717_v62 = vpop.f32.mrb[53].mxu1 }
 0x788   :  { %v5816_v51 = vadd.f32 %v5676_v11, %v12831_v43  ;;  %v5818_v2 = vadd.f32 %v5717_v62, %v12832_v61  ;;  %v5678_v21 = vpop.f32.mrb[54].mxu0  ;;  %v5719_v52 = vpop.f32.mrb[54].mxu1 }
 0x789   :  { %v9171_v63 = vmul.f32 -1.442695, %v5815_v8  ;;  %v5679_v29 = vpop.f32.mrb[55].mxu0  ;;  %v5720_v40 = vpop.f32.mrb[55].mxu1  ;;  %v9173_v3 = vmul.f32 -1.442695, %v5817_v48 }
 0x78a   :  { %v9172_v44 = vmul.f32 -1.442695, %v5816_v51 }
 0x78b   :  { %9736 = vpow2.f32 %v9171_v63 }
 0x78c   :  { %9738 = vpow2.f32 %v9172_v44 }
 0x78d   :  { %9740 = vtanh.f32 %v5818_v2 }
 0x78e   :  { %9742 = vpow2.f32 %v9173_v3 }
 0x795   :  { %v9737_v46 = vpop.eup %9736 }
 0x796   :  { %v5858_v28 = vadd.f32 1.0, %v9737_v46  ;;  %v9739_v12 = vpop.eup %9738 }
 0x797   :  { %v5859_v4 = vadd.f32 1.0, %v9739_v12  ;;  %v9741_v25 = vpop.eup %9740 }
 0x798   :  { %9744 = vrcp.f32 %v5858_v28  ;;  %v9743_v37 = vpop.eup %9742 }
 0x799   :  { %9746 = vrcp.f32 %v5859_v4  ;;  %v5860_v39 = vadd.f32 1.0, %v9743_v37 }
 0x79b   :  { %9748 = vrcp.f32 %v5860_v39 }
 0x7a2   :  { %v9745_v13 = vpop.eup %9744 }
 0x7a3   :  { %v5870_v34 = vmul.f32 %v9745_v13, %v9741_v25  ;;  %v9747_v36 = vpop.eup %9746 }
 0x7a4   :  { %v5869_v1 = vmul.f32 %v9747_v36, %v11404_v10 }
 0x7a5   :  { %v9749_v19 = vpop.eup %9748 }
 0x7a6   :  { %v11741_v45 = vadd.f32 %v5870_v34, %v5869_v1  ;;  %v12834_v1 = vld [vmem:[#allocation17_spill] sm:$0xff] }
 0x7a8   :  { %9750 = vtanh.f32 %v11741_v45 }
 0x7b2   :  { %v9751_v15 = vpop.eup %9750 }
 0x7b3   :  { %v5873_v38 = vmul.f32 %v9751_v15, %v9749_v19  ;;  %v12835_v19 = vld [vmem:[#allocation18_spill] sm:$0xff]  ;;  %v12836_v15 = vld [vmem:[#allocation19_spill] sm:$0xff] }
 0x7b5   :  { %v5875_v14 = vpack.c.bf16 %v5873_v38, %v5873_v38  ;;  %v12837_v38 = vld [vmem:[#allocation20_spill] sm:$0xff] }
 0x7b7   :  { %5876 = vst [vmem:[#allocation3] sm:$0xf] %v5875_v14  ;;  %v12838_v14 = vld [vmem:[#allocation21_spill] sm:$0xff] }
 0x7c6   :  { %v5756_v6 = vpop.f32.mrb[56].mxu0  ;;  %v5797_v26 = vpop.f32.mrb[56].mxu1 }
 0x7c7   :  { %v5804_v55 = vadd.f32 %v5756_v6, %v10607_v27  ;;  %v5758_v41 = vpop.f32.mrb[57].mxu0  ;;  %v5799_v58 = vpop.f32.mrb[57].mxu1  ;;  %v5806_v62 = vadd.f32 %v5797_v26, %v10617_v57  ;;  %v12839_v6 = vld [vmem:[#allocation38_spill] sm:$0xff]  ;;  %v12842_v26 = vld [vmem:[#allocation41_spill] sm:$0xff] }
 0x7c8   :  { %v5805_v47 = vadd.f32 %v5758_v41, %v10611_v33  ;;  %v5760_v0 = vpop.f32.mrb[58].mxu0  ;;  %v5801_v10 = vpop.f32.mrb[58].mxu1  ;;  %v5807_v43 = vadd.f32 %v5799_v58, %v10621_v60  ;;  %v12845_v41 = vld [vmem:[#allocation44_spill] sm:$0xff]  ;;  %v12846_v58 = vld [vmem:[#allocation45_spill] sm:$0xff] }
 0x7c9   :  { %v9167_v8 = vmul.f32 -1.442695, %v5804_v55  ;;  %v5761_v30 = vpop.f32.mrb[59].mxu0  ;;  %v5802_v48 = vpop.f32.mrb[59].mxu1  ;;  %v9169_v51 = vmul.f32 -1.442695, %v5806_v62 }
 0x7ca   :  { %v9168_v11 = vmul.f32 -1.442695, %v5805_v47  ;;  %v12844_v55 = vld [vmem:[#allocation43_spill] sm:$0xff]  ;;  %v12847_v47 = vld [vmem:[#allocation46_spill] sm:$0xff]  ;;  %v12849_v10 = vld [vmem:[#allocation48_spill] sm:$0xff] }
 0x7cb   :  { %9752 = vpow2.f32 %v9167_v8  ;;  %v12848_v0 = vld [vmem:[#allocation47_spill] sm:$0xff]  ;;  %v12850_v8 = vld [vmem:[#allocation49_spill] sm:$0xff]  ;;  %v12851_v30 = vld [vmem:[#allocation50_spill] sm:$0xff] }
 0x7cc   :  { %9754 = vpow2.f32 %v9168_v11  ;;  %v12852_v48 = vld [vmem:[#allocation51_spill] sm:$0xff]  ;;  %v12853_v11 = vld [vmem:[#allocation52_spill] sm:$0xff]  ;;  %v12854_v62 = vld [vmem:[#allocation53_spill] sm:$0xff] }
 0x7cd   :  { %9756 = vtanh.f32 %v5807_v43  ;;  %v12855_v43 = vld [vmem:[#allocation54_spill] sm:$0xff] }
 0x7ce   :  { %9758 = vpow2.f32 %v9169_v51  ;;  %v12856_v51 = vld [vmem:[#allocation55_spill] sm:$0xff] }
 0x7d5   :  { %v9753_v61 = vpop.eup %9752 }
 0x7d6   :  { %v5828_v2 = vadd.f32 1.0, %v9753_v61  ;;  %v9755_v21 = vpop.eup %9754  ;;  %v12857_v61 = vld [vmem:[#allocation56_spill] sm:$0xff] }
 0x7d7   :  { %v5829_v52 = vadd.f32 1.0, %v9755_v21  ;;  %v9757_v63 = vpop.eup %9756  ;;  %v12859_v21 = vld [vmem:[#allocation58_spill] sm:$0xff] }
 0x7d8   :  { %9760 = vrcp.f32 %v5828_v2  ;;  %v9759_v29 = vpop.eup %9758  ;;  %v12858_v2 = vld [vmem:[#allocation57_spill] sm:$0xff] }
 0x7d9   :  { %9762 = vrcp.f32 %v5829_v52  ;;  %v5830_v46 = vadd.f32 1.0, %v9759_v29  ;;  %v12860_v52 = vld [vmem:[#allocation59_spill] sm:$0xff]  ;;  %v12862_v29 = vld [vmem:[#allocation61_spill] sm:$0xff] }
 0x7db   :  { %9764 = vrcp.f32 %v5830_v46  ;;  %v12866_v46 = vld [vmem:[#allocation65_spill] sm:$0xff] }
 0x7e2   :  { %v9761_v40 = vpop.eup %9760 }
 0x7e3   :  { %v5840_v44 = vmul.f32 %v9761_v40, %v9757_v63  ;;  %v9763_v3 = vpop.eup %9762  ;;  %v12861_v63 = vld [vmem:[#allocation60_spill] sm:$0xff]  ;;  %v12863_v40 = vld [vmem:[#allocation62_spill] sm:$0xff] }
 0x7e4   :  { %v5839_v28 = vmul.f32 %v9763_v3, %v11412_v18  ;;  %v12833_v18 = vld [vmem:[#allocation16_spill] sm:$0xff] }
 0x7e5   :  { %v9765_v4 = vpop.eup %9764  ;;  %v12865_v3 = vld [vmem:[#allocation64_spill] sm:$0xff] }
 0x7e6   :  { %v11749_v12 = vadd.f32 %v5840_v44, %v5839_v28  ;;  %v12864_v44 = vld [vmem:[#allocation63_spill] sm:$0xff]  ;;  %v12867_v28 = vld [vmem:[#allocation66_spill] sm:$0xff] }
 0x7e8   :  { %9766 = vtanh.f32 %v11749_v12 }
 0x7f2   :  { %v9767_v25 = vpop.eup %9766 }
 0x7f3   :  { %v5843_v37 = vmul.f32 %v9767_v25, %v9765_v4  ;;  %v12868_v4 = vld [vmem:[#allocation67_spill] sm:$0xff]  ;;  %v12869_v25 = vld [vmem:[#allocation68_spill] sm:$0xff] }
 0x7f5   :  { %v5845_v13 = vpack.c.bf16 %v5843_v37, %v5843_v37  ;;  %v12870_v37 = vld [vmem:[#allocation69_spill] sm:$0xff] }
 0x7f7   :  { %9170 = vst [vmem:[%s12161_s5 + $0x10] sm:$0xf] %v5845_v13  ;;  %5846 = vst [vmem:[#allocation3 + $0x4] sm:$0xf] %v5845_v13  ;;  %v12871_v13 = vld [vmem:[#allocation70_spill] sm:$0xff] }
 0x7fe   :  { %v5877_v34 = vld [vmem:[#allocation3] sm:$0xff] }
 0x7ff   :  { %v9175_v36 = vcombine.high %v5877_v34, %v5877_v34  ;;  %v11755_v39 = vcombine.low %v5877_v34, %v5877_v34  ;;  %v12872_v34 = vld [vmem:[#allocation71_spill] sm:$0xff] }
 0x801   :  { %6685 = vmatprep.mubr.bf16.mxu0 %v9175_v36  ;;  %6726 = vmatprep.mubr.bf16.mxu1 %v9175_v36 }
 0x802   :  { %6686 = vmatmul.mubr.bf16.vlgmr.msra.gmra.mrb[60].mxu0 %v11755_v39  ;;  %6727 = vmatmul.mubr.bf16.vlgmr.msra.gmra.mrb[60].mxu1 %v11755_v39 }
 0x803   :  { %6736 = vmatpush1.bf16.msra.mxu0 %v11391_v49  ;;  %6777 = vmatpush1.bf16.msra.mxu1 %v11393_v53  ;;  %v12840_v49 = vld [vmem:[#allocation39_spill] sm:$0xff]  ;;  %v12841_v53 = vld [vmem:[#allocation40_spill] sm:$0xff] }
 0x804   :  { %6767 = vmatprep.mubr.bf16.mxu0 %v9175_v36  ;;  %6808 = vmatprep.mubr.bf16.mxu1 %v9175_v36  ;;  %v12873_v36 = vld [vmem:[#allocation72_spill] sm:$0xff] }
 0x805   :  { %6737 = vmatprep.subr.bf16.mxu0 %v11420_v24  ;;  %6778 = vmatprep.subr.bf16.mxu1 %v12833_v18  ;;  %v12843_v24 = vld [vmem:[#allocation42_spill] sm:$0xff]  ;;  %v12874_v18 = vld [vmem:[#allocation73_spill] sm:$0xff] }
 0x807   :  { %6738 = vmatpush1.bf16.msra.mxu0 %v12834_v1  ;;  %6779 = vmatpush1.bf16.msra.mxu1 %v12835_v19  ;;  %v12875_v1 = vld [vmem:[#allocation74_spill] sm:$0xff]  ;;  %v12876_v19 = vld [vmem:[#allocation75_spill] sm:$0xff] }
 0x808   :  { %6739 = vmatprep.subr.bf16.mxu0 %v12836_v15  ;;  %6780 = vmatprep.subr.bf16.mxu1 %v12837_v38  ;;  %v12877_v15 = vld [vmem:[#allocation76_spill] sm:$0xff]  ;;  %v12878_v38 = vld [vmem:[#allocation77_spill] sm:$0xff] }
 0x80b   :  { %6740 = vmatpush1.bf16.msra.mxu0 %v12838_v14  ;;  %6781 = vmatpush1.bf16.msra.mxu1 %v12839_v6  ;;  %v12879_v14 = vld [vmem:[#allocation78_spill] sm:$0xff]  ;;  %v12880_v6 = vld [vmem:[#allocation79_spill] sm:$0xff] }
 0x80c   :  { %6741 = vmatprep.subr.bf16.mxu0 %v12840_v49  ;;  %6782 = vmatprep.subr.bf16.mxu1 %v12841_v53  ;;  %v12881_v49 = vld [vmem:[#allocation80_spill] sm:$0xff]  ;;  %v12885_v53 = vld [vmem:[#allocation85_spill] sm:$0xff] }
 0x80f   :  { %6742 = vmatpush1.bf16.msra.mxu0 %v12842_v26  ;;  %6783 = vmatpush1.bf16.msra.mxu1 %v12843_v24  ;;  %v12886_v26 = vld [vmem:[#allocation87_spill] sm:$0xff]  ;;  %v12891_v24 = vld [vmem:[#allocation90_spill] sm:$0xff] }
 0x810   :  { %6743 = vmatprep.subr.bf16.mxu0 %v12844_v55  ;;  %6784 = vmatprep.subr.bf16.mxu1 %v12845_v41  ;;  %v12892_v55 = vld [vmem:[#allocation93_spill] sm:$0xff]  ;;  %v12893_v41 = vld [vmem:[#allocation94_spill] sm:$0xff] }
 0x813   :  { %6744 = vmatpush1.bf16.msra.mxu0 %v12846_v58  ;;  %6785 = vmatpush1.bf16.msra.mxu1 %v12847_v47  ;;  %v12894_v58 = vld [vmem:[#allocation88_spill] sm:$0xff] }
 0x814   :  { %6745 = vmatprep.subr.bf16.mxu0 %v12848_v0  ;;  %6786 = vmatprep.subr.bf16.mxu1 %v12849_v10  ;;  %v12895_v47 = vld [vmem:[#allocation92_spill] sm:$0xff]  ;;  %v12897_v0 = vld [vmem:[#allocation102_spill] sm:$0xff] }
 0x815   :  { %v12898_v10 = vld [vmem:[#allocation98_spill] sm:$0xff] }
 0x817   :  { %6746 = vmatpush1.bf16.msra.mxu0 %v12850_v8  ;;  %6787 = vmatpush1.bf16.msra.mxu1 %v12851_v30  ;;  %v12900_v8 = vld [vmem:[#allocation97_spill] sm:$0xff]  ;;  %v12901_v30 = vld [vmem:[#allocation106_spill] sm:$0xff] }
 0x818   :  { %6747 = vmatprep.subr.bf16.mxu0 %v12852_v48  ;;  %6788 = vmatprep.subr.bf16.mxu1 %v12853_v11  ;;  %v12902_v48 = vld [vmem:[#allocation99_spill] sm:$0xff]  ;;  %v12903_v11 = vld [vmem:[#allocation100_spill] sm:$0xff] }
 0x81b   :  { %6748 = vmatpush1.bf16.msra.mxu0 %v12854_v62  ;;  %6789 = vmatpush1.bf16.msra.mxu1 %v12855_v43  ;;  %v12904_v62 = vld [vmem:[#allocation101_spill] sm:$0xff]  ;;  %v12905_v43 = vld [vmem:[#allocation110_spill] sm:$0xff] }
 0x81c   :  { %6749 = vmatprep.subr.bf16.mxu0 %v12856_v51  ;;  %6790 = vmatprep.subr.bf16.mxu1 %v12857_v61  ;;  %v12906_v51 = vld [vmem:[#allocation103_spill] sm:$0xff]  ;;  %v12907_v61 = vld [vmem:[#allocation104_spill] sm:$0xff] }
 0x81f   :  { %6750 = vmatpush1.bf16.msra.mxu0 %v12858_v2  ;;  %6791 = vmatpush1.bf16.msra.mxu1 %v12859_v21  ;;  %v6955_v2 = vld [vmem:[#allocation8 + $0x200] sm:$0xff] }
 0x820   :  { %6751 = vmatprep.subr.bf16.mxu0 %v12860_v52  ;;  %6792 = vmatprep.subr.bf16.mxu1 %v12861_v63  ;;  %v6959_v21 = vld [vmem:[#allocation8 + $0x220] sm:$0xff]  ;;  %v6956_v52 = vld [vmem:[#allocation8 + $0x208] sm:$0xff] }
 0x821   :  { %v9378_v63 = vcombine.high %v6955_v2, %v6959_v21 }
 0x823   :  { %6752 = vmatpush1.bf16.msra.mxu0 %v12862_v29  ;;  %6793 = vmatpush1.bf16.msra.mxu1 %v12863_v40  ;;  %v6960_v29 = vld [vmem:[#allocation8 + $0x228] sm:$0xff] }
 0x824   :  { %6753 = vmatprep.subr.bf16.mxu0 %v12864_v44  ;;  %6794 = vmatprep.subr.bf16.mxu1 %v12865_v3  ;;  %v9379_v40 = vcombine.low %v6956_v52, %v6960_v29  ;;  %v6968_v44 = vld [vmem:[#allocation8 + $0x268] sm:$0xff] }
 0x827   :  { %6754 = vmatpush1.bf16.msra.mxu0 %v12866_v46  ;;  %6795 = vmatpush1.bf16.msra.mxu1 %v12867_v28  ;;  %v6971_v46 = vld [vmem:[#allocation8 + $0x280] sm:$0xff] }
 0x828   :  { %6755 = vmatprep.subr.bf16.mxu0 %v12868_v4  ;;  %6796 = vmatprep.subr.bf16.mxu1 %v12869_v25  ;;  %v6975_v28 = vld [vmem:[#allocation8 + $0x2a0] sm:$0xff]  ;;  %v6972_v4 = vld [vmem:[#allocation8 + $0x288] sm:$0xff] }
 0x829   :  { %v9394_v25 = vcombine.high %v6971_v46, %v6975_v28 }
 0x82b   :  { %6756 = vmatpush1.bf16.msra.mxu0 %v12870_v37  ;;  %6797 = vmatpush1.bf16.msra.mxu1 %v12871_v13  ;;  %v6976_v37 = vld [vmem:[#allocation8 + $0x2a8] sm:$0xff]  ;;  %v9393_v13 = vcombine.low %v6971_v46, %v6975_v28  ;;  %v12908_v46 = vld [vmem:[#allocation30_spill] sm:$0xff] }
 0x82c   :  { %6757 = vmatprep.subr.bf16.mxu0 %v12872_v34  ;;  %6798 = vmatprep.subr.bf16.mxu1 %v12873_v36  ;;  %v9395_v34 = vcombine.low %v6972_v4, %v6976_v37  ;;  %v9396_v36 = vcombine.high %v6972_v4, %v6976_v37  ;;  %v12909_v4 = vld [vmem:[#allocation31_spill] sm:$0xff] }
 0x82f   :  { %6758 = vmatpush1.bf16.msra.mxu0 %v12874_v18  ;;  %6799 = vmatpush1.bf16.msra.mxu1 %v12875_v1  ;;  %v6979_v18 = vld [vmem:[#allocation8 + $0x2c0] sm:$0xff] }
 0x830   :  { %6759 = vmatprep.subr.bf16.mxu0 %v12876_v19  ;;  %6800 = vmatprep.subr.bf16.mxu1 %v12877_v15  ;;  %v6983_v1 = vld [vmem:[#allocation8 + $0x2e0] sm:$0xff]  ;;  %v6980_v19 = vld [vmem:[#allocation8 + $0x2c8] sm:$0xff] }
 0x831   :  { %v9402_v15 = vcombine.high %v6979_v18, %v6983_v1 }
 0x833   :  { %6760 = vmatpush1.bf16.msra.mxu0 %v11560_v50  ;;  %6801 = vmatpush1.bf16.msra.mxu1 %v11562_v56  ;;  %v12882_v50 = vld [vmem:[#allocation81_spill] sm:$0xff]  ;;  %v12883_v56 = vld [vmem:[#allocation82_spill] sm:$0xff] }
 0x834   :  { %6761 = vmatprep.subr.bf16.mxu0 %v11566_v9  ;;  %6802 = vmatprep.subr.bf16.mxu1 %v12878_v38  ;;  %v12884_v9 = vld [vmem:[#allocation83_spill] sm:$0xff]  ;;  %v6984_v38 = vld [vmem:[#allocation8 + $0x2e8] sm:$0xff] }
 0x837   :  { %6762 = vmatpush1.bf16.msra.mxu0 %v12879_v14  ;;  %6803 = vmatpush1.bf16.msra.mxu1 %v11574_v35  ;;  %v12887_v35 = vld [vmem:[#allocation84_spill] sm:$0xff]  ;;  %v9401_v14 = vcombine.low %v6979_v18, %v6983_v1  ;;  %v12911_v18 = vld [vmem:[#allocation33_spill] sm:$0xff] }
 0x838   :  { %6763 = vmatprep.subr.bf16.mxu0 %v11578_v31  ;;  %6804 = vmatprep.subr.bf16.mxu1 %v11580_v17  ;;  %v12888_v31 = vld [vmem:[#allocation86_spill] sm:$0xff]  ;;  %v12889_v17 = vld [vmem:[#allocation89_spill] sm:$0xff] }
 0x83b   :  { %6764 = vmatpush1.bf16.msra.mxu0 %v11584_v54  ;;  %6805 = vmatpush1.bf16.msra.mxu1 %v12880_v6  ;;  %v12890_v54 = vld [vmem:[#allocation91_spill] sm:$0xff]  ;;  %v9403_v6 = vcombine.low %v6980_v19, %v6984_v38 }
 0x83c   :  { %6765 = vmatprep.subr.bf16.mxu0 %v12881_v49  ;;  %6806 = vmatprep.subr.bf16.mxu1 %v12882_v50  ;;  %v9404_v49 = vcombine.high %v6980_v19, %v6984_v38  ;;  %v6987_v50 = vld [vmem:[#allocation8 + $0x300] sm:$0xff] }
 0x83f   :  { %6766 = vmatpush1.bf16.msra.mxu0 %v12883_v56  ;;  %6807 = vmatpush1.bf16.msra.mxu1 %v12884_v9  ;;  %v6991_v56 = vld [vmem:[#allocation8 + $0x320] sm:$0xff]  ;;  %v6988_v9 = vld [vmem:[#allocation8 + $0x308] sm:$0xff] }
 0x840   :  { %7666 = vmatprep.subr.bf16.mxu0 %v12885_v53  ;;  %7707 = vmatprep.subr.bf16.mxu1 %v12886_v26  ;;  %v9410_v53 = vcombine.high %v6987_v50, %v6991_v56  ;;  %v6992_v26 = vld [vmem:[#allocation8 + $0x328] sm:$0xff] }
 0x842   :  { %6768 = vmatmul.mubr.bf16.vlgmr.msra.gmra.mrb[64].mxu0 %v11755_v39  ;;  %6809 = vmatmul.mubr.bf16.vlgmr.msra.gmra.mrb[64].mxu1 %v11755_v39  ;;  %v12896_v39 = vld [vmem:[#allocation95_spill] sm:$0xff] }
 0x843   :  { %7667 = vmatpush1.bf16.msra.mxu0 %v12887_v35  ;;  %7708 = vmatpush1.bf16.msra.mxu1 %v12888_v31  ;;  %v9409_v35 = vcombine.low %v6987_v50, %v6991_v56  ;;  %v9411_v31 = vcombine.low %v6988_v9, %v6992_v26 }
 0x844   :  { %7668 = vmatprep.subr.bf16.mxu0 %v11614_v42  ;;  %7709 = vmatprep.subr.bf16.mxu1 %v12889_v17  ;;  %v12899_v42 = vld [vmem:[#allocation96_spill] sm:$0xff]  ;;  %v9412_v17 = vcombine.high %v6988_v9, %v6992_v26 }
 0x847   :  { %7669 = vmatpush1.bf16.msra.mxu0 %v12890_v54  ;;  %7710 = vmatpush1.bf16.msra.mxu1 %v12891_v24  ;;  %v6995_v54 = vld [vmem:[#allocation8 + $0x340] sm:$0xff] }
 0x848   :  { %7670 = vmatprep.subr.bf16.mxu0 %v12892_v55  ;;  %7711 = vmatprep.subr.bf16.mxu1 %v12893_v41  ;;  %v6999_v24 = vld [vmem:[#allocation8 + $0x360] sm:$0xff]  ;;  %v6996_v55 = vld [vmem:[#allocation8 + $0x348] sm:$0xff] }
 0x849   :  { %v9418_v41 = vcombine.high %v6995_v54, %v6999_v24 }
 0x84b   :  { %7671 = vmatpush1.bf16.msra.mxu0 %v12894_v58  ;;  %7712 = vmatpush1.bf16.msra.mxu1 %v12895_v47  ;;  %v7000_v58 = vld [vmem:[#allocation8 + $0x368] sm:$0xff]  ;;  %v9417_v47 = vcombine.low %v6995_v54, %v6999_v24 }
 0x84c   :  { %7672 = vmatprep.subr.bf16.mxu0 %v12896_v39  ;;  %7713 = vmatprep.subr.bf16.mxu1 %v12897_v0  ;;  %v9419_v39 = vcombine.low %v6996_v55, %v7000_v58  ;;  %v9420_v0 = vcombine.high %v6996_v55, %v7000_v58 }
 0x84f   :  { %7673 = vmatpush1.bf16.msra.mxu0 %v12898_v10  ;;  %7714 = vmatpush1.bf16.msra.mxu1 %v12899_v42  ;;  %v7003_v10 = vld [vmem:[#allocation8 + $0x380] sm:$0xff] }
 0x850   :  { %7674 = vmatprep.subr.bf16.mxu0 %v12900_v8  ;;  %7715 = vmatprep.subr.bf16.mxu1 %v12901_v30  ;;  %v7007_v42 = vld [vmem:[#allocation8 + $0x3a0] sm:$0xff]  ;;  %v7004_v8 = vld [vmem:[#allocation8 + $0x388] sm:$0xff] }
 0x851   :  { %v9425_v30 = vcombine.low %v7003_v10, %v7007_v42 }
 0x853   :  { %7675 = vmatpush1.bf16.msra.mxu0 %v12902_v48  ;;  %7716 = vmatpush1.bf16.msra.mxu1 %v12903_v11  ;;  %v9426_v48 = vcombine.high %v7003_v10, %v7007_v42  ;;  %v7008_v11 = vld [vmem:[#allocation8 + $0x3a8] sm:$0xff] }
 0x854   :  { %7676 = vmatprep.subr.bf16.mxu0 %v12904_v62  ;;  %7717 = vmatprep.subr.bf16.mxu1 %v12905_v43  ;;  %v7011_v62 = vld [vmem:[#allocation8 + $0x3c0] sm:$0xff] }
 0x855   :  { %v7015_v43 = vld [vmem:[#allocation8 + $0x3e0] sm:$0xff] }
 0x857   :  { %7677 = vmatpush1.bf16.msra.mxu0 %v12906_v51  ;;  %7718 = vmatpush1.bf16.msra.mxu1 %v12907_v61  ;;  %v9427_v51 = vcombine.low %v7004_v8, %v7008_v11  ;;  %v9428_v61 = vcombine.high %v7004_v8, %v7008_v11 }
 0x858   :  { %7678 = vmatprep.subr.bf16.mxu0 %v11678_v5  ;;  %7719 = vmatprep.subr.bf16.mxu1 %v11684_v20  ;;  %v9377_v5 = vcombine.low %v6955_v2, %v6959_v21  ;;  %v9380_v20 = vcombine.high %v6956_v52, %v6960_v29  ;;  %v9434_v2 = vcombine.high %v7011_v62, %v7015_v43  ;;  %v7012_v21 = vld [vmem:[#allocation8 + $0x3c8] sm:$0xff] }
 0x859   :  { %v7016_v52 = vld [vmem:[#allocation8 + $0x3e8] sm:$0xff]  ;;  %v9433_v29 = vcombine.low %v7011_v62, %v7015_v43 }
 0x85b   :  { %7679 = vmatpush1.bf16.msra.mxu0 %v11680_v7  ;;  %7720 = vmatpush1.bf16.msra.mxu1 %v11682_v22  ;;  %v6963_v7 = vld [vmem:[#allocation8 + $0x240] sm:$0xff] }
 0x85c   :  { %7680 = vmatprep.subr.bf16.mxu0 %v11690_v23  ;;  %7721 = vmatprep.subr.bf16.mxu1 %v11696_v32  ;;  %v6967_v22 = vld [vmem:[#allocation8 + $0x260] sm:$0xff]  ;;  %v6964_v23 = vld [vmem:[#allocation8 + $0x248] sm:$0xff] }
 0x85d   :  { %v9386_v32 = vcombine.high %v6963_v7, %v6967_v22  ;;  %v9387_v3 = vcombine.low %v6964_v23, %v6968_v44 }
 0x85f   :  { %7681 = vmatpush1.bf16.msra.mxu0 %v11692_v59  ;;  %7722 = vmatpush1.bf16.msra.mxu1 %v11694_v16  ;;  %v9385_v59 = vcombine.low %v6963_v7, %v6967_v22  ;;  %v9388_v16 = vcombine.high %v6964_v23, %v6968_v44  ;;  %v6894_v7 = vld [vmem:[#allocation8 + $0x18] sm:$0xff] }
 0x860   :  { %7682 = vmatprep.subr.bf16.mxu0 %v9378_v63  ;;  %7723 = vmatprep.subr.bf16.mxu1 %v9380_v20  ;;  %v9436_v63 = vcombine.high %v7012_v21, %v7016_v52  ;;  %v6897_v20 = vld [vmem:[#allocation8 + $0x30] sm:$0xff]  ;;  %v6898_v23 = vld [vmem:[#allocation8 + $0x38] sm:$0xff] }
 0x861   :  { %v11859_v44 = vcombine.low %v6894_v7, %v6898_v23 }
 0x863   :  { %7683 = vmatpush1.bf16.msra.mxu0 %v9377_v5  ;;  %7724 = vmatpush1.bf16.msra.mxu1 %v9379_v40  ;;  %v9435_v5 = vcombine.low %v7012_v21, %v7016_v52  ;;  %v6893_v40 = vld [vmem:[#allocation8 + $0x10] sm:$0xff] }
 0x864   :  { %7684 = vmatprep.subr.bf16.mxu0 %v9386_v32  ;;  %7725 = vmatprep.subr.bf16.mxu1 %v9388_v16  ;;  %v11855_v22 = vcombine.high %v6893_v40, %v6897_v20  ;;  %v11857_v32 = vcombine.low %v6893_v40, %v6897_v20 }
 0x867   :  { %7685 = vmatpush1.bf16.msra.mxu0 %v9385_v59  ;;  %7726 = vmatpush1.bf16.msra.mxu1 %v9387_v3  ;;  %v11861_v59 = vcombine.high %v6894_v7, %v6898_v23 }
 0x868   :  { %7686 = vmatprep.subr.bf16.mxu0 %v9394_v25  ;;  %7727 = vmatprep.subr.bf16.mxu1 %v9396_v36 }
 0x86b   :  { %7687 = vmatpush1.bf16.msra.mxu0 %v9393_v13  ;;  %7728 = vmatpush1.bf16.msra.mxu1 %v9395_v34  ;;  %v12910_v34 = vld [vmem:[#allocation32_spill] sm:$0xff] }
 0x86c   :  { %7688 = vmatprep.subr.bf16.mxu0 %v9402_v15  ;;  %7729 = vmatprep.subr.bf16.mxu1 %v9404_v49 }
 0x86f   :  { %7689 = vmatpush1.bf16.msra.mxu0 %v9401_v14  ;;  %7730 = vmatpush1.bf16.msra.mxu1 %v9403_v6 }
 0x870   :  { %7690 = vmatprep.subr.bf16.mxu0 %v9410_v53  ;;  %7731 = vmatprep.subr.bf16.mxu1 %v9412_v17 }
 0x873   :  { %7691 = vmatpush1.bf16.msra.mxu0 %v9409_v35  ;;  %7732 = vmatpush1.bf16.msra.mxu1 %v9411_v31 }
 0x874   :  { %7692 = vmatprep.subr.bf16.mxu0 %v9418_v41  ;;  %7733 = vmatprep.subr.bf16.mxu1 %v9420_v0 }
 0x877   :  { %7693 = vmatpush1.bf16.msra.mxu0 %v9417_v47  ;;  %7734 = vmatpush1.bf16.msra.mxu1 %v9419_v39 }
 0x878   :  { %7694 = vmatprep.subr.bf16.mxu0 %v9426_v48  ;;  %7735 = vmatprep.subr.bf16.mxu1 %v9428_v61 }
 0x87b   :  { %7695 = vmatpush1.bf16.msra.mxu0 %v9425_v30  ;;  %7736 = vmatpush1.bf16.msra.mxu1 %v9427_v51 }
 0x87c   :  { %7696 = vmatprep.subr.bf16.mxu0 %v9434_v2  ;;  %7737 = vmatprep.subr.bf16.mxu1 %v9436_v63 }
 0x87f   :  { %7697 = vmatpush1.bf16.msra.mxu0 %v9433_v29  ;;  %7738 = vmatpush1.bf16.msra.mxu1 %v9435_v5 }
 0x880   :  { %7748 = vmatprep.subr.bf16.mxu0 %v11855_v22  ;;  %7789 = vmatprep.subr.bf16.mxu1 %v11861_v59 }
 0x8d5   :  { %v6687_v3 = vpop.f32.mrb[60].mxu0  ;;  %v6728_v16 = vpop.f32.mrb[60].mxu1 }
 0x8d6   :  { %v6828_v28 = vadd.f32 %v6687_v3, %v12908_v46  ;;  %v6830_v25 = vadd.f32 %v6728_v16, %v12909_v4  ;;  %v6689_v37 = vpop.f32.mrb[61].mxu0  ;;  %v6730_v13 = vpop.f32.mrb[61].mxu1 }
 0x8d7   :  { %v6829_v36 = vadd.f32 %v6689_v37, %v12910_v34  ;;  %v6831_v1 = vadd.f32 %v6730_v13, %v12911_v18  ;;  %v6691_v19 = vpop.f32.mrb[62].mxu0  ;;  %v6732_v15 = vpop.f32.mrb[62].mxu1 }
 0x8d8   :  { %v9308_v38 = vmul.f32 -1.442695, %v6828_v28  ;;  %v6692_v14 = vpop.f32.mrb[63].mxu0  ;;  %v6733_v6 = vpop.f32.mrb[63].mxu1  ;;  %v9310_v50 = vmul.f32 -1.442695, %v6830_v25 }
 0x8d9   :  { %v9309_v49 = vmul.f32 -1.442695, %v6829_v36  ;;  %v6905_v19 = vld [vmem:[#allocation8 + $0x70] sm:$0xff]  ;;  %v6906_v14 = vld [vmem:[#allocation8 + $0x78] sm:$0xff] }
 0x8da   :  { %9768 = vpow2.f32 %v9308_v38  ;;  %v6902_v38 = vld [vmem:[#allocation8 + $0x58] sm:$0xff] }
 0x8db   :  { %9770 = vpow2.f32 %v9309_v49  ;;  %v6909_v49 = vld [vmem:[#allocation8 + $0x90] sm:$0xff] }
 0x8dc   :  { %9772 = vtanh.f32 %v6831_v1  ;;  %v6901_v1 = vld [vmem:[#allocation8 + $0x50] sm:$0xff] }
 0x8dd   :  { %9774 = vpow2.f32 %v9310_v50  ;;  %v11886_v50 = vcombine.high %v6901_v1, %v6905_v19 }
 0x8e4   :  { %v9769_v56 = vpop.eup %9768 }
 0x8e5   :  { %v6871_v9 = vadd.f32 1.0, %v9769_v56  ;;  %v9771_v53 = vpop.eup %9770  ;;  %v11888_v56 = vcombine.high %v6902_v38, %v6906_v14 }
 0x8e6   :  { %v6872_v26 = vadd.f32 1.0, %v9771_v53  ;;  %v9773_v35 = vpop.eup %9772  ;;  %v6910_v53 = vld [vmem:[#allocation8 + $0x98] sm:$0xff] }
 0x8e7   :  { %9776 = vrcp.f32 %v6871_v9  ;;  %v9775_v31 = vpop.eup %9774  ;;  %v6913_v9 = vld [vmem:[#allocation8 + $0xb0] sm:$0xff] }
 0x8e8   :  { %9778 = vrcp.f32 %v6872_v26  ;;  %v6873_v55 = vadd.f32 1.0, %v9775_v31  ;;  %v6914_v26 = vld [vmem:[#allocation8 + $0xb8] sm:$0xff]  ;;  %v11896_v31 = vcombine.low %v6902_v38, %v6906_v14  ;;  %v6957_v38 = vld [vmem:[#allocation8 + $0x210] sm:$0xff] }
 0x8e9   :  { %v6961_v14 = vld [vmem:[#allocation8 + $0x230] sm:$0xff] }
 0x8ea   :  { %9780 = vrcp.f32 %v6873_v55  ;;  %v6921_v55 = vld [vmem:[#allocation8 + $0xf0] sm:$0xff] }
 0x8f1   :  { %v9777_v17 = vpop.eup %9776 }
 0x8f2   :  { %v6883_v54 = vmul.f32 %v9777_v17, %v9773_v35  ;;  %v9779_v24 = vpop.eup %9778  ;;  %v11894_v35 = vcombine.low %v6901_v1, %v6905_v19  ;;  %v11898_v17 = vcombine.high %v6909_v49, %v6913_v9 }
 0x8f3   :  { %v6882_v41 = vmul.f32 %v9779_v24, %v11741_v45  ;;  %v6917_v24 = vld [vmem:[#allocation8 + $0xd0] sm:$0xff] }
 0x8f4   :  { %v9781_v47 = vpop.eup %9780 }
 0x8f5   :  { %v11870_v58 = vadd.f32 %v6883_v54, %v6882_v41  ;;  %v11900_v54 = vcombine.high %v6910_v53, %v6914_v26  ;;  %v6918_v41 = vld [vmem:[#allocation8 + $0xd8] sm:$0xff] }
 0x8f7   :  { %12912 = vst [vmem:[#allocation105_spill] sm:$0xff] %v11870_v58  ;;  %9782 = vtanh.f32 %v11870_v58  ;;  %v7005_v58 = vld [vmem:[#allocation8 + $0x390] sm:$0xff] }
 0x901   :  { %v9783_v39 = vpop.eup %9782 }
 0x902   :  { %v6886_v0 = vmul.f32 %v9783_v39, %v9781_v47  ;;  %v6922_v47 = vld [vmem:[#allocation8 + $0xf8] sm:$0xff]  ;;  %v11906_v39 = vcombine.low %v6909_v49, %v6913_v9 }
 0x903   :  { %v6962_v49 = vld [vmem:[#allocation8 + $0x238] sm:$0xff] }
 0x904   :  { %v6888_v10 = vpack.c.bf16 %v6886_v0, %v6886_v0  ;;  %v11908_v0 = vcombine.low %v6910_v53, %v6914_v26  ;;  %v11972_v26 = vcombine.high %v6957_v38, %v6961_v14 }
 0x906   :  { %6889 = vst [vmem:[#allocation3] sm:$0xf] %v6888_v10  ;;  %v11912_v10 = vcombine.high %v6917_v24, %v6921_v55 }
 0x915   :  { %v6769_v42 = vpop.f32.mrb[64].mxu0  ;;  %v6810_v8 = vpop.f32.mrb[64].mxu1 }
 0x916   :  { %v6817_v30 = vadd.f32 %v6769_v42, %v10607_v27  ;;  %v6771_v48 = vpop.f32.mrb[65].mxu0  ;;  %v6812_v11 = vpop.f32.mrb[65].mxu1  ;;  %v6819_v52 = vadd.f32 %v6810_v8, %v10617_v57  ;;  %v11914_v42 = vcombine.high %v6918_v41, %v6922_v47  ;;  %v6925_v8 = vld [vmem:[#allocation8 + $0x110] sm:$0xff]  ;;  %v7002_v27 = vld [vmem:[#allocation8 + $0x378] sm:$0xff] }
 0x917   :  { %v6818_v62 = vadd.f32 %v6771_v48, %v10611_v33  ;;  %v6773_v43 = vpop.f32.mrb[66].mxu0  ;;  %v6814_v45 = vpop.f32.mrb[66].mxu1  ;;  %v6820_v63 = vadd.f32 %v6812_v11, %v10621_v60  ;;  %v6926_v48 = vld [vmem:[#allocation8 + $0x118] sm:$0xff]  ;;  %v6997_v60 = vld [vmem:[#allocation8 + $0x350] sm:$0xff] }
 0x918   :  { %v9304_v51 = vmul.f32 -1.442695, %v6817_v30  ;;  %v6774_v61 = vpop.f32.mrb[67].mxu0  ;;  %v6815_v2 = vpop.f32.mrb[67].mxu1  ;;  %v9306_v29 = vmul.f32 -1.442695, %v6819_v52  ;;  %v11920_v43 = vcombine.low %v6918_v41, %v6922_v47 }
 0x919   :  { %v9305_v21 = vmul.f32 -1.442695, %v6818_v62  ;;  %v6929_v30 = vld [vmem:[#allocation8 + $0x130] sm:$0xff]  ;;  %v6930_v11 = vld [vmem:[#allocation8 + $0x138] sm:$0xff]  ;;  %v11918_v62 = vcombine.low %v6917_v24, %v6921_v55 }
 0x91a   :  { %9784 = vpow2.f32 %v9304_v51  ;;  %v11924_v45 = vcombine.high %v6925_v8, %v6929_v30  ;;  %v11926_v51 = vcombine.high %v6926_v48, %v6930_v11  ;;  %v6933_v61 = vld [vmem:[#allocation8 + $0x150] sm:$0xff]  ;;  %v6938_v52 = vld [vmem:[#allocation8 + $0x178] sm:$0xff] }
 0x91b   :  { %9786 = vpow2.f32 %v9305_v21  ;;  %v6937_v2 = vld [vmem:[#allocation8 + $0x170] sm:$0xff]  ;;  %v6934_v21 = vld [vmem:[#allocation8 + $0x158] sm:$0xff] }
 0x91c   :  { %9788 = vtanh.f32 %v6820_v63  ;;  %v11930_v63 = vcombine.low %v6925_v8, %v6929_v30  ;;  %v6965_v55 = vld [vmem:[#allocation8 + $0x250] sm:$0xff]  ;;  %v6966_v47 = vld [vmem:[#allocation8 + $0x258] sm:$0xff]  ;;  %v11978_v30 = vcombine.low %v6957_v38, %v6961_v14 }
 0x91d   :  { %9790 = vpow2.f32 %v9306_v29  ;;  %v11932_v29 = vcombine.low %v6926_v48, %v6930_v11  ;;  %v6969_v41 = vld [vmem:[#allocation8 + $0x270] sm:$0xff]  ;;  %v6970_v8 = vld [vmem:[#allocation8 + $0x278] sm:$0xff] }
 0x91e   :  { %v11984_v11 = vcombine.high %v6965_v55, %v6969_v41  ;;  %v6986_v38 = vld [vmem:[#allocation8 + $0x2f8] sm:$0xff]  ;;  %v7001_v57 = vld [vmem:[#allocation8 + $0x370] sm:$0xff] }
 0x91f   :  { %v6998_v33 = vld [vmem:[#allocation8 + $0x358] sm:$0xff] }
 0x924   :  { %v9785_v5 = vpop.eup %9784 }
 0x925   :  { %v6841_v40 = vadd.f32 1.0, %v9785_v5  ;;  %v9787_v20 = vpop.eup %9786  ;;  %v11936_v5 = vcombine.high %v6933_v61, %v6937_v2 }
 0x926   :  { %v6842_v7 = vadd.f32 1.0, %v9787_v20  ;;  %v9789_v23 = vpop.eup %9788  ;;  %v6941_v20 = vld [vmem:[#allocation8 + $0x190] sm:$0xff] }
 0x927   :  { %9792 = vrcp.f32 %v6841_v40  ;;  %v9791_v3 = vpop.eup %9790  ;;  %v11938_v40 = vcombine.high %v6934_v21, %v6938_v52 }
 0x928   :  { %9794 = vrcp.f32 %v6842_v7  ;;  %v6843_v4 = vadd.f32 1.0, %v9791_v3  ;;  %v6945_v7 = vld [vmem:[#allocation8 + $0x1b0] sm:$0xff]  ;;  %v6946_v3 = vld [vmem:[#allocation8 + $0x1b8] sm:$0xff] }
 0x92a   :  { %9796 = vrcp.f32 %v6843_v4 }
 0x931   :  { %v9793_v16 = vpop.eup %9792 }
 0x932   :  { %v6853_v46 = vmul.f32 %v9793_v16, %v9789_v23  ;;  %v9795_v28 = vpop.eup %9794  ;;  %v6942_v23 = vld [vmem:[#allocation8 + $0x198] sm:$0xff]  ;;  %v11942_v16 = vcombine.low %v6933_v61, %v6937_v2  ;;  %v11986_v61 = vcombine.high %v6966_v47, %v6970_v8  ;;  %v6973_v2 = vld [vmem:[#allocation8 + $0x290] sm:$0xff] }
 0x933   :  { %v6852_v25 = vmul.f32 %v9795_v28, %v11749_v12  ;;  %v11948_v28 = vcombine.high %v6941_v20, %v6945_v7  ;;  %v11950_v4 = vcombine.high %v6942_v23, %v6946_v3  ;;  %v11956_v1 = vcombine.low %v6942_v23, %v6946_v3 }
 0x934   :  { %v9797_v13 = vpop.eup %9796  ;;  %v11992_v23 = vcombine.low %v6966_v47, %v6970_v8  ;;  %v6993_v47 = vld [vmem:[#allocation8 + $0x330] sm:$0xff]  ;;  %v6990_v8 = vld [vmem:[#allocation8 + $0x318] sm:$0xff] }
 0x935   :  { %v11878_v37 = vadd.f32 %v6853_v46, %v6852_v25  ;;  %v11944_v46 = vcombine.low %v6934_v21, %v6938_v52  ;;  %v6949_v25 = vld [vmem:[#allocation8 + $0x1d0] sm:$0xff]  ;;  %v6974_v52 = vld [vmem:[#allocation8 + $0x298] sm:$0xff] }
 0x936   :  { %v6977_v21 = vld [vmem:[#allocation8 + $0x2b0] sm:$0xff] }
 0x937   :  { %12913 = vst [vmem:[#allocation107_spill] sm:$0xff] %v11878_v37  ;;  %9798 = vtanh.f32 %v11878_v37  ;;  %v11996_v3 = vcombine.high %v6973_v2, %v6977_v21  ;;  %v12002_v14 = vcombine.low %v6973_v2, %v6977_v21  ;;  %v6994_v37 = vld [vmem:[#allocation8 + $0x338] sm:$0xff] }
 0x941   :  { %v9799_v34 = vpop.eup %9798 }
 0x942   :  { %v6856_v36 = vmul.f32 %v9799_v34, %v9797_v13  ;;  %v6953_v13 = vld [vmem:[#allocation8 + $0x1f0] sm:$0xff]  ;;  %v6950_v34 = vld [vmem:[#allocation8 + $0x1d8] sm:$0xff] }
 0x943   :  { %v11960_v19 = vcombine.high %v6949_v25, %v6953_v13  ;;  %v11966_v9 = vcombine.low %v6949_v25, %v6953_v13  ;;  %v6981_v13 = vld [vmem:[#allocation8 + $0x2d0] sm:$0xff] }
 0x944   :  { %v6858_v18 = vpack.c.bf16 %v6856_v36, %v6856_v36  ;;  %v6954_v36 = vld [vmem:[#allocation8 + $0x1f8] sm:$0xff] }
 0x945   :  { %v11968_v53 = vcombine.low %v6950_v34, %v6954_v36 }
 0x946   :  { %9307 = vst [vmem:[%s12161_s5 + $0x14] sm:$0xf] %v6858_v18  ;;  %6859 = vst [vmem:[#allocation3 + $0x4] sm:$0xf] %v6858_v18  ;;  %v11954_v18 = vcombine.low %v6941_v20, %v6945_v7  ;;  %v6978_v20 = vld [vmem:[#allocation8 + $0x2b8] sm:$0xff]  ;;  %v11990_v7 = vcombine.low %v6965_v55, %v6969_v41  ;;  %v6989_v41 = vld [vmem:[#allocation8 + $0x310] sm:$0xff] }
 0x947   :  { %v11998_v25 = vcombine.high %v6974_v52, %v6978_v20 }
 0x94d   :  { %v6890_v15 = vld [vmem:[#allocation3] sm:$0xff] }
 0x94e   :  { %v9312_v12 = vcombine.high %v6890_v15, %v6890_v15  ;;  %v11884_v6 = vcombine.low %v6890_v15, %v6890_v15  ;;  %v11962_v15 = vcombine.high %v6950_v34, %v6954_v36  ;;  %v6985_v34 = vld [vmem:[#allocation8 + $0x2f0] sm:$0xff]  ;;  %v6982_v36 = vld [vmem:[#allocation8 + $0x2d8] sm:$0xff] }
 0x94f   :  { %v12010_v55 = vcombine.high %v6982_v36, %v6986_v38  ;;  %v12014_v2 = vcombine.low %v6981_v13, %v6985_v34  ;;  %v12016_v21 = vcombine.low %v6982_v36, %v6986_v38  ;;  %v12032_v36 = vcombine.high %v6997_v60, %v7001_v57 }
 0x950   :  { %7698 = vmatprep.mubr.bf16.mxu0 %v9312_v12  ;;  %7739 = vmatprep.mubr.bf16.mxu1 %v9312_v12  ;;  %v12034_v38 = vcombine.high %v6998_v33, %v7002_v27 }
 0x951   :  { %7699 = vmatmul.mubr.bf16.vlgmr.msra.gmra.mrb[68].mxu0 %v11884_v6  ;;  %7740 = vmatmul.mubr.bf16.vlgmr.msra.gmra.mrb[68].mxu1 %v11884_v6  ;;  %12916 = vst [vmem:[#allocation109_spill] sm:$0xff] %v12010_v55  ;;  %12917 = vst [vmem:[#allocation14_spill] sm:$0xff] %v12014_v2 }
 0x952   :  { %7749 = vmatpush1.bf16.msra.mxu0 %v11857_v32  ;;  %7790 = vmatpush1.bf16.msra.mxu1 %v11859_v44  ;;  %12918 = vst [vmem:[#allocation22_spill] sm:$0xff] %v12016_v21  ;;  %12921 = vst [vmem:[#allocation25_spill] sm:$0xff] %v12034_v38 }
 0x953   :  { %7780 = vmatprep.mubr.bf16.mxu0 %v9312_v12  ;;  %7821 = vmatprep.mubr.bf16.mxu1 %v9312_v12  ;;  %v6958_v12 = vld [vmem:[#allocation8 + $0x218] sm:$0xff] }
 0x954   :  { %7750 = vmatprep.subr.bf16.mxu0 %v11886_v50  ;;  %7791 = vmatprep.subr.bf16.mxu1 %v11888_v56  ;;  %v11974_v24 = vcombine.high %v6958_v12, %v6962_v49  ;;  %v11980_v48 = vcombine.low %v6958_v12, %v6962_v49  ;;  %v12004_v12 = vcombine.low %v6974_v52, %v6978_v20 }
 0x955   :  { %v12008_v49 = vcombine.high %v6981_v13, %v6985_v34  ;;  %v12020_v52 = vcombine.high %v6989_v41, %v6993_v47  ;;  %v12022_v20 = vcombine.high %v6990_v8, %v6994_v37  ;;  %v12026_v13 = vcombine.low %v6989_v41, %v6993_v47 }
 0x956   :  { %7751 = vmatpush1.bf16.msra.mxu0 %v11894_v35  ;;  %7792 = vmatpush1.bf16.msra.mxu1 %v11896_v31  ;;  %12914 = vst [vmem:[#allocation108_spill] sm:$0xff] %v12004_v12  ;;  %v12028_v34 = vcombine.low %v6990_v8, %v6994_v37  ;;  %v12038_v41 = vcombine.low %v6997_v60, %v7001_v57 }
 0x957   :  { %7752 = vmatprep.subr.bf16.mxu0 %v11898_v17  ;;  %7793 = vmatprep.subr.bf16.mxu1 %v11900_v54  ;;  %12915 = vst [vmem:[#allocation15_spill] sm:$0xff] %v12008_v49  ;;  %12919 = vst [vmem:[#allocation23_spill] sm:$0xff] %v12020_v52  ;;  %v12040_v37 = vcombine.low %v6998_v33, %v7002_v27 }
 0x958   :  { %12920 = vst [vmem:[#allocation24_spill] sm:$0xff] %v12022_v20  ;;  %12922 = vst [vmem:[#allocation26_spill] sm:$0xff] %v12038_v41 }
 0x95a   :  { %7753 = vmatpush1.bf16.msra.mxu0 %v11906_v39  ;;  %7794 = vmatpush1.bf16.msra.mxu1 %v11908_v0 }
 0x95b   :  { %7754 = vmatprep.subr.bf16.mxu0 %v11912_v10  ;;  %7795 = vmatprep.subr.bf16.mxu1 %v11914_v42 }
 0x95e   :  { %7755 = vmatpush1.bf16.msra.mxu0 %v11918_v62  ;;  %7796 = vmatpush1.bf16.msra.mxu1 %v11920_v43 }
 0x95f   :  { %7756 = vmatprep.subr.bf16.mxu0 %v11924_v45  ;;  %7797 = vmatprep.subr.bf16.mxu1 %v11926_v51 }
 0x962   :  { %7757 = vmatpush1.bf16.msra.mxu0 %v11930_v63  ;;  %7798 = vmatpush1.bf16.msra.mxu1 %v11932_v29 }
 0x963   :  { %7758 = vmatprep.subr.bf16.mxu0 %v11936_v5  ;;  %7799 = vmatprep.subr.bf16.mxu1 %v11938_v40 }
 0x966   :  { %7759 = vmatpush1.bf16.msra.mxu0 %v11942_v16  ;;  %7800 = vmatpush1.bf16.msra.mxu1 %v11944_v46 }
 0x967   :  { %7760 = vmatprep.subr.bf16.mxu0 %v11948_v28  ;;  %7801 = vmatprep.subr.bf16.mxu1 %v11950_v4 }
 0x96a   :  { %7761 = vmatpush1.bf16.msra.mxu0 %v11954_v18  ;;  %7802 = vmatpush1.bf16.msra.mxu1 %v11956_v1 }
 0x96b   :  { %7762 = vmatprep.subr.bf16.mxu0 %v11960_v19  ;;  %7803 = vmatprep.subr.bf16.mxu1 %v11962_v15 }
 0x96e   :  { %7763 = vmatpush1.bf16.msra.mxu0 %v11966_v9  ;;  %7804 = vmatpush1.bf16.msra.mxu1 %v11968_v53 }
 0x96f   :  { %7764 = vmatprep.subr.bf16.mxu0 %v11972_v26  ;;  %7805 = vmatprep.subr.bf16.mxu1 %v11974_v24 }
 0x972   :  { %7765 = vmatpush1.bf16.msra.mxu0 %v11978_v30  ;;  %7806 = vmatpush1.bf16.msra.mxu1 %v11980_v48 }
 0x973   :  { %7766 = vmatprep.subr.bf16.mxu0 %v11984_v11  ;;  %7807 = vmatprep.subr.bf16.mxu1 %v11986_v61 }
 0x976   :  { %7767 = vmatpush1.bf16.msra.mxu0 %v11990_v7  ;;  %7808 = vmatpush1.bf16.msra.mxu1 %v11992_v23 }
 0x977   :  { %7768 = vmatprep.subr.bf16.mxu0 %v11996_v3  ;;  %7809 = vmatprep.subr.bf16.mxu1 %v11998_v25 }
 0x97a   :  { %7769 = vmatpush1.bf16.msra.mxu0 %v12002_v14  ;;  %7810 = vmatpush1.bf16.msra.mxu1 %v12004_v12  ;;  %v7010_v12 = vld [vmem:[#allocation8 + $0x3b8] sm:$0xff] }
 0x97b   :  { %7770 = vmatprep.subr.bf16.mxu0 %v12008_v49  ;;  %7811 = vmatprep.subr.bf16.mxu1 %v12010_v55  ;;  %v7009_v55 = vld [vmem:[#allocation8 + $0x3b0] sm:$0xff]  ;;  %v7006_v49 = vld [vmem:[#allocation8 + $0x398] sm:$0xff] }
 0x97c   :  { %v12044_v47 = vcombine.high %v7005_v58, %v7009_v55  ;;  %v12046_v8 = vcombine.high %v7006_v49, %v7010_v12  ;;  %v12050_v57 = vcombine.low %v7005_v58, %v7009_v55  ;;  %v12052_v27 = vcombine.low %v7006_v49, %v7010_v12  ;;  %v12927_v58 = vld [vmem:[#allocation22_spill] sm:$0xff]  ;;  %v12937_v55 = vld [vmem:[#allocation13_spill] sm:$0xff] }
 0x97e   :  { %7771 = vmatpush1.bf16.msra.mxu0 %v12014_v2  ;;  %7812 = vmatpush1.bf16.msra.mxu1 %v12016_v21  ;;  %v7014_v21 = vld [vmem:[#allocation8 + $0x3d8] sm:$0xff] }
 0x97f   :  { %7772 = vmatprep.subr.bf16.mxu0 %v12020_v52  ;;  %7813 = vmatprep.subr.bf16.mxu1 %v12022_v20  ;;  %v7013_v20 = vld [vmem:[#allocation8 + $0x3d0] sm:$0xff]  ;;  %v7018_v2 = vld [vmem:[#allocation8 + $0x3f8] sm:$0xff] }
 0x980   :  { %v7017_v52 = vld [vmem:[#allocation8 + $0x3f0] sm:$0xff]  ;;  %v12058_v60 = vcombine.high %v7014_v21, %v7018_v2 }
 0x981   :  { %v12056_v33 = vcombine.high %v7013_v20, %v7017_v52 }
 0x982   :  { %7773 = vmatpush1.bf16.msra.mxu0 %v12026_v13  ;;  %7814 = vmatpush1.bf16.msra.mxu1 %v12028_v34 }
 0x983   :  { %7774 = vmatprep.subr.bf16.mxu0 %v12032_v36  ;;  %7815 = vmatprep.subr.bf16.mxu1 %v12034_v38  ;;  %v12062_v38 = vcombine.low %v7013_v20, %v7017_v52  ;;  %v12938_v20 = vld [vmem:[#allocation12_spill] sm:$0xff] }
 0x986   :  { %7775 = vmatpush1.bf16.msra.mxu0 %v12038_v41  ;;  %7816 = vmatpush1.bf16.msra.mxu1 %v12040_v37  ;;  %v12064_v41 = vcombine.low %v7014_v21, %v7018_v2 }
 0x987   :  { %7776 = vmatprep.subr.bf16.mxu0 %v12044_v47  ;;  %7817 = vmatprep.subr.bf16.mxu1 %v12046_v8 }
 0x98a   :  { %7777 = vmatpush1.bf16.msra.mxu0 %v12050_v57  ;;  %7818 = vmatpush1.bf16.msra.mxu1 %v12052_v27 }
 0x98b   :  { %7778 = vmatprep.subr.bf16.mxu0 %v12056_v33  ;;  %7819 = vmatprep.subr.bf16.mxu1 %v12058_v60 }
 0x98e   :  { %7779 = vmatpush1.bf16.msra.mxu0 %v12062_v38  ;;  %7820 = vmatpush1.bf16.msra.mxu1 %v12064_v41 }
 0x98f   :  { %8295 = vmatprep.subr.bf16.mxu0 %v11855_v22  ;;  %8336 = vmatprep.subr.bf16.mxu1 %v11861_v59  ;;  %v12923_v22 = vld [vmem:[#allocation108_spill] sm:$0xff]  ;;  %v12926_v59 = vld [vmem:[#allocation14_spill] sm:$0xff] }
 0x991   :  { %7781 = vmatmul.mubr.bf16.vlgmr.msra.gmra.mrb[72].mxu0 %v11884_v6  ;;  %7822 = vmatmul.mubr.bf16.vlgmr.msra.gmra.mrb[72].mxu1 %v11884_v6  ;;  %v12928_v6 = vld [vmem:[#allocation23_spill] sm:$0xff] }
 0x992   :  { %8296 = vmatpush1.bf16.msra.mxu0 %v11857_v32  ;;  %8337 = vmatpush1.bf16.msra.mxu1 %v11859_v44  ;;  %v12924_v32 = vld [vmem:[#allocation15_spill] sm:$0xff]  ;;  %v12925_v44 = vld [vmem:[#allocation109_spill] sm:$0xff] }
 0x993   :  { %8297 = vmatprep.subr.bf16.mxu0 %v11886_v50  ;;  %8338 = vmatprep.subr.bf16.mxu1 %v11888_v56  ;;  %v12929_v50 = vld [vmem:[#allocation24_spill] sm:$0xff]  ;;  %v12930_v56 = vld [vmem:[#allocation25_spill] sm:$0xff] }
 0x996   :  { %8298 = vmatpush1.bf16.msra.mxu0 %v11894_v35  ;;  %8339 = vmatpush1.bf16.msra.mxu1 %v11896_v31  ;;  %v12931_v35 = vld [vmem:[#allocation26_spill] sm:$0xff] }
 0x997   :  { %8299 = vmatprep.subr.bf16.mxu0 %v11898_v17  ;;  %8340 = vmatprep.subr.bf16.mxu1 %v11900_v54  ;;  %v12932_v54 = vld [vmem:[#allocation34_spill] sm:$0xff] }
 0x99a   :  { %8300 = vmatpush1.bf16.msra.mxu0 %v11906_v39  ;;  %8341 = vmatpush1.bf16.msra.mxu1 %v11908_v0  ;;  %v12933_v0 = vld [vmem:[#allocation35_spill] sm:$0xff] }
 0x99b   :  { %8301 = vmatprep.subr.bf16.mxu0 %v11912_v10  ;;  %8342 = vmatprep.subr.bf16.mxu1 %v11914_v42 }
 0x99e   :  { %8302 = vmatpush1.bf16.msra.mxu0 %v11918_v62  ;;  %8343 = vmatpush1.bf16.msra.mxu1 %v11920_v43  ;;  %v12934_v43 = vld [vmem:[#allocation36_spill] sm:$0xff] }
 0x99f   :  { %8303 = vmatprep.subr.bf16.mxu0 %v11924_v45  ;;  %8344 = vmatprep.subr.bf16.mxu1 %v11926_v51  ;;  %v12935_v51 = vld [vmem:[#allocation37_spill] sm:$0xff] }
 0x9a2   :  { %8304 = vmatpush1.bf16.msra.mxu0 %v11930_v63  ;;  %8345 = vmatpush1.bf16.msra.mxu1 %v11932_v29 }
 0x9a3   :  { %8305 = vmatprep.subr.bf16.mxu0 %v11936_v5  ;;  %8346 = vmatprep.subr.bf16.mxu1 %v11938_v40 }
 0x9a6   :  { %8306 = vmatpush1.bf16.msra.mxu0 %v11942_v16  ;;  %8347 = vmatpush1.bf16.msra.mxu1 %v11944_v46 }
 0x9a7   :  { %8307 = vmatprep.subr.bf16.mxu0 %v11948_v28  ;;  %8348 = vmatprep.subr.bf16.mxu1 %v11950_v4 }
 0x9aa   :  { %8308 = vmatpush1.bf16.msra.mxu0 %v11954_v18  ;;  %8349 = vmatpush1.bf16.msra.mxu1 %v11956_v1 }
 0x9ab   :  { %8309 = vmatprep.subr.bf16.mxu0 %v11960_v19  ;;  %8350 = vmatprep.subr.bf16.mxu1 %v11962_v15 }
 0x9ae   :  { %8310 = vmatpush1.bf16.msra.mxu0 %v11966_v9  ;;  %8351 = vmatpush1.bf16.msra.mxu1 %v11968_v53 }
 0x9af   :  { %8311 = vmatprep.subr.bf16.mxu0 %v11972_v26  ;;  %8352 = vmatprep.subr.bf16.mxu1 %v11974_v24 }
 0x9b2   :  { %8312 = vmatpush1.bf16.msra.mxu0 %v11978_v30  ;;  %8353 = vmatpush1.bf16.msra.mxu1 %v11980_v48 }
 0x9b3   :  { %8313 = vmatprep.subr.bf16.mxu0 %v11984_v11  ;;  %8354 = vmatprep.subr.bf16.mxu1 %v11986_v61  ;;  %v12936_v11 = vld [vmem:[#allocation105_spill] sm:$0xff] }
 0x9b6   :  { %8314 = vmatpush1.bf16.msra.mxu0 %v11990_v7  ;;  %8355 = vmatpush1.bf16.msra.mxu1 %v11992_v23 }
 0x9b7   :  { %8315 = vmatprep.subr.bf16.mxu0 %v11996_v3  ;;  %8356 = vmatprep.subr.bf16.mxu1 %v11998_v25 }
 0x9ba   :  { %8316 = vmatpush1.bf16.msra.mxu0 %v12002_v14  ;;  %8357 = vmatpush1.bf16.msra.mxu1 %v12923_v22 }
 0x9bb   :  { %8317 = vmatprep.subr.bf16.mxu0 %v12924_v32  ;;  %8358 = vmatprep.subr.bf16.mxu1 %v12925_v44 }
 0x9be   :  { %8318 = vmatpush1.bf16.msra.mxu0 %v12926_v59  ;;  %8359 = vmatpush1.bf16.msra.mxu1 %v12927_v58 }
 0x9bf   :  { %8319 = vmatprep.subr.bf16.mxu0 %v12928_v6  ;;  %8360 = vmatprep.subr.bf16.mxu1 %v12929_v50 }
 0x9c2   :  { %8320 = vmatpush1.bf16.msra.mxu0 %v12026_v13  ;;  %8361 = vmatpush1.bf16.msra.mxu1 %v12028_v34 }
 0x9c3   :  { %8321 = vmatprep.subr.bf16.mxu0 %v12032_v36  ;;  %8362 = vmatprep.subr.bf16.mxu1 %v12930_v56 }
 0x9c6   :  { %8322 = vmatpush1.bf16.msra.mxu0 %v12931_v35  ;;  %8363 = vmatpush1.bf16.msra.mxu1 %v12040_v37 }
 0x9c7   :  { %8323 = vmatprep.subr.bf16.mxu0 %v12044_v47  ;;  %8364 = vmatprep.subr.bf16.mxu1 %v12046_v8  ;;  %v12939_v8 = vld [vmem:[#allocation111_spill] sm:$0xff] }
 0x9ca   :  { %8324 = vmatpush1.bf16.msra.mxu0 %v12050_v57  ;;  %8365 = vmatpush1.bf16.msra.mxu1 %v12052_v27  ;;  %v12940_v27 = vld [vmem:[#allocation112_spill] sm:$0xff] }
 0x9cb   :  { %8325 = vmatprep.subr.bf16.mxu0 %v12056_v33  ;;  %8366 = vmatprep.subr.bf16.mxu1 %v12058_v60 }
 0x9ce   :  { %8326 = vmatpush1.bf16.msra.mxu0 %v12062_v38  ;;  %8367 = vmatpush1.bf16.msra.mxu1 %v12064_v41 }
 0xa24   :  { %v7700_v31 = vpop.f32.mrb[68].mxu0  ;;  %v7741_v17 = vpop.f32.mrb[68].mxu1 }
 0xa25   :  { %v7841_v39 = vadd.f32 %v7700_v31, %v12932_v54  ;;  %v7843_v10 = vadd.f32 %v7741_v17, %v12933_v0  ;;  %v7702_v42 = vpop.f32.mrb[69].mxu0  ;;  %v7743_v62 = vpop.f32.mrb[69].mxu1  ;;  %v12941_v17 = vld [vmem:[#allocation107_spill] sm:$0xff] }
 0xa26   :  { %v7842_v45 = vadd.f32 %v7702_v42, %v12934_v43  ;;  %v7844_v63 = vadd.f32 %v7743_v62, %v12935_v51  ;;  %v7704_v29 = vpop.f32.mrb[70].mxu0  ;;  %v7745_v5 = vpop.f32.mrb[70].mxu1 }
 0xa27   :  { %v9445_v40 = vmul.f32 -1.442695, %v7841_v39  ;;  %v7705_v16 = vpop.f32.mrb[71].mxu0  ;;  %v7746_v46 = vpop.f32.mrb[71].mxu1  ;;  %v9447_v4 = vmul.f32 -1.442695, %v7843_v10 }
 0xa28   :  { %v9446_v28 = vmul.f32 -1.442695, %v7842_v45 }
 0xa29   :  { %9800 = vpow2.f32 %v9445_v40 }
 0xa2a   :  { %9802 = vpow2.f32 %v9446_v28 }
 0xa2b   :  { %9804 = vtanh.f32 %v7844_v63 }
 0xa2c   :  { %9806 = vpow2.f32 %v9447_v4 }
 0xa33   :  { %v9801_v18 = vpop.eup %9800 }
 0xa34   :  { %v7884_v1 = vadd.f32 1.0, %v9801_v18  ;;  %v9803_v19 = vpop.eup %9802 }
 0xa35   :  { %v7885_v15 = vadd.f32 1.0, %v9803_v19  ;;  %v9805_v9 = vpop.eup %9804 }
 0xa36   :  { %9808 = vrcp.f32 %v7884_v1  ;;  %v9807_v53 = vpop.eup %9806 }
 0xa37   :  { %9810 = vrcp.f32 %v7885_v15  ;;  %v7886_v48 = vadd.f32 1.0, %v9807_v53 }
 0xa39   :  { %9812 = vrcp.f32 %v7886_v48 }
 0xa40   :  { %v9809_v26 = vpop.eup %9808 }
 0xa41   :  { %v7896_v24 = vmul.f32 %v9809_v26, %v9805_v9  ;;  %v9811_v30 = vpop.eup %9810 }
 0xa42   :  { %v7895_v61 = vmul.f32 %v9811_v30, %v12936_v11 }
 0xa43   :  { %v9813_v23 = vpop.eup %9812 }
 0xa44   :  { %v7897_v7 = vadd.f32 %v7896_v24, %v7895_v61 }
 0xa46   :  { %9814 = vtanh.f32 %v7897_v7 }
 0xa50   :  { %v9815_v3 = vpop.eup %9814 }
 0xa51   :  { %v7899_v25 = vmul.f32 %v9815_v3, %v9813_v23 }
 0xa53   :  { %v7901_v14 = vpack.c.bf16 %v7899_v25, %v7899_v25 }
 0xa55   :  { %7902 = vst [vmem:[#allocation3] sm:$0xf] %v7901_v14 }
 0xa64   :  { %v7782_v12 = vpop.f32.mrb[72].mxu0  ;;  %v7823_v49 = vpop.f32.mrb[72].mxu1 }
 0xa65   :  { %v7830_v2 = vadd.f32 %v7782_v12, %v12937_v55  ;;  %v7784_v21 = vpop.f32.mrb[73].mxu0  ;;  %v7825_v52 = vpop.f32.mrb[73].mxu1  ;;  %v7832_v57 = vadd.f32 %v7823_v49, %v12939_v8 }
 0xa66   :  { %v7831_v13 = vadd.f32 %v7784_v21, %v12938_v20  ;;  %v7786_v34 = vpop.f32.mrb[74].mxu0  ;;  %v7827_v36 = vpop.f32.mrb[74].mxu1  ;;  %v7833_v33 = vadd.f32 %v7825_v52, %v12940_v27 }
 0xa67   :  { %v9441_v38 = vmul.f32 -1.442695, %v7830_v2  ;;  %v7787_v41 = vpop.f32.mrb[75].mxu0  ;;  %v7828_v37 = vpop.f32.mrb[75].mxu1  ;;  %v9443_v60 = vmul.f32 -1.442695, %v7832_v57 }
 0xa68   :  { %v9442_v47 = vmul.f32 -1.442695, %v7831_v13 }
 0xa69   :  { %9816 = vpow2.f32 %v9441_v38 }
 0xa6a   :  { %9818 = vpow2.f32 %v9442_v47 }
 0xa6b   :  { %9820 = vtanh.f32 %v7833_v33 }
 0xa6c   :  { %9822 = vpow2.f32 %v9443_v60 }
 0xa73   :  { %v9817_v22 = vpop.eup %9816 }
 0xa74   :  { %v7854_v32 = vadd.f32 1.0, %v9817_v22  ;;  %v9819_v44 = vpop.eup %9818 }
 0xa75   :  { %v7855_v59 = vadd.f32 1.0, %v9819_v44  ;;  %v9821_v58 = vpop.eup %9820 }
 0xa76   :  { %9824 = vrcp.f32 %v7854_v32  ;;  %v9823_v6 = vpop.eup %9822 }
 0xa77   :  { %9826 = vrcp.f32 %v7855_v59  ;;  %v7856_v31 = vadd.f32 1.0, %v9823_v6 }
 0xa79   :  { %9828 = vrcp.f32 %v7856_v31 }
 0xa80   :  { %v9825_v50 = vpop.eup %9824 }
 0xa81   :  { %v7866_v56 = vmul.f32 %v9825_v50, %v9821_v58  ;;  %v9827_v35 = vpop.eup %9826 }
 0xa82   :  { %v7865_v54 = vmul.f32 %v9827_v35, %v12941_v17 }
 0xa83   :  { %v9829_v0 = vpop.eup %9828 }
 0xa84   :  { %v7867_v39 = vadd.f32 %v7866_v56, %v7865_v54 }
 0xa86   :  { %9830 = vtanh.f32 %v7867_v39 }
 0xa90   :  { %v9831_v10 = vpop.eup %9830 }
 0xa91   :  { %v7869_v42 = vmul.f32 %v9831_v10, %v9829_v0 }
 0xa93   :  { %v7871_v62 = vpack.c.bf16 %v7869_v42, %v7869_v42 }
 0xa95   :  { %9444 = vst [vmem:[%s12161_s5 + $0x18] sm:$0xf] %v7871_v62  ;;  %7872 = vst [vmem:[#allocation3 + $0x4] sm:$0xf] %v7871_v62 }
 0xa9c   :  { %v7903_v43 = vld [vmem:[#allocation3] sm:$0xff] }
 0xa9d   :  { %v9449_v45 = vcombine.high %v7903_v43, %v7903_v43  ;;  %v9448_v51 = vcombine.low %v7903_v43, %v7903_v43 }
 0xa9f   :  { %8327 = vmatprep.mubr.bf16.mxu0 %v9449_v45  ;;  %8368 = vmatprep.mubr.bf16.mxu1 %v9449_v45 }
 0xaa0   :  { %8328 = vmatmul.mubr.bf16.vlgmr.msra.gmra.mrb[76].mxu0 %v9448_v51  ;;  %8369 = vmatmul.mubr.bf16.vlgmr.msra.gmra.mrb[76].mxu1 %v9448_v51 }
 0xb73   :  { %v8329_v63 = vpop.f32.mrb[76].mxu0  ;;  %v8370_v29 = vpop.f32.mrb[76].mxu1 }
 0xb74   :  { %v8330_v5 = vadd.f32 %v8329_v63, %v12937_v55  ;;  %v8331_v40 = vpop.f32.mrb[77].mxu0  ;;  %v8372_v16 = vpop.f32.mrb[77].mxu1  ;;  %v8371_v9 = vadd.f32 %v8370_v29, %v12939_v8 }
 0xb75   :  { %v8332_v46 = vadd.f32 %v8331_v40, %v12938_v20  ;;  %v8333_v28 = vpop.f32.mrb[78].mxu0  ;;  %v8374_v4 = vpop.f32.mrb[78].mxu1  ;;  %v8373_v53 = vadd.f32 %v8372_v16, %v12940_v27 }
 0xb76   :  { %v9514_v18 = vmul.f32 -1.442695, %v8330_v5  ;;  %v8334_v1 = vpop.f32.mrb[79].mxu0  ;;  %v8375_v19 = vpop.f32.mrb[79].mxu1  ;;  %v9516_v26 = vmul.f32 -1.442695, %v8371_v9 }
 0xb77   :  { %v9515_v15 = vmul.f32 -1.442695, %v8332_v46 }
 0xb78   :  { %9832 = vpow2.f32 %v9514_v18 }
 0xb79   :  { %9834 = vpow2.f32 %v9515_v15 }
 0xb7a   :  { %9836 = vtanh.f32 %v8373_v53 }
 0xb7b   :  { %9838 = vpow2.f32 %v9516_v26 }
 0xb82   :  { %v9833_v24 = vpop.eup %9832 }
 0xb83   :  { %v8386_v30 = vadd.f32 1.0, %v9833_v24  ;;  %v9835_v48 = vpop.eup %9834 }
 0xb84   :  { %v8387_v11 = vadd.f32 1.0, %v9835_v48  ;;  %v9837_v61 = vpop.eup %9836 }
 0xb85   :  { %9840 = vrcp.f32 %v8386_v30  ;;  %v9839_v7 = vpop.eup %9838 }
 0xb86   :  { %9842 = vrcp.f32 %v8387_v11  ;;  %v8388_v14 = vadd.f32 1.0, %v9839_v7 }
 0xb88   :  { %9844 = vrcp.f32 %v8388_v14 }
 0xb8f   :  { %v9841_v23 = vpop.eup %9840 }
 0xb90   :  { %v8398_v3 = vmul.f32 %v9841_v23, %v9837_v61  ;;  %v9843_v25 = vpop.eup %9842 }
 0xb91   :  { %v8397_v12 = vmul.f32 %v9843_v25, %v7867_v39 }
 0xb92   :  { %v9845_v55 = vpop.eup %9844 }
 0xb93   :  { %v8399_v49 = vadd.f32 %v8398_v3, %v8397_v12 }
 0xb95   :  { %9846 = vtanh.f32 %v8399_v49 }
 0xb9f   :  { %v9847_v2 = vpop.eup %9846 }
 0xba0   :  { %v8401_v21 = vmul.f32 %v9847_v2, %v9845_v55 }
 0xba2   :  { %v8403_v52 = vpack.c.bf16 %v8401_v21, %v8401_v21 }
 0xba4   :  { %8404 = vst [vmem:[#allocation3 + $0x4] sm:$0xf] %v8403_v52  ;;  %8405 = vst [vmem:[%s12161_s5 + $0x1c] sm:$0xf] %v8403_v52 }
 0xba5   :  { %8410 = vsyncpa [#allocation7], 1 }
 0xba6   :  { %8411 = vsyncpa [#allocation9], 1 }

</bundles_post_ra>
